<compile_context>
chip_gen: v7x
topology: tpu7x:2x2x1
jax: 0.10.0
libtpu: 0.0.40
codegen_flags: <defaults>
</compile_context>

<pallas_src>
import math

import jax
import jax.numpy as jnp
from jax.experimental import pallas as pl
from jax.experimental.pallas import tpu as pltpu


_MM = jnp.bfloat16          # operand dtype for MXU matmuls (f32 accumulation)
_OUT_PAD = 128              # lane-dense padded width of the fc4 output


# -----------------------------------------------------------------------------
# Pallas kernel: entire ControlNetwork forward fused, tiled over rows
# -----------------------------------------------------------------------------
def _control_net_kernel(coords_ref,
                        dw1_ref, db1_ref, dw2_ref, db2_ref, dw3_ref, db3_ref,
                        w1c_ref, w1s_ref, w1r_ref, w1f_ref, b1_ref,
                        w2_ref, b2_ref, w3_ref, b3_ref, w4_ref, b4_ref,
                        o_ref):
    coords = coords_ref[...].astype(jnp.float32)                 # (T, 14)

    # ---- frozen AE decoder on z_im = coords[..., 4:6] ----------------------
    z0 = coords[:, 4:5]
    z1 = coords[:, 5:6]
    # K=2 first layer as rank-1 VPU FMAs (avoids a degenerate MXU shape).
    d = z0 * dw1_ref[0:1, :] + z1 * dw1_ref[1:2, :] + db1_ref[...]
    d = jnp.maximum(d, 0.0)                                      # (T, 16)
    d = jnp.dot(d.astype(_MM), dw2_ref[...],
                preferred_element_type=jnp.float32) + db2_ref[...]
    d = jnp.maximum(d, 0.0)                                      # (T, 64)
    d = jnp.dot(d.astype(_MM), dw3_ref[...],
                preferred_element_type=jnp.float32) + db3_ref[...]
    d = jnp.maximum(d, 0.0)                                      # (T, 128)
    # Decoder's last (linear) layer is fused into fc1 (W_fused = dw4 @ w1x,
    # db4 @ w1x folded into b1), so no (T, 30) intermediate is formed.

    # ---- fc1 with the feature concat fused away (split along K) ------------
    c0 = coords[:, 0:1]
    cos0 = jnp.cos(c0)
    sin0 = jnp.sin(c0)
    rest = coords[:, 1:14]                                       # (T, 13)

    h = cos0 * w1c_ref[...] + sin0 * w1s_ref[...] + b1_ref[...]  # rank-1 pieces (VPU)
    h = h + jnp.dot(rest.astype(_MM), w1r_ref[...],
                    preferred_element_type=jnp.float32)
    h = h + jnp.dot(d.astype(_MM), w1f_ref[...],                 # fused decoder tail + x_im block
                    preferred_element_type=jnp.float32)
    h = jnp.maximum(h, 0.0)                                      # (T, 256)

    h = jnp.dot(h.astype(_MM), w2_ref[...],
                preferred_element_type=jnp.float32) + b2_ref[...]
    h = jnp.maximum(h, 0.0)                                      # (T, 256)

    h = jnp.dot(h.astype(_MM), w3_ref[...],
                preferred_element_type=jnp.float32) + b3_ref[...]
    h = jnp.maximum(h, 0.0)                                      # (T, 128)

    out = jnp.dot(h.astype(_MM), w4_ref[...],
                  preferred_element_type=jnp.float32) + b4_ref[...]
    o_ref[...] = out.astype(o_ref.dtype)                         # (T, 128) lane-dense; cols 6.. are 0


# -----------------------------------------------------------------------------
# Parameter handling
# -----------------------------------------------------------------------------
def _linear_init(key, fan_in, fan_out, dtype=jnp.float32):
    """PyTorch nn.Linear default init; returns (W^T [fan_in, fan_out], b [1, fan_out])."""
    kw, kb = jax.random.split(key)
    bound = 1.0 / math.sqrt(fan_in)
    w = jax.random.uniform(kw, (fan_out, fan_in), dtype=dtype, minval=-bound, maxval=bound)
    b = jax.random.uniform(kb, (fan_out,), dtype=dtype, minval=-bound, maxval=bound)
    return w.T, b.reshape(1, fan_out)


def init_params(key, input_dim=14):
    # TODO(synk): the real module loads the frozen AE decoder from
    # 'hamiltonian_nn/quadruped/models/ae_model.pth'; no file I/O is allowed here,
    # so the decoder is deterministically random-initialized instead.
    dec_dims = [(2, 16), (16, 64), (64, 128), (128, 30)]
    fc_dims = [(input_dim + 31, 256), (256, 256), (256, 128), (128, 6)]
    keys = jax.random.split(key, len(dec_dims) + len(fc_dims))
    dec = [_linear_init(k, fi, fo) for k, (fi, fo) in zip(keys[:4], dec_dims)]
    fc = [_linear_init(k, fi, fo) for k, (fi, fo) in zip(keys[4:], fc_dims)]
    return {"dec": dec, "fc": fc}


def _pack_kernel_params(params):
    """Flatten master (f32) params into the kernel's argument order:
       * fc1 split along its contraction axis into [cos | sin | coords[...,1:] | x_im],
       * decoder last layer algebraically fused into the x_im block (exact: no ReLU between),
       * all MXU operands cast to bf16 once (f32 accumulation in-kernel),
       * fc4 zero-padded to 128 output columns for lane-dense stores."""
    (dw1, db1), (dw2, db2), (dw3, db3), (dw4, db4) = params["dec"]
    (w1, b1), (w2, b2), (w3, b3), (w4, b4) = params["fc"]

    w1c = w1[0:1, :]                               # cos column (f32, VPU rank-1)
    w1s = w1[1:2, :]                               # sin column (f32, VPU rank-1)
    w1r = w1[2:15, :].astype(_MM)                  # coords[...,1:] block (13, 256)
    w1x = w1[15:45, :]                             # x_im block (30, 256), f32 for the fusion

    w1f = (dw4 @ w1x).astype(_MM)                  # fused decoder-tail + fc1 block (128, 256)
    b1f = b1 + db4 @ w1x                           # fold decoder bias through fc1 (1, 256)

    w4p = jnp.zeros((w4.shape[0], _OUT_PAD), w4.dtype).at[:, :w4.shape[1]].set(w4).astype(_MM)
    b4p = jnp.zeros((1, _OUT_PAD), b4.dtype).at[:, :b4.shape[1]].set(b4)

    return (dw1, db1, dw2.astype(_MM), db2, dw3.astype(_MM), db3,
            w1c, w1s, w1r, w1f, b1f,
            w2.astype(_MM), b2, w3.astype(_MM), b3,
            w4p, b4p)


# -----------------------------------------------------------------------------
# Forward wrapper
# -----------------------------------------------------------------------------
def control_network_forward(coords, params, *, tile_n=None, max_tile_n=4096, target_steps=4):
    *lead, in_f = coords.shape
    assert in_f == 14, "ControlNetwork expects 14 input coordinates"

    x = coords.reshape(-1, in_f).astype(jnp.float32)
    n = x.shape[0]

    # Adaptive row tile: big enough to amortize ~0.35us/step grid overhead, small
    # enough to keep >= target_steps grid steps (so v7x's 2 TensorCores both get work)
    # and to avoid padding small batches up to a huge fixed tile.
    if tile_n is None:
        tile_n = min(max_tile_n, max(256, pl.cdiv(n, target_steps)))
    tile_n = int(-(-int(tile_n) // 8) * 8)          # multiple of 8 (sublane-aligned)
    n_tiles = max(1, pl.cdiv(n, tile_n))
    n_pad = n_tiles * tile_n
    if n_pad != n:
        x = jnp.pad(x, ((0, n_pad - n), (0, 0)))    # zero rows are benign, sliced off below

    flat = _pack_kernel_params(params)
    out_f = params["fc"][-1][0].shape[1]            # 6 (true output width)

    def row_spec(shape):
        return pl.BlockSpec(shape, lambda i: (i, 0))

    def const_spec(arr):
        # Constant index_map -> weight stays resident in VMEM across all grid steps.
        return pl.BlockSpec(arr.shape, lambda i: (0, 0))

    in_specs = [row_spec((tile_n, in_f))] + [const_spec(a) for a in flat]
    out_spec = row_spec((tile_n, _OUT_PAD))

    # Advisory cost hint so XLA schedules this compute-heavy call sensibly.
    macs_per_row = (2 * 16 + 16 * 64 + 64 * 128                  # decoder (last layer fused)
                    + 2 * 256 + 13 * 256 + 128 * 256             # fc1 (split + fused block)
                    + 256 * 256 + 256 * 128 + 128 * _OUT_PAD)    # fc2 / fc3 / fc4 (padded)
    weight_bytes = sum(int(a.size) * a.dtype.itemsize for a in flat)
    cost = pl.CostEstimate(
        flops=2 * n_pad * macs_per_row,
        transcendentals=2 * n_pad,                               # cos + sin per row
        bytes_accessed=n_pad * in_f * 4 + n_pad * _OUT_PAD * 4 + weight_bytes,
    )

    out = pl.pallas_call(
        _control_net_kernel,
        out_shape=jax.ShapeDtypeStruct((n_pad, _OUT_PAD), jnp.float32),
        grid_spec=pltpu.PrefetchScalarGridSpec(
            num_scalar_prefetch=0,
            grid=(n_tiles,),
            in_specs=in_specs,
            out_specs=out_spec,
        ),
        compiler_params=pltpu.CompilerParams(
            dimension_semantics=("parallel",),
            # Large row tiles need more than the default scoped VMEM; 48 MiB keeps
            # ~2x headroom even on v7x's 64 MiB-per-TC physical VMEM.
            vmem_limit_bytes=48 * 1024 * 1024,
        ),
        cost_estimate=cost,
    )(x, *flat)

    return out[:n, :out_f].reshape(*lead, out_f)


# -----------------------------------------------------------------------------
# Pure-JAX (f32) reference for correctness check
# -----------------------------------------------------------------------------
def reference_forward(coords_flat, params):
    x = coords_flat.astype(jnp.float32)
    h = x[:, 4:6]
    dec = params["dec"]
    for i, (wt, b) in enumerate(dec):
        h = h @ wt + b
        if i < len(dec) - 1:
            h = jnp.maximum(h, 0.0)
    x_im = h
    feats = jnp.concatenate(
        [jnp.cos(x[:, 0:1]), jnp.sin(x[:, 0:1]), x[:, 1:], x_im], axis=-1)
    h = feats
    fc = params["fc"]
    for i, (wt, b) in enumerate(fc):
        h = h @ wt + b
        if i < len(fc) - 1:
            h = jnp.maximum(h, 0.0)
    return h


if __name__ == "__main__":
    key = jax.random.PRNGKey(0)
    k_params, k_coords = jax.random.split(key)

    params = init_params(k_params, input_dim=14)

    # Small demo input: batch=2, num_points=600 -> 1200 rows. Adaptive tiling picks
    # a 304-row tile -> 4 grid steps (exercises the ragged/padded last tile and
    # keeps multiple grid steps for cross-core sharding).
    batch, num_points = 2, 600
    coords = jax.random.uniform(k_coords, (batch, num_points, 14),
                                dtype=jnp.float32, minval=-1.0, maxval=1.0)

    out = control_network_forward(coords, params)
    out = jax.block_until_ready(out)

    ref = reference_forward(coords.reshape(-1, 14), params).reshape(batch, num_points, 6)
    assert out.shape == (batch, num_points, 6)
    max_err = float(jnp.max(jnp.abs(out - ref)))
    # Tolerance accounts for bf16 matmul operands (f32 accumulation) in the kernel.
    assert jnp.allclose(out, ref, atol=5e-2, rtol=5e-2), \
        f"mismatch vs f32 reference (max abs err {max_err})"

    print("KERNEL_OK")
</pallas_src>

<mosaic_0001>
module attributes {stable_mosaic.version = 11 : i64} {
  func.func @_control_net_kernel(%arg0: i32, %arg1: memref<304x14xf32, #tpu.memory_space<vmem>>, %arg2: memref<2x16xf32, #tpu.memory_space<vmem>>, %arg3: memref<1x16xf32, #tpu.memory_space<vmem>>, %arg4: memref<16x64xbf16, #tpu.memory_space<vmem>>, %arg5: memref<1x64xf32, #tpu.memory_space<vmem>>, %arg6: memref<64x128xbf16, #tpu.memory_space<vmem>>, %arg7: memref<1x128xf32, #tpu.memory_space<vmem>>, %arg8: memref<1x256xf32, #tpu.memory_space<vmem>>, %arg9: memref<1x256xf32, #tpu.memory_space<vmem>>, %arg10: memref<13x256xbf16, #tpu.memory_space<vmem>>, %arg11: memref<128x256xbf16, #tpu.memory_space<vmem>>, %arg12: memref<1x256xf32, #tpu.memory_space<vmem>>, %arg13: memref<256x256xbf16, #tpu.memory_space<vmem>>, %arg14: memref<1x256xf32, #tpu.memory_space<vmem>>, %arg15: memref<256x128xbf16, #tpu.memory_space<vmem>>, %arg16: memref<1x128xf32, #tpu.memory_space<vmem>>, %arg17: memref<128x128xbf16, #tpu.memory_space<vmem>>, %arg18: memref<1x128xf32, #tpu.memory_space<vmem>>, %arg19: memref<304x128xf32, #tpu.memory_space<vmem>>) attributes {dimension_semantics = [#tpu.dimension_semantics<parallel>], iteration_bounds = array<i64: 4>, scalar_prefetch = 0 : i64, scratch_operands = 0 : i64, tpu.core_type = #tpu.core_type<tc>, window_params = [{transform_indices = @transform_0, window_bounds = array<i64: 304, 14>}, {pipeline_mode = #tpu.pipeline_mode<synchronous>, transform_indices = @transform_1, window_bounds = array<i64: 2, 16>}, {pipeline_mode = #tpu.pipeline_mode<synchronous>, transform_indices = @transform_2, window_bounds = array<i64: 1, 16>}, {pipeline_mode = #tpu.pipeline_mode<synchronous>, transform_indices = @transform_3, window_bounds = array<i64: 16, 64>}, {pipeline_mode = #tpu.pipeline_mode<synchronous>, transform_indices = @transform_4, window_bounds = array<i64: 1, 64>}, {pipeline_mode = #tpu.pipeline_mode<synchronous>, transform_indices = @transform_5, window_bounds = array<i64: 64, 128>}, {pipeline_mode = #tpu.pipeline_mode<synchronous>, transform_indices = @transform_6, window_bounds = array<i64: 1, 128>}, {pipeline_mode = #tpu.pipeline_mode<synchronous>, transform_indices = @transform_7, window_bounds = array<i64: 1, 256>}, {pipeline_mode = #tpu.pipeline_mode<synchronous>, transform_indices = @transform_8, window_bounds = array<i64: 1, 256>}, {pipeline_mode = #tpu.pipeline_mode<synchronous>, transform_indices = @transform_9, window_bounds = array<i64: 13, 256>}, {pipeline_mode = #tpu.pipeline_mode<synchronous>, transform_indices = @transform_10, window_bounds = array<i64: 128, 256>}, {pipeline_mode = #tpu.pipeline_mode<synchronous>, transform_indices = @transform_11, window_bounds = array<i64: 1, 256>}, {pipeline_mode = #tpu.pipeline_mode<synchronous>, transform_indices = @transform_12, window_bounds = array<i64: 256, 256>}, {pipeline_mode = #tpu.pipeline_mode<synchronous>, transform_indices = @transform_13, window_bounds = array<i64: 1, 256>}, {pipeline_mode = #tpu.pipeline_mode<synchronous>, transform_indices = @transform_14, window_bounds = array<i64: 256, 128>}, {pipeline_mode = #tpu.pipeline_mode<synchronous>, transform_indices = @transform_15, window_bounds = array<i64: 1, 128>}, {pipeline_mode = #tpu.pipeline_mode<synchronous>, transform_indices = @transform_16, window_bounds = array<i64: 128, 128>}, {pipeline_mode = #tpu.pipeline_mode<synchronous>, transform_indices = @transform_17, window_bounds = array<i64: 1, 128>}, {transform_indices = @transform_18, window_bounds = array<i64: 304, 128>}]} {
    %c0 = arith.constant 0 : index
    %c0_0 = arith.constant 0 : index
    %0 = vector.load %arg1[%c0, %c0_0] : memref<304x14xf32, #tpu.memory_space<vmem>>, vector<304x14xf32>
    %1 = vector.extract_strided_slice %0 {offsets = [0, 4], sizes = [304, 1], strides = [1, 1]} : vector<304x14xf32> to vector<304x1xf32>
    %2 = vector.extract_strided_slice %0 {offsets = [0, 5], sizes = [304, 1], strides = [1, 1]} : vector<304x14xf32> to vector<304x1xf32>
    %c0_1 = arith.constant 0 : index
    %c0_2 = arith.constant 0 : index
    %3 = vector.load %arg2[%c0_1, %c0_2] : memref<2x16xf32, #tpu.memory_space<vmem>>, vector<1x16xf32>
    %4 = vector.broadcast %1 : vector<304x1xf32> to vector<304x16xf32>
    %5 = vector.broadcast %3 : vector<1x16xf32> to vector<304x16xf32>
    %6 = arith.mulf %4, %5 : vector<304x16xf32>
    %c1 = arith.constant 1 : index
    %c0_3 = arith.constant 0 : index
    %7 = vector.load %arg2[%c1, %c0_3] : memref<2x16xf32, #tpu.memory_space<vmem>>, vector<1x16xf32>
    %8 = vector.broadcast %2 : vector<304x1xf32> to vector<304x16xf32>
    %9 = vector.broadcast %7 : vector<1x16xf32> to vector<304x16xf32>
    %10 = arith.mulf %8, %9 : vector<304x16xf32>
    %11 = arith.addf %6, %10 : vector<304x16xf32>
    %c0_4 = arith.constant 0 : index
    %c0_5 = arith.constant 0 : index
    %12 = vector.load %arg3[%c0_4, %c0_5] : memref<1x16xf32, #tpu.memory_space<vmem>>, vector<1x16xf32>
    %13 = vector.broadcast %12 : vector<1x16xf32> to vector<304x16xf32>
    %14 = arith.addf %11, %13 : vector<304x16xf32>
    %cst = arith.constant 0.000000e+00 : f32
    %15 = vector.broadcast %cst : f32 to vector<304x16xf32>
    %16 = arith.maximumf %14, %15 : vector<304x16xf32>
    %17 = arith.truncf %16 : vector<304x16xf32> to vector<304x16xbf16>
    %c0_6 = arith.constant 0 : index
    %c0_7 = arith.constant 0 : index
    %18 = vector.load %arg4[%c0_6, %c0_7] : memref<16x64xbf16, #tpu.memory_space<vmem>>, vector<16x64xbf16>
    %cst_8 = arith.constant dense<0.000000e+00> : vector<304x64xf32>
    %19 = tpu.matmul %17, %18, %cst_8 {dimension_numbers = #tpu.dot_dimension_numbers<[1], [0], [0], [1], [0, 0, 1, 1], [], []>} : vector<304x16xbf16>, vector<16x64xbf16>, vector<304x64xf32> -> vector<304x64xf32>
    %c0_9 = arith.constant 0 : index
    %c0_10 = arith.constant 0 : index
    %20 = vector.load %arg5[%c0_9, %c0_10] : memref<1x64xf32, #tpu.memory_space<vmem>>, vector<1x64xf32>
    %21 = vector.broadcast %20 : vector<1x64xf32> to vector<304x64xf32>
    %22 = arith.addf %19, %21 : vector<304x64xf32>
    %cst_11 = arith.constant 0.000000e+00 : f32
    %23 = vector.broadcast %cst_11 : f32 to vector<304x64xf32>
    %24 = arith.maximumf %22, %23 : vector<304x64xf32>
    %25 = arith.truncf %24 : vector<304x64xf32> to vector<304x64xbf16>
    %c0_12 = arith.constant 0 : index
    %c0_13 = arith.constant 0 : index
    %26 = vector.load %arg6[%c0_12, %c0_13] : memref<64x128xbf16, #tpu.memory_space<vmem>>, vector<64x128xbf16>
    %cst_14 = arith.constant dense<0.000000e+00> : vector<304x128xf32>
    %27 = tpu.matmul %25, %26, %cst_14 {dimension_numbers = #tpu.dot_dimension_numbers<[1], [0], [0], [1], [0, 0, 1, 1], [], []>} : vector<304x64xbf16>, vector<64x128xbf16>, vector<304x128xf32> -> vector<304x128xf32>
    %c0_15 = arith.constant 0 : index
    %c0_16 = arith.constant 0 : index
    %28 = vector.load %arg7[%c0_15, %c0_16] : memref<1x128xf32, #tpu.memory_space<vmem>>, vector<1x128xf32>
    %29 = vector.broadcast %28 : vector<1x128xf32> to vector<304x128xf32>
    %30 = arith.addf %27, %29 : vector<304x128xf32>
    %cst_17 = arith.constant 0.000000e+00 : f32
    %31 = vector.broadcast %cst_17 : f32 to vector<304x128xf32>
    %32 = arith.maximumf %30, %31 : vector<304x128xf32>
    %33 = vector.extract_strided_slice %0 {offsets = [0, 0], sizes = [304, 1], strides = [1, 1]} : vector<304x14xf32> to vector<304x1xf32>
    %34 = math.cos %33 : vector<304x1xf32>
    %35 = math.sin %33 : vector<304x1xf32>
    %36 = vector.extract_strided_slice %0 {offsets = [0, 1], sizes = [304, 13], strides = [1, 1]} : vector<304x14xf32> to vector<304x13xf32>
    %c0_18 = arith.constant 0 : index
    %c0_19 = arith.constant 0 : index
    %37 = vector.load %arg8[%c0_18, %c0_19] : memref<1x256xf32, #tpu.memory_space<vmem>>, vector<1x256xf32>
    %38 = vector.broadcast %34 : vector<304x1xf32> to vector<304x256xf32>
    %39 = vector.broadcast %37 : vector<1x256xf32> to vector<304x256xf32>
    %40 = arith.mulf %38, %39 : vector<304x256xf32>
    %c0_20 = arith.constant 0 : index
    %c0_21 = arith.constant 0 : index
    %41 = vector.load %arg9[%c0_20, %c0_21] : memref<1x256xf32, #tpu.memory_space<vmem>>, vector<1x256xf32>
    %42 = vector.broadcast %35 : vector<304x1xf32> to vector<304x256xf32>
    %43 = vector.broadcast %41 : vector<1x256xf32> to vector<304x256xf32>
    %44 = arith.mulf %42, %43 : vector<304x256xf32>
    %45 = arith.addf %40, %44 : vector<304x256xf32>
    %c0_22 = arith.constant 0 : index
    %c0_23 = arith.constant 0 : index
    %46 = vector.load %arg12[%c0_22, %c0_23] : memref<1x256xf32, #tpu.memory_space<vmem>>, vector<1x256xf32>
    %47 = vector.broadcast %46 : vector<1x256xf32> to vector<304x256xf32>
    %48 = arith.addf %45, %47 : vector<304x256xf32>
    %49 = arith.truncf %36 : vector<304x13xf32> to vector<304x13xbf16>
    %c0_24 = arith.constant 0 : index
    %c0_25 = arith.constant 0 : index
    %50 = vector.load %arg10[%c0_24, %c0_25] : memref<13x256xbf16, #tpu.memory_space<vmem>>, vector<13x256xbf16>
    %cst_26 = arith.constant dense<0.000000e+00> : vector<304x256xf32>
    %51 = tpu.matmul %49, %50, %cst_26 {dimension_numbers = #tpu.dot_dimension_numbers<[1], [0], [0], [1], [0, 0, 1, 1], [], []>} : vector<304x13xbf16>, vector<13x256xbf16>, vector<304x256xf32> -> vector<304x256xf32>
    %52 = arith.addf %48, %51 : vector<304x256xf32>
    %53 = arith.truncf %32 : vector<304x128xf32> to vector<304x128xbf16>
    %c0_27 = arith.constant 0 : index
    %c0_28 = arith.constant 0 : index
    %54 = vector.load %arg11[%c0_27, %c0_28] : memref<128x256xbf16, #tpu.memory_space<vmem>>, vector<128x256xbf16>
    %cst_29 = arith.constant dense<0.000000e+00> : vector<304x256xf32>
    %55 = tpu.matmul %53, %54, %cst_29 {dimension_numbers = #tpu.dot_dimension_numbers<[1], [0], [0], [1], [0, 0, 1, 1], [], []>} : vector<304x128xbf16>, vector<128x256xbf16>, vector<304x256xf32> -> vector<304x256xf32>
    %56 = arith.addf %52, %55 : vector<304x256xf32>
    %cst_30 = arith.constant 0.000000e+00 : f32
    %57 = vector.broadcast %cst_30 : f32 to vector<304x256xf32>
    %58 = arith.maximumf %56, %57 : vector<304x256xf32>
    %59 = arith.truncf %58 : vector<304x256xf32> to vector<304x256xbf16>
    %c0_31 = arith.constant 0 : index
    %c0_32 = arith.constant 0 : index
    %60 = vector.load %arg13[%c0_31, %c0_32] : memref<256x256xbf16, #tpu.memory_space<vmem>>, vector<256x256xbf16>
    %cst_33 = arith.constant dense<0.000000e+00> : vector<304x256xf32>
    %61 = tpu.matmul %59, %60, %cst_33 {dimension_numbers = #tpu.dot_dimension_numbers<[1], [0], [0], [1], [0, 0, 1, 1], [], []>} : vector<304x256xbf16>, vector<256x256xbf16>, vector<304x256xf32> -> vector<304x256xf32>
    %c0_34 = arith.constant 0 : index
    %c0_35 = arith.constant 0 : index
    %62 = vector.load %arg14[%c0_34, %c0_35] : memref<1x256xf32, #tpu.memory_space<vmem>>, vector<1x256xf32>
    %63 = vector.broadcast %62 : vector<1x256xf32> to vector<304x256xf32>
    %64 = arith.addf %61, %63 : vector<304x256xf32>
    %cst_36 = arith.constant 0.000000e+00 : f32
    %65 = vector.broadcast %cst_36 : f32 to vector<304x256xf32>
    %66 = arith.maximumf %64, %65 : vector<304x256xf32>
    %67 = arith.truncf %66 : vector<304x256xf32> to vector<304x256xbf16>
    %c0_37 = arith.constant 0 : index
    %c0_38 = arith.constant 0 : index
    %68 = vector.load %arg15[%c0_37, %c0_38] : memref<256x128xbf16, #tpu.memory_space<vmem>>, vector<256x128xbf16>
    %cst_39 = arith.constant dense<0.000000e+00> : vector<304x128xf32>
    %69 = tpu.matmul %67, %68, %cst_39 {dimension_numbers = #tpu.dot_dimension_numbers<[1], [0], [0], [1], [0, 0, 1, 1], [], []>} : vector<304x256xbf16>, vector<256x128xbf16>, vector<304x128xf32> -> vector<304x128xf32>
    %c0_40 = arith.constant 0 : index
    %c0_41 = arith.constant 0 : index
    %70 = vector.load %arg16[%c0_40, %c0_41] : memref<1x128xf32, #tpu.memory_space<vmem>>, vector<1x128xf32>
    %71 = vector.broadcast %70 : vector<1x128xf32> to vector<304x128xf32>
    %72 = arith.addf %69, %71 : vector<304x128xf32>
    %cst_42 = arith.constant 0.000000e+00 : f32
    %73 = vector.broadcast %cst_42 : f32 to vector<304x128xf32>
    %74 = arith.maximumf %72, %73 : vector<304x128xf32>
    %75 = arith.truncf %74 : vector<304x128xf32> to vector<304x128xbf16>
    %c0_43 = arith.constant 0 : index
    %c0_44 = arith.constant 0 : index
    %76 = vector.load %arg17[%c0_43, %c0_44] : memref<128x128xbf16, #tpu.memory_space<vmem>>, vector<128x128xbf16>
    %cst_45 = arith.constant dense<0.000000e+00> : vector<304x128xf32>
    %77 = tpu.matmul %75, %76, %cst_45 {dimension_numbers = #tpu.dot_dimension_numbers<[1], [0], [0], [1], [0, 0, 1, 1], [], []>} : vector<304x128xbf16>, vector<128x128xbf16>, vector<304x128xf32> -> vector<304x128xf32>
    %c0_46 = arith.constant 0 : index
    %c0_47 = arith.constant 0 : index
    %78 = vector.load %arg18[%c0_46, %c0_47] : memref<1x128xf32, #tpu.memory_space<vmem>>, vector<1x128xf32>
    %79 = vector.broadcast %78 : vector<1x128xf32> to vector<304x128xf32>
    %80 = arith.addf %77, %79 : vector<304x128xf32>
    %c0_48 = arith.constant 0 : index
    %c0_49 = arith.constant 0 : index
    %81 = vector.load %arg19[%c0_48, %c0_49] : memref<304x128xf32, #tpu.memory_space<vmem>>, vector<304x128xf32>
    tpu.vector_store %arg19[%c0_48, %c0_49], %80 {strides = array<i32>} : memref<304x128xf32, #tpu.memory_space<vmem>>, vector<304x128xf32>,
    return
  }
  func.func @transform_0(%arg0: i32) -> (i32, i32) {
    %c0_i32 = arith.constant 0 : i32
    %c0_i32_0 = arith.constant 0 : i32
    return %arg0, %c0_i32 : i32, i32
  }
  func.func @transform_1(%arg0: i32) -> (i32, i32) {
    %c0_i32 = arith.constant 0 : i32
    %c0_i32_0 = arith.constant 0 : i32
    %c0_i32_1 = arith.constant 0 : i32
    return %c0_i32, %c0_i32_0 : i32, i32
  }
  func.func @transform_2(%arg0: i32) -> (i32, i32) {
    %c0_i32 = arith.constant 0 : i32
    %c0_i32_0 = arith.constant 0 : i32
    %c0_i32_1 = arith.constant 0 : i32
    return %c0_i32, %c0_i32_0 : i32, i32
  }
  func.func @transform_3(%arg0: i32) -> (i32, i32) {
    %c0_i32 = arith.constant 0 : i32
    %c0_i32_0 = arith.constant 0 : i32
    %c0_i32_1 = arith.constant 0 : i32
    return %c0_i32, %c0_i32_0 : i32, i32
  }
  func.func @transform_4(%arg0: i32) -> (i32, i32) {
    %c0_i32 = arith.constant 0 : i32
    %c0_i32_0 = arith.constant 0 : i32
    %c0_i32_1 = arith.constant 0 : i32
    return %c0_i32, %c0_i32_0 : i32, i32
  }
  func.func @transform_5(%arg0: i32) -> (i32, i32) {
    %c0_i32 = arith.constant 0 : i32
    %c0_i32_0 = arith.constant 0 : i32
    %c0_i32_1 = arith.constant 0 : i32
    return %c0_i32, %c0_i32_0 : i32, i32
  }
  func.func @transform_6(%arg0: i32) -> (i32, i32) {
    %c0_i32 = arith.constant 0 : i32
    %c0_i32_0 = arith.constant 0 : i32
    %c0_i32_1 = arith.constant 0 : i32
    return %c0_i32, %c0_i32_0 : i32, i32
  }
  func.func @transform_7(%arg0: i32) -> (i32, i32) {
    %c0_i32 = arith.constant 0 : i32
    %c0_i32_0 = arith.constant 0 : i32
    %c0_i32_1 = arith.constant 0 : i32
    return %c0_i32, %c0_i32_0 : i32, i32
  }
  func.func @transform_8(%arg0: i32) -> (i32, i32) {
    %c0_i32 = arith.constant 0 : i32
    %c0_i32_0 = arith.constant 0 : i32
    %c0_i32_1 = arith.constant 0 : i32
    return %c0_i32, %c0_i32_0 : i32, i32
  }
  func.func @transform_9(%arg0: i32) -> (i32, i32) {
    %c0_i32 = arith.constant 0 : i32
    %c0_i32_0 = arith.constant 0 : i32
    %c0_i32_1 = arith.constant 0 : i32
    return %c0_i32, %c0_i32_0 : i32, i32
  }
  func.func @transform_10(%arg0: i32) -> (i32, i32) {
    %c0_i32 = arith.constant 0 : i32
    %c0_i32_0 = arith.constant 0 : i32
    %c0_i32_1 = arith.constant 0 : i32
    return %c0_i32, %c0_i32_0 : i32, i32
  }
  func.func @transform_11(%arg0: i32) -> (i32, i32) {
    %c0_i32 = arith.constant 0 : i32
    %c0_i32_0 = arith.constant 0 : i32
    %c0_i32_1 = arith.constant 0 : i32
    return %c0_i32, %c0_i32_0 : i32, i32
  }
  func.func @transform_12(%arg0: i32) -> (i32, i32) {
    %c0_i32 = arith.constant 0 : i32
    %c0_i32_0 = arith.constant 0 : i32
    %c0_i32_1 = arith.constant 0 : i32
    return %c0_i32, %c0_i32_0 : i32, i32
  }
  func.func @transform_13(%arg0: i32) -> (i32, i32) {
    %c0_i32 = arith.constant 0 : i32
    %c0_i32_0 = arith.constant 0 : i32
    %c0_i32_1 = arith.constant 0 : i32
    return %c0_i32, %c0_i32_0 : i32, i32
  }
  func.func @transform_14(%arg0: i32) -> (i32, i32) {
    %c0_i32 = arith.constant 0 : i32
    %c0_i32_0 = arith.constant 0 : i32
    %c0_i32_1 = arith.constant 0 : i32
    return %c0_i32, %c0_i32_0 : i32, i32
  }
  func.func @transform_15(%arg0: i32) -> (i32, i32) {
    %c0_i32 = arith.constant 0 : i32
    %c0_i32_0 = arith.constant 0 : i32
    %c0_i32_1 = arith.constant 0 : i32
    return %c0_i32, %c0_i32_0 : i32, i32
  }
  func.func @transform_16(%arg0: i32) -> (i32, i32) {
    %c0_i32 = arith.constant 0 : i32
    %c0_i32_0 = arith.constant 0 : i32
    %c0_i32_1 = arith.constant 0 : i32
    return %c0_i32, %c0_i32_0 : i32, i32
  }
  func.func @transform_17(%arg0: i32) -> (i32, i32) {
    %c0_i32 = arith.constant 0 : i32
    %c0_i32_0 = arith.constant 0 : i32
    %c0_i32_1 = arith.constant 0 : i32
    return %c0_i32, %c0_i32_0 : i32, i32
  }
  func.func @transform_18(%arg0: i32) -> (i32, i32) {
    %c0_i32 = arith.constant 0 : i32
    %c0_i32_0 = arith.constant 0 : i32
    return %arg0, %c0_i32 : i32, i32
  }
}

</mosaic_0001>

<bundles_post_ra>
// kernel: tpu_custom_call.1
= control target key start
LH: loop header
LB: loop body
LE: loop exit
PB: predicated region body
PF: predicated region fallthrough
CT: control target
= control target key end

     0   :  { %s20946_s0 = inlined_call_operand.vmem [shape: f32[1216,14], index: 0, kind: input, shape index: {}]   ;;  %s20947_s1 = inlined_call_operand.vmem [shape: f32[2,16], index: 1, kind: input, shape index: {}]   ;;  %s20948_s2 = inlined_call_operand.vmem [shape: f32[1,16], index: 2, kind: input, shape index: {}]   ;;  %s20949_s3 = inlined_call_operand.vmem [shape: bf16[16,64], index: 3, kind: input, shape index: {}]   ;;  %s20950_s4 = inlined_call_operand.vmem [shape: f32[1,64], index: 4, kind: input, shape index: {}]   ;;  %s20951_s5 = inlined_call_operand.vmem [shape: bf16[64,128], index: 5, kind: input, shape index: {}]   ;;  %s20952_s6 = inlined_call_operand.vmem [shape: f32[1,128], index: 6, kind: input, shape index: {}]   ;;  %s20953_s7 = inlined_call_operand.vmem [shape: f32[1,256], index: 7, kind: input, shape index: {}]   ;;  %s20954_s8 = inlined_call_operand.vmem [shape: f32[1,256], index: 8, kind: input, shape index: {}]   ;;  %s20955_s9 = inlined_call_operand.vmem [shape: bf16[13,256], index: 9, kind: input, shape index: {}]   ;;  %s20956_s10 = inlined_call_operand.vmem [shape: bf16[128,256], index: 10, kind: input, shape index: {}]   ;;  %s20957_s11 = inlined_call_operand.vmem [shape: f32[1,256], index: 11, kind: input, shape index: {}]   ;;  %s20958_s12 = inlined_call_operand.vmem [shape: bf16[256,256], index: 12, kind: input, shape index: {}]   ;;  %s20959_s13 = inlined_call_operand.vmem [shape: f32[1,256], index: 13, kind: input, shape index: {}]   ;;  %s20960_s14 = inlined_call_operand.vmem [shape: bf16[256,128], index: 14, kind: input, shape index: {}]   ;;  %s20961_s15 = inlined_call_operand.vmem [shape: f32[1,128], index: 15, kind: input, shape index: {}]   ;;  %s20962_s16 = inlined_call_operand.vmem [shape: bf16[128,128], index: 16, kind: input, shape index: {}]   ;;  %s20963_s17 = inlined_call_operand.vmem [shape: f32[1,128], index: 17, kind: input, shape index: {}]   ;;  %s20964_s18 = inlined_call_operand.hbm [shape: f32[1216,128], index: 18, kind: output, shape index: {}]  }
   0x1   :  { %20996 = sst [smem:[#allocation40_spill]] %s20946_s0 }
   0x2   :  { %20997 = sst [smem:[#allocation41_spill]] %s20947_s1 }
   0x3   :  { %20998 = sst [smem:[#allocation42_spill]] %s20948_s2 }
   0x4   :  { %20999 = sst [smem:[#allocation43_spill]] %s20949_s3 }
   0x5   :  { %21000 = sst [smem:[#allocation44_spill]] %s20950_s4 }
   0x6   :  { %21001 = sst [smem:[#allocation45_spill]] %s20951_s5 }
   0x7   :  { %21002 = sst [smem:[#allocation46_spill]] %s20952_s6 }
   0x8   :  { %21003 = sst [smem:[#allocation47_spill]] %s20953_s7 }
   0x9   :  { %23 = vsyncpa [#allocation3], 0 }
   0xa   :  { %25 = vsyncpa [#allocation3 + $0x1], 0  ;;  %s14377_s27 = smov 0   ;;  %s14379_s28 = smov 0  }
   0xb   :  { %s14381_s29 = smov 0   ;;  %s14383_s30 = smov 0  }
   0xc LB: > { %s14398_s0 = sadd.s32 4294967295, %s14264_s30   ;;  %s12674_s19 = sadd.s32 4294967294, %s14264_s30   ;;  %s14264_s30 = sphi %s14383_s30, %s21199_s30   ;;  %s14260_s29 = sphi %s14381_s29, %s21198_s29   ;;  %s14256_s28 = sphi %s14379_s28, %s21197_s28   ;;  %s14252_s27 = sphi %s14377_s27, %s21196_s27  }
   0xd   : > { %s14402_s1 = sadd.s32 1, %s14264_s30   ;;  %s421_s20 = sadd.s32 1, %s14260_s29 }
   0xe   : > { %s418_s21 = ssub.s32 %s14264_s30, %s14402_s1  ;;  %p431_p0 = scmp.ne.s32.totalorder %s14260_s29, %s14256_s28 }
   0xf   : > { %p419_p1 = scmp.eq.s32.totalorder %s418_s21, 0  ;;  %p432_p2 = scmp.eq.s32.totalorder %s14398_s0, 3 }
  0x10   : > { %p437_p3 = scmp.ne.s32.totalorder %s14256_s28, %s14252_s27  ;;  %p438_p4 = scmp.eq.s32.totalorder %s12674_s19, 3 }
  0x11   : > { %s14413_s22 = scalar_select %p419_p1, %s14260_s29, %s421_s20  }
  0x12   : > { %p14415_p5 = por %p432_p2, %p431_p0  ;;  %p14419_p6 = por %p438_p4, %p437_p3 }
  0x13   : > { %p12677_p7 = scmp.ge.s32.totalorder %s14264_s30, 1  ;;  %p516_p8 = scmp.lt.s32.totalorder %s14264_s30, 5 }
  0x15   : > { %p517_p9 = pnand %p12677_p7, %p516_p8 }
  0x17   : > { %520 = sbr.rel (%p517_p9) target bundleno = 2376 (0x948), region = 92 }
  0x1e   : > { %s570_s24 = smul.u32 38, %s14398_s0  ;;  %v14266_v0 = vmov 5   ;;  %v14267_v1 = vmov 4   ;;  %s21006_s20 = sld [smem:[#allocation40_spill]]  ;;  %v20969_v12 = vmov 0.0   ;;  %vm14269_vm0 = vmmov 0  }
  0x1f   : > { %13816 = vset.pattern.permute.xlu1 %v14266_v0  ;;  %13815 = vset.pattern.permute.xlu0 %v14267_v1  ;;  %s21007_s3 = sld [smem:[#allocation43_spill]]  ;;  %vm1199_vm1 = vcmask 130048   ;;  %s21010_s5 = sld [smem:[#allocation45_spill]]  ;;  %vm10549_vm2 = vcmask 1045504   ;;  %vm10550_vm3 = vcmask 1046528   ;;  %vm10491_vm4 = vcmask 105472  }
  0x20   : > { %p571_p10 = scmp.lt.s32.totalorder %s570_s24, 151  ;;  %13200 = vmatprep.subr.bf16.mxu0 %v20969_v12  ;;  %13202 = vmatprep.mubr.msk.bf16.mxu0 %vm14269_vm0, %v20969_v12  ;;  %s21011_s26 = smov 127   ;;  %vm1538_vm5 = vcmask 523264  }
  0x21   : > { %13454 = vmatprep.subr.bf16.mxu1 %v20969_v12  ;;  %13242 = vmatprep.mubr.msk.bf16.mxu1 %vm14269_vm0, %v20969_v12  ;;  %s21012_s4 = sld [smem:[#allocation44_spill]]  ;;  %s21026_s6 = sld [smem:[#allocation46_spill]] }
  0x22   : > { %s21201_s24 = smov (!%p571_p10, %s570_s24), 151  ;;  %s21109_s7 = sld [smem:[#allocation47_spill]] }
  0x23   : > { %s12678_s25 = sshll.u32 %s21201_s24, 3  ;;  %s21009_s24 = sld [smem:[#allocation42_spill]] }
  0x24   : > { %s14431_s21 = scalar_lea.vmem %s21006_s20, %s12678_s25  ;;  %s21008_s20 = sld [smem:[#allocation41_spill]] }
  0x25   : > { %v14434_v2 = vld [vmem:[%s14431_s21] sm:$0xff]  ;;  %v14439_v3 = vld [vmem:[%s14431_s21 + $0x8] sm:$0xff]  ;;  %v14442_v4 = vld [vmem:[%s14431_s21 + $0x10] sm:$0xff]  ;;  %s20966_s25 = smov 127  }
  0x26   : > { %851 = vperm.xlu1 %13816, %v14434_v2   ;;  %619 = vperm.xlu0 %13815, %v14434_v2   ;;  %v14448_v5 = vld [vmem:[%s14431_s21 + $0x18] sm:$0xff]  ;;  %v14458_v6 = vld [vmem:[%s14431_s21 + $0x28] sm:$0xff]  ;;  %v14461_v7 = vld [vmem:[%s14431_s21 + $0x20] sm:$0xff] }
  0x27   : > { %v14467_v8 = vld [vmem:[%s14431_s21 + $0x30] sm:$0xff]  ;;  %v13867_v10 = vld [vmem:[%s21007_s3] sm:$0xff]   ;;  %v14482_v11 = vld [vmem:[%s14431_s21 + $0x38] sm:$0xff]  ;;  %s567_s3 = sand.u32 1, %s14256_s28  }
  0x28   : > { %v14475_v9 = vld [vmem:[%s14431_s21 + $0x50] sm:$0xff]  ;;  %13201 = vmatpush3.bf16.msra.mxu0 %v13867_v10  ;;  %v14489_v13 = vld [vmem:[%s14431_s21 + $0x48] sm:$0xff]  ;;  %13455 = vmatpush3.bf16.msra.mxu1 %v13867_v10  ;;  %v14502_v14 = vld [vmem:[%s14431_s21 + $0x40] sm:$0xff]  ;;  %s13608_s19 = smul.u32 304, %s567_s3 }
  0x29   : > { %13278 = vmatprep.subr.bf16.mxu1 %v20969_v12  ;;  %v14506_v15 = vld [vmem:[%s14431_s21 + $0x68] sm:$0xff]  ;;  %v14512_v16 = vld [vmem:[%s14431_s21 + $0x70] sm:$0xff]  ;;  %v14521_v17 = vld [vmem:[%s14431_s21 + $0x58] sm:$0xff] }
  0x2a   : > { %855 = vperm.xlu1 %13816, %v14439_v3   ;;  %13818 = vset.pattern.permute.xlu0 %v14266_v0  ;;  %v14524_v18 = vld [vmem:[%s14431_s21 + $0x90] sm:$0xff]  ;;  %v14530_v19 = vld [vmem:[%s14431_s21 + $0x88] sm:$0xff]  ;;  %v14537_v20 = vld [vmem:[%s14431_s21 + $0x60] sm:$0xff] }
  0x2b   : > { %859 = vperm.xlu0 %13818, %v14442_v4   ;;  %v14543_v21 = vld [vmem:[%s14431_s21 + $0xa8] sm:$0xff]  ;;  %v14548_v22 = vld [vmem:[%s14431_s21 + $0xb0] sm:$0xff]  ;;  %v14554_v23 = vld [vmem:[%s14431_s21 + $0x78] sm:$0xff] }
  0x2c   : > { %v14560_v24 = vld [vmem:[%s14431_s21 + $0xd0] sm:$0xff]  ;;  %v14566_v25 = vld [vmem:[%s14431_s21 + $0xc8] sm:$0xff]  ;;  %v14571_v26 = vld [vmem:[%s14431_s21 + $0x80] sm:$0xff] }
  0x2d   : > { %v14578_v27 = vld [vmem:[%s14431_s21 + $0xe8] sm:$0xff]  ;;  %v14584_v28 = vld [vmem:[%s14431_s21 + $0xf0] sm:$0xff]  ;;  %v14590_v29 = vld [vmem:[%s14431_s21 + $0x98] sm:$0xff] }
  0x2e   : > { %13817 = vset.pattern.permute.xlu1 %v14267_v1  ;;  %v14597_v30 = vld [vmem:[%s14431_s21 + $0x108] sm:$0xff]  ;;  %v14603_v31 = vld [vmem:[%s14431_s21 + $0x110] sm:$0xff]  ;;  %v14606_v32 = vld [vmem:[%s14431_s21 + $0xa0] sm:$0xff] }
  0x2f   : > { %634 = vperm.xlu1 %13817, %v14448_v5   ;;  %13819 = vset.pattern.permute.xlu0 %v14267_v1  ;;  %v14616_v33 = vld [vmem:[%s14431_s21 + $0x128] sm:$0xff]  ;;  %v14622_v34 = vld [vmem:[%s14431_s21 + $0xb8] sm:$0xff]  ;;  %v14628_v37 = vld [vmem:[%s21008_s20 + $0x1] ss:$0 sm:$0xff] }
  0x30   : > { %624 = vperm.xlu0 %13819, %v14439_v3   ;;  %v14633_v38 = vld [vmem:[%s21008_s20] ss:$0 sm:$0xff] }
  0x31   : > { %v14641_v45 = vld [vmem:[%s14431_s21 + $0xc0] sm:$0xff] }
  0x32   : > { %v14646_v46 = vld [vmem:[%s21009_s24] ss:$0 sm:$0xff]  ;;  %s13129_s24 = smul.u32 4864, %s14398_s0  ;;  %s20905_s0 = scalar_lea.sflag [#allocation3], %s567_s3 }
  0x33   : > { %13820 = vset.pattern.permute.xlu1 %v14266_v0 }
  0x34   : > { %863 = vperm.xlu1 %13820, %v14448_v5   ;;  %629 = vperm.xlu0 %13819, %v14442_v4  }
  0x38   : > { %13821 = vset.pattern.permute.xlu1 %v14267_v1  ;;  %644 = vperm.xlu0 %13819, %v14458_v6  }
  0x39   : > { %639 = vperm.xlu1 %13821, %v14461_v7  }
  0x3c   : > { %649 = vperm.xlu0 %13819, %v14467_v8  }
  0x3d   : > { %13822 = vset.pattern.permute.xlu1 %v14266_v0 }
  0x3e   : > { %867 = vperm.xlu1 %13822, %v14461_v7  }
  0x40   : > { %13824 = vset.pattern.permute.xlu0 %v14266_v0 }
  0x41   : > { %875 = vperm.xlu0 %13824, %v14467_v8  }
  0x42   : > { %871 = vperm.xlu1 %13822, %v14458_v6  }
  0x45   : > { %891 = vperm.xlu0 %13824, %v14475_v9  }
  0x46   : > { %13823 = vset.pattern.permute.xlu1 %v14267_v1 }
  0x47   : > { %654 = vperm.xlu1 %13823, %v14482_v11  }
  0x49   : > { %13829 = vset.pattern.permute.xlu0 %v14267_v1 }
  0x4a   : > { %664 = vperm.xlu0 %13829, %v14489_v13  }
  0x4b   : > { %13825 = vset.pattern.permute.xlu1 %v14266_v0 }
  0x4c   : > { %879 = vperm.xlu1 %13825, %v14482_v11  }
  0x4e   : > { %669 = vperm.xlu0 %13829, %v14475_v9  }
  0x50   : > { %13826 = vset.pattern.permute.xlu1 %v14267_v1 }
  0x51   : > { %659 = vperm.xlu1 %13826, %v14502_v14  }
  0x52   : > { %684 = vperm.xlu0 %13829, %v14506_v15  }
  0x55   : > { %13827 = vset.pattern.permute.xlu1 %v14266_v0 }
  0x56   : > { %883 = vperm.xlu1 %13827, %v14502_v14   ;;  %689 = vperm.xlu0 %13829, %v14512_v16  }
  0x5a   : > { %887 = vperm.xlu1 %13827, %v14489_v13   ;;  %13834 = vset.pattern.permute.xlu0 %v14266_v0 }
  0x5b   : > { %907 = vperm.xlu0 %13834, %v14512_v16  }
  0x5e   : > { %13828 = vset.pattern.permute.xlu1 %v14267_v1 }
  0x5f   : > { %674 = vperm.xlu1 %13828, %v14521_v17   ;;  %923 = vperm.xlu0 %13834, %v14524_v18  }
  0x63   : > { %13830 = vset.pattern.permute.xlu1 %v14266_v0  ;;  %13839 = vset.pattern.permute.xlu0 %v14267_v1 }
  0x64   : > { %895 = vperm.xlu1 %13830, %v14521_v17   ;;  %704 = vperm.xlu0 %13839, %v14530_v19  }
  0x68   : > { %13831 = vset.pattern.permute.xlu1 %v14267_v1  ;;  %709 = vperm.xlu0 %13839, %v14524_v18  }
  0x69   : > { %679 = vperm.xlu1 %13831, %v14537_v20  }
  0x6c   : > { %724 = vperm.xlu0 %13839, %v14543_v21  }
  0x6d   : > { %13832 = vset.pattern.permute.xlu1 %v14266_v0 }
  0x6e   : > { %899 = vperm.xlu1 %13832, %v14537_v20  }
  0x70   : > { %729 = vperm.xlu0 %13839, %v14548_v22  }
  0x72   : > { %903 = vperm.xlu1 %13832, %v14506_v15  }
  0x74   : > { %13844 = vset.pattern.permute.xlu0 %v14266_v0 }
  0x75   : > { %939 = vperm.xlu0 %13844, %v14548_v22  }
  0x76   : > { %13833 = vset.pattern.permute.xlu1 %v14267_v1 }
  0x77   : > { %694 = vperm.xlu1 %13833, %v14554_v23  }
  0x79   : > { %955 = vperm.xlu0 %13844, %v14560_v24  }
  0x7b   : > { %13835 = vset.pattern.permute.xlu1 %v14266_v0 }
  0x7c   : > { %911 = vperm.xlu1 %13835, %v14554_v23  }
  0x7d   : > { %13849 = vset.pattern.permute.xlu0 %v14267_v1 }
  0x7e   : > { %744 = vperm.xlu0 %13849, %v14566_v25  }
  0x80   : > { %13836 = vset.pattern.permute.xlu1 %v14267_v1 }
  0x81   : > { %699 = vperm.xlu1 %13836, %v14571_v26  }
  0x82   : > { %749 = vperm.xlu0 %13849, %v14560_v24  }
  0x85   : > { %13837 = vset.pattern.permute.xlu1 %v14266_v0 }
  0x86   : > { %915 = vperm.xlu1 %13837, %v14571_v26   ;;  %764 = vperm.xlu0 %13849, %v14578_v27  }
  0x8a   : > { %919 = vperm.xlu1 %13837, %v14530_v19   ;;  %13854 = vset.pattern.permute.xlu0 %v14266_v0 }
  0x8b   : > { %971 = vperm.xlu0 %13854, %v14584_v28  }
  0x8e   : > { %13838 = vset.pattern.permute.xlu1 %v14267_v1 }
  0x8f   : > { %714 = vperm.xlu1 %13838, %v14590_v29   ;;  %13855 = vset.pattern.permute.xlu0 %v14267_v1 }
  0x90   : > { %769 = vperm.xlu0 %13855, %v14584_v28  }
  0x93   : > { %13840 = vset.pattern.permute.xlu1 %v14266_v0 }
  0x94   : > { %927 = vperm.xlu1 %13840, %v14590_v29   ;;  %784 = vperm.xlu0 %13855, %v14597_v30  }
  0x98   : > { %13841 = vset.pattern.permute.xlu1 %v14267_v1  ;;  %789 = vperm.xlu0 %13855, %v14603_v31  }
  0x99   : > { %719 = vperm.xlu1 %13841, %v14606_v32  }
  0x9c   : > { %13860 = vset.pattern.permute.xlu0 %v14266_v0 }
  0x9d   : > { %13842 = vset.pattern.permute.xlu1 %v14266_v0  ;;  %987 = vperm.xlu0 %13860, %v14603_v31  }
  0x9e   : > { %931 = vperm.xlu1 %13842, %v14606_v32  }
  0xa1   : > { %13863 = vset.pattern.permute.xlu0 %v14267_v1 }
  0xa2   : > { %935 = vperm.xlu1 %13842, %v14543_v21   ;;  %804 = vperm.xlu0 %13863, %v14616_v33  }
  0xa5   : > { %v852_v35 = vpop.permute.xlu1 %851  ;;  %v620_v36 = vpop.permute.xlu0 %619 }
  0xa6   : > { %13843 = vset.pattern.permute.xlu1 %v14267_v1  ;;  %v1006_v40 = vmul.f32 %v14628_v37, %v852_v35  ;;  %v811_v41 = vmul.f32 %v14633_v38, %v620_v36 }
  0xa7   : > { %734 = vperm.xlu1 %13843, %v14622_v34  }
  0xa8   : > { %v1044_v43 = vadd.f32 %v1006_v40, %v811_v41 }
  0xa9   : > { %v856_v39 = vpop.permute.xlu1 %855 }
  0xaa   : > { %v860_v42 = vpop.permute.xlu0 %859  ;;  %v1007_v48 = vmul.f32 %v14628_v37, %v856_v39  ;;  %v1089_v50 = vadd.f32 %v14646_v46, %v1044_v43  ;;  %v14667_v43 = vld [vmem:[%s14431_s21 + $0xd8] sm:$0xff] }
  0xab   : > { %13845 = vset.pattern.permute.xlu1 %v14266_v0  ;;  %v1008_v51 = vmul.f32 %v14628_v37, %v860_v42 }
  0xac   : > { %943 = vperm.xlu1 %13845, %v14622_v34   ;;  %v1127_v59 = vmax.f32 %v1089_v50, 0.0 }
  0xae   : > { %v635_v44 = vpop.permute.xlu1 %634 }
  0xaf   : > { %v625_v47 = vpop.permute.xlu0 %624  ;;  %v814_v55 = vmul.f32 %v14633_v38, %v635_v44 }
  0xb0   : > { %v812_v49 = vmul.f32 %v14633_v38, %v625_v47  ;;  %13846 = vset.pattern.permute.xlu1 %v14267_v1 }
  0xb1   : > { %739 = vperm.xlu1 %13846, %v14641_v45  }
  0xb2   : > { %v1045_v52 = vadd.f32 %v1007_v48, %v812_v49 }
  0xb3   : > { %v864_v53 = vpop.permute.xlu1 %863  ;;  %v630_v54 = vpop.permute.xlu0 %629 }
  0xb4   : > { %v1090_v56 = vadd.f32 %v14646_v46, %v1045_v52  ;;  %v1009_v57 = vmul.f32 %v14628_v37, %v864_v53  ;;  %v813_v58 = vmul.f32 %v14633_v38, %v630_v54 }
  0xb5   : > { %13847 = vset.pattern.permute.xlu1 %v14266_v0 }
  0xb6   : > { %v1128_v60 = vmax.f32 %v1090_v56, 0.0  ;;  %v1047_v61 = vadd.f32 %v1009_v57, %v814_v55  ;;  %v1046_v62 = vadd.f32 %v1008_v51, %v813_v58  ;;  %947 = vperm.xlu1 %13847, %v14641_v45  }
  0xb7   : > { %v645_v63 = vpop.permute.xlu0 %644 }
  0xb8   : > { %v1092_v10 = vadd.f32 %v14646_v46, %v1047_v61  ;;  %v1091_v35 = vadd.f32 %v14646_v46, %v1046_v62  ;;  %v640_v36 = vpop.permute.xlu1 %639  ;;  %v1165_v39 = vpack.c.bf16 %v1128_v60, %v1127_v59  ;;  %v816_v50 = vmul.f32 %v14633_v38, %v645_v63  ;;  %v14685_v61 = vld [vmem:[%s14431_s21 + $0xe0] sm:$0xff] }
  0xb9   : > { %v815_v47 = vmul.f32 %v14633_v38, %v640_v36 }
  0xba   : > { %951 = vperm.xlu1 %13847, %v14566_v25   ;;  %13203 = vmatmul.mubr.msk.bf16.vlgmr.msra.gmra.mrb[0].mxu0 %vm1199_vm1, %v1165_v39  ;;  %v1130_v41 = vmax.f32 %v1092_v10, 0.0  ;;  %v1129_v42 = vmax.f32 %v1091_v35, 0.0 }
  0xbb   : > { %13206 = vmatprep.mubr.msk.bf16.mxu0 %vm14269_vm0, %v20969_v12  ;;  %v650_v40 = vpop.permute.xlu0 %649 }
  0xbc   : > { %v1166_v51 = vpack.c.bf16 %v1130_v41, %v1129_v42  ;;  %v817_v57 = vmul.f32 %v14633_v38, %v650_v40 }
  0xbd   : > { %v868_v44 = vpop.permute.xlu1 %867 }
  0xbe   : > { %v1010_v48 = vmul.f32 %v14628_v37, %v868_v44  ;;  %13848 = vset.pattern.permute.xlu1 %v14267_v1 }
  0xbf   : > { %754 = vperm.xlu1 %13848, %v14667_v43  }
  0xc0   : > { %v1048_v49 = vadd.f32 %v1010_v48, %v815_v47  ;;  %v876_v53 = vpop.permute.xlu0 %875 }
  0xc1   : > { %v872_v52 = vpop.permute.xlu1 %871  ;;  %v1012_v58 = vmul.f32 %v14628_v37, %v876_v53 }
  0xc2   : > { %v1011_v54 = vmul.f32 %v14628_v37, %v872_v52  ;;  %13207 = vmatmul.mubr.msk.bf16.gmra.mrb[4].mxu0 %vm1199_vm1, %v1166_v51  ;;  %v1093_v55 = vadd.f32 %v14646_v46, %v1048_v49  ;;  %v14700_v52 = vld [vmem:[%s14431_s21 + $0xf8] sm:$0xff] }
  0xc3   : > { %13850 = vset.pattern.permute.xlu1 %v14266_v0  ;;  %13210 = vmatprep.mubr.msk.bf16.mxu0 %vm14269_vm0, %v20969_v12  ;;  %v1050_v10 = vadd.f32 %v1012_v58, %v817_v57 }
  0xc4   : > { %v1049_v56 = vadd.f32 %v1011_v54, %v816_v50  ;;  %959 = vperm.xlu1 %13850, %v14667_v43   ;;  %v1131_v62 = vmax.f32 %v1093_v55, 0.0  ;;  %v892_v44 = vpop.permute.xlu0 %891 }
  0xc5   : > { %v1095_v41 = vadd.f32 %v14646_v46, %v1050_v10  ;;  %v1016_v10 = vmul.f32 %v14628_v37, %v892_v44 }
  0xc6   : > { %v1094_v59 = vadd.f32 %v14646_v46, %v1049_v56  ;;  %v655_v60 = vpop.permute.xlu1 %654 }
  0xc7   : > { %v818_v39 = vmul.f32 %v14633_v38, %v655_v60  ;;  %v1133_v48 = vmax.f32 %v1095_v41, 0.0  ;;  %v14718_v41 = vld [vmem:[%s14431_s21 + $0x100] sm:$0xff] }
  0xc8   : > { %v1132_v63 = vmax.f32 %v1094_v59, 0.0  ;;  %13851 = vset.pattern.permute.xlu1 %v14267_v1 }
  0xc9   : > { %759 = vperm.xlu1 %13851, %v14685_v61   ;;  %v665_v54 = vpop.permute.xlu0 %664 }
  0xca   : > { %v1167_v35 = vpack.c.bf16 %v1132_v63, %v1131_v62  ;;  %v820_v58 = vmul.f32 %v14633_v38, %v665_v54  ;;  %v10405_v54 = vpack.c.bf16 %v14439_v3, %v14434_v2 }
  0xcb   : > { %v880_v36 = vpop.permute.xlu1 %879 }
  0xcc   : > { %v1013_v40 = vmul.f32 %v14628_v37, %v880_v36  ;;  %13211 = vmatmul.mubr.msk.bf16.gmra.mrb[8].mxu0 %vm1199_vm1, %v1167_v35  ;;  %10445 = vrot.lane.b32.xlu0 %v10405_v54, %s20966_s25 }
  0xcd   : > { %13852 = vset.pattern.permute.xlu1 %v14266_v0  ;;  %13214 = vmatprep.mubr.msk.bf16.mxu0 %vm14269_vm0, %v20969_v12  ;;  %v670_v60 = vpop.permute.xlu0 %669 }
  0xce   : > { %v1051_v42 = vadd.f32 %v1013_v40, %v818_v39  ;;  %963 = vperm.xlu1 %13852, %v14685_v61   ;;  %v821_v36 = vmul.f32 %v14633_v38, %v670_v60 }
  0xd0   : > { %v1096_v47 = vadd.f32 %v14646_v46, %v1051_v42  ;;  %v660_v49 = vpop.permute.xlu1 %659 }
  0xd1   : > { %v819_v55 = vmul.f32 %v14633_v38, %v660_v49 }
  0xd2   : > { %v1134_v50 = vmax.f32 %v1096_v47, 0.0  ;;  %967 = vperm.xlu1 %13852, %v14578_v27  }
  0xd4   : > { %v1168_v51 = vpack.c.bf16 %v1134_v50, %v1133_v48  ;;  %v1054_v48 = vadd.f32 %v1016_v10, %v821_v36  ;;  %v14736_v10 = vld [vmem:[%s14431_s21 + $0x118] sm:$0xff] }
  0xd5   : > { %v884_v53 = vpop.permute.xlu1 %883 }
  0xd6   : > { %v1014_v56 = vmul.f32 %v14628_v37, %v884_v53  ;;  %13853 = vset.pattern.permute.xlu1 %v14267_v1  ;;  %13215 = vmatmul.mubr.msk.bf16.gmra.mrb[12].mxu0 %vm1199_vm1, %v1168_v51  ;;  %v1099_v53 = vadd.f32 %v14646_v46, %v1054_v48 }
  0xd7   : > { %774 = vperm.xlu1 %13853, %v14700_v52   ;;  %13218 = vmatprep.mubr.msk.bf16.mxu0 %vm14269_vm0, %v20969_v12 }
  0xd8   : > { %v1052_v57 = vadd.f32 %v1014_v56, %v819_v55  ;;  %v685_v56 = vpop.permute.xlu0 %684 }
  0xd9   : > { %v888_v59 = vpop.permute.xlu1 %887 }
  0xda   : > { %v1015_v62 = vmul.f32 %v14628_v37, %v888_v59  ;;  %v1097_v63 = vadd.f32 %v14646_v46, %v1052_v57 }
  0xdb   : > { %13856 = vset.pattern.permute.xlu1 %v14266_v0 }
  0xdc   : > { %v1053_v35 = vadd.f32 %v1015_v62, %v820_v58  ;;  %975 = vperm.xlu1 %13856, %v14700_v52   ;;  %v1135_v42 = vmax.f32 %v1097_v63, 0.0  ;;  %v1137_v58 = vmax.f32 %v1099_v53, 0.0  ;;  %v690_v62 = vpop.permute.xlu0 %689 }
  0xde   : > { %v1098_v39 = vadd.f32 %v14646_v46, %v1053_v35  ;;  %v675_v40 = vpop.permute.xlu1 %674 }
  0xdf   : > { %v822_v44 = vmul.f32 %v14633_v38, %v675_v40 }
  0xe0   : > { %v1136_v47 = vmax.f32 %v1098_v39, 0.0  ;;  %13857 = vset.pattern.permute.xlu1 %v14267_v1  ;;  %v824_v39 = vmul.f32 %v14633_v38, %v685_v56 }
  0xe1   : > { %779 = vperm.xlu1 %13857, %v14718_v41  }
  0xe2   : > { %v1169_v49 = vpack.c.bf16 %v1136_v47, %v1135_v42  ;;  %v908_v42 = vpop.permute.xlu0 %907 }
  0xe3   : > { %v896_v50 = vpop.permute.xlu1 %895 }
  0xe4   : > { %v1017_v51 = vmul.f32 %v14628_v37, %v896_v50  ;;  %13219 = vmatmul.mubr.msk.bf16.gmra.mrb[16].mxu0 %vm1199_vm1, %v1169_v49  ;;  %v825_v50 = vmul.f32 %v14633_v38, %v690_v62 }
  0xe5   : > { %13858 = vset.pattern.permute.xlu1 %v14266_v0  ;;  %13222 = vmatprep.mubr.msk.bf16.mxu0 %vm14269_vm0, %v20969_v12 }
  0xe6   : > { %v1055_v55 = vadd.f32 %v1017_v51, %v822_v44  ;;  %979 = vperm.xlu1 %13858, %v14718_v41   ;;  %v1020_v44 = vmul.f32 %v14628_v37, %v908_v42  ;;  %v10407_v51 = vpack.c.bf16 %v14458_v6, %v14461_v7 }
  0xe8   : > { %v1100_v57 = vadd.f32 %v14646_v46, %v1055_v55  ;;  %v680_v59 = vpop.permute.xlu1 %679  ;;  %v14756_v55 = vld [vmem:[%s14431_s21 + $0x120] sm:$0xff]  ;;  %10449 = vrot.lane.b32.xlu0 %v10407_v51, %s20966_s25 }
  0xe9   : > { %v823_v2 = vmul.f32 %v14633_v38, %v680_v59 }
  0xea   : > { %v1138_v60 = vmax.f32 %v1100_v57, 0.0  ;;  %983 = vperm.xlu1 %13858, %v14597_v30  }
  0xec   : > { %v1170_v63 = vpack.c.bf16 %v1138_v60, %v1137_v58  ;;  %v1058_v58 = vadd.f32 %v1020_v44, %v825_v50  ;;  %v10408_v50 = vpack.c.bf16 %v14482_v11, %v14467_v8  ;;  %v10410_v11 = vpack.c.bf16 %v14521_v17, %v14475_v9 }
  0xed   : > { %v900_v35 = vpop.permute.xlu1 %899  ;;  %v10411_v9 = vpack.c.bf16 %v14506_v15, %v14537_v20 }
  0xee   : > { %v1018_v3 = vmul.f32 %v14628_v37, %v900_v35  ;;  %13859 = vset.pattern.permute.xlu1 %v14267_v1  ;;  %13223 = vmatmul.mubr.msk.bf16.gmra.mrb[20].mxu0 %vm1199_vm1, %v1170_v63  ;;  %v1103_v7 = vadd.f32 %v14646_v46, %v1058_v58 }
  0xef   : > { %794 = vperm.xlu1 %13859, %v14736_v10   ;;  %13226 = vmatprep.mubr.msk.bf16.mxu0 %vm14269_vm0, %v20969_v12 }
  0xf0   : > { %v1056_v36 = vadd.f32 %v1018_v3, %v823_v2  ;;  %v1141_v2 = vmax.f32 %v1103_v7, 0.0 }
  0xf1   : > { %v904_v40 = vpop.permute.xlu1 %903 }
  0xf2   : > { %v1019_v47 = vmul.f32 %v14628_v37, %v904_v40  ;;  %v1101_v48 = vadd.f32 %v14646_v46, %v1056_v36 }
  0xf3   : > { %13861 = vset.pattern.permute.xlu1 %v14266_v0 }
  0xf4   : > { %v1057_v49 = vadd.f32 %v1019_v47, %v824_v39  ;;  %991 = vperm.xlu1 %13861, %v14736_v10   ;;  %v1139_v56 = vmax.f32 %v1101_v48, 0.0  ;;  %v10406_v39 = vpack.c.bf16 %v14448_v5, %v14442_v4  ;;  %v10409_v47 = vpack.c.bf16 %v14489_v13, %v14502_v14 }
  0xf6   : > { %v1102_v53 = vadd.f32 %v14646_v46, %v1057_v49  ;;  %v695_v54 = vpop.permute.xlu1 %694  ;;  %10453 = vrot.lane.b32.xlu0 %v10409_v47, %s20966_s25  ;;  %v10412_v47 = vpack.c.bf16 %v14554_v23, %v14512_v16 }
  0xf7   : > { %v826_v62 = vmul.f32 %v14633_v38, %v695_v54 }
  0xf8   : > { %v1140_v57 = vmax.f32 %v1102_v53, 0.0  ;;  %13862 = vset.pattern.permute.xlu1 %v14267_v1  ;;  %v924_v1 = vpop.permute.xlu0 %923 }
  0xf9   : > { %799 = vperm.xlu1 %13862, %v14756_v55   ;;  %v1024_v53 = vmul.f32 %v14628_v37, %v924_v1 }
  0xfa   : > { %v1171_v59 = vpack.c.bf16 %v1140_v57, %v1139_v56  ;;  %10457 = vrot.lane.b32.xlu0 %v10411_v9, %s20966_s25 }
  0xfb   : > { %v912_v60 = vpop.permute.xlu1 %911 }
  0xfc   : > { %v1021_v6 = vmul.f32 %v14628_v37, %v912_v60  ;;  %13227 = vmatmul.mubr.msk.bf16.gmra.mrb[24].mxu0 %vm1199_vm1, %v1171_v59 }
  0xfd   : > { %13864 = vset.pattern.permute.xlu1 %v14266_v0  ;;  %13230 = vmatprep.mubr.msk.bf16.mxu0 %vm14269_vm0, %v20969_v12  ;;  %v705_v0 = vpop.permute.xlu0 %704 }
  0xfe   : > { %v1059_v63 = vadd.f32 %v1021_v6, %v826_v62  ;;  %995 = vperm.xlu1 %13864, %v14756_v55   ;;  %v828_v5 = vmul.f32 %v14633_v38, %v705_v0 }
 0x100   : > { %v1104_v35 = vadd.f32 %v14646_v46, %v1059_v63  ;;  %v700_v3 = vpop.permute.xlu1 %699 }
 0x101   : > { %v827_v48 = vmul.f32 %v14633_v38, %v700_v3  ;;  %v710_v14 = vpop.permute.xlu0 %709 }
 0x102   : > { %v1142_v36 = vmax.f32 %v1104_v35, 0.0  ;;  %999 = vperm.xlu1 %13864, %v14616_v33   ;;  %v829_v8 = vmul.f32 %v14633_v38, %v710_v14 }
 0x104   : > { %v1172_v40 = vpack.c.bf16 %v1142_v36, %v1141_v2  ;;  %v1062_v60 = vadd.f32 %v1024_v53, %v829_v8 }
 0x105   : > { %v916_v42 = vpop.permute.xlu1 %915  ;;  %v725_v35 = vpop.permute.xlu0 %724 }
 0x106   : > { %v1022_v49 = vmul.f32 %v14628_v37, %v916_v42  ;;  %13231 = vmatmul.mubr.msk.bf16.gmra.mrb[28].mxu0 %vm1199_vm1, %v1172_v40  ;;  %10447 = vrot.lane.b32.xlu1 %v10406_v39, %s20966_s25  ;;  %v1107_v1 = vadd.f32 %v14646_v46, %v1062_v60  ;;  %v832_v20 = vmul.f32 %v14633_v38, %v725_v35  ;;  %v13870_v35 = vld [vmem:[%s21010_s5 + $0x10] sm:$0xff]  }
 0x107   : > { %13234 = vmatprep.mubr.msk.bf16.mxu0 %vm14269_vm0, %v20969_v12 }
 0x108   : > { %v1060_v4 = vadd.f32 %v1022_v49, %v827_v48  ;;  %v1145_v3 = vmax.f32 %v1107_v1, 0.0 }
 0x109   : > { %v920_v13 = vpop.permute.xlu1 %919  ;;  %v730_v40 = vpop.permute.xlu0 %729 }
 0x10a   : > { %v1023_v44 = vmul.f32 %v14628_v37, %v920_v13  ;;  %10451 = vrot.lane.b32.xlu1 %v10408_v50, %s20966_s25  ;;  %v1105_v51 = vadd.f32 %v14646_v46, %v1060_v4  ;;  %v833_v16 = vmul.f32 %v14633_v38, %v730_v40 }
 0x10c   : > { %v1061_v54 = vadd.f32 %v1023_v44, %v828_v5  ;;  %v1143_v58 = vmax.f32 %v1105_v51, 0.0  ;;  %v10413_v44 = vpack.c.bf16 %v14530_v19, %v14571_v26  ;;  %v13869_v26 = vld [vmem:[%s21010_s5 + $0x8] sm:$0xff]  }
 0x10d   : > { %v940_v4 = vpop.permute.xlu0 %939 }
 0x10e   : > { %v1106_v56 = vadd.f32 %v14646_v46, %v1061_v54  ;;  %v715_v57 = vpop.permute.xlu1 %714  ;;  %10455 = vrot.lane.b32.xlu1 %v10410_v11, %s20966_s25  ;;  %v1028_v23 = vmul.f32 %v14628_v37, %v940_v4  ;;  %10461 = vrot.lane.b32.xlu0 %v10413_v44, %s20966_s25 }
 0x10f   : > { %v830_v7 = vmul.f32 %v14633_v38, %v715_v57  ;;  %v13868_v57 = vld [vmem:[%s21010_s5] sm:$0xff]  }
 0x110   : > { %v1144_v59 = vmax.f32 %v1106_v56, 0.0  ;;  %v1066_v11 = vadd.f32 %v1028_v23, %v833_v16 }
 0x111   : > { %v956_v56 = vpop.permute.xlu0 %955 }
 0x112   : > { %v1173_v62 = vpack.c.bf16 %v1144_v59, %v1143_v58  ;;  %10459 = vrot.lane.b32.xlu1 %v10412_v47, %s20966_s25  ;;  %v1111_v19 = vadd.f32 %v14646_v46, %v1066_v11  ;;  %s20817_s25 = scalar_lea.vmem [#allocation2], %s13608_s19 }
 0x113   : > { %v928_v6 = vpop.permute.xlu1 %927 }
 0x114   : > { %v1025_v63 = vmul.f32 %v14628_v37, %v928_v6  ;;  %13235 = vmatmul.mubr.msk.bf16.gmra.mrb[32].mxu0 %vm1199_vm1, %v1173_v62  ;;  %v10414_v6 = vpack.c.bf16 %v14590_v29, %v14524_v18  ;;  %v1149_v9 = vmax.f32 %v1111_v19, 0.0  ;;  %v13872_v19 = vld [vmem:[%s20955_s9] ss:$8 sps:$4 sm:$0x7f]  }
 0x115   : > { %13238 = vmatprep.mubr.msk.bf16.mxu0 %vm14269_vm0, %v20969_v12 }
 0x116   : > { %v1063_v17 = vadd.f32 %v1025_v63, %v830_v7  ;;  %v745_v63 = vpop.permute.xlu0 %744  ;;  %10463 = vrot.lane.b32.xlu1 %v10414_v6, %s21011_s26 }
 0x118   : > { %v1108_v2 = vadd.f32 %v14646_v46, %v1063_v17  ;;  %v720_v36 = vpop.permute.xlu1 %719 }
 0x119   : > { %v831_v48 = vmul.f32 %v14633_v38, %v720_v36  ;;  %v13871_v36 = vld [vmem:[%s21010_s5 + $0x18] sm:$0xff]  }
 0x11a   : > { %v1146_v39 = vmax.f32 %v1108_v2, 0.0 }
 0x11c   : > { %v1174_v42 = vpack.c.bf16 %v1146_v39, %v1145_v3  ;;  %v750_v3 = vpop.permute.xlu0 %749  ;;  %v10415_v39 = vpack.c.bf16 %v14543_v21, %v14606_v32 }
 0x11d   : > { %v932_v0 = vpop.permute.xlu1 %931  ;;  %v837_v4 = vmul.f32 %v14633_v38, %v750_v3 }
 0x11e   : > { %v1026_v49 = vmul.f32 %v14628_v37, %v932_v0  ;;  %13239 = vmatmul.mubr.msk.bf16.gmra.mrb[36].mxu0 %vm1199_vm1, %v1174_v42  ;;  %10465 = vrot.lane.b32.xlu0 %v10415_v39, %s21011_s26 }
 0x120   : > { %v1064_v15 = vadd.f32 %v1026_v49, %v831_v48  ;;  %v765_v0 = vpop.permute.xlu0 %764  ;;  %v836_v48 = vmul.f32 %v14633_v38, %v745_v63 }
 0x121   : > { %v936_v50 = vpop.permute.xlu1 %935  ;;  %v840_v3 = vmul.f32 %v14633_v38, %v765_v0 }
 0x122   : > { %v1027_v5 = vmul.f32 %v14628_v37, %v936_v50  ;;  %v1109_v13 = vadd.f32 %v14646_v46, %v1064_v15 }
 0x124   : > { %v1065_v14 = vadd.f32 %v1027_v5, %v832_v20  ;;  %v1147_v54 = vmax.f32 %v1109_v13, 0.0  ;;  %v972_v32 = vpop.permute.xlu0 %971  ;;  %v1032_v20 = vmul.f32 %v14628_v37, %v956_v56  ;;  %v10416_v5 = vpack.c.bf16 %v14622_v34, %v14548_v22 }
 0x125   : > { %v10417_v34 = vpack.c.bf16 %v14566_v25, %v14641_v45  ;;  %v13874_v25 = vld [vmem:[%s20955_s9 + $0x4] ss:$8 sps:$4 sm:$0x7f]  }
 0x126   : > { %v1110_v51 = vadd.f32 %v14646_v46, %v1065_v14  ;;  %v735_v53 = vpop.permute.xlu1 %734  ;;  %10467 = vrot.lane.b32.xlu1 %v10416_v5, %s21011_s26  ;;  %v1070_v44 = vadd.f32 %v1032_v20, %v837_v4  ;;  %v20978_v4 = vmov 0  }
 0x127   : > { %v834_v60 = vmul.f32 %v14633_v38, %v735_v53  ;;  %10469 = vrot.lane.b32.xlu0 %v10417_v34, %s21011_s26  ;;  %10591 = vmatprep.mubr.bf16.mxu0 %v20978_v4 }
 0x128   : > { %v1148_v8 = vmax.f32 %v1110_v51, 0.0  ;;  %v770_v51 = vpop.permute.xlu0 %769  ;;  %v1115_v56 = vadd.f32 %v14646_v46, %v1070_v44  ;;  %13865 = vset.pattern.permute.xlu1 %v20978_v4  ;;  %13866 = vset.pattern.permute.xlu0 %v20978_v4 }
 0x12a   : > { %v1175_v58 = vpack.c.bf16 %v1148_v8, %v1147_v54 }
 0x12b   : > { %v944_v59 = vpop.permute.xlu1 %943 }
 0x12c   : > { %v1029_v62 = vmul.f32 %v14628_v37, %v944_v59  ;;  %13243 = vmatmul.mubr.msk.bf16.vlgmr.msra.gmra.mrb[0].mxu1 %vm1199_vm1, %v1175_v58  ;;  %v14867_v22 = vpop.permute.xlu0 %784  ;;  %v1153_v59 = vmax.f32 %v1115_v56, 0.0  ;;  %v10421_v56 = vpack.c.bf16 %v14597_v30, %v14718_v41 }
 0x12d   : > { %13246 = vmatprep.mubr.msk.bf16.mxu1 %vm14269_vm0, %v20969_v12  ;;  %13279 = vmatpush3.bf16.msra.mxu1 %v13868_v57 }
 0x12e   : > { %v1067_v7 = vadd.f32 %v1029_v62, %v834_v60  ;;  %13280 = vmatprep.subr.bf16.mxu1 %v20969_v12 }
 0x130   : > { %v1112_v1 = vadd.f32 %v14646_v46, %v1067_v7  ;;  %v740_v17 = vpop.permute.xlu1 %739  ;;  %v14878_v6 = vpop.permute.xlu0 %789  ;;  %v14271_v7 = vmov 65535  }
 0x131   : > { %13281 = vmatpush3.bf16.msra.mxu1 %v13869_v26  ;;  %v835_v40 = vmul.f32 %v14633_v38, %v740_v17  ;;  %v10418_v26 = vpack.c.bf16 %v14667_v43, %v14560_v24  ;;  %v10551_v63 = vsel %vm10549_vm2, 4294967295, %v14271_v7 }
 0x132   : > { %v1150_v2 = vmax.f32 %v1112_v1, 0.0  ;;  %13282 = vmatprep.subr.bf16.mxu1 %v20969_v12 }
 0x133   : > { %10471 = vrot.lane.b32.xlu1 %v10418_v26, %s21011_s26 }
 0x134   : > { %v1176_v18 = vpack.c.bf16 %v1150_v2, %v1149_v9  ;;  %v10552_v9 = vsel %vm10550_vm3, %v10551_v63, 0 }
 0x135   : > { %v948_v29 = vpop.permute.xlu1 %947  ;;  %13283 = vmatpush3.bf16.msra.mxu1 %v13870_v35  ;;  %v10554_v24 = vand.u32 %v13872_v19, %v10552_v9  ;;  %v10557_v43 = vand.u32 %v13874_v25, %v10552_v9 }
 0x136   : > { %v1030_v42 = vmul.f32 %v14628_v37, %v948_v29  ;;  %13247 = vmatmul.mubr.msk.bf16.gmra.mrb[4].mxu1 %vm1199_vm1, %v1176_v18  ;;  %13284 = vmatprep.subr.bf16.mxu1 %v20969_v12  ;;  %v988_v29 = vpop.permute.xlu0 %987 }
 0x137   : > { %13250 = vmatprep.mubr.msk.bf16.mxu1 %vm14269_vm0, %v20969_v12  ;;  %10559 = vmatprep.subr.bf16.mxu0 %v10557_v43  ;;  %v1040_v26 = vmul.f32 %v14628_v37, %v988_v29 }
 0x138   : > { %v1068_v47 = vadd.f32 %v1030_v42, %v835_v40  ;;  %10560 = vmatpush1.bf16.msra.mxu0 %v10554_v24  ;;  %v1036_v42 = vmul.f32 %v14628_v37, %v972_v32 }
 0x139   : > { %v952_v49 = vpop.permute.xlu1 %951  ;;  %13285 = vmatpush3.bf16.msra.mxu1 %v13871_v36 }
 0x13a   : > { %v1031_v21 = vmul.f32 %v14628_v37, %v952_v49  ;;  %v1113_v15 = vadd.f32 %v14646_v46, %v1068_v47  ;;  %v841_v47 = vmul.f32 %v14633_v38, %v770_v51  ;;  %v10419_v49 = vpack.c.bf16 %v14578_v27, %v14685_v61 }
 0x13c   : > { %v1069_v50 = vadd.f32 %v1031_v21, %v836_v48  ;;  %v1151_v16 = vmax.f32 %v1113_v15, 0.0  ;;  %v14894_v48 = vpop.permute.xlu0 %804  ;;  %10473 = vrot.lane.b32.xlu0 %v10419_v49, %s21011_s26 }
 0x13e   : > { %v1114_v13 = vadd.f32 %v14646_v46, %v1069_v50  ;;  %v755_v14 = vpop.permute.xlu1 %754  ;;  %v1074_v50 = vadd.f32 %v1036_v42, %v841_v47 }
 0x13f   : > { %v838_v8 = vmul.f32 %v14633_v38, %v755_v14 }
 0x140   : > { %v1152_v23 = vmax.f32 %v1114_v13, 0.0  ;;  %v10446_v5 = vpop.permute.xlu0 %10445  ;;  %v1119_v14 = vadd.f32 %v14646_v46, %v1074_v50  ;;  %10477 = vrot.lane.b32.xlu0 %v10421_v56, %s21011_s26  ;;  %v14957_v50 = vld [vmem:[%s14431_s21] sm:$0xff] }
 0x141   : > { %13033 = vmatmul.mubr.msk.bf16.vlgmr.msra.gmra.mrb[40].mxu0 %vm10491_vm4, %v10446_v5 }
 0x142   : > { %v1177_v53 = vpack.c.bf16 %v1152_v23, %v1151_v16  ;;  %10601 = vmatprep.mubr.bf16.mxu0 %v20978_v4  ;;  %v10420_v16 = vpack.c.bf16 %v14700_v52, %v14584_v28  ;;  %v1157_v51 = vmax.f32 %v1119_v14, 0.0  ;;  %v844_v28 = vmul.f32 %v14633_v38, %v14867_v22 }
 0x143   : > { %v960_v54 = vpop.permute.xlu1 %959 }
 0x144   : > { %v1033_v11 = vmul.f32 %v14628_v37, %v960_v54  ;;  %13251 = vmatmul.mubr.msk.bf16.gmra.mrb[8].mxu1 %vm1199_vm1, %v1177_v53  ;;  %10475 = vrot.lane.b32.xlu1 %v10420_v16, %s21011_s26 }
 0x145   : > { %13254 = vmatprep.mubr.msk.bf16.mxu1 %vm14269_vm0, %v20969_v12 }
 0x146   : > { %v1071_v57 = vadd.f32 %v1033_v11, %v838_v8 }
 0x148   : > { %v1116_v58 = vadd.f32 %v14646_v46, %v1071_v57  ;;  %v760_v60 = vpop.permute.xlu1 %759 }
 0x149   : > { %v839_v17 = vmul.f32 %v14633_v38, %v760_v60  ;;  %v10422_v60 = vpack.c.bf16 %v14736_v10, %v14603_v31  ;;  %v10423_v31 = vpack.c.bf16 %v14616_v33, %v14756_v55  ;;  %v848_v55 = vmul.f32 %v14633_v38, %v14894_v48 }
 0x14a   : > { %v1154_v62 = vmax.f32 %v1116_v58, 0.0 }
 0x14b   : > { %10479 = vrot.lane.b32.xlu1 %v10422_v60, %s21011_s26  ;;  %10481 = vrot.lane.b32.xlu0 %v10423_v31, %s21011_s26  ;;  %v13877_v31 = vld [vmem:[%s20956_s10 + $0x4] ss:$8 sps:$4 sm:$0xff]   ;;  %s12612_s26 = sshll.u32 %s20817_s25, 4  ;;  %s20900_s26 = int_to_ptr.vmem [resolvable:$true] %s12612_s26 }
 0x14c   : > { %v1178_v45 = vpack.c.bf16 %v1154_v62, %v1153_v59  ;;  %v845_v62 = vmul.f32 %v14633_v38, %v14878_v6  ;;  %10973 = vmatprep.subr.bf16.mxu0 %v13877_v31  ;;  %s14202_s5 = scalar_lea.vmem %s20900_s26, 4864 }
 0x14d   : > { %v964_v1 = vpop.permute.xlu1 %963  ;;  %p14203_p11 = scmp.ne.s32.totalorder %s20900_s26, %s14202_s5 }
 0x14e   : > { %v1034_v35 = vmul.f32 %v14628_v37, %v964_v1  ;;  %13255 = vmatmul.mubr.msk.bf16.gmra.mrb[12].mxu1 %vm1199_vm1, %v1178_v45  ;;  %v1078_v7 = vadd.f32 %v1040_v26, %v845_v62 }
 0x14f   : > { %13258 = vmatprep.mubr.msk.bf16.mxu1 %vm14269_vm0, %v20969_v12  ;;  %p14204_p12 = pnand %p14203_p11, %p14415_p5 }
 0x150   : > { %v1072_v2 = vadd.f32 %v1034_v35, %v839_v17  ;;  %v1123_v10 = vadd.f32 %v14646_v46, %v1078_v7 }
 0x151   : > { %v968_v18 = vpop.permute.xlu1 %967  ;;  %p14205_p13 = pneg %p14204_p12 }
 0x152   : > { %v1035_v36 = vmul.f32 %v14628_v37, %v968_v18  ;;  %v1117_v39 = vadd.f32 %v14646_v46, %v1072_v2  ;;  %v1161_v43 = vmax.f32 %v1123_v10, 0.0 }
 0x154   : > { %v1073_v40 = vadd.f32 %v1035_v36, %v840_v3  ;;  %v1155_v15 = vmax.f32 %v1117_v39, 0.0 }
 0x156   : > { %v1118_v0 = vadd.f32 %v14646_v46, %v1073_v40  ;;  %v775_v21 = vpop.permute.xlu1 %774 }
 0x157   : > { %v842_v61 = vmul.f32 %v14633_v38, %v775_v21 }
 0x158   : > { %v1156_v20 = vmax.f32 %v1118_v0, 0.0 }
 0x15a   : > { %v1179_v32 = vpack.c.bf16 %v1156_v20, %v1155_v15  ;;  %v10450_v48 = vpop.permute.xlu0 %10449 }
 0x15b   : > { %v976_v27 = vpop.permute.xlu1 %975 }
 0x15c   : > { %v1037_v13 = vmul.f32 %v14628_v37, %v976_v27  ;;  %13259 = vmatmul.mubr.msk.bf16.gmra.mrb[16].mxu1 %vm1199_vm1, %v1179_v32 }
 0x15d   : > { %13262 = vmatprep.mubr.msk.bf16.mxu1 %vm14269_vm0, %v20969_v12 }
 0x15e   : > { %v1075_v23 = vadd.f32 %v1037_v13, %v842_v61 }
 0x160   : > { %v1120_v44 = vadd.f32 %v14646_v46, %v1075_v23  ;;  %v780_v53 = vpop.permute.xlu1 %779 }
 0x161   : > { %v843_v34 = vmul.f32 %v14633_v38, %v780_v53 }
 0x162   : > { %v1158_v54 = vmax.f32 %v1120_v44, 0.0 }
 0x164   : > { %v1180_v8 = vpack.c.bf16 %v1158_v54, %v1157_v51  ;;  %v14973_v54 = vld [vmem:[%s14431_s21 + $0x8] sm:$0xff] }
 0x165   : > { %v980_v11 = vpop.permute.xlu1 %979 }
 0x166   : > { %v1038_v57 = vmul.f32 %v14628_v37, %v980_v11  ;;  %13263 = vmatmul.mubr.msk.bf16.gmra.mrb[20].mxu1 %vm1199_vm1, %v1180_v8  ;;  %v1925_v8 = vand.u32 2139095040, %v14973_v54  ;;  %v14977_v11 = vld [vmem:[%s14431_s21 + $0x18] sm:$0xff] }
 0x167   : > { %13266 = vmatprep.mubr.msk.bf16.mxu1 %vm14269_vm0, %v20969_v12  ;;  %v2131_v56 = vand.u32 2139095040, %v14977_v11 }
 0x168   : > { %v1076_v52 = vadd.f32 %v1038_v57, %v843_v34  ;;  %v10454_v26 = vpop.permute.xlu0 %10453 }
 0x169   : > { %v984_v58 = vpop.permute.xlu1 %983  ;;  %v2132_v60 = vshrl.u32 %v2131_v56, 23 }
 0x16a   : > { %v1039_v59 = vmul.f32 %v14628_v37, %v984_v58  ;;  %v1121_v30 = vadd.f32 %v14646_v46, %v1076_v52 }
 0x16c   : > { %v1077_v41 = vadd.f32 %v1039_v59, %v844_v28  ;;  %v1159_v22 = vmax.f32 %v1121_v30, 0.0 }
 0x16e   : > { %v1122_v19 = vadd.f32 %v14646_v46, %v1077_v41  ;;  %v795_v25 = vpop.permute.xlu1 %794  ;;  %v1926_v41 = vshrl.u32 %v1925_v8, 23 }
 0x16f   : > { %v846_v9 = vmul.f32 %v14633_v38, %v795_v25  ;;  %v14988_v25 = vld [vmem:[%s14431_s21 + $0x10] sm:$0xff] }
 0x170   : > { %v1160_v45 = vmax.f32 %v1122_v19, 0.0  ;;  %v12731_v7 = vadd.s32 4294967169, %v1926_v41  ;;  %v20980_v41 = vmov 1326507024  }
 0x172   : > { %v1181_v63 = vpack.c.bf16 %v1160_v45, %v1159_v22  ;;  %v2028_v22 = vand.u32 2139095040, %v14988_v25 }
 0x173   : > { %v992_v1 = vpop.permute.xlu1 %991 }
 0x174   : > { %v1041_v17 = vmul.f32 %v14628_v37, %v992_v1  ;;  %13267 = vmatmul.mubr.msk.bf16.gmra.mrb[24].mxu1 %vm1199_vm1, %v1181_v63  ;;  %v12739_v63 = vadd.s32 4294967169, %v2132_v60  ;;  %v14127_v1 = vld [vmem:[%s14431_s21 + $0x20] sm:$0xff] }
 0x175   : > { %13270 = vmatprep.mubr.msk.bf16.mxu1 %vm14269_vm0, %v20969_v12 }
 0x176   : > { %v1079_v6 = vadd.f32 %v1041_v17, %v846_v9  ;;  %v2234_v9 = vand.u32 2139095040, %v14127_v1  ;;  %v13875_v17 = vld [vmem:[%s20956_s10] ss:$8 sps:$4 sm:$0xff]   ;;  %v10458_v1 = vpop.permute.xlu0 %10457 }
 0x177   : > { %10974 = vmatpush1.bf16.msra.mxu0 %v13875_v17 }
 0x178   : > { %v1124_v35 = vadd.f32 %v14646_v46, %v1079_v6  ;;  %v800_v24 = vpop.permute.xlu1 %799 }
 0x179   : > { %v847_v29 = vmul.f32 %v14633_v38, %v800_v24  ;;  %v1822_v38 = vand.u32 2139095040, %v14957_v50  ;;  %v15003_v24 = vshrl.u32 %v2028_v22, 23  ;;  %v13880_v22 = vld [vmem:[%s20956_s10 + $0x14] ss:$8 sps:$4 sm:$0xff]  }
 0x17a   : > { %v1162_v2 = vmax.f32 %v1124_v35, 0.0  ;;  %10975 = vmatprep.subr.bf16.mxu0 %v13880_v22 }
 0x17b   : > { %v1823_v27 = vshrl.u32 %v1822_v38, 23 }
 0x17c   : > { %v1182_v3 = vpack.c.bf16 %v1162_v2, %v1161_v43  ;;  %v15006_v43 = vld [vmem:[%s14431_s21 + $0x28] sm:$0xff] }
 0x17d   : > { %v996_v18 = vpop.permute.xlu1 %995  ;;  %v12727_v44 = vadd.s32 4294967169, %v1823_v27  ;;  %v2337_v2 = vand.u32 2139095040, %v15006_v43 }
 0x17e   : > { %v1042_v36 = vmul.f32 %v14628_v37, %v996_v18  ;;  %13271 = vmatmul.mubr.msk.bf16.gmra.mrb[28].mxu1 %vm1199_vm1, %v1182_v3  ;;  %v15010_v3 = vld [vmem:[%s14431_s21 + $0x38] sm:$0xff] }
 0x17f   : > { %13274 = vmatprep.mubr.msk.bf16.mxu1 %vm14269_vm0, %v20969_v12  ;;  %v1829_v52 = vadd.s32 1, %v12727_v44  ;;  %v2543_v18 = vand.u32 2139095040, %v15010_v3 }
 0x180   : > { %v1080_v33 = vadd.f32 %v1042_v36, %v847_v29 }
 0x181   : > { %v1000_v39 = vpop.permute.xlu1 %999  ;;  %vm1830_vm6 = vcmp.gt.s32.totalorder %v1829_v52, 0 }
 0x182   : > { %v1043_v40 = vmul.f32 %v14628_v37, %v1000_v39  ;;  %v1125_v42 = vadd.f32 %v14646_v46, %v1080_v33  ;;  %v14963_v37 = vld [vmem:[%s21012_s4] ss:$0 sm:$0xff]  ;;  %v1831_v10 = vsel %vm1830_vm6, %v1829_v52, 0  ;;  %v15014_v33 = vadd.s32 1, %v12731_v7 }
 0x183   : > { %v1833_v35 = vand.u32 31, %v1831_v10  ;;  %v15018_v39 = vshrl.u32 %v2234_v9, 23 }
 0x184   : > { %v1081_v47 = vadd.f32 %v1043_v40, %v848_v55  ;;  %v1163_v21 = vmax.f32 %v1125_v42, 0.0  ;;  %v15016_v55 = vadd.s32 1, %v12739_v63  ;;  %vm1933_vm7 = vcmp.gt.s32.totalorder %v15014_v33, 0 }
 0x185   : > { %v10448_v49 = vpop.permute.xlu1 %10447  ;;  %v1834_v42 = vsub.s32 32, %v1833_v35 }
 0x186   : > { %v1126_v0 = vadd.f32 %v14646_v46, %v1081_v47  ;;  %13034 = vmatmul.mubr.msk.bf16.gmra.mrb[44].mxu0 %vm10491_vm4, %v10448_v49  ;;  %vm2139_vm8 = vcmp.gt.s32.totalorder %v15016_v55, 0 }
 0x187   : > { %10611 = vmatprep.mubr.bf16.mxu0 %v20978_v4  ;;  %v1849_v60 = vshrl.u32 %v20980_v41, %v1834_v42 }
 0x188   : > { %v1164_v15 = vmax.f32 %v1126_v0, 0.0 }
 0x189   : > { %v10452_v51 = vpop.permute.xlu1 %10451 }
 0x18a   : > { %v1183_v20 = vpack.c.bf16 %v1164_v15, %v1163_v21  ;;  %v1819_v21 = vand.u32 2147483647, %v14957_v50 }
 0x18c   : > { %13275 = vmatmul.mubr.msk.bf16.gmra.mrb[32].mxu1 %vm1199_vm1, %v1183_v20  ;;  %v20972_v20 = vmov 2102212464  }
 0x18d   : > { %v1291_v46 = vpop.f32.mrb[0].mxu0  ;;  %13286 = vmatprep.mubr.msk.bf16.mxu1 %vm14269_vm0, %v20969_v12  ;;  %v10456_v15 = vpop.permute.xlu1 %10455  ;;  %v1845_v38 = vshll.u32 %v20972_v20, %v1833_v35  ;;  %v1843_v8 = vshrl.u32 %v20972_v20, %v1834_v42 }
 0x18e   : > { %v1292_v5 = vadd.f32 %v14963_v37, %v1291_v46  ;;  %v13204_v32 = vpop.f32.mrb[1].mxu0  ;;  %13035 = vmatmul.mubr.msk.bf16.gmra.mrb[48].mxu0 %vm10491_vm4, %v10450_v48  ;;  %v1826_v46 = vand.u32 8388607, %v1819_v21 }
 0x18f   : > { %v1294_v61 = vpop.f32.mrb[2].mxu0  ;;  %10621 = vmatprep.mubr.bf16.mxu0 %v20978_v4  ;;  %v20983_v32 = vmov 683565275  }
 0x190   : > { %v1295_v13 = vadd.f32 %v14963_v37, %v1294_v61  ;;  %v13205_v14 = vpop.f32.mrb[3].mxu0  ;;  %v1442_v16 = vmax.f32 %v1292_v5, 0.0  ;;  %v15025_v5 = vshrl.u32 %v1831_v10, 5  ;;  %v1836_v27 = vshll.u32 %v20983_v32, %v1833_v35 }
 0x191   : > { %v20976_v61 = vmov 2475754826   ;;  %v1835_v9 = vshrl.u32 %v20983_v32, %v1834_v42  ;;  %v1922_v10 = vand.u32 2147483647, %v14973_v54  ;;  %v10460_v43 = vpop.permute.xlu1 %10459 }
 0x192   : > { %v1443_v23 = vmax.f32 %v1295_v13, 0.0  ;;  %v1837_v13 = vshrl.u32 %v20976_v61, %v1834_v42  ;;  %v1839_v14 = vshll.u32 %v20976_v61, %v1833_v35  ;;  %vm1851_vm9 = vcmp.lt.s32.totalorder %v15025_v5, 1 }
 0x193   : > { %vm1852_vm10 = vcmp.lt.s32.totalorder %v15025_v5, 2  ;;  %vm1853_vm11 = vcmp.lt.s32.totalorder %v15025_v5, 3  ;;  %vm1854_vm12 = vcmp.lt.s32.totalorder %v15025_v5, 4 }
 0x194   : > { %v1480_v53 = vpack.c.bf16 %v1443_v23, %v1442_v16  ;;  %v20974_v16 = vmov 2131351028   ;;  %v1838_v56 = vor.u32 %v1837_v13, %v1836_v27 }
 0x195   : > { %v1299_v34 = vpop.f32.mrb[4].mxu0  ;;  %v1840_v23 = vshrl.u32 %v20974_v16, %v1834_v42  ;;  %v1842_v44 = vshll.u32 %v20974_v16, %v1833_v35 }
 0x196   : > { %v1300_v57 = vadd.f32 %v14963_v37, %v1299_v34  ;;  %v13208_v28 = vpop.f32.mrb[5].mxu0  ;;  %13287 = vmatmul.mubr.msk.bf16.vlgmr.msra.gmra.mrb[36].mxu1 %vm1538_vm5, %v1480_v53  ;;  %13036 = vmatmul.mubr.msk.bf16.gmra.mrb[52].mxu0 %vm10491_vm4, %v10452_v51  ;;  %v1827_v53 = vor.u32 8388608, %v1826_v46  ;;  %v1929_v46 = vand.u32 8388607, %v1922_v10 }
 0x197   : > { %v1302_v58 = vpop.f32.mrb[6].mxu0  ;;  %13290 = vmatprep.mubr.msk.bf16.mxu1 %vm14269_vm0, %v20969_v12  ;;  %10631 = vmatprep.mubr.bf16.mxu0 %v20978_v4  ;;  %v1841_v34 = vor.u32 %v1840_v23, %v1839_v14 }
 0x198   : > { %v1303_v59 = vadd.f32 %v14963_v37, %v1302_v58  ;;  %v13209_v30 = vpop.f32.mrb[7].mxu0  ;;  %v1444_v62 = vmax.f32 %v1300_v57, 0.0  ;;  %v20981_v57 = vmov 920167782   ;;  %v1844_v58 = vor.u32 %v1843_v8, %v1842_v44 }
 0x199   : > { %v1846_v28 = vshrl.u32 %v20981_v57, %v1834_v42  ;;  %v1848_v52 = vshll.u32 %v20981_v57, %v1833_v35  ;;  %v1867_v7 = vshll.u32 %v1827_v53, 8  ;;  %v1855_v42 = vsel %vm1851_vm9, %v1835_v9, %v1838_v56 }
 0x19a   : > { %v1445_v19 = vmax.f32 %v1303_v59, 0.0  ;;  %v1930_v8 = vor.u32 8388608, %v1929_v46 }
 0x19b   : > { %v1847_v30 = vor.u32 %v1846_v28, %v1845_v38  ;;  %v1850_v17 = vor.u32 %v1849_v60, %v1848_v52  ;;  %v15100_v28 = vld [vmem:[%s14431_s21 + $0x30] sm:$0xff]  ;;  %v1934_v52 = vsel %vm1933_vm7, %v15014_v33, 0 }
 0x19c   : > { %v1481_v45 = vpack.c.bf16 %v1445_v19, %v1444_v62  ;;  %v2440_v5 = vand.u32 2139095040, %v15100_v28  ;;  %v15114_v60 = vshrl.u32 %v1934_v52, 5 }
 0x19d   : > { %v1860_v31 = vsel %vm1854_vm12, %v1847_v30, 920167782 }
 0x19e   : > { %13291 = vmatmul.mubr.msk.bf16.gmra.mrb[40].mxu1 %vm1538_vm5, %v1481_v45  ;;  %13037 = vmatmul.mubr.msk.bf16.gmra.mrb[56].mxu0 %vm10491_vm4, %v10454_v26  ;;  %v13878_v26 = vld [vmem:[%s20956_s10 + $0x10] ss:$8 sps:$4 sm:$0xff]   ;;  %v1859_v45 = vsel %vm1851_vm9, %v1838_v56, %v1841_v34  ;;  %v15093_v56 = vadd.s32 4294967169, %v15003_v24  ;;  %v2140_v24 = vsel %vm2139_vm8, %v15016_v55, 0  ;;  %vm1954_vm14 = vcmp.lt.s32.totalorder %v15114_v60, 1 }
 0x19f   : > { %v1307_v6 = vpop.f32.mrb[8].mxu0  ;;  %13294 = vmatprep.mubr.msk.bf16.mxu1 %vm14269_vm0, %v20969_v12  ;;  %10641 = vmatprep.mubr.bf16.mxu0 %v20978_v4  ;;  %v15118_v33 = vshrl.u32 %v2140_v24, 5  ;;  %vm1955_vm15 = vcmp.lt.s32.totalorder %v15114_v60, 2  ;;  %vm1956_vm1 = vcmp.lt.s32.totalorder %v15114_v60, 3  ;;  %vm1957_vm2 = vcmp.lt.s32.totalorder %v15114_v60, 4 }
 0x1a0   : > { %v1308_v29 = vadd.f32 %v14963_v37, %v1307_v6  ;;  %v13212_v36 = vpop.f32.mrb[9].mxu0  ;;  %10976 = vmatpush1.bf16.msra.mxu0 %v13878_v26 }
 0x1a1   : > { %v1310_v40 = vpop.f32.mrb[10].mxu0  ;;  %v1861_v36 = vsel %vm1853_vm11, %v1844_v58, %v1860_v31  ;;  %vm2160_vm7 = vcmp.lt.s32.totalorder %v15118_v33, 1  ;;  %vm2162_vm8 = vcmp.lt.s32.totalorder %v15118_v33, 3 }
 0x1a2   : > { %v1446_v47 = vmax.f32 %v1308_v29, 0.0  ;;  %v1311_v49 = vadd.f32 %v14963_v37, %v1310_v40  ;;  %v13213_v0 = vpop.f32.mrb[11].mxu0  ;;  %v1856_v29 = vsel %vm1854_vm12, %v1844_v58, 2102212464  ;;  %v1863_v40 = vsel %vm1851_vm9, %v1841_v34, %v1844_v58 }
 0x1a3   : > { %v1864_v0 = vsel %vm1854_vm12, %v1850_v17, 1326507024  ;;  %vm2163_vm9 = vcmp.lt.s32.totalorder %v15118_v33, 4 }
 0x1a4   : > { %v1447_v48 = vmax.f32 %v1311_v49, 0.0  ;;  %v1862_v49 = vsel %vm1852_vm10, %v1859_v45, %v1861_v36 }
 0x1a5   : > { %v15085_v14 = vmul.u32.u64.low %v1867_v7, %v1862_v49  ;;  %v15086_v23 = vmul.u32.u64.high %v1867_v7, %v1862_v49, %v15085_v14 }
 0x1a6   : > { %v1482_v51 = vpack.c.bf16 %v1447_v48, %v1446_v47  ;;  %13038 = vmatmul.mubr.msk.bf16.gmra.mrb[60].mxu0 %vm10491_vm4, %v10456_v15  ;;  %v1857_v47 = vsel %vm1853_vm11, %v1841_v34, %v1856_v29  ;;  %v1865_v48 = vsel %vm1853_vm11, %v1847_v30, %v1864_v0  ;;  %v15097_v34 = vshrl.u32 %v2337_v2, 23 }
 0x1a7   : > { %10651 = vmatprep.mubr.bf16.mxu0 %v20978_v4  ;;  %v1858_v27 = vsel %vm1852_vm10, %v1855_v42, %v1857_v47  ;;  %v1866_v13 = vsel %vm1852_vm10, %v1863_v40, %v1865_v48  ;;  %v2128_v30 = vand.u32 2147483647, %v14977_v11  ;;  %v1877_v2 = vadd.s32 1, %v15086_v23 }
 0x1a8   : > { %13295 = vmatmul.mubr.msk.bf16.gmra.mrb[44].mxu1 %vm1538_vm5, %v1482_v51  ;;  %v15089_v51 = vmul.u32.u64.low %v1867_v7, %v1866_v13  ;;  %v15090_v53 = vmul.u32.u64.high %v1867_v7, %v1866_v13, %v15089_v51  ;;  %v1874_v58 = vmul.u32 %v1867_v7, %v1858_v27  ;;  %v15138_v27 = vand.u32 31, %v2140_v24 }
 0x1a9   : > { %v1315_v59 = vpop.f32.mrb[12].mxu0  ;;  %13298 = vmatprep.mubr.msk.bf16.mxu1 %vm14269_vm0, %v20969_v12  ;;  %vm2161_vm10 = vcmp.lt.s32.totalorder %v15118_v33, 2  ;;  %vm1821_vm11 = vcmp.lt.s32.totalorder %v14957_v50, 0  ;;  %v13886_v33 = vld [vmem:[%s20956_s10 + $0x34] ss:$8 sps:$4 sm:$0xff]  }
 0x1aa   : > { %v1316_v62 = vadd.f32 %v14963_v37, %v1315_v59  ;;  %v13216_v19 = vpop.f32.mrb[13].mxu0  ;;  %v1936_v59 = vand.u32 31, %v1934_v52  ;;  %vm1876_vm13 = vc.u32 %v15090_v53, %v15085_v14 }
 0x1ab   : > { %v1318_v63 = vpop.f32.mrb[14].mxu0  ;;  %v1878_v22 = vsel %vm1876_vm13, %v1877_v2, %v15086_v23  ;;  %vm15302_vm13 = vcmp.le.f32.partialorder %v1819_v21, 0.7853982  ;;  %v13884_v21 = vld [vmem:[%s20956_s10 + $0x30] ss:$8 sps:$4 sm:$0xff]  }
 0x1ac   : > { %v1319_v6 = vadd.f32 %v14963_v37, %v1318_v63  ;;  %v13217_v35 = vpop.f32.mrb[15].mxu0  ;;  %v1448_v15 = vmax.f32 %v1316_v62, 0.0  ;;  %v15116_v62 = vshll.u32 %v1930_v8, 8  ;;  %v1937_v19 = vsub.s32 32, %v1936_v59  ;;  %v10462_v8 = vpop.permute.xlu0 %10461 }
 0x1ad   : > { %v1939_v26 = vshll.u32 %v20983_v32, %v1936_v59  ;;  %v1942_v55 = vshll.u32 %v20976_v61, %v1936_v59  ;;  %v1945_v45 = vshll.u32 %v20974_v16, %v1936_v59  ;;  %v1948_v7 = vshll.u32 %v20972_v20, %v1936_v59 }
 0x1ae   : > { %v1449_v38 = vmax.f32 %v1319_v6, 0.0  ;;  %13039 = vmatmul.mubr.msk.bf16.gmra.mrb[64].mxu0 %vm10491_vm4, %v10458_v1  ;;  %v1951_v63 = vshll.u32 %v20981_v57, %v1936_v59  ;;  %v1879_v1 = vadd.s32 %v1878_v22, %v1874_v58  ;;  %v1938_v9 = vshrl.u32 %v20983_v32, %v1937_v19 }
 0x1af   : > { %10661 = vmatprep.mubr.bf16.mxu0 %v20978_v4  ;;  %v1940_v17 = vshrl.u32 %v20976_v61, %v1937_v19  ;;  %v1943_v31 = vshrl.u32 %v20974_v16, %v1937_v19  ;;  %v1946_v35 = vshrl.u32 %v20972_v20, %v1937_v19  ;;  %v1949_v29 = vshrl.u32 %v20981_v57, %v1937_v19 }
 0x1b0   : > { %v1483_v44 = vpack.c.bf16 %v1449_v38, %v1448_v15  ;;  %v1952_v36 = vshrl.u32 %v20980_v41, %v1937_v19  ;;  %v1880_v47 = vadd.s32 536870912, %v1879_v1 }
 0x1b1   : > { %v1941_v49 = vor.u32 %v1940_v17, %v1939_v26  ;;  %v1944_v0 = vor.u32 %v1943_v31, %v1942_v55  ;;  %v1947_v38 = vor.u32 %v1946_v35, %v1945_v45  ;;  %v1950_v48 = vor.u32 %v1949_v29, %v1948_v7  ;;  %v13883_v29 = vld [vmem:[%s20956_s10 + $0x24] ss:$8 sps:$4 sm:$0xff]  }
 0x1b2   : > { %13299 = vmatmul.mubr.msk.bf16.gmra.mrb[48].mxu1 %vm1538_vm5, %v1483_v44  ;;  %v1953_v46 = vor.u32 %v1952_v36, %v1951_v63  ;;  %v15141_v44 = vshrl.u32 %v1880_v47, 30  ;;  %10977 = vmatprep.subr.bf16.mxu0 %v13883_v29  ;;  %v1875_v29 = vadd.s32 %v15085_v14, %v15090_v53 }
 0x1b3   : > { %13302 = vmatprep.mubr.msk.bf16.mxu1 %vm14269_vm0, %v20969_v12  ;;  %v1958_v52 = vsel %vm1954_vm14, %v1938_v9, %v1941_v49  ;;  %v1962_v58 = vsel %vm1954_vm14, %v1941_v49, %v1944_v0  ;;  %v1963_v2 = vsel %vm1957_vm2, %v1950_v48, 920167782  ;;  %v1966_v55 = vsel %vm1954_vm14, %v1944_v0, %v1947_v38 }
 0x1b4   : > { %v1882_v24 = vshll.u32 %v15141_v44, 30  ;;  %v1964_v26 = vsel %vm1956_vm1, %v1947_v38, %v1963_v2  ;;  %v1967_v22 = vsel %vm1957_vm2, %v1953_v46, 1326507024  ;;  %v15164_v9 = vand.u32 8388607, %v2128_v30 }
 0x1b5   : > { %v1965_v63 = vsel %vm1955_vm15, %v1962_v58, %v1964_v26  ;;  %v1968_v31 = vsel %vm1956_vm1, %v1950_v48, %v1967_v22  ;;  %v2154_v26 = vshll.u32 %v20972_v20, %v15138_v27 }
 0x1b6   : > { %13040 = vmatmul.mubr.msk.bf16.gmra.mrb[68].mxu0 %vm10491_vm4, %v10460_v43  ;;  %v1959_v43 = vsel %vm1957_vm2, %v1947_v38, 2102212464  ;;  %v15158_v7 = vsub.s32 %v1879_v1, %v1882_v24  ;;  %v13881_v1 = vld [vmem:[%s20956_s10 + $0x20] ss:$8 sps:$4 sm:$0xff]   ;;  %v2148_v38 = vshll.u32 %v20976_v61, %v15138_v27  ;;  %vm15379_vm2 = vcmp.le.f32.partialorder %v1922_v10, 0.7853982 }
 0x1b7   : > { %v1323_v6 = vpop.f32.mrb[16].mxu0  ;;  %10671 = vmatprep.mubr.bf16.mxu0 %v20978_v4  ;;  %v1960_v19 = vsel %vm1956_vm1, %v1944_v0, %v1959_v43  ;;  %10978 = vmatpush1.bf16.msra.mxu0 %v13881_v1  ;;  %v2157_v1 = vshll.u32 %v20981_v57, %v15138_v27 }
 0x1b8   : > { %v1324_v40 = vadd.f32 %v14963_v37, %v1323_v6  ;;  %v13220_v42 = vpop.f32.mrb[17].mxu0  ;;  %v1961_v17 = vsel %vm1955_vm15, %v1958_v52, %v1960_v19  ;;  %v15172_v6 = vmul.u32.u64.low %v15116_v62, %v1965_v63  ;;  %v15173_v35 = vmul.u32.u64.high %v15116_v62, %v1965_v63, %v15172_v6  ;;  %10979 = vmatprep.subr.bf16.mxu0 %v13886_v33 }
 0x1b9   : > { %v1326_v15 = vpop.f32.mrb[18].mxu0  ;;  %v1885_v36 = vsub.s32 0, %v15158_v7  ;;  %v15187_v42 = vsub.s32 32, %v15138_v27 }
 0x1ba   : > { %v1327_v13 = vadd.f32 %v14963_v37, %v1326_v15  ;;  %v13221_v23 = vpop.f32.mrb[19].mxu0  ;;  %v1450_v51 = vmax.f32 %v1324_v40, 0.0  ;;  %v1969_v40 = vsel %vm1955_vm15, %v1966_v55, %v1968_v31  ;;  %v2145_v15 = vshll.u32 %v20983_v32, %v15138_v27 }
 0x1bb   : > { %v15192_v49 = vmul.u32.u64.low %v15116_v62, %v1969_v40  ;;  %v15193_v0 = vmul.u32.u64.high %v15116_v62, %v1969_v40, %v15192_v49  ;;  %v12728_v46 = vmin.u32 %v1885_v36, %v15158_v7  ;;  %v2146_v23 = vshrl.u32 %v20976_v61, %v15187_v42  ;;  %10980 = vmatpush1.bf16.msra.mxu0 %v13884_v21 }
 0x1bc   : > { %v1451_v59 = vmax.f32 %v1327_v13, 0.0  ;;  %v1977_v13 = vmul.u32 %v15116_v62, %v1961_v17  ;;  %v1980_v52 = vadd.s32 1, %v15173_v35  ;;  %v2149_v58 = vshrl.u32 %v20974_v16, %v15187_v42 }
 0x1bd   : > { %v2152_v24 = vshrl.u32 %v20972_v20, %v15187_v42  ;;  %v1887_v19 = vclz %v12728_v46  ;;  %vm1979_vm3 = vc.u32 %v15193_v0, %v15172_v6  ;;  %v15216_v55 = vor.u32 %v2146_v23, %v2145_v15  ;;  %v10466_v46 = vpop.permute.xlu0 %10465 }
 0x1be   : > { %v1484_v45 = vpack.c.bf16 %v1451_v59, %v1450_v51  ;;  %13041 = vmatmul.mubr.msk.bf16.gmra.mrb[72].mxu0 %vm10491_vm4, %v10462_v8  ;;  %v10464_v8 = vpop.permute.xlu1 %10463  ;;  %v2151_v59 = vshll.u32 %v20974_v16, %v15138_v27  ;;  %v15218_v22 = vor.u32 %v2149_v58, %v2148_v38  ;;  %v1981_v31 = vsel %vm1979_vm3, %v1980_v52, %v15173_v35 }
 0x1bf   : > { %10681 = vmatprep.mubr.bf16.mxu0 %v20978_v4  ;;  %v12729_v17 = vadd.s32 4294967294, %v1887_v19  ;;  %v1982_v36 = vadd.s32 %v1981_v31, %v1977_v13  ;;  %v2136_v23 = vor.u32 8388608, %v15164_v9  ;;  %v2144_v52 = vshrl.u32 %v20983_v32, %v15187_v42 }
 0x1c0   : > { %13303 = vmatmul.mubr.msk.bf16.gmra.mrb[52].mxu1 %vm1538_vm5, %v1484_v45  ;;  %v2155_v45 = vshrl.u32 %v20981_v57, %v15187_v42  ;;  %v2153_v40 = vor.u32 %v2152_v24, %v2151_v59  ;;  %vm1924_vm3 = vcmp.lt.s32.totalorder %v14973_v54, 0 }
 0x1c1   : > { %v1331_v47 = vpop.f32.mrb[20].mxu0  ;;  %13306 = vmatprep.mubr.msk.bf16.mxu1 %vm14269_vm0, %v20969_v12  ;;  %vm12730_vm6 = vcmp.lt.s32.totalorder %v12729_v17, 0  ;;  %v1983_v35 = vadd.s32 536870912, %v1982_v36 }
 0x1c2   : > { %v1332_v60 = vadd.f32 %v14963_v37, %v1331_v47  ;;  %v13224_v48 = vpop.f32.mrb[21].mxu0  ;;  %v2158_v47 = vshrl.u32 %v20980_v41, %v15187_v42  ;;  %v2156_v15 = vor.u32 %v2155_v45, %v2154_v26  ;;  %v1890_v38 = vsel %vm12730_vm6, 0, %v12729_v17 }
 0x1c3   : > { %v1334_v51 = vpop.f32.mrb[22].mxu0  ;;  %v1891_v27 = vsub.s32 32, %v1890_v38  ;;  %v1892_v14 = vshll.u32 %v15158_v7, %v1890_v38  ;;  %v1895_v53 = vsub.s32 4294967266, %v1890_v38  ;;  %v2544_v48 = vshrl.u32 %v2543_v18, 23 }
 0x1c4   : > { %v1452_v43 = vmax.f32 %v1332_v60, 0.0  ;;  %v1335_v62 = vadd.f32 %v14963_v37, %v1334_v51  ;;  %v13225_v2 = vpop.f32.mrb[23].mxu0  ;;  %v2159_v60 = vor.u32 %v2158_v47, %v2157_v1  ;;  %v15240_v13 = vshrl.u32 %v1983_v35, 30 }
 0x1c5   : > { %v1893_v51 = vshrl.u32 %v1875_v29, %v1891_v27  ;;  %v2168_v7 = vsel %vm2160_vm7, %v15216_v55, %v15218_v22  ;;  %v2169_v3 = vsel %vm2163_vm9, %v2156_v15, 920167782  ;;  %v2172_v58 = vsel %vm2160_vm7, %v15218_v22, %v2153_v40 }
 0x1c6   : > { %v1453_v63 = vmax.f32 %v1335_v62, 0.0  ;;  %13042 = vmatmul.mubr.msk.bf16.gmra.mrb[76].mxu0 %vm10491_vm4, %v10464_v8  ;;  %v1896_v8 = vadd.s32 127, %v1895_v53  ;;  %v1985_v18 = vshll.u32 %v15240_v13, 30  ;;  %v2170_v9 = vsel %vm2162_vm8, %v2153_v40, %v2169_v3  ;;  %v10468_v53 = vpop.permute.xlu1 %10467 }
 0x1c7   : > { %10691 = vmatprep.mubr.bf16.mxu0 %v20978_v4  ;;  %v1894_v59 = vor.u32 %v1893_v51, %v1892_v14  ;;  %v2173_v62 = vsel %vm2163_vm9, %v2159_v60, 1326507024  ;;  %v2171_v19 = vsel %vm2161_vm10, %v2168_v7, %v2170_v9  ;;  %v15270_v45 = vshll.u32 %v2136_v23, 8 }
 0x1c8   : > { %v1485_v49 = vpack.c.bf16 %v1453_v63, %v1452_v43  ;;  %v1897_v24 = vshll.u32 %v1896_v8, 23  ;;  %v2165_v43 = vsel %vm2163_vm9, %v2153_v40, 2102212464  ;;  %v15264_v42 = vsub.s32 %v1982_v36, %v1985_v18 }
 0x1c9   : > { %v2174_v26 = vsel %vm2162_vm8, %v2156_v15, %v2173_v62  ;;  %v1901_v1 = vcvt.s32.f32 %v1894_v59  ;;  %v2035_v40 = vadd.s32 1, %v15093_v56  ;;  %v12743_v15 = vadd.s32 4294967169, %v15018_v39 }
 0x1ca   : > { %13307 = vmatmul.mubr.msk.bf16.gmra.mrb[56].mxu1 %vm1538_vm5, %v1485_v49  ;;  %v1898_v31 = vor.u32 4788187, %v1897_v24  ;;  %v2175_v29 = vsel %vm2161_vm10, %v2172_v58, %v2174_v26  ;;  %v1988_v47 = vsub.s32 0, %v15264_v42  ;;  %v2164_v14 = vsel %vm2160_vm7, %v2144_v52, %v15216_v55 }
 0x1cb   : > { %13310 = vmatprep.mubr.msk.bf16.mxu1 %vm14269_vm0, %v20969_v12  ;;  %v15278_v49 = vmul.u32.u64.low %v15270_v45, %v2175_v29  ;;  %v15279_v38 = vmul.u32.u64.high %v15270_v45, %v2175_v29, %v15278_v49  ;;  %v15291_v23 = vmul.u32.u64.low %v15270_v45, %v2171_v19  ;;  %v15292_v51 = vmul.u32.u64.high %v15270_v45, %v2171_v19, %v15291_v23 }
 0x1cc   : > { %v1899_v27 = vand.u32 2147483647, %v1898_v31  ;;  %v12732_v56 = vmin.u32 %v1988_v47, %v15264_v42  ;;  %v12747_v39 = vadd.s32 4294967169, %v15097_v34  ;;  %v2441_v55 = vshrl.u32 %v2440_v5, 23 }
 0x1cd   : > { %vm2036_vm12 = vcmp.gt.s32.totalorder %v2035_v40, 0  ;;  %v12755_v58 = vadd.s32 4294967169, %v2544_v48  ;;  %vm2185_vm14 = vc.u32 %v15279_v38, %v15291_v23  ;;  %v2186_v5 = vadd.s32 1, %v15292_v51 }
 0x1ce   : > { %13043 = vmatmul.mubr.msk.bf16.gmra.mrb[80].mxu0 %vm10491_vm4, %v10466_v46  ;;  %v2166_v46 = vsel %vm2162_vm8, %v15218_v22, %v2165_v43  ;;  %v1902_v3 = vmul.f32 %v1901_v1, %v1899_v27  ;;  %v1990_v18 = vclz %v12732_v56  ;;  %v15312_v59 = vadd.s32 1, %v12743_v15 }
 0x1cf   : > { %v1339_v2 = vpop.f32.mrb[24].mxu0  ;;  %10701 = vmatprep.mubr.bf16.mxu0 %v20978_v4  ;;  %v2167_v9 = vsel %vm2161_vm10, %v2164_v14, %v2166_v46  ;;  %v2037_v24 = vsel %vm2036_vm12, %v2035_v40, 0  ;;  %v2187_v31 = vsel %vm2185_vm14, %v2186_v5, %v15292_v51  ;;  %v15337_v1 = vadd.s32 1, %v12747_v39  ;;  %v10470_v40 = vpop.permute.xlu0 %10469 }
 0x1d0   : > { %v1340_v63 = vadd.f32 %v14963_v37, %v1339_v2  ;;  %v13228_v17 = vpop.f32.mrb[25].mxu0  ;;  %v1903_v34 = vxor.u32 2147483648, %v1902_v3  ;;  %v12733_v28 = vadd.s32 4294967294, %v1990_v18  ;;  %v1978_v2 = vadd.s32 %v15172_v6, %v15193_v0  ;;  %v13889_v18 = vld [vmem:[%s20956_s10 + $0x44] ss:$8 sps:$4 sm:$0xff]  }
 0x1d1   : > { %v1342_v36 = vpop.f32.mrb[26].mxu0  ;;  %v2183_v19 = vmul.u32 %v15270_v45, %v2167_v9  ;;  %v1905_v6 = vsub.s32 4, %v15141_v44  ;;  %v2025_v15 = vand.u32 2147483647, %v14988_v25  ;;  %v15346_v14 = vand.u32 31, %v2037_v24  ;;  %10981 = vmatprep.subr.bf16.mxu0 %v13889_v18 }
 0x1d2   : > { %v1343_v35 = vadd.f32 %v14963_v37, %v1342_v36  ;;  %v13229_v60 = vpop.f32.mrb[27].mxu0  ;;  %v1454_v8 = vmax.f32 %v1340_v63, 0.0  ;;  %v1904_v48 = vsel %vm1821_vm11, %v1903_v34, %v1902_v3  ;;  %vm12734_vm15 = vcmp.lt.s32.totalorder %v12733_v28, 0 }
 0x1d3   : > { %v1907_v62 = vsel %vm15302_vm13, %v14957_v50, %v1904_v48  ;;  %v1993_v17 = vsel %vm12734_vm15, 0, %v12733_v28  ;;  %v2188_v27 = vadd.s32 %v2187_v31, %v2183_v19  ;;  %v15359_v34 = vshrl.u32 %v2037_v24, 5  ;;  %v10472_v48 = vpop.permute.xlu1 %10471  ;;  %v13890_v31 = vld [vmem:[%s20956_s10 + $0x50] ss:$8 sps:$4 sm:$0xff]  }
 0x1d4   : > { %v1455_v7 = vmax.f32 %v1343_v35, 0.0  ;;  %13971 = vcosq.f32 %v1907_v62  ;;  %v1994_v0 = vsub.s32 32, %v1993_v17  ;;  %v1995_v47 = vshll.u32 %v15264_v42, %v1993_v17 }
 0x1d5   : > { %13973 = vsinq.f32 %v1907_v62  ;;  %v1998_v49 = vsub.s32 4294967266, %v1993_v17  ;;  %v1906_v35 = vsel %vm1821_vm11, %v1905_v6, %v15141_v44  ;;  %v15351_v42 = vadd.s32 4294967169, %v2441_v55  ;;  %v13887_v55 = vld [vmem:[%s20956_s10 + $0x40] ss:$8 sps:$4 sm:$0xff]  }
 0x1d6   : > { %v1486_v52 = vpack.c.bf16 %v1455_v7, %v1454_v8  ;;  %13044 = vmatmul.mubr.msk.bf16.gmra.mrb[84].mxu0 %vm10491_vm4, %v10468_v53  ;;  %v1996_v60 = vshrl.u32 %v1978_v2, %v1994_v0  ;;  %v1908_v46 = vsel %vm15302_vm13, 0, %v1906_v35  ;;  %v2189_v7 = vadd.s32 536870912, %v2188_v27  ;;  %v13892_v2 = vld [vmem:[%s20956_s10 + $0x54] ss:$8 sps:$4 sm:$0xff]  }
 0x1d7   : > { %10711 = vmatprep.mubr.bf16.mxu0 %v20978_v4  ;;  %v1999_v51 = vadd.s32 127, %v1998_v49  ;;  %v1912_v39 = vand.u32 3, %v1908_v46  ;;  %v15354_v44 = vadd.s32 1, %v12755_v58  ;;  %v5826_v22 = vadd.s32 3, %v1908_v46  ;;  %10982 = vmatpush1.bf16.msra.mxu0 %v13887_v55 }
 0x1d8   : > { %13311 = vmatmul.mubr.msk.bf16.gmra.mrb[60].mxu1 %vm1538_vm5, %v1486_v52  ;;  %v1997_v8 = vor.u32 %v1996_v60, %v1995_v47  ;;  %v15366_v9 = vand.u32 8388607, %v2025_v15  ;;  %v15369_v58 = vsub.s32 32, %v15346_v14  ;;  %v2008_v21 = vsub.s32 4, %v15240_v13  ;;  %10983 = vmatprep.subr.bf16.mxu0 %v13892_v2 }
 0x1d9   : > { %v1347_v43 = vpop.f32.mrb[28].mxu0  ;;  %13314 = vmatprep.mubr.msk.bf16.mxu1 %vm14269_vm0, %v20969_v12  ;;  %v2000_v52 = vshll.u32 %v1999_v51, 23  ;;  %v15373_v33 = vshrl.u32 %v2189_v7, 30  ;;  %vm1914_vm1 = vcmp.eq.s32.totalorder %v1912_v39, 0  ;;  %v5827_v24 = vand.u32 3, %v5826_v22 }
 0x1da   : > { %v1348_v26 = vadd.f32 %v14963_v37, %v1347_v43  ;;  %v13232_v63 = vpop.f32.mrb[29].mxu0  ;;  %v2004_v5 = vcvt.s32.f32 %v1997_v8  ;;  %vm1917_vm6 = vcmp.eq.s32.totalorder %v1912_v39, 2  ;;  %vm1913_vm7 = vcmp.lt.s32.totalorder %v1912_v39, 2 }
 0x1db   : > { %v1350_v29 = vpop.f32.mrb[30].mxu0  ;;  %v2001_v28 = vor.u32 4788187, %v2000_v52  ;;  %v2191_v63 = vshll.u32 %v15373_v33, 30  ;;  %vm5829_vm8 = vcmp.eq.s32.totalorder %v5827_v24, 0  ;;  %vm5832_vm9 = vcmp.eq.s32.totalorder %v5827_v24, 2  ;;  %10984 = vmatpush1.bf16.msra.mxu0 %v13890_v31 }
 0x1dc   : > { %v1351_v45 = vadd.f32 %v14963_v37, %v1350_v29  ;;  %v13233_v36 = vpop.f32.mrb[31].mxu0  ;;  %v1456_v53 = vmax.f32 %v1348_v26, 0.0  ;;  %v2009_v26 = vsel %vm1924_vm3, %v2008_v21, %v15240_v13  ;;  %vm5828_vm10 = vcmp.lt.s32.totalorder %v5827_v24, 2 }
 0x1dd   : > { %v2002_v19 = vand.u32 2147483647, %v2001_v28  ;;  %v2011_v13 = vsel %vm15379_vm2, 0, %v2009_v26  ;;  %vm1911_vm11 = vweird.f32 %v14957_v50  ;;  %v15400_v36 = vsub.s32 %v2188_v27, %v2191_v63  ;;  %v13893_v27 = vld [vmem:[%s20956_s10 + $0x60] ss:$8 sps:$4 sm:$0xff]  }
 0x1de   : > { %v1457_v56 = vmax.f32 %v1351_v45, 0.0  ;;  %13045 = vmatmul.mubr.msk.bf16.gmra.mrb[88].mxu0 %vm10491_vm4, %v10470_v40  ;;  %v13972_v62 = vpop.eup %13971  ;;  %v5930_v7 = vadd.s32 3, %v2011_v13  ;;  %v2042_v39 = vshll.u32 %v20983_v32, %v15346_v14  ;;  %v2045_v22 = vshll.u32 %v20976_v61, %v15346_v14  ;;  %v13898_v26 = vld [vmem:[%s20956_s10 + $0x74] ss:$8 sps:$4 sm:$0xff]  }
 0x1df   : > { %10721 = vmatprep.mubr.bf16.mxu0 %v20978_v4  ;;  %v13974_v17 = vpop.eup %13973  ;;  %v1918_v10 = vxor.u32 2147483648, %v13972_v62  ;;  %v2005_v40 = vmul.f32 %v2004_v5, %v2002_v19  ;;  %v10474_v5 = vpop.permute.xlu0 %10473  ;;  %v2046_v24 = vshrl.u32 %v20974_v16, %v15369_v58  ;;  %v2184_v50 = vadd.s32 %v15291_v23, %v15279_v38 }
 0x1e0   : > { %v1487_v3 = vpack.c.bf16 %v1457_v56, %v1456_v53  ;;  %v1915_v29 = vxor.u32 2147483648, %v13974_v17  ;;  %v13895_v53 = vld [vmem:[%s20956_s10 + $0x64] ss:$8 sps:$4 sm:$0xff]   ;;  %v2033_v31 = vor.u32 8388608, %v15366_v9  ;;  %vm20968_vm12 = vcmp.lt.s32.totalorder %v14977_v11, 0 }
 0x1e1   : > { %v1919_v0 = vsel %vm1917_vm6, %v1918_v10, %v13974_v17  ;;  %v5834_v45 = vsel %vm5832_vm9, %v1918_v10, %v13974_v17  ;;  %v2006_v56 = vxor.u32 2147483648, %v2005_v40  ;;  %10985 = vmatprep.subr.bf16.mxu0 %v13895_v53  ;;  %v15436_v17 = vand.u32 3, %v5930_v7  ;;  %v13896_v10 = vld [vmem:[%s20956_s10 + $0x70] ss:$8 sps:$4 sm:$0xff]   ;;  %v15556_v9 = vld [vmem:[%s21012_s4] ss:$0 sm:$0xff]  ;;  %s20896_s4 = scalar_lea.hbm %s20964_s18, %s13129_s24 }
 0x1e2   : > { %13315 = vmatmul.mubr.msk.bf16.gmra.mrb[64].mxu1 %vm1538_vm5, %v1487_v3  ;;  %v1916_v35 = vsel %vm1914_vm1, %v13972_v62, %v1915_v29  ;;  %v5831_v60 = vsel %vm5829_vm8, %v13972_v62, %v1915_v29  ;;  %v2194_v3 = vsub.s32 0, %v15400_v36  ;;  %10986 = vmatpush1.bf16.msra.mxu0 %v13893_v27  ;;  %v2041_v38 = vshrl.u32 %v20983_v32, %v15369_v58  ;;  %s14279_s24 = smov [#allocation2]  }
 0x1e3   : > { %13318 = vmatprep.mubr.msk.bf16.mxu1 %vm14269_vm0, %v20969_v12  ;;  %v1920_v51 = vsel %vm1913_vm7, %v1916_v35, %v1919_v0  ;;  %v5835_v8 = vsel %vm5828_vm10, %v5831_v60, %v5834_v45  ;;  %v2007_v21 = vsel %vm1924_vm3, %v2006_v56, %v2005_v40  ;;  %10987 = vmatprep.subr.bf16.mxu0 %v13898_v26  ;;  %vm2057_vm13 = vcmp.lt.s32.totalorder %v15359_v34, 1  ;;  %s14206_s19 = sshll.u32 %s14279_s24, 4  ;;  %s14207_s19 = int_to_ptr.vmem [resolvable:$false] %s14206_s19 }
 0x1e4   : > { %v1921_v55 = vsel %vm1911_vm11, nan, %v1920_v51  ;;  %v5836_v2 = vsel %vm1911_vm11, nan, %v5835_v8  ;;  %v2010_v19 = vsel %vm15379_vm2, %v14973_v54, %v2007_v21  ;;  %v12740_v63 = vmin.u32 %v2194_v3, %v15400_v36  ;;  %v10476_v8 = vpop.permute.xlu1 %10475  ;;  %p14209_p0 = scmp.lt.s32.totalorder %s20900_s26, %s14207_s19 }
 0x1e5   : > { %9688 = vperm.xlu1 %13865, %v1921_v55   ;;  %13975 = vcosq.f32 %v2010_v19  ;;  %v2048_v40 = vshll.u32 %v20974_v16, %v15346_v14  ;;  %v2049_v23 = vshrl.u32 %v20972_v20, %v15369_v58  ;;  %v15456_v45 = vand.u32 3, %v2011_v13 }
 0x1e6   : > { %13046 = vmatmul.mubr.msk.bf16.gmra.mrb[92].mxu0 %vm10491_vm4, %v10472_v48  ;;  %v2043_v48 = vshrl.u32 %v20976_v61, %v15369_v58  ;;  %13977 = vsinq.f32 %v2010_v19  ;;  %v2196_v29 = vclz %v12740_v63  ;;  %vm5932_vm14 = vcmp.lt.s32.totalorder %v15436_v17, 2 }
 0x1e7   : > { %v1355_v6 = vpop.f32.mrb[32].mxu0  ;;  %10731 = vmatprep.mubr.bf16.mxu0 %v20978_v4  ;;  %10988 = vmatpush1.bf16.msra.mxu0 %v13896_v10  ;;  %vm5933_vm15 = vcmp.eq.s32.totalorder %v15436_v17, 0  ;;  %v2051_v60 = vshll.u32 %v20972_v20, %v15346_v14  ;;  %v2052_v53 = vshrl.u32 %v20981_v57, %v15369_v58  ;;  %vm2014_vm1 = vweird.f32 %v14973_v54 }
 0x1e8   : > { %v1356_v47 = vadd.f32 %v14963_v37, %v1355_v6  ;;  %v13236_v49 = vpop.f32.mrb[33].mxu0  ;;  %v2214_v6 = vsub.s32 4, %v15373_v33  ;;  %v12741_v0 = vadd.s32 4294967294, %v2196_v29  ;;  %13362 = vmatprep.subr.bf16.mxu0 %v20969_v12  ;;  %vm5936_vm2 = vcmp.eq.s32.totalorder %v15436_v17, 2 }
 0x1e9   : > { %v1358_v46 = vpop.f32.mrb[34].mxu0  ;;  %9966 = vperm.xlu1 %13865, %v5836_v2   ;;  %v15458_v49 = vor.u32 %v2046_v24, %v2045_v22  ;;  %v2050_v3 = vor.u32 %v2049_v23, %v2048_v40  ;;  %vm2345_vm6 = vcmp.gt.s32.totalorder %v15337_v1, 0  ;;  %vm2017_vm7 = vcmp.eq.s32.totalorder %v15456_v45, 0 }
 0x1ea   : > { %v1359_v18 = vadd.f32 %v14963_v37, %v1358_v46  ;;  %v13237_v52 = vpop.f32.mrb[35].mxu0  ;;  %v1458_v28 = vmax.f32 %v1356_v47, 0.0  ;;  %v2044_v47 = vor.u32 %v2043_v48, %v2042_v39  ;;  %vm12742_vm3 = vcmp.lt.s32.totalorder %v12741_v0, 0 }
 0x1eb   : > { %v15474_v46 = vshll.u32 %v20981_v57, %v15346_v14  ;;  %v2199_v27 = vsel %vm12742_vm3, 0, %v12741_v0  ;;  %v2215_v7 = vsel %vm20968_vm12, %v2214_v6, %v15373_v33  ;;  %vm15487_vm8 = vcmp.le.f32.partialorder %v2128_v30, 0.7853982 }
 0x1ec   : > { %v1459_v62 = vmax.f32 %v1359_v18, 0.0  ;;  %v2055_v18 = vshrl.u32 %v20980_v41, %v15369_v58  ;;  %v2200_v39 = vsub.s32 32, %v2199_v27  ;;  %v2201_v14 = vshll.u32 %v15400_v36, %v2199_v27 }
 0x1ed   : > { %v2204_v33 = vsub.s32 4294967266, %v2199_v27  ;;  %vm2016_vm9 = vcmp.lt.s32.totalorder %v15456_v45, 2  ;;  %vm2020_vm10 = vcmp.eq.s32.totalorder %v15456_v45, 2  ;;  %v2053_v58 = vor.u32 %v2052_v53, %v2051_v60  ;;  %v14131_v27 = vld [vmem:[%s14431_s21 + $0x40] sm:$0xff] }
 0x1ee   : > { %v1488_v43 = vpack.c.bf16 %v1459_v62, %v1458_v28  ;;  %13047 = vmatmul.mubr.msk.bf16.gmra.mrb[96].mxu0 %vm10491_vm4, %v10474_v5  ;;  %v2202_v5 = vshrl.u32 %v2184_v50, %v2200_v39  ;;  %v2056_v36 = vor.u32 %v2055_v18, %v15474_v46  ;;  %vm2058_vm11 = vcmp.lt.s32.totalorder %v15359_v34, 2 }
 0x1ef   : > { %10741 = vmatprep.mubr.bf16.mxu0 %v20978_v4  ;;  %v13976_v21 = vpop.eup %13975  ;;  %v2205_v30 = vadd.s32 127, %v2204_v33  ;;  %vm2059_vm3 = vcmp.lt.s32.totalorder %v15359_v34, 3  ;;  %vm2060_vm12 = vcmp.lt.s32.totalorder %v15359_v34, 4  ;;  %v2061_v10 = vsel %vm2057_vm13, %v2041_v38, %v2044_v47  ;;  %v10478_v38 = vpop.permute.xlu0 %10477 }
 0x1f0   : > { %13319 = vmatmul.mubr.msk.bf16.gmra.mrb[68].mxu1 %vm1538_vm5, %v1488_v43  ;;  %v13978_v48 = vpop.eup %13977  ;;  %v2021_v62 = vxor.u32 2147483648, %v13976_v21  ;;  %v2203_v2 = vor.u32 %v2202_v5, %v2201_v14  ;;  %v2062_v19 = vsel %vm2060_vm12, %v2050_v3, 2102212464  ;;  %v2065_v6 = vsel %vm2057_vm13, %v2044_v47, %v15458_v49 }
 0x1f1   : > { %v1363_v35 = vpop.f32.mrb[36].mxu0  ;;  %13322 = vmatprep.mubr.msk.bf16.mxu1 %vm14269_vm0, %v20969_v12  ;;  %v2018_v26 = vxor.u32 2147483648, %v13978_v48  ;;  %v2206_v63 = vshll.u32 %v2205_v30, 23  ;;  %v2063_v50 = vsel %vm2059_vm3, %v15458_v49, %v2062_v19  ;;  %v2066_v60 = vsel %vm2060_vm12, %v2053_v58, 920167782  ;;  %v10480_v19 = vpop.permute.xlu1 %10479 }
 0x1f2   : > { %v1364_v13 = vadd.f32 %v14963_v37, %v1363_v35  ;;  %v13240_v56 = vpop.f32.mrb[37].mxu0  ;;  %v5938_v43 = vsel %vm5936_vm2, %v2021_v62, %v13978_v48  ;;  %v2210_v29 = vcvt.s32.f32 %v2203_v2  ;;  %v2022_v40 = vsel %vm2020_vm10, %v2021_v62, %v13978_v48  ;;  %v15574_v48 = vld [vmem:[%s14431_s21 + $0x50] sm:$0xff] }
 0x1f3   : > { %v1366_v51 = vpop.f32.mrb[38].mxu0  ;;  %v5935_v23 = vsel %vm5933_vm15, %v13976_v21, %v2018_v26  ;;  %v2207_v0 = vor.u32 4788187, %v2206_v63  ;;  %v2019_v35 = vsel %vm2017_vm7, %v13976_v21, %v2018_v26  ;;  %v2069_v56 = vsel %vm2057_vm13, %v15458_v49, %v2050_v3 }
 0x1f4   : > { %v1367_v52 = vadd.f32 %v14963_v37, %v1366_v51  ;;  %v13241_v55 = vpop.f32.mrb[39].mxu0  ;;  %v1460_v28 = vmax.f32 %v1364_v13, 0.0  ;;  %v5939_v53 = vsel %vm5932_vm14, %v5935_v23, %v5938_v43  ;;  %v2023_v47 = vsel %vm2016_vm9, %v2019_v35, %v2022_v40 }
 0x1f5   : > { %v2067_v13 = vsel %vm2059_vm3, %v2050_v3, %v2066_v60  ;;  %v5940_v46 = vsel %vm2014_vm1, nan, %v5939_v53  ;;  %v2208_v51 = vand.u32 2147483647, %v2207_v0  ;;  %v2646_v45 = vand.u32 2139095040, %v14131_v27  ;;  %v15601_v53 = vld [vmem:[%s14431_s21 + $0x28] sm:$0xff] }
 0x1f6   : > { %v1461_v37 = vmax.f32 %v1367_v52, 0.0  ;;  %13048 = vmatmul.mubr.msk.bf16.gmra.mrb[100].mxu0 %vm10491_vm4, %v10476_v8  ;;  %v2024_v8 = vsel %vm2014_vm1, nan, %v2023_v47  ;;  %v2068_v17 = vsel %vm2058_vm11, %v2065_v6, %v2067_v13  ;;  %9971 = vperm.xlu1 %13865, %v5940_v46   ;;  %v2217_v18 = vsel %vm15487_vm8, 0, %v2215_v7 }
 0x1f7   : > { %10751 = vmatprep.mubr.bf16.mxu0 %v20978_v4  ;;  %v2070_v49 = vsel %vm2060_vm12, %v2056_v36, 1326507024  ;;  %v2073_v3 = vshll.u32 %v2033_v31, 8  ;;  %v2211_v54 = vmul.f32 %v2210_v29, %v2208_v51  ;;  %9693 = vperm.xlu0 %13866, %v2024_v8   ;;  %v2064_v55 = vsel %vm2058_vm11, %v2061_v10, %v2063_v50  ;;  %v15583_v29 = vld [vmem:[%s14431_s21 + $0x18] sm:$0xff] }
 0x1f8   : > { %v1489_v24 = vpack.c.bf16 %v1461_v37, %v1460_v28  ;;  %v2071_v39 = vsel %vm2059_vm3, %v2053_v58, %v2070_v49  ;;  %v2346_v7 = vsel %vm2345_vm6, %v15337_v1, 0  ;;  %v15566_v58 = vadd.s32 1, %v15351_v42 }
 0x1f9   : > { %v2072_v33 = vsel %vm2058_vm11, %v2069_v56, %v2071_v39  ;;  %v15561_v28 = vmul.u32.u64.low %v2073_v3, %v2068_v17  ;;  %v15562_v37 = vmul.u32.u64.high %v2073_v3, %v2068_v17, %v15561_v28  ;;  %v2212_v1 = vxor.u32 2147483648, %v2211_v54 }
 0x1fa   : > { %13323 = vmatmul.mubr.msk.bf16.gmra.mrb[72].mxu1 %vm1538_vm5, %v1489_v24  ;;  %v15568_v36 = vmul.u32.u64.low %v2073_v3, %v2072_v33  ;;  %v15569_v21 = vmul.u32.u64.high %v2073_v3, %v2072_v33, %v15568_v36  ;;  %v15571_v30 = vshrl.u32 %v2646_v45, 23  ;;  %v2852_v34 = vand.u32 2139095040, %v15574_v48 }
 0x1fb   : > { %13326 = vmatprep.mubr.msk.bf16.mxu1 %vm14269_vm0, %v20969_v12  ;;  %v6138_v2 = vadd.s32 3, %v2217_v18  ;;  %vm21019_vm12 = vcmp.lt.s32.totalorder %v14977_v11, 0  ;;  %v15580_v26 = vand.u32 3, %v2217_v18  ;;  %v2080_v63 = vmul.u32 %v2073_v3, %v2064_v55 }
 0x1fc   : > { %v2213_v42 = vsel %vm21019_vm12, %v2212_v1, %v2211_v54  ;;  %v2348_v10 = vand.u32 31, %v2346_v7  ;;  %v2083_v6 = vadd.s32 1, %v15562_v37  ;;  %vm2082_vm13 = vc.u32 %v15569_v21, %v15561_v28 }
 0x1fd   : > { %v2216_v40 = vsel %vm15487_vm8, %v15583_v29, %v2213_v42  ;;  %v15596_v35 = vand.u32 3, %v6138_v2  ;;  %v2334_v47 = vand.u32 2147483647, %v15601_v53  ;;  %v15604_v13 = vshrl.u32 %v2346_v7, 5 }
 0x1fe   : > { %13049 = vmatmul.mubr.msk.bf16.gmra.mrb[104].mxu0 %vm10491_vm4, %v10478_v38  ;;  %v15590_v38 = vld [vmem:[%s14431_s21 + $0x48] sm:$0xff]  ;;  %13979 = vcosq.f32 %v2216_v40  ;;  %v2349_v23 = vsub.s32 32, %v2348_v10  ;;  %v2084_v22 = vsel %vm2082_vm13, %v2083_v6, %v15562_v37  ;;  %v2351_v56 = vshll.u32 %v20983_v32, %v2348_v10 }
 0x1ff   : > { %v1371_v52 = vpop.f32.mrb[0].mxu1  ;;  %10761 = vmatprep.mubr.bf16.mxu0 %v20978_v4  ;;  %v2749_v11 = vand.u32 2139095040, %v15590_v38  ;;  %13981 = vsinq.f32 %v2216_v40  ;;  %v2085_v60 = vadd.s32 %v2084_v22, %v2080_v63  ;;  %vm2223_vm14 = vcmp.eq.s32.totalorder %v15580_v26, 0 }
 0x200   : > { %v1372_v31 = vadd.f32 %v15556_v9, %v1371_v52  ;;  %v13244_v14 = vpop.f32.mrb[1].mxu1  ;;  %v2352_v46 = vshrl.u32 %v20976_v61, %v2349_v23  ;;  %v2354_v51 = vshll.u32 %v20976_v61, %v2348_v10  ;;  %v2355_v8 = vshrl.u32 %v20974_v16, %v2349_v23 }
 0x201   : > { %v1374_v5 = vpop.f32.mrb[2].mxu1  ;;  %v2360_v17 = vshll.u32 %v20972_v20, %v2348_v10  ;;  %vm2222_vm15 = vcmp.lt.s32.totalorder %v15580_v26, 2  ;;  %v2086_v45 = vadd.s32 536870912, %v2085_v60  ;;  %v2357_v18 = vshll.u32 %v20974_v16, %v2348_v10 }
 0x202   : > { %v1375_v24 = vadd.f32 %v15556_v9, %v1374_v5  ;;  %v13245_v62 = vpop.f32.mrb[3].mxu1  ;;  %v1462_v50 = vmax.f32 %v1372_v31, 0.0  ;;  %v2358_v49 = vshrl.u32 %v20972_v20, %v2349_v23  ;;  %v2361_v3 = vshrl.u32 %v20981_v57, %v2349_v23  ;;  %v10482_v31 = vpop.permute.xlu0 %10481 }
 0x203   : > { %vm2220_vm1 = vweird.f32 %v15583_v29  ;;  %vm2226_vm2 = vcmp.eq.s32.totalorder %v15580_v26, 2  ;;  %v2363_v55 = vshll.u32 %v20981_v57, %v2348_v10  ;;  %v2364_v39 = vshrl.u32 %v20980_v41, %v2349_v23 }
 0x204   : > { %v1463_v43 = vmax.f32 %v1375_v24, 0.0  ;;  %vm6140_vm6 = vcmp.lt.s32.totalorder %v15596_v35, 2  ;;  %v15625_v14 = vshrl.u32 %v2086_v45, 30  ;;  %v2341_v33 = vand.u32 8388607, %v2334_v47 }
 0x205   : > { %v2362_v37 = vor.u32 %v2361_v3, %v2360_v17  ;;  %vm6141_vm7 = vcmp.eq.s32.totalorder %v15596_v35, 0  ;;  %vm6144_vm8 = vcmp.eq.s32.totalorder %v15596_v35, 2  ;;  %v2353_v36 = vor.u32 %v2352_v46, %v2351_v56 }
 0x206   : > { %v1490_v0 = vpack.c.bf16 %v1463_v43, %v1462_v50  ;;  %13050 = vmatmul.mubr.msk.bf16.gmra.mrb[108].mxu0 %vm10491_vm4, %v10480_v19  ;;  %v2088_v24 = vshll.u32 %v15625_v14, 30  ;;  %v2356_v62 = vor.u32 %v2355_v8, %v2354_v51  ;;  %v2359_v2 = vor.u32 %v2358_v49, %v2357_v18 }
 0x207   : > { %10771 = vmatprep.mubr.bf16.mxu0 %v20978_v4  ;;  %vm2369_vm9 = vcmp.lt.s32.totalorder %v15604_v13, 4  ;;  %v2365_v63 = vor.u32 %v2364_v39, %v2363_v55  ;;  %vm2366_vm10 = vcmp.lt.s32.totalorder %v15604_v13, 1  ;;  %v2342_v43 = vor.u32 8388608, %v2341_v33 }
 0x208   : > { %13327 = vmatmul.mubr.msk.bf16.gmra.mrb[76].mxu1 %vm1538_vm5, %v1490_v0  ;;  %v13980_v10 = vpop.eup %13979  ;;  %v15637_v50 = vsub.s32 %v2085_v60, %v2088_v24  ;;  %vm2368_vm11 = vcmp.lt.s32.totalorder %v15604_v13, 3  ;;  %v2375_v40 = vsel %vm2369_vm9, %v2362_v37, 920167782  ;;  %v2350_v56 = vshrl.u32 %v20983_v32, %v2349_v23 }
 0x209   : > { %v1379_v27 = vpop.f32.mrb[4].mxu1  ;;  %13330 = vmatprep.mubr.msk.bf16.mxu1 %vm14269_vm0, %v20969_v12  ;;  %v13982_v6 = vpop.eup %13981  ;;  %v2227_v22 = vxor.u32 2147483648, %v13980_v10  ;;  %v2371_v60 = vsel %vm2369_vm9, %v2359_v2, 2102212464  ;;  %v2374_v8 = vsel %vm2366_vm10, %v2353_v36, %v2356_v62  ;;  %v2379_v45 = vsel %vm2369_vm9, %v2365_v63, 1326507024 }
 0x20a   : > { %v1380_v52 = vadd.f32 %v15556_v9, %v1379_v27  ;;  %v13248_v54 = vpop.f32.mrb[5].mxu1  ;;  %v2224_v46 = vxor.u32 2147483648, %v13982_v6  ;;  %v2091_v51 = vsub.s32 0, %v15637_v50  ;;  %v2376_v27 = vsel %vm2368_vm11, %v2359_v2, %v2375_v40  ;;  %v15695_v63 = vld [vmem:[%s14431_s21 + $0x10] sm:$0xff] }
 0x20b   : > { %v1382_v7 = vpop.f32.mrb[6].mxu1  ;;  %v2228_v17 = vsel %vm2226_vm2, %v2227_v22, %v13982_v6  ;;  %v6146_v23 = vsel %vm6144_vm8, %v2227_v22, %v13982_v6  ;;  %v15668_v54 = vld [vmem:[%s14431_s21 + $0x58] sm:$0xff]  ;;  %v2380_v24 = vsel %vm2368_vm11, %v2362_v37, %v2379_v45  ;;  %v2372_v26 = vsel %vm2368_vm11, %v2356_v62, %v2371_v60 }
 0x20c   : > { %v1383_v5 = vadd.f32 %v15556_v9, %v1382_v7  ;;  %v13249_v1 = vpop.f32.mrb[7].mxu1  ;;  %v1464_v19 = vmax.f32 %v1380_v52, 0.0  ;;  %v2225_v18 = vsel %vm2223_vm14, %v13980_v10, %v2224_v46  ;;  %v6143_v49 = vsel %vm6141_vm7, %v13980_v10, %v2224_v46 }
 0x20d   : > { %v12736_v3 = vmin.u32 %v2091_v51, %v15637_v50  ;;  %v2378_v52 = vsel %vm2366_vm10, %v2356_v62, %v2359_v2  ;;  %v2955_v55 = vand.u32 2139095040, %v15668_v54  ;;  %v2229_v39 = vsel %vm2222_vm15, %v2225_v18, %v2228_v17 }
 0x20e   : > { %v1465_v42 = vmax.f32 %v1383_v5, 0.0  ;;  %13051 = vmatmul.mubr.msk.bf16.gmra.mrb[112].mxu0 %vm10491_vm4, %v10482_v31  ;;  %vm2367_vm4 = vcmp.lt.s32.totalorder %v15604_v13, 2  ;;  %v6147_v7 = vsel %vm6140_vm6, %v6143_v49, %v6146_v23  ;;  %v2111_v31 = vsub.s32 4, %v15625_v14 }
 0x20f   : > { %11005 = vmatprep.mubr.bf16.mxu0 %v20978_v4  ;;  %v2230_v33 = vsel %vm2220_vm1, nan, %v2229_v39  ;;  %v2093_v5 = vclz %v12736_v3  ;;  %v2370_v1 = vsel %vm2366_vm10, %v2350_v56, %v2353_v36  ;;  %v2377_v35 = vsel %vm2367_vm4, %v2374_v8, %v2376_v27  ;;  %v15711_v56 = vld [vmem:[%s14431_s21 + $0x60] sm:$0xff]  ;;  %v15730_v3 = vld [vmem:[%s14431_s21 + $0x68] sm:$0xff] }
 0x210   : > { %v1491_v0 = vpack.c.bf16 %v1465_v42, %v1464_v19  ;;  %9703 = vperm.xlu1 %13865, %v2230_v33   ;;  %v2381_v2 = vsel %vm2367_vm4, %v2378_v52, %v2380_v24  ;;  %v2382_v19 = vshll.u32 %v2342_v43, 8  ;;  %v15690_v42 = vshrl.u32 %v2852_v34, 23  ;;  %v15741_v24 = vld [vmem:[%s14431_s21 + $0x78] sm:$0xff] }
 0x211   : > { %v6148_v37 = vsel %vm2220_vm1, nan, %v6147_v7  ;;  %vm2027_vm3 = vcmp.lt.s32.totalorder %v15695_v63, 0  ;;  %v12737_v62 = vadd.s32 4294967294, %v2093_v5  ;;  %v2081_v6 = vadd.s32 %v15561_v28, %v15569_v21 }
 0x212   : > { %13331 = vmatmul.mubr.msk.bf16.gmra.mrb[80].mxu1 %vm1538_vm5, %v1491_v0  ;;  %v15701_v43 = vmul.u32.u64.low %v2382_v19, %v2381_v2  ;;  %v15702_v0 = vmul.u32.u64.high %v2382_v19, %v2381_v2, %v15701_v43  ;;  %v2373_v34 = vsel %vm2367_vm4, %v2370_v1, %v2372_v26  ;;  %v3058_v46 = vand.u32 2139095040, %v15711_v56 }
 0x213   : > { %13334 = vmatprep.mubr.msk.bf16.mxu1 %vm14269_vm0, %v20969_v12  ;;  %vm12738_vm12 = vcmp.lt.s32.totalorder %v12737_v62, 0  ;;  %v15706_v29 = vmul.u32.u64.low %v2382_v19, %v2377_v35  ;;  %v15707_v22 = vmul.u32.u64.high %v2382_v19, %v2377_v35, %v15706_v29  ;;  %v2112_v21 = vsel %vm2027_vm3, %v2111_v31, %v15625_v14 }
 0x214   : > { %9981 = vperm.xlu1 %13865, %v6148_v37   ;;  %v2096_v28 = vsel %vm12738_vm12, 0, %v12737_v62  ;;  %vm2242_vm13 = vcmp.gt.s32.totalorder %v15312_v59, 0  ;;  %v2389_v45 = vmul.u32 %v2382_v19, %v2373_v34  ;;  %vm15724_vm15 = vcmp.le.f32.partialorder %v2025_v15, 0.7853982 }
 0x215   : > { %v2097_v13 = vsub.s32 32, %v2096_v28  ;;  %v2098_v8 = vshll.u32 %v15637_v50, %v2096_v28  ;;  %v2101_v17 = vsub.s32 4294967266, %v2096_v28  ;;  %vm2391_vm14 = vc.u32 %v15702_v0, %v15706_v29 }
 0x216   : > { %v2392_v50 = vadd.s32 1, %v15707_v22  ;;  %v3161_v52 = vand.u32 2139095040, %v15730_v3  ;;  %v2114_v7 = vsel %vm15724_vm15, 0, %v2112_v21  ;;  %v2243_v31 = vsel %vm2242_vm13, %v15312_v59, 0 }
 0x217   : > { %v1387_v36 = vpop.f32.mrb[8].mxu1  ;;  %v2099_v14 = vshrl.u32 %v2081_v6, %v2097_v13  ;;  %v2102_v49 = vadd.s32 127, %v2101_v17  ;;  %v6034_v5 = vadd.s32 3, %v2114_v7  ;;  %v15738_v1 = vadd.s32 4294967169, %v15571_v30  ;;  %v15757_v6 = vld [vmem:[%s14431_s21 + $0x20] sm:$0xff] }
 0x218   : > { %v1388_v10 = vadd.f32 %v15556_v9, %v1387_v36  ;;  %v13252_v40 = vpop.f32.mrb[9].mxu1  ;;  %v2393_v15 = vsel %vm2391_vm14, %v2392_v50, %v15707_v22  ;;  %v3367_v26 = vand.u32 2139095040, %v15741_v24  ;;  %v2245_v2 = vand.u32 31, %v2243_v31 }
 0x219   : > { %v1390_v48 = vpop.f32.mrb[10].mxu1  ;;  %v2100_v33 = vor.u32 %v2099_v14, %v2098_v8  ;;  %v2103_v25 = vshll.u32 %v2102_v49, 23  ;;  %v2394_v35 = vadd.s32 %v2393_v15, %v2389_v45  ;;  %v15747_v59 = vshrl.u32 %v2749_v11, 23 }
 0x21a   : > { %v1391_v51 = vadd.f32 %v15556_v9, %v1390_v48  ;;  %v13253_v60 = vpop.f32.mrb[11].mxu1  ;;  %v1466_v23 = vmax.f32 %v1388_v10, 0.0  ;;  %v15751_v19 = vshrl.u32 %v2955_v55, 23  ;;  %v2231_v38 = vand.u32 2147483647, %v15757_v6 }
 0x21b   : > { %v2104_v30 = vor.u32 4788187, %v2103_v25  ;;  %v2107_v37 = vcvt.s32.f32 %v2100_v33  ;;  %v2395_v40 = vadd.s32 536870912, %v2394_v35  ;;  %v2246_v11 = vsub.s32 32, %v2245_v2 }
 0x21c   : > { %v1467_v27 = vmax.f32 %v1391_v51, 0.0  ;;  %v15760_v54 = vand.u32 3, %v2114_v7  ;;  %v15762_v55 = vand.u32 3, %v6034_v5  ;;  %v15764_v34 = vshrl.u32 %v2243_v31, 5 }
 0x21d   : > { %v2105_v48 = vand.u32 2147483647, %v2104_v30  ;;  %v2396_v60 = vshrl.u32 %v2395_v40, 30  ;;  %v2248_v28 = vshll.u32 %v20983_v32, %v2245_v2  ;;  %v2251_v21 = vshll.u32 %v20976_v61, %v2245_v2 }
 0x21e   : > { %v1492_v39 = vpack.c.bf16 %v1467_v27, %v1466_v23  ;;  %v2249_v17 = vshrl.u32 %v20976_v61, %v2246_v11  ;;  %v2257_v23 = vshll.u32 %v20972_v20, %v2245_v2  ;;  %vm2336_vm1 = vcmp.lt.s32.totalorder %v15601_v53, 0 }
 0x21f   : > { %v2108_v8 = vmul.f32 %v2107_v37, %v2105_v48  ;;  %v2397_v45 = vshll.u32 %v2396_v60, 30  ;;  %v2252_v14 = vshrl.u32 %v20974_v16, %v2246_v11  ;;  %v2258_v49 = vshrl.u32 %v20981_v57, %v2246_v11 }
 0x220   : > { %13335 = vmatmul.mubr.msk.bf16.gmra.mrb[84].mxu1 %vm1538_vm5, %v1492_v39  ;;  %v2238_v39 = vand.u32 8388607, %v2231_v38  ;;  %v2254_v7 = vshll.u32 %v20974_v16, %v2245_v2  ;;  %v2255_v31 = vshrl.u32 %v20972_v20, %v2246_v11  ;;  %v2247_v15 = vshrl.u32 %v20983_v32, %v2246_v11 }
 0x221   : > { %v1395_v36 = vpop.f32.mrb[12].mxu1  ;;  %13338 = vmatprep.mubr.msk.bf16.mxu1 %vm14269_vm0, %v20969_v12  ;;  %v2109_v50 = vxor.u32 2147483648, %v2108_v8  ;;  %v15778_v25 = vsub.s32 %v2394_v35, %v2397_v45  ;;  %vm2263_vm2 = vcmp.lt.s32.totalorder %v15764_v34, 1  ;;  %v2260_v30 = vshll.u32 %v20981_v57, %v2245_v2 }
 0x222   : > { %v1396_v62 = vadd.f32 %v15556_v9, %v1395_v36  ;;  %v13256_v10 = vpop.f32.mrb[13].mxu1  ;;  %v2250_v36 = vor.u32 %v2249_v17, %v2248_v28  ;;  %v2261_v37 = vshrl.u32 %v20980_v41, %v2246_v11  ;;  %v2259_v40 = vor.u32 %v2258_v49, %v2257_v23 }
 0x223   : > { %v1398_v43 = vpop.f32.mrb[14].mxu1  ;;  %v2110_v5 = vsel %vm2027_vm3, %v2109_v50, %v2108_v8  ;;  %v2400_v35 = vsub.s32 0, %v15778_v25  ;;  %v2253_v10 = vor.u32 %v2252_v14, %v2251_v21  ;;  %v2256_v48 = vor.u32 %v2255_v31, %v2254_v7 }
 0x224   : > { %v1399_v22 = vadd.f32 %v15556_v9, %v1398_v43  ;;  %v13257_v51 = vpop.f32.mrb[15].mxu1  ;;  %v1468_v13 = vmax.f32 %v1396_v62, 0.0  ;;  %v2113_v62 = vsel %vm15724_vm15, %v15695_v63, %v2110_v5  ;;  %v2420_v43 = vsub.s32 4, %v2396_v60 }
 0x225   : > { %13983 = vcosq.f32 %v2113_v62  ;;  %vm2266_vm6 = vcmp.lt.s32.totalorder %v15764_v34, 4  ;;  %vm15796_vm7 = vcmp.le.f32.partialorder %v2334_v47, 0.7853982  ;;  %v12748_v18 = vmin.u32 %v2400_v35, %v15778_v25 }
 0x226   : > { %v1469_v27 = vmax.f32 %v1399_v22, 0.0  ;;  %13985 = vsinq.f32 %v2113_v62  ;;  %v2239_v11 = vor.u32 8388608, %v2238_v39  ;;  %vm2264_vm8 = vcmp.lt.s32.totalorder %v15764_v34, 2 }
 0x227   : > { %v2262_v22 = vor.u32 %v2261_v37, %v2260_v30  ;;  %vm2265_vm9 = vcmp.lt.s32.totalorder %v15764_v34, 3  ;;  %v2267_v51 = vsel %vm2263_vm2, %v2247_v15, %v2250_v36  ;;  %v2268_v28 = vsel %vm2266_vm6, %v2256_v48, 2102212464 }
 0x228   : > { %v1493_v33 = vpack.c.bf16 %v1469_v27, %v1468_v13  ;;  %vm2551_vm10 = vcmp.gt.s32.totalorder %v15354_v44, 0  ;;  %vm2120_vm11 = vcmp.eq.s32.totalorder %v15760_v54, 0  ;;  %v2402_v47 = vclz %v12748_v18 }
 0x229   : > { %v2269_v21 = vsel %vm2265_vm9, %v2253_v10, %v2268_v28  ;;  %v2271_v13 = vsel %vm2263_vm2, %v2250_v36, %v2253_v10  ;;  %v2272_v8 = vsel %vm2266_vm6, %v2259_v40, 920167782  ;;  %vm2119_vm4 = vcmp.lt.s32.totalorder %v15760_v54, 2 }
 0x22a   : > { %13339 = vmatmul.mubr.msk.bf16.gmra.mrb[88].mxu1 %vm1538_vm5, %v1493_v33  ;;  %vm2123_vm3 = vcmp.eq.s32.totalorder %v15760_v54, 2  ;;  %v2390_v23 = vadd.s32 %v15706_v29, %v15702_v0  ;;  %v2421_v27 = vsel %vm2336_vm1, %v2420_v43, %v2396_v60  ;;  %vm6037_vm12 = vcmp.eq.s32.totalorder %v15762_v55, 0 }
 0x22b   : > { %13342 = vmatprep.mubr.msk.bf16.mxu1 %vm14269_vm0, %v20969_v12  ;;  %vm2117_vm13 = vweird.f32 %v15695_v63  ;;  %v12749_v49 = vadd.s32 4294967294, %v2402_v47  ;;  %vm6036_vm14 = vcmp.lt.s32.totalorder %v15762_v55, 2  ;;  %v2273_v50 = vsel %vm2265_vm9, %v2256_v48, %v2272_v8 }
 0x22c   : > { %v2275_v39 = vsel %vm2263_vm2, %v2253_v10, %v2256_v48  ;;  %v15831_v29 = vsel %vm2264_vm8, %v2267_v51, %v2269_v21  ;;  %v2274_v60 = vsel %vm2264_vm8, %v2271_v13, %v2273_v50  ;;  %v2276_v7 = vsel %vm2266_vm6, %v2262_v22, 1326507024 }
 0x22d   : > { %v2279_v31 = vshll.u32 %v2239_v11, 8  ;;  %vm12750_vm15 = vcmp.lt.s32.totalorder %v12749_v49, 0  ;;  %v2277_v36 = vsel %vm2265_vm9, %v2259_v40, %v2276_v7  ;;  %v2423_v22 = vsel %vm15796_vm7, 0, %v2421_v27 }
 0x22e   : > { %v2405_v30 = vsel %vm12750_vm15, 0, %v12749_v49  ;;  %v2278_v37 = vsel %vm2264_vm8, %v2275_v39, %v2277_v36  ;;  %vm6040_vm2 = vcmp.eq.s32.totalorder %v15762_v55, 2  ;;  %v15927_v2 = vadd.s32 4294967169, %v15747_v59 }
 0x22f   : > { %v1403_v17 = vpop.f32.mrb[16].mxu1  ;;  %v15842_v62 = vmul.u32.u64.low %v2279_v31, %v2274_v60  ;;  %v15843_v35 = vmul.u32.u64.high %v2279_v31, %v2274_v60, %v15842_v62  ;;  %v2406_v43 = vsub.s32 32, %v2405_v30  ;;  %v2407_v48 = vshll.u32 %v15778_v25, %v2405_v30  ;;  %v13984_v11 = vpop.eup %13983 }
 0x230   : > { %v1404_v45 = vadd.f32 %v15556_v9, %v1403_v17  ;;  %v13260_v14 = vpop.f32.mrb[17].mxu1  ;;  %v2410_v18 = vsub.s32 4294967266, %v2405_v30  ;;  %v15850_v40 = vmul.u32.u64.low %v2279_v31, %v2278_v37  ;;  %v15851_v51 = vmul.u32.u64.high %v2279_v31, %v2278_v37, %v15850_v40  ;;  %v13986_v34 = vpop.eup %13985 }
 0x231   : > { %v1406_v0 = vpop.f32.mrb[18].mxu1  ;;  %v2124_v47 = vxor.u32 2147483648, %v13984_v11  ;;  %v2408_v21 = vshrl.u32 %v2390_v23, %v2406_v43  ;;  %v2121_v8 = vxor.u32 2147483648, %v13986_v34  ;;  %v6346_v17 = vadd.s32 3, %v2423_v22  ;;  %v15884_v43 = vld [vmem:[%s14431_s21 + $0x70] sm:$0xff] }
 0x232   : > { %v1470_v33 = vmax.f32 %v1404_v45, 0.0  ;;  %v1407_v15 = vadd.f32 %v15556_v9, %v1406_v0  ;;  %v13261_v5 = vpop.f32.mrb[19].mxu1  ;;  %v2411_v13 = vadd.s32 127, %v2410_v18  ;;  %v2286_v45 = vmul.u32 %v2279_v31, %v15831_v29 }
 0x233   : > { %v2289_v25 = vadd.s32 1, %v15843_v35  ;;  %v2125_v27 = vsel %vm2123_vm3, %v2124_v47, %v13986_v34  ;;  %v2409_v14 = vor.u32 %v2408_v21, %v2407_v48  ;;  %v6042_v50 = vsel %vm6040_vm2, %v2124_v47, %v13986_v34 }
 0x234   : > { %v1471_v10 = vmax.f32 %v1407_v15, 0.0  ;;  %v2412_v49 = vshll.u32 %v2411_v13, 23  ;;  %v2122_v23 = vsel %vm2120_vm11, %v13984_v11, %v2121_v8  ;;  %v6039_v0 = vsel %vm6037_vm12, %v13984_v11, %v2121_v8 }
 0x235   : > { %vm2288_vm6 = vc.u32 %v15851_v51, %v15842_v62  ;;  %v2552_v29 = vsel %vm2551_vm10, %v15354_v44, 0  ;;  %v2126_v31 = vsel %vm2119_vm4, %v2122_v23, %v2125_v27  ;;  %v2416_v15 = vcvt.s32.f32 %v2409_v14 }
 0x236   : > { %v1494_v28 = vpack.c.bf16 %v1471_v10, %v1470_v33  ;;  %v2413_v33 = vor.u32 4788187, %v2412_v49  ;;  %v2127_v36 = vsel %vm2117_vm13, nan, %v2126_v31  ;;  %v6043_v30 = vsel %vm6036_vm14, %v6039_v0, %v6042_v50  ;;  %v15880_v10 = vld [vmem:[%s14431_s21 + $0x38] sm:$0xff] }
 0x237   : > { %v2290_v37 = vsel %vm2288_vm6, %v2289_v25, %v15843_v35  ;;  %v2540_v44 = vand.u32 2147483647, %v15880_v10  ;;  %v3264_v54 = vand.u32 2139095040, %v15884_v43  ;;  %9698 = vperm.xlu0 %13866, %v2127_v36   ;;  %v15888_v40 = vand.u32 3, %v2423_v22 }
 0x238   : > { %13343 = vmatmul.mubr.msk.bf16.gmra.mrb[92].mxu1 %vm1538_vm5, %v1494_v28  ;;  %v2414_v11 = vand.u32 2147483647, %v2413_v33  ;;  %v6044_v55 = vsel %vm2117_vm13, nan, %v6043_v30  ;;  %v15892_v34 = vand.u32 3, %v6346_v17  ;;  %v2291_v35 = vadd.s32 %v2290_v37, %v2286_v45 }
 0x239   : > { %v1411_v39 = vpop.f32.mrb[20].mxu1  ;;  %13346 = vmatprep.mubr.msk.bf16.mxu1 %vm14269_vm0, %v20969_v12  ;;  %v2554_v28 = vand.u32 31, %v2552_v29  ;;  %v15894_v8 = vshrl.u32 %v2552_v29, 5  ;;  %v2547_v27 = vand.u32 8388607, %v2540_v44  ;;  %vm2428_vm11 = vcmp.lt.s32.totalorder %v15888_v40, 2 }
 0x23a   : > { %v1412_v60 = vadd.f32 %v15556_v9, %v1411_v39  ;;  %v13264_v7 = vpop.f32.mrb[21].mxu1  ;;  %v2417_v13 = vmul.f32 %v2416_v15, %v2414_v11  ;;  %v2292_v25 = vadd.s32 536870912, %v2291_v35  ;;  %v15924_v11 = vadd.s32 4294967169, %v15690_v42 }
 0x23b   : > { %v1414_v5 = vpop.f32.mrb[22].mxu1  ;;  %v2555_v14 = vsub.s32 32, %v2554_v28  ;;  %v2557_v22 = vshll.u32 %v20983_v32, %v2554_v28  ;;  %9976 = vperm.xlu0 %13866, %v6044_v55   ;;  %v2560_v63 = vshll.u32 %v20976_v61, %v2554_v28  ;;  %v2566_v17 = vshll.u32 %v20972_v20, %v2554_v28 }
 0x23c   : > { %v1415_v48 = vadd.f32 %v15556_v9, %v1414_v5  ;;  %v13265_v18 = vpop.f32.mrb[23].mxu1  ;;  %v1472_v47 = vmax.f32 %v1412_v60, 0.0  ;;  %v2418_v50 = vxor.u32 2147483648, %v2417_v13  ;;  %v15901_v45 = vshrl.u32 %v2292_v25, 30 }
 0x23d   : > { %v2558_v39 = vshrl.u32 %v20976_v61, %v2555_v14  ;;  %v2561_v23 = vshrl.u32 %v20974_v16, %v2555_v14  ;;  %v2563_v0 = vshll.u32 %v20974_v16, %v2554_v28  ;;  %v2564_v60 = vshrl.u32 %v20972_v20, %v2555_v14 }
 0x23e   : > { %v1473_v21 = vmax.f32 %v1415_v48, 0.0  ;;  %v2419_v29 = vsel %vm2336_vm1, %v2418_v50, %v2417_v13  ;;  %v2567_v7 = vshrl.u32 %v20981_v57, %v2555_v14  ;;  %vm2572_vm8 = vcmp.lt.s32.totalorder %v15894_v8, 1 }
 0x23f   : > { %v2422_v31 = vsel %vm15796_vm7, %v15601_v53, %v2419_v29  ;;  %v2294_v33 = vshll.u32 %v15901_v45, 30  ;;  %v2569_v15 = vshll.u32 %v20981_v57, %v2554_v28  ;;  %vm2575_vm9 = vcmp.lt.s32.totalorder %v15894_v8, 4 }
 0x240   : > { %v1495_v49 = vpack.c.bf16 %v1473_v21, %v1472_v47  ;;  %13987 = vcosq.f32 %v2422_v31  ;;  %v2559_v5 = vor.u32 %v2558_v39, %v2557_v22  ;;  %v2562_v36 = vor.u32 %v2561_v23, %v2560_v63 }
 0x241   : > { %v2568_v30 = vor.u32 %v2567_v7, %v2566_v17  ;;  %13989 = vsinq.f32 %v2422_v31  ;;  %v15920_v37 = vsub.s32 %v2291_v35, %v2294_v33  ;;  %v2565_v48 = vor.u32 %v2564_v60, %v2563_v0 }
 0x242   : > { %13347 = vmatmul.mubr.msk.bf16.gmra.mrb[96].mxu1 %vm1538_vm5, %v1495_v49  ;;  %v2570_v18 = vshrl.u32 %v20980_v41, %v2555_v14  ;;  %v15931_v55 = vshrl.u32 %v3058_v46, 23  ;;  %v2548_v28 = vor.u32 8388608, %v2547_v27  ;;  %vm2429_vm1 = vcmp.eq.s32.totalorder %v15888_v40, 0 }
 0x243   : > { %13350 = vmatprep.mubr.msk.bf16.mxu1 %vm14269_vm0, %v20969_v12  ;;  %v2297_v35 = vsub.s32 0, %v15920_v37  ;;  %vm2573_vm7 = vcmp.lt.s32.totalorder %v15894_v8, 2  ;;  %vm2574_vm10 = vcmp.lt.s32.totalorder %v15894_v8, 3  ;;  %v2556_v56 = vshrl.u32 %v20983_v32, %v2555_v14 }
 0x244   : > { %v2571_v21 = vor.u32 %v2570_v18, %v2569_v15  ;;  %v2580_v46 = vsel %vm2572_vm8, %v2559_v5, %v2562_v36  ;;  %v2581_v59 = vsel %vm2575_vm9, %v2568_v30, 920167782  ;;  %vm2426_vm4 = vweird.f32 %v15601_v53 }
 0x245   : > { %vm2432_vm3 = vcmp.eq.s32.totalorder %v15888_v40, 2  ;;  %vm6348_vm12 = vcmp.lt.s32.totalorder %v15892_v34, 2  ;;  %v12744_v27 = vmin.u32 %v2297_v35, %v15920_v37  ;;  %v2584_v22 = vsel %vm2572_vm8, %v2562_v36, %v2565_v48 }
 0x246   : > { %v2577_v50 = vsel %vm2575_vm9, %v2565_v48, 2102212464  ;;  %v2582_v63 = vsel %vm2574_vm10, %v2565_v48, %v2581_v59  ;;  %v2585_v17 = vsel %vm2575_vm9, %v2571_v21, 1326507024  ;;  %v2588_v29 = vshll.u32 %v2548_v28, 8 }
 0x247   : > { %v1419_v47 = vpop.f32.mrb[24].mxu1  ;;  %v2299_v39 = vclz %v12744_v27  ;;  %v2583_v23 = vsel %vm2573_vm7, %v2580_v46, %v2582_v63  ;;  %v2586_v0 = vsel %vm2574_vm10, %v2568_v30, %v2585_v17  ;;  %v2576_v31 = vsel %vm2572_vm8, %v2556_v56, %v2559_v5 }
 0x248   : > { %v1420_v42 = vadd.f32 %v15556_v9, %v1419_v47  ;;  %v13268_v13 = vpop.f32.mrb[25].mxu1  ;;  %v2587_v33 = vsel %vm2573_vm7, %v2584_v22, %v2586_v0  ;;  %v2578_v48 = vsel %vm2574_vm10, %v2562_v36, %v2577_v50  ;;  %vm6352_vm13 = vcmp.eq.s32.totalorder %v15892_v34, 2 }
 0x249   : > { %v1422_v25 = vpop.f32.mrb[26].mxu1  ;;  %v12745_v15 = vadd.s32 4294967294, %v2299_v39  ;;  %v15967_v18 = vmul.u32.u64.low %v2588_v29, %v2587_v33  ;;  %v15968_v47 = vmul.u32.u64.high %v2588_v29, %v2587_v33, %v15967_v18  ;;  %vm6349_vm14 = vcmp.eq.s32.totalorder %v15892_v34, 0 }
 0x24a   : > { %v1423_v14 = vadd.f32 %v15556_v9, %v1422_v25  ;;  %v13269_v49 = vpop.f32.mrb[27].mxu1  ;;  %v1474_v60 = vmax.f32 %v1420_v42, 0.0  ;;  %v13988_v35 = vpop.eup %13987  ;;  %v15971_v30 = vmul.u32.u64.low %v2588_v29, %v2583_v23  ;;  %v15972_v28 = vmul.u32.u64.high %v2588_v29, %v2583_v23, %v15971_v30 }
 0x24b   : > { %v13990_v42 = vpop.eup %13989  ;;  %v2433_v5 = vxor.u32 2147483648, %v13988_v35  ;;  %v2287_v13 = vadd.s32 %v15842_v62, %v15851_v51  ;;  %vm12746_vm15 = vcmp.lt.s32.totalorder %v12745_v15, 0  ;;  %v2317_v46 = vsub.s32 4, %v15901_v45 }
 0x24c   : > { %v1475_v7 = vmax.f32 %v1423_v14, 0.0  ;;  %v2430_v36 = vxor.u32 2147483648, %v13990_v42  ;;  %v2302_v56 = vsel %vm12746_vm15, 0, %v12745_v15  ;;  %v2579_v59 = vsel %vm2573_vm7, %v2576_v31, %v2578_v48 }
 0x24d   : > { %v2434_v27 = vsel %vm2432_vm3, %v2433_v5, %v13990_v42  ;;  %v6354_v22 = vsel %vm6352_vm13, %v2433_v5, %v13990_v42  ;;  %v2303_v14 = vsub.s32 32, %v2302_v56  ;;  %v2304_v62 = vshll.u32 %v15920_v37, %v2302_v56 }
 0x24e   : > { %v1496_v21 = vpack.c.bf16 %v1475_v7, %v1474_v60  ;;  %v2431_v50 = vsel %vm2429_vm1, %v13988_v35, %v2430_v36  ;;  %v6351_v8 = vsel %vm6349_vm14, %v13988_v35, %v2430_v36  ;;  %v2307_v63 = vsub.s32 4294967266, %v2302_v56 }
 0x24f   : > { %v2435_v39 = vsel %vm2428_vm11, %v2431_v50, %v2434_v27  ;;  %v6355_v23 = vsel %vm6348_vm12, %v6351_v8, %v6354_v22  ;;  %vm2233_vm2 = vcmp.lt.s32.totalorder %v15757_v6, 0  ;;  %v2305_v37 = vshrl.u32 %v2287_v13, %v2303_v14 }
 0x250   : > { %13351 = vmatmul.mubr.msk.bf16.gmra.mrb[100].mxu1 %vm1538_vm5, %v1496_v21  ;;  %v2436_v7 = vsel %vm2426_vm4, nan, %v2435_v39  ;;  %v2318_v31 = vsel %vm2233_vm2, %v2317_v46, %v15901_v45  ;;  %v2595_v33 = vmul.u32 %v2588_v29, %v2579_v59  ;;  %v2308_v15 = vadd.s32 127, %v2307_v63 }
 0x251   : > { %v1427_v25 = vpop.f32.mrb[28].mxu1  ;;  %13354 = vmatprep.mubr.msk.bf16.mxu1 %vm14269_vm0, %v20969_v12  ;;  %9713 = vperm.xlu1 %13865, %v2436_v7   ;;  %v2306_v40 = vor.u32 %v2305_v37, %v2304_v62  ;;  %vm2597_vm6 = vc.u32 %v15968_v47, %v15971_v30  ;;  %v2598_v34 = vadd.s32 1, %v15972_v28  ;;  %v6356_v35 = vsel %vm2426_vm4, nan, %v6355_v23 }
 0x252   : > { %v1428_v51 = vadd.f32 %v15556_v9, %v1427_v25  ;;  %v13272_v49 = vpop.f32.mrb[29].mxu1  ;;  %vm16010_vm8 = vcmp.le.f32.partialorder %v2231_v38, 0.7853982  ;;  %v2309_v45 = vshll.u32 %v2308_v15, 23  ;;  %vm2448_vm9 = vcmp.gt.s32.totalorder %v15566_v58, 0  ;;  %v16020_v38 = vld [vmem:[%s14431_s21 + $0x30] sm:$0xff] }
 0x253   : > { %v1430_v17 = vpop.f32.mrb[30].mxu1  ;;  %v2320_v29 = vsel %vm16010_vm8, 0, %v2318_v31  ;;  %v2599_v42 = vsel %vm2597_vm6, %v2598_v34, %v15972_v28  ;;  %v2449_v53 = vsel %vm2448_vm9, %v15566_v58, 0  ;;  %v2313_v46 = vcvt.s32.f32 %v2306_v40 }
 0x254   : > { %v1431_v0 = vadd.f32 %v15556_v9, %v1430_v17  ;;  %v13273_v60 = vpop.f32.mrb[31].mxu1  ;;  %v1476_v48 = vmax.f32 %v1428_v51, 0.0  ;;  %v2600_v13 = vadd.s32 %v2599_v42, %v2595_v33  ;;  %v6242_v36 = vadd.s32 3, %v2320_v29 }
 0x255   : > { %9991 = vperm.xlu1 %13865, %v6356_v35   ;;  %v2310_v56 = vor.u32 4788187, %v2309_v45  ;;  %v2437_v59 = vand.u32 2147483647, %v16020_v38  ;;  %v2451_v25 = vand.u32 31, %v2449_v53  ;;  %v16024_v27 = vadd.s32 1, %v15738_v1 }
 0x256   : > { %v1477_v18 = vmax.f32 %v1431_v0, 0.0  ;;  %v16028_v28 = vshrl.u32 %v3161_v52, 23  ;;  %v16032_v22 = vshrl.u32 %v3367_v26, 23  ;;  %v2601_v58 = vadd.s32 536870912, %v2600_v13 }
 0x257   : > { %v16036_v14 = vadd.s32 4294967169, %v15751_v19  ;;  %v16040_v62 = vshrl.u32 %v3264_v54, 23  ;;  %v2311_v3 = vand.u32 2147483647, %v2310_v56  ;;  %v2452_v52 = vsub.s32 32, %v2451_v25 }
 0x258   : > { %v1497_v5 = vpack.c.bf16 %v1477_v18, %v1476_v48  ;;  %v16045_v1 = vadd.s32 1, %v15924_v11  ;;  %v16048_v24 = vadd.s32 1, %v15927_v2  ;;  %v16051_v26 = vadd.s32 4294967169, %v15931_v55 }
 0x259   : > { %v16053_v19 = vshrl.u32 %v2601_v58, 30  ;;  %v2314_v51 = vmul.f32 %v2313_v46, %v2311_v3  ;;  %v16055_v43 = vand.u32 3, %v2320_v29  ;;  %v16057_v54 = vand.u32 3, %v6242_v36 }
 0x25a   : > { %13355 = vmatmul.mubr.msk.bf16.gmra.mrb[104].mxu1 %vm1538_vm5, %v1497_v5  ;;  %v2444_v49 = vand.u32 8388607, %v2437_v59  ;;  %v2454_v11 = vshll.u32 %v20983_v32, %v2451_v25  ;;  %v2457_v2 = vshll.u32 %v20976_v61, %v2451_v25  ;;  %v2463_v8 = vshll.u32 %v20972_v20, %v2451_v25 }
 0x25b   : > { %13358 = vmatprep.mubr.msk.bf16.mxu1 %vm14269_vm0, %v20969_v12  ;;  %v2603_v50 = vshll.u32 %v16053_v19, 30  ;;  %v2315_v63 = vxor.u32 2147483648, %v2314_v51  ;;  %v2455_v17 = vshrl.u32 %v20976_v61, %v2452_v52  ;;  %v2458_v39 = vshrl.u32 %v20974_v16, %v2452_v52 }
 0x25c   : > { %v2464_v23 = vshrl.u32 %v20981_v57, %v2452_v52  ;;  %v16071_v7 = vshrl.u32 %v2449_v53, 5  ;;  %v2460_v31 = vshll.u32 %v20974_v16, %v2451_v25  ;;  %v2461_v15 = vshrl.u32 %v20972_v20, %v2452_v52 }
 0x25d   : > { %v16069_v60 = vsub.s32 %v2600_v13, %v2603_v50  ;;  %v2316_v40 = vsel %vm2233_vm2, %v2315_v63, %v2314_v51  ;;  %v2466_v34 = vshll.u32 %v20981_v57, %v2451_v25  ;;  %v2467_v48 = vshrl.u32 %v20980_v41, %v2452_v52  ;;  %v16096_v51 = vld [vmem:[%s21026_s6] ss:$0 sm:$0xff] }
 0x25e   : > { %v2319_v45 = vsel %vm16010_vm8, %v15757_v6, %v2316_v40  ;;  %v2445_v42 = vor.u32 8388608, %v2444_v49  ;;  %v2456_v5 = vor.u32 %v2455_v17, %v2454_v11  ;;  %v2459_v13 = vor.u32 %v2458_v39, %v2457_v2 }
 0x25f   : > { %v1435_v55 = vpop.f32.mrb[32].mxu1  ;;  %v2606_v29 = vsub.s32 0, %v16069_v60  ;;  %13991 = vcosq.f32 %v2319_v45  ;;  %v2465_v36 = vor.u32 %v2464_v23, %v2463_v8  ;;  %vm2542_vm1 = vcmp.lt.s32.totalorder %v15880_v10, 0 }
 0x260   : > { %v1436_v37 = vadd.f32 %v15556_v9, %v1435_v55  ;;  %v13276_v0 = vpop.f32.mrb[33].mxu1  ;;  %13993 = vsinq.f32 %v2319_v45  ;;  %vm2329_vm7 = vcmp.eq.s32.totalorder %v16055_v43, 2  ;;  %v2462_v21 = vor.u32 %v2461_v15, %v2460_v31 }
 0x261   : > { %v1438_v33 = vpop.f32.mrb[34].mxu1  ;;  %v12756_v46 = vmin.u32 %v2606_v29, %v16069_v60  ;;  %v2468_v25 = vor.u32 %v2467_v48, %v2466_v34  ;;  %vm2469_vm10 = vcmp.lt.s32.totalorder %v16071_v7, 1  ;;  %vm2326_vm11 = vcmp.eq.s32.totalorder %v16055_v43, 0 }
 0x262   : > { %v1439_v18 = vadd.f32 %v15556_v9, %v1438_v33  ;;  %v13277_v35 = vpop.f32.mrb[35].mxu1  ;;  %v1478_v53 = vmax.f32 %v1436_v37, 0.0  ;;  %v2453_v9 = vshrl.u32 %v20983_v32, %v2452_v52  ;;  %vm6245_vm4 = vcmp.eq.s32.totalorder %v16057_v54, 0 }
 0x263   : > { %v2608_v3 = vclz %v12756_v46  ;;  %vm2471_vm3 = vcmp.lt.s32.totalorder %v16071_v7, 3  ;;  %vm2472_vm12 = vcmp.lt.s32.totalorder %v16071_v7, 4  ;;  %vm2325_vm13 = vcmp.lt.s32.totalorder %v16055_v43, 2 }
 0x264   : > { %v1479_v56 = vmax.f32 %v1439_v18, 0.0  ;;  %v2596_v52 = vadd.s32 %v15971_v30, %v15968_v47  ;;  %v2626_v49 = vsub.s32 4, %v16053_v19  ;;  %vm6244_vm14 = vcmp.lt.s32.totalorder %v16057_v54, 2 }
 0x265   : > { %vm2470_vm15 = vcmp.lt.s32.totalorder %v16071_v7, 2  ;;  %v16104_v50 = vshll.u32 %v2445_v42, 8  ;;  %vm2323_vm2 = vweird.f32 %v15757_v6  ;;  %v12757_v11 = vadd.s32 4294967294, %v2608_v3 }
 0x266   : > { %v1498_v58 = vpack.c.bf16 %v1479_v56, %v1478_v53  ;;  %v2474_v2 = vsel %vm2472_vm12, %v2462_v21, 2102212464  ;;  %v2477_v8 = vsel %vm2469_vm10, %v2456_v5, %v2459_v13  ;;  %v2478_v47 = vsel %vm2472_vm12, %v2465_v36, 920167782 }
 0x267   : > { %v2473_v55 = vsel %vm2469_vm10, %v2453_v9, %v2456_v5  ;;  %v2475_v63 = vsel %vm2471_vm3, %v2459_v13, %v2474_v2  ;;  %v2479_v17 = vsel %vm2471_vm3, %v2462_v21, %v2478_v47  ;;  %v2482_v39 = vsel %vm2472_vm12, %v2468_v25, 1326507024 }
 0x268   : > { %13359 = vmatmul.mubr.msk.bf16.gmra.mrb[108].mxu1 %vm1538_vm5, %v1498_v58  ;;  %vm2757_vm5 = vcmp.gt.s32.totalorder %v16048_v24, 0  ;;  %vm16126_vm6 = vcmp.le.f32.partialorder %v2540_v44, 0.7853982  ;;  %vm12758_vm8 = vcmp.lt.s32.totalorder %v12757_v11, 0  ;;  %v2480_v31 = vsel %vm2470_vm15, %v2477_v8, %v2479_v17 }
 0x269   : > { %v1630_v30 = vpop.f32.mrb[36].mxu1  ;;  %v2481_v33 = vsel %vm2469_vm10, %v2459_v13, %v2462_v21  ;;  %v2611_v15 = vsel %vm12758_vm8, 0, %v12757_v11  ;;  %v2483_v34 = vsel %vm2471_vm3, %v2465_v36, %v2482_v39  ;;  %vm6248_vm9 = vcmp.eq.s32.totalorder %v16057_v54, 2  ;;  %v13992_v42 = vpop.eup %13991 }
 0x26a   : > { %v1631_v23 = vadd.f32 %v16096_v51, %v1630_v30  ;;  %v13288_v37 = vpop.f32.mrb[37].mxu1  ;;  %v16137_v48 = vmul.u32.u64.low %v16104_v50, %v2480_v31  ;;  %v16138_v18 = vmul.u32.u64.high %v16104_v50, %v2480_v31, %v16137_v48  ;;  %v2612_v45 = vsub.s32 32, %v2611_v15  ;;  %v13994_v56 = vpop.eup %13993 }
 0x26b   : > { %v1633_v40 = vpop.f32.mrb[38].mxu1  ;;  %v2613_v29 = vshll.u32 %v16069_v60, %v2611_v15  ;;  %v2616_v5 = vsub.s32 4294967266, %v2611_v15  ;;  %v2627_v13 = vsel %vm2542_vm1, %v2626_v49, %v16053_v19  ;;  %v2476_v36 = vsel %vm2470_vm15, %v2473_v55, %v2475_v63 }
 0x26c   : > { %v1634_v44 = vadd.f32 %v16096_v51, %v1633_v40  ;;  %v13289_v35 = vpop.f32.mrb[39].mxu1  ;;  %v2484_v53 = vsel %vm2470_vm15, %v2481_v33, %v2483_v34  ;;  %v1781_v46 = vmax.f32 %v1631_v23, 0.0  ;;  %v2330_v21 = vxor.u32 2147483648, %v13992_v42 }
 0x26d   : > { %v2614_v25 = vshrl.u32 %v2596_v52, %v2612_v45  ;;  %v2327_v60 = vxor.u32 2147483648, %v13994_v56  ;;  %v2617_v58 = vadd.s32 127, %v2616_v5  ;;  %v2495_v55 = vadd.s32 1, %v16138_v18 }
 0x26e   : > { %v1782_v9 = vmax.f32 %v1634_v44, 0.0  ;;  %v16152_v3 = vmul.u32.u64.low %v16104_v50, %v2484_v53  ;;  %v16153_v11 = vmul.u32.u64.high %v16104_v50, %v2484_v53, %v16152_v3  ;;  %v2331_v19 = vsel %vm2329_vm7, %v2330_v21, %v13994_v56 }
 0x26f   : > { %v2615_v49 = vor.u32 %v2614_v25, %v2613_v29  ;;  %v6250_v7 = vsel %vm6248_vm9, %v2330_v21, %v13994_v56  ;;  %v2328_v47 = vsel %vm2326_vm11, %v13992_v42, %v2327_v60  ;;  %v2618_v30 = vshll.u32 %v2617_v58, 23  ;;  %v16195_v21 = vld [vmem:[%s14431_s21 + $0x80] sm:$0xff] }
 0x270   : > { %v10858_v2 = vpack.c.bf16 %v1782_v9, %v1781_v46  ;;  %v6247_v52 = vsel %vm6245_vm4, %v13992_v42, %v2327_v60  ;;  %v2332_v39 = vsel %vm2325_vm13, %v2328_v47, %v2331_v19  ;;  %v2492_v37 = vmul.u32 %v16104_v50, %v2476_v36  ;;  %v16179_v50 = vld [vmem:[%s14431_s21 + $0x48] sm:$0xff] }
 0x271   : > { %v1638_v8 = vpop.f32.mrb[40].mxu1  ;;  %v6251_v23 = vsel %vm6244_vm14, %v6247_v52, %v6250_v7  ;;  %v2333_v33 = vsel %vm2323_vm2, nan, %v2332_v39  ;;  %v2619_v40 = vor.u32 4788187, %v2618_v30  ;;  %v2622_v15 = vcvt.s32.f32 %v2615_v49 }
 0x272   : > { %v1639_v63 = vadd.f32 %v16096_v51, %v1638_v8  ;;  %v13292_v17 = vpop.f32.mrb[41].mxu1  ;;  %11006 = vmatmul.mubr.bf16.vlgmr.msra.gmra.mrb[40].mxu0 %v10858_v2  ;;  %v2629_v34 = vsel %vm16126_vm6, 0, %v2627_v13  ;;  %9708 = vperm.xlu0 %13866, %v2333_v33   ;;  %vm2494_vm7 = vc.u32 %v16153_v11, %v16137_v48  ;;  %v2746_v35 = vand.u32 2147483647, %v16179_v50 }
 0x273   : > { %v1641_v31 = vpop.f32.mrb[42].mxu1  ;;  %11015 = vmatprep.mubr.bf16.mxu0 %v20978_v4  ;;  %v6554_v54 = vadd.s32 3, %v2629_v34  ;;  %v2620_v45 = vand.u32 2147483647, %v2619_v40  ;;  %v6252_v29 = vsel %vm2323_vm2, nan, %v6251_v23  ;;  %v2496_v42 = vsel %vm2494_vm7, %v2495_v55, %v16138_v18 }
 0x274   : > { %v1642_v44 = vadd.f32 %v16096_v51, %v1641_v31  ;;  %v13293_v43 = vpop.f32.mrb[43].mxu1  ;;  %v2758_v5 = vsel %vm2757_vm5, %v16048_v24, 0  ;;  %v1783_v13 = vmax.f32 %v1639_v63, 0.0  ;;  %v2497_v53 = vadd.s32 %v2496_v42, %v2492_v37 }
 0x275   : > { %v2760_v56 = vand.u32 31, %v2758_v5  ;;  %v16189_v46 = vadd.s32 4294967169, %v16028_v28  ;;  %v16192_v9 = vadd.s32 4294967169, %v16032_v22  ;;  %v3470_v6 = vand.u32 2139095040, %v16195_v21 }
 0x276   : > { %v1784_v36 = vmax.f32 %v1642_v44, 0.0  ;;  %v2623_v25 = vmul.f32 %v2622_v15, %v2620_v45  ;;  %v16198_v60 = vand.u32 3, %v2629_v34  ;;  %9986 = vperm.xlu0 %13866, %v6252_v29   ;;  %v2498_v24 = vadd.s32 536870912, %v2497_v53 }
 0x277   : > { %v2761_v58 = vsub.s32 32, %v2760_v56  ;;  %v16200_v2 = vand.u32 3, %v6554_v54  ;;  %v2753_v28 = vand.u32 8388607, %v2746_v35  ;;  %v2763_v22 = vshll.u32 %v20983_v32, %v2760_v56 }
 0x278   : > { %v10859_v18 = vpack.c.bf16 %v1784_v36, %v1783_v13  ;;  %v2624_v3 = vxor.u32 2147483648, %v2623_v25  ;;  %v16205_v19 = vshrl.u32 %v2498_v24, 30  ;;  %v2766_v49 = vshll.u32 %v20976_v61, %v2760_v56 }
 0x279   : > { %v2769_v7 = vshll.u32 %v20974_v16, %v2760_v56  ;;  %v2772_v8 = vshll.u32 %v20972_v20, %v2760_v56  ;;  %v2764_v52 = vshrl.u32 %v20976_v61, %v2761_v58  ;;  %v2767_v55 = vshrl.u32 %v20974_v16, %v2761_v58 }
 0x27a   : > { %11016 = vmatmul.mubr.bf16.gmra.mrb[44].mxu0 %v10859_v18  ;;  %v2625_v30 = vsel %vm2542_vm1, %v2624_v3, %v2623_v25  ;;  %v2770_v63 = vshrl.u32 %v20972_v20, %v2761_v58  ;;  %v2500_v37 = vshll.u32 %v16205_v19, 30  ;;  %v2773_v31 = vshrl.u32 %v20981_v57, %v2761_v58 }
 0x27b   : > { %v1646_v47 = vpop.f32.mrb[44].mxu1  ;;  %11025 = vmatprep.mubr.bf16.mxu0 %v20978_v4  ;;  %v2628_v23 = vsel %vm16126_vm6, %v15880_v10, %v2625_v30  ;;  %v2754_v40 = vor.u32 8388608, %v2753_v28  ;;  %v2759_v15 = vshrl.u32 %v2758_v5, 5  ;;  %v2775_v34 = vshll.u32 %v20981_v57, %v2760_v56 }
 0x27c   : > { %v1647_v17 = vadd.f32 %v16096_v51, %v1646_v47  ;;  %v13296_v39 = vpop.f32.mrb[45].mxu1  ;;  %13995 = vcosq.f32 %v2628_v23  ;;  %v16224_v54 = vsub.s32 %v2497_v53, %v2500_v37  ;;  %v2762_v45 = vshrl.u32 %v20983_v32, %v2761_v58 }
 0x27d   : > { %v1649_v33 = vpop.f32.mrb[46].mxu1  ;;  %13997 = vsinq.f32 %v2628_v23  ;;  %vm2638_vm1 = vcmp.eq.s32.totalorder %v16198_v60, 2  ;;  %v2765_v0 = vor.u32 %v2764_v52, %v2763_v22  ;;  %v2768_v29 = vor.u32 %v2767_v55, %v2766_v49 }
 0x27e   : > { %v1650_v44 = vadd.f32 %v16096_v51, %v1649_v33  ;;  %v13297_v43 = vpop.f32.mrb[47].mxu1  ;;  %v2771_v42 = vor.u32 %v2770_v63, %v2769_v7  ;;  %v2776_v13 = vshrl.u32 %v20980_v41, %v2761_v58  ;;  %v1785_v36 = vmax.f32 %v1647_v17, 0.0 }
 0x27f   : > { %vm2635_vm10 = vcmp.eq.s32.totalorder %v16198_v60, 0  ;;  %vm6557_vm11 = vcmp.eq.s32.totalorder %v16200_v2, 0  ;;  %v2503_v5 = vsub.s32 0, %v16224_v54  ;;  %v2774_v56 = vor.u32 %v2773_v31, %v2772_v8 }
 0x280   : > { %v1786_v25 = vmax.f32 %v1650_v44, 0.0  ;;  %vm2634_vm4 = vcmp.lt.s32.totalorder %v16198_v60, 2  ;;  %vm6556_vm3 = vcmp.lt.s32.totalorder %v16200_v2, 2  ;;  %vm6560_vm12 = vcmp.eq.s32.totalorder %v16200_v2, 2 }
 0x281   : > { %v2777_v53 = vor.u32 %v2776_v13, %v2775_v34  ;;  %vm2778_vm13 = vcmp.lt.s32.totalorder %v2759_v15, 1  ;;  %vm2781_vm14 = vcmp.lt.s32.totalorder %v2759_v15, 4  ;;  %vm2632_vm15 = vweird.f32 %v15880_v10 }
 0x282   : > { %v10860_v18 = vpack.c.bf16 %v1786_v25, %v1785_v36  ;;  %v12752_v24 = vmin.u32 %v2503_v5, %v16224_v54  ;;  %vm2780_vm2 = vcmp.lt.s32.totalorder %v2759_v15, 3  ;;  %v2783_v58 = vsel %vm2781_vm14, %v2771_v42, 2102212464 }
 0x283   : > { %v2493_v3 = vadd.s32 %v16137_v48, %v16153_v11  ;;  %vm2779_vm5 = vcmp.lt.s32.totalorder %v2759_v15, 2  ;;  %v2782_v28 = vsel %vm2778_vm13, %v2762_v45, %v2765_v0  ;;  %v16241_v22 = vshll.u32 %v2754_v40, 8 }
 0x284   : > { %11026 = vmatmul.mubr.bf16.gmra.mrb[48].mxu0 %v10860_v18  ;;  %v2505_v49 = vclz %v12752_v24  ;;  %v2784_v7 = vsel %vm2780_vm2, %v2768_v29, %v2783_v58  ;;  %v2786_v8 = vsel %vm2778_vm13, %v2765_v0, %v2768_v29  ;;  %v2787_v47 = vsel %vm2781_vm14, %v2774_v56, 920167782 }
 0x285   : > { %v1654_v30 = vpop.f32.mrb[48].mxu1  ;;  %v2523_v52 = vsub.s32 4, %v16205_v19  ;;  %v2788_v55 = vsel %vm2780_vm2, %v2771_v42, %v2787_v47  ;;  %v2790_v48 = vsel %vm2778_vm13, %v2768_v29, %v2771_v42  ;;  %v2791_v11 = vsel %vm2781_vm14, %v2777_v53, 1326507024  ;;  %11035 = vmatprep.mubr.bf16.mxu0 %v20978_v4 }
 0x286   : > { %v1655_v63 = vadd.f32 %v16096_v51, %v1654_v30  ;;  %v13300_v17 = vpop.f32.mrb[49].mxu1  ;;  %v12753_v39 = vadd.s32 4294967294, %v2505_v49  ;;  %v2789_v23 = vsel %vm2779_vm5, %v2786_v8, %v2788_v55  ;;  %v2792_v37 = vsel %vm2780_vm2, %v2774_v56, %v2791_v11  ;;  %v13996_v31 = vpop.eup %13995 }
 0x287   : > { %v1657_v33 = vpop.f32.mrb[50].mxu1  ;;  %v2785_v40 = vsel %vm2779_vm5, %v2782_v28, %v2784_v7  ;;  %v2793_v34 = vsel %vm2779_vm5, %v2790_v48, %v2792_v37  ;;  %v16257_v44 = vmul.u32.u64.low %v16241_v22, %v2789_v23  ;;  %v16258_v43 = vmul.u32.u64.high %v16241_v22, %v2789_v23, %v16257_v44  ;;  %v13998_v45 = vpop.eup %13997 }
 0x288   : > { %v2639_v0 = vxor.u32 2147483648, %v13996_v31  ;;  %v1787_v29 = vmax.f32 %v1655_v63, 0.0  ;;  %v1658_v42 = vadd.f32 %v16096_v51, %v1657_v33  ;;  %v13301_v13 = vpop.f32.mrb[51].mxu1  ;;  %vm12754_vm6 = vcmp.lt.s32.totalorder %v12753_v39, 0 }
 0x289   : > { %v2636_v36 = vxor.u32 2147483648, %v13998_v45  ;;  %v2508_v25 = vsel %vm12754_vm6, 0, %v12753_v39  ;;  %v16263_v5 = vmul.u32.u64.low %v16241_v22, %v2793_v34  ;;  %v16264_v56 = vmul.u32.u64.high %v16241_v22, %v2793_v34, %v16263_v5 }
 0x28a   : > { %v2640_v15 = vsel %vm2638_vm1, %v2639_v0, %v13998_v45  ;;  %v6562_v53 = vsel %vm6560_vm12, %v2639_v0, %v13998_v45  ;;  %v1788_v18 = vmax.f32 %v1658_v42, 0.0  ;;  %v2509_v24 = vsub.s32 32, %v2508_v25 }
 0x28b   : > { %v2637_v58 = vsel %vm2635_vm10, %v13996_v31, %v2636_v36  ;;  %v6559_v28 = vsel %vm6557_vm11, %v13996_v31, %v2636_v36  ;;  %v2510_v49 = vshll.u32 %v16224_v54, %v2508_v25  ;;  %v2513_v7 = vsub.s32 4294967266, %v2508_v25 }
 0x28c   : > { %v2641_v8 = vsel %vm2634_vm4, %v2637_v58, %v2640_v15  ;;  %v6563_v47 = vsel %vm6556_vm3, %v6559_v28, %v6562_v53  ;;  %v10861_v30 = vpack.c.bf16 %v1788_v18, %v1787_v29  ;;  %v2511_v55 = vshrl.u32 %v2493_v3, %v2509_v24  ;;  %v16336_v18 = vld [vmem:[%s14431_s21 + $0x88] sm:$0xff] }
 0x28d   : > { %v2642_v48 = vsel %vm2632_vm15, nan, %v2641_v8  ;;  %vm2439_vm8 = vcmp.lt.s32.totalorder %v16020_v38, 0  ;;  %v2514_v11 = vadd.s32 127, %v2513_v7  ;;  %v2801_v63 = vmul.u32 %v16241_v22, %v2785_v40  ;;  %v14148_v22 = vld [vmem:[%s14431_s21 + $0x90] sm:$0xff] }
 0x28e   : > { %9723 = vperm.xlu1 %13865, %v2642_v48   ;;  %v2512_v54 = vor.u32 %v2511_v55, %v2510_v49  ;;  %v2524_v60 = vsel %vm2439_vm8, %v2523_v52, %v16205_v19  ;;  %vm2803_vm9 = vc.u32 %v16264_v56, %v16257_v44  ;;  %v2804_v2 = vadd.s32 1, %v16258_v43  ;;  %11036 = vmatmul.mubr.bf16.gmra.mrb[52].mxu0 %v10861_v30 }
 0x28f   : > { %v12783_v3 = vadd.s32 4294967169, %v16040_v62  ;;  %v6564_v17 = vsel %vm2632_vm15, nan, %v6563_v47  ;;  %v2515_v39 = vshll.u32 %v2514_v11, 23  ;;  %vm2654_vm7 = vcmp.gt.s32.totalorder %v16024_v27, 0  ;;  %11045 = vmatprep.mubr.bf16.mxu0 %v20978_v4 }
 0x290   : > { %v3471_v19 = vshrl.u32 %v3470_v6, 23  ;;  %v3676_v52 = vand.u32 2139095040, %v14148_v22  ;;  %vm16299_vm1 = vcmp.le.f32.partialorder %v2437_v59, 0.7853982  ;;  %v2805_v10 = vsel %vm2803_vm9, %v2804_v2, %v16258_v43  ;;  %v16310_v6 = vld [vmem:[%s14431_s21 + $0x40] sm:$0xff] }
 0x291   : > { %v2516_v62 = vor.u32 4788187, %v2515_v39  ;;  %v2519_v37 = vcvt.s32.f32 %v2512_v54  ;;  %v2526_v31 = vsel %vm16299_vm1, 0, %v2524_v60  ;;  %v2806_v33 = vadd.s32 %v2805_v10, %v2801_v63 }
 0x292   : > { %v16307_v40 = vadd.s32 1, %v16036_v14  ;;  %10001 = vperm.xlu1 %13865, %v6564_v17   ;;  %v6450_v21 = vadd.s32 3, %v2526_v31  ;;  %v2643_v59 = vand.u32 2147483647, %v16310_v6  ;;  %v2655_v34 = vsel %vm2654_vm7, %v16024_v27, 0 }
 0x293   : > { %v16317_v43 = vadd.s32 1, %v16051_v26  ;;  %v2517_v45 = vand.u32 2147483647, %v2516_v62  ;;  %v2807_v0 = vadd.s32 536870912, %v2806_v33  ;;  %v2657_v29 = vand.u32 31, %v2655_v34  ;;  %v16319_v42 = vpop.f32.mrb[52].mxu1 }
 0x294   : > { %v16322_v14 = vadd.s32 1, %v16189_v46  ;;  %v16325_v13 = vadd.s32 1, %v16192_v9  ;;  %v16327_v36 = vadd.s32 1, %v12783_v3  ;;  %v16329_v25 = vshrl.u32 %v3676_v52, 23  ;;  %v13304_v53 = vpop.f32.mrb[53].mxu1  ;;  %v16367_v52 = vld [vmem:[%s14431_s21 + $0x98] sm:$0xff] }
 0x295   : > { %v16331_v5 = vadd.s32 4294967169, %v3471_v19  ;;  %v2520_v27 = vmul.f32 %v2519_v37, %v2517_v45  ;;  %v16333_v26 = vshrl.u32 %v2807_v0, 30  ;;  %v2658_v15 = vsub.s32 32, %v2657_v29  ;;  %v16345_v28 = vpop.f32.mrb[54].mxu1 }
 0x296   : > { %v3573_v24 = vand.u32 2139095040, %v16336_v18  ;;  %v16339_v46 = vand.u32 3, %v2526_v31  ;;  %v16341_v58 = vand.u32 3, %v6450_v21  ;;  %v2650_v9 = vand.u32 8388607, %v2643_v59  ;;  %v13305_v30 = vpop.f32.mrb[55].mxu1 }
 0x297   : > { %vm2963_vm10 = vcmp.gt.s32.totalorder %v16307_v40, 0  ;;  %v2521_v49 = vxor.u32 2147483648, %v2520_v27  ;;  %v2809_v7 = vshll.u32 %v16333_v26, 30  ;;  %v2660_v8 = vshll.u32 %v20983_v32, %v2657_v29 }
 0x298   : > { %v2663_v47 = vshll.u32 %v20976_v61, %v2657_v29  ;;  %v2661_v55 = vshrl.u32 %v20976_v61, %v2658_v15  ;;  %v2664_v48 = vshrl.u32 %v20974_v16, %v2658_v15  ;;  %v2666_v11 = vshll.u32 %v20974_v16, %v2657_v29 }
 0x299   : > { %v2669_v63 = vshll.u32 %v20972_v20, %v2657_v29  ;;  %v2522_v54 = vsel %vm2439_vm8, %v2521_v49, %v2520_v27  ;;  %v16357_v60 = vsub.s32 %v2806_v33, %v2809_v7  ;;  %v2667_v2 = vshrl.u32 %v20972_v20, %v2658_v15  ;;  %v16380_v27 = vld [vmem:[%s14431_s21 + $0x58] sm:$0xff] }
 0x29a   : > { %v2670_v3 = vshrl.u32 %v20981_v57, %v2658_v15  ;;  %v2525_v17 = vsel %vm16299_vm1, %v16020_v38, %v2522_v54  ;;  %v2656_v39 = vshrl.u32 %v2655_v34, 5  ;;  %v2672_v19 = vshll.u32 %v20981_v57, %v2657_v29 }
 0x29b   : > { %v2673_v22 = vshrl.u32 %v20980_v41, %v2658_v15  ;;  %v3779_v10 = vand.u32 2139095040, %v16367_v52  ;;  %13999 = vcosq.f32 %v2525_v17  ;;  %v2812_v62 = vsub.s32 0, %v16357_v60 }
 0x29c   : > { %v2651_v37 = vor.u32 8388608, %v2650_v9  ;;  %14001 = vsinq.f32 %v2525_v17  ;;  %v2659_v31 = vshrl.u32 %v20983_v32, %v2658_v15  ;;  %v2662_v33 = vor.u32 %v2661_v55, %v2660_v8 }
 0x29d   : > { %v2665_v23 = vor.u32 %v2664_v48, %v2663_v47  ;;  %vm2535_vm11 = vcmp.eq.s32.totalorder %v16339_v46, 2  ;;  %v2802_v21 = vadd.s32 %v16257_v44, %v16264_v56  ;;  %v12764_v34 = vmin.u32 %v2812_v62, %v16357_v60 }
 0x29e   : > { %v2668_v45 = vor.u32 %v2667_v2, %v2666_v11  ;;  %v2671_v0 = vor.u32 %v2670_v3, %v2669_v63  ;;  %vm2532_vm4 = vcmp.eq.s32.totalorder %v16339_v46, 0  ;;  %vm6453_vm3 = vcmp.eq.s32.totalorder %v16341_v58, 0 }
 0x29f   : > { %vm6456_vm12 = vcmp.eq.s32.totalorder %v16341_v58, 2  ;;  %v2674_v29 = vor.u32 %v2673_v22, %v2672_v19  ;;  %vm2675_vm13 = vcmp.lt.s32.totalorder %v2656_v39, 1  ;;  %v2952_v15 = vand.u32 2147483647, %v16380_v27 }
 0x2a0   : > { %vm2531_vm14 = vcmp.lt.s32.totalorder %v16339_v46, 2  ;;  %v2814_v53 = vclz %v12764_v34  ;;  %vm6452_vm15 = vcmp.lt.s32.totalorder %v16341_v58, 2  ;;  %vm2677_vm2 = vcmp.lt.s32.totalorder %v2656_v39, 3 }
 0x2a1   : > { %vm2678_vm5 = vcmp.lt.s32.totalorder %v2656_v39, 4  ;;  %v2691_v44 = vshll.u32 %v2651_v37, 8  ;;  %vm2529_vm6 = vweird.f32 %v16020_v38  ;;  %vm2676_vm8 = vcmp.lt.s32.totalorder %v2656_v39, 2 }
 0x2a2   : > { %v2679_v56 = vsel %vm2675_vm13, %v2659_v31, %v2662_v33  ;;  %v2680_v9 = vsel %vm2678_vm5, %v2668_v45, 2102212464  ;;  %v2683_v49 = vsel %vm2675_vm13, %v2662_v33, %v2665_v23  ;;  %vm2748_vm9 = vcmp.lt.s32.totalorder %v16179_v50, 0 }
 0x2a3   : > { %v12765_v7 = vadd.s32 4294967294, %v2814_v53  ;;  %v2681_v8 = vsel %vm2677_vm2, %v2665_v23, %v2680_v9  ;;  %v2684_v47 = vsel %vm2678_vm5, %v2671_v0, 920167782  ;;  %v2687_v30 = vsel %vm2675_vm13, %v2665_v23, %v2668_v45 }
 0x2a4   : > { %v2685_v55 = vsel %vm2677_vm2, %v2668_v45, %v2684_v47  ;;  %v2688_v48 = vsel %vm2678_vm5, %v2674_v29, 1326507024  ;;  %v16394_v11 = vand.u32 8388607, %v2952_v15  ;;  %v2964_v63 = vsel %vm2963_vm10, %v16307_v40, 0 }
 0x2a5   : > { %vm12766_vm7 = vcmp.lt.s32.totalorder %v12765_v7, 0  ;;  %v2682_v54 = vsel %vm2676_vm8, %v2679_v56, %v2681_v8  ;;  %v2686_v2 = vsel %vm2676_vm8, %v2683_v49, %v2685_v55  ;;  %v2689_v3 = vsel %vm2677_vm2, %v2671_v0, %v2688_v48  ;;  %v14000_v37 = vpop.eup %13999 }
 0x2a6   : > { %v2817_v17 = vsel %vm12766_vm7, 0, %v12765_v7  ;;  %v2690_v19 = vsel %vm2676_vm8, %v2687_v30, %v2689_v3  ;;  %v16403_v22 = vmul.u32.u64.low %v2691_v44, %v2686_v2  ;;  %v16404_v62 = vmul.u32.u64.high %v2691_v44, %v2686_v2, %v16403_v22  ;;  %v14002_v45 = vpop.eup %14001 }
 0x2a7   : > { %vm16409_vm1 = vcmp.le.f32.partialorder %v2746_v35, 0.7853982  ;;  %v2818_v40 = vsub.s32 32, %v2817_v17  ;;  %v2819_v33 = vshll.u32 %v16357_v60, %v2817_v17  ;;  %v2822_v23 = vsub.s32 4294967266, %v2817_v17 }
 0x2a8   : > { %v2832_v34 = vsub.s32 4, %v16333_v26  ;;  %v2536_v39 = vxor.u32 2147483648, %v14000_v37  ;;  %v16415_v0 = vmul.u32.u64.low %v2691_v44, %v2690_v19  ;;  %v16416_v29 = vmul.u32.u64.high %v2691_v44, %v2690_v19, %v16415_v0 }
 0x2a9   : > { %v2966_v53 = vand.u32 31, %v2964_v63  ;;  %v2533_v56 = vxor.u32 2147483648, %v14002_v45  ;;  %v2820_v9 = vshrl.u32 %v2802_v21, %v2818_v40  ;;  %v2823_v49 = vadd.s32 127, %v2822_v23 }
 0x2aa   : > { %v2698_v7 = vmul.u32 %v2691_v44, %v2682_v54  ;;  %v2537_v35 = vsel %vm2535_vm11, %v2536_v39, %v14002_v45  ;;  %v6458_v8 = vsel %vm6456_vm12, %v2536_v39, %v14002_v45  ;;  %v2701_v60 = vadd.s32 1, %v16404_v62  ;;  %v16447_v39 = vpop.f32.mrb[56].mxu1 }
 0x2ab   : > { %v2967_v47 = vsub.s32 32, %v2966_v53  ;;  %v2534_v30 = vsel %vm2532_vm4, %v14000_v37, %v2533_v56  ;;  %v2821_v55 = vor.u32 %v2820_v9, %v2819_v33  ;;  %v2824_v48 = vshll.u32 %v2823_v49, 23 }
 0x2ac   : > { %v6455_v2 = vsel %vm6453_vm3, %v14000_v37, %v2533_v56  ;;  %v2538_v21 = vsel %vm2531_vm14, %v2534_v30, %v2537_v35  ;;  %v2833_v44 = vsel %vm2748_vm9, %v2832_v34, %v16333_v26  ;;  %vm2700_vm10 = vc.u32 %v16416_v29, %v16403_v22  ;;  %v13308_v56 = vpop.f32.mrb[57].mxu1 }
 0x2ad   : > { %v6459_v54 = vsel %vm6452_vm15, %v6455_v2, %v6458_v8  ;;  %v2539_v3 = vsel %vm2529_vm6, nan, %v2538_v21  ;;  %v2825_v17 = vor.u32 4788187, %v2824_v48  ;;  %v2828_v19 = vcvt.s32.f32 %v2821_v55 }
 0x2ae   : > { %v16438_v40 = vshrl.u32 %v2964_v63, 5  ;;  %9718 = vperm.xlu0 %13866, %v2539_v3   ;;  %v6460_v46 = vsel %vm2529_vm6, nan, %v6459_v54  ;;  %v2702_v37 = vsel %vm2700_vm10, %v2701_v60, %v16404_v62  ;;  %v2969_v26 = vshll.u32 %v20983_v32, %v2966_v53 }
 0x2af   : > { %v2970_v58 = vshrl.u32 %v20976_v61, %v2967_v47  ;;  %v2826_v33 = vand.u32 2147483647, %v2825_v17  ;;  %v2703_v23 = vadd.s32 %v2702_v37, %v2698_v7  ;;  %v2972_v34 = vshll.u32 %v20976_v61, %v2966_v53 }
 0x2b0   : > { %v2973_v45 = vshrl.u32 %v20974_v16, %v2967_v47  ;;  %v2835_v63 = vsel %vm16409_vm1, 0, %v2833_v44  ;;  %v2975_v38 = vshll.u32 %v20974_v16, %v2966_v53  ;;  %v2976_v0 = vshrl.u32 %v20972_v20, %v2967_v47  ;;  %v16460_v44 = vpop.f32.mrb[58].mxu1 }
 0x2b1   : > { %v2978_v62 = vshll.u32 %v20972_v20, %v2966_v53  ;;  %v2829_v9 = vmul.f32 %v2828_v19, %v2826_v33  ;;  %v2704_v49 = vadd.s32 536870912, %v2703_v23  ;;  %v2979_v7 = vshrl.u32 %v20981_v57, %v2967_v47  ;;  %v13309_v19 = vpop.f32.mrb[59].mxu1 }
 0x2b2   : > { %vm2984_vm11 = vcmp.lt.s32.totalorder %v16438_v40, 1  ;;  %9996 = vperm.xlu0 %13866, %v6460_v46   ;;  %v2971_v35 = vor.u32 %v2970_v58, %v2969_v26  ;;  %v2974_v8 = vor.u32 %v2973_v45, %v2972_v34  ;;  %v2981_v60 = vshll.u32 %v20981_v57, %v2966_v53 }
 0x2b3   : > { %v2982_v30 = vshrl.u32 %v20980_v41, %v2967_v47  ;;  %v2830_v55 = vxor.u32 2147483648, %v2829_v9  ;;  %v16458_v48 = vshrl.u32 %v2704_v49, 30  ;;  %v2977_v2 = vor.u32 %v2976_v0, %v2975_v38 }
 0x2b4   : > { %v2980_v21 = vor.u32 %v2979_v7, %v2978_v62  ;;  %v6762_v54 = vadd.s32 3, %v2835_v63  ;;  %v2960_v3 = vor.u32 8388608, %v16394_v11  ;;  %vm2987_vm4 = vcmp.lt.s32.totalorder %v16438_v40, 4 }
 0x2b5   : > { %v2983_v17 = vor.u32 %v2982_v30, %v2981_v60  ;;  %v2831_v46 = vsel %vm2748_vm9, %v2830_v55, %v2829_v9  ;;  %v2706_v53 = vshll.u32 %v16458_v48, 30  ;;  %v2968_v37 = vshrl.u32 %v20983_v32, %v2967_v47  ;;  %v16504_v30 = vld [vmem:[%s14431_s21 + $0xa0] sm:$0xff] }
 0x2b6   : > { %vm2986_vm3 = vcmp.lt.s32.totalorder %v16438_v40, 3  ;;  %v2834_v26 = vsel %vm16409_vm1, %v16179_v50, %v2831_v46  ;;  %vm2985_vm12 = vcmp.lt.s32.totalorder %v16438_v40, 2  ;;  %v2992_v11 = vsel %vm2984_vm11, %v2971_v35, %v2974_v8 }
 0x2b7   : > { %v2993_v58 = vsel %vm2987_vm4, %v2980_v21, 920167782  ;;  %14003 = vcosq.f32 %v2834_v26  ;;  %v16477_v33 = vsub.s32 %v2703_v23, %v2706_v53  ;;  %v2989_v47 = vsel %vm2987_vm4, %v2977_v2, 2102212464 }
 0x2b8   : > { %v2996_v34 = vsel %vm2984_vm11, %v2974_v8, %v2977_v2  ;;  %14005 = vsinq.f32 %v2834_v26  ;;  %v16483_v31 = vand.u32 3, %v2835_v63  ;;  %v2994_v45 = vsel %vm2986_vm3, %v2977_v2, %v2993_v58 }
 0x2b9   : > { %v2997_v38 = vsel %vm2987_vm4, %v2983_v17, 1326507024  ;;  %v6763_v0 = vand.u32 3, %v6762_v54  ;;  %v2709_v23 = vsub.s32 0, %v16477_v33  ;;  %v2995_v62 = vsel %vm2985_vm12, %v2992_v11, %v2994_v45 }
 0x2ba   : > { %v2998_v56 = vsel %vm2986_vm3, %v2980_v21, %v2997_v38  ;;  %v2988_v9 = vsel %vm2984_vm11, %v2968_v37, %v2971_v35  ;;  %v2990_v63 = vsel %vm2986_vm3, %v2974_v8, %v2989_v47  ;;  %v3000_v7 = vshll.u32 %v2960_v3, 8 }
 0x2bb   : > { %v2999_v49 = vsel %vm2985_vm12, %v2996_v34, %v2998_v56  ;;  %v16501_v60 = vadd.s32 4294967169, %v16329_v25  ;;  %v3882_v55 = vand.u32 2139095040, %v16504_v30  ;;  %v12760_v2 = vmin.u32 %v2709_v23, %v16477_v33 }
 0x2bc   : > { %v1663_v21 = vadd.f32 %v16096_v51, %v16319_v42  ;;  %v16510_v35 = vmul.u32.u64.low %v3000_v7, %v2999_v49  ;;  %v16511_v54 = vmul.u32.u64.high %v3000_v7, %v2999_v49, %v16510_v35  ;;  %vm2838_vm13 = vweird.f32 %v16179_v50 }
 0x2bd   : > { %v16513_v8 = vmul.u32.u64.low %v3000_v7, %v2995_v62  ;;  %v16514_v17 = vmul.u32.u64.high %v3000_v7, %v2995_v62, %v16513_v8  ;;  %v2711_v25 = vclz %v12760_v2  ;;  %v2991_v3 = vsel %vm2985_vm12, %v2988_v9, %v2990_v63 }
 0x2be   : > { %v1666_v19 = vadd.f32 %v16096_v51, %v16345_v28  ;;  %vm2840_vm14 = vcmp.lt.s32.totalorder %v16483_v31, 2  ;;  %vm2841_vm15 = vcmp.eq.s32.totalorder %v16483_v31, 0  ;;  %vm2844_vm2 = vcmp.eq.s32.totalorder %v16483_v31, 2 }
 0x2bf   : > { %vm6764_vm5 = vcmp.lt.s32.totalorder %v6763_v0, 2  ;;  %vm6765_vm6 = vcmp.eq.s32.totalorder %v6763_v0, 0  ;;  %v12761_v42 = vadd.s32 4294967294, %v2711_v25  ;;  %v1789_v46 = vmax.f32 %v1663_v21, 0.0  ;;  %v16543_v21 = vld [vmem:[%s14431_s21 + $0xa8] sm:$0xff] }
 0x2c0   : > { %v1790_v53 = vmax.f32 %v1666_v19, 0.0  ;;  %vm6768_vm8 = vcmp.eq.s32.totalorder %v6763_v0, 2  ;;  %v3007_v37 = vmul.u32 %v3000_v7, %v2991_v3  ;;  %vm3009_vm9 = vc.u32 %v16511_v54, %v16513_v8 }
 0x2c1   : > { %v3010_v40 = vadd.s32 1, %v16514_v17  ;;  %v14004_v26 = vpop.eup %14003  ;;  %v2699_v51 = vadd.s32 %v16403_v22, %v16416_v29  ;;  %vm12762_vm7 = vcmp.lt.s32.totalorder %v12761_v42, 0  ;;  %vm2860_vm1 = vcmp.gt.s32.totalorder %v16045_v1, 0 }
 0x2c2   : > { %v10862_v28 = vpack.c.bf16 %v1790_v53, %v1789_v46  ;;  %v14006_v11 = vpop.eup %14005  ;;  %v2845_v58 = vxor.u32 2147483648, %v14004_v26  ;;  %v2714_v47 = vsel %vm12762_vm7, 0, %v12761_v42  ;;  %v2729_v34 = vsub.s32 4, %v16458_v48  ;;  %v16553_v46 = vld [vmem:[%s14431_s21 + $0xb8] sm:$0xff] }
 0x2c3   : > { %v3011_v45 = vsel %vm3009_vm9, %v3010_v40, %v16514_v17  ;;  %v2842_v38 = vxor.u32 2147483648, %v14006_v11  ;;  %v2715_v23 = vsub.s32 32, %v2714_v47  ;;  %v2716_v62 = vshll.u32 %v16477_v33, %v2714_v47 }
 0x2c4   : > { %v2719_v56 = vsub.s32 4294967266, %v2714_v47  ;;  %11046 = vmatmul.mubr.bf16.gmra.mrb[56].mxu0 %v10862_v28  ;;  %v2846_v22 = vsel %vm2844_vm2, %v2845_v58, %v14006_v11  ;;  %v6770_v29 = vsel %vm6768_vm8, %v2845_v58, %v14006_v11  ;;  %v3012_v9 = vadd.s32 %v3011_v45, %v3007_v37 }
 0x2c5   : > { %v2861_v63 = vsel %vm2860_vm1, %v16045_v1, 0  ;;  %11055 = vmatprep.mubr.bf16.mxu0 %v20978_v4  ;;  %v2843_v49 = vsel %vm2841_vm15, %v14004_v26, %v2842_v38  ;;  %v6767_v7 = vsel %vm6765_vm6, %v14004_v26, %v2842_v38  ;;  %v2717_v2 = vshrl.u32 %v2699_v51, %v2715_v23 }
 0x2c6   : > { %v2720_v33 = vadd.s32 127, %v2719_v56  ;;  %v3985_v35 = vand.u32 2139095040, %v16543_v21  ;;  %v2847_v17 = vsel %vm2840_vm14, %v2843_v49, %v2846_v22  ;;  %v6771_v25 = vsel %vm6764_vm5, %v6767_v7, %v6770_v29 }
 0x2c7   : > { %v3013_v3 = vadd.s32 536870912, %v3012_v9  ;;  %v2848_v1 = vsel %vm2838_vm13, nan, %v2847_v17  ;;  %vm2645_vm10 = vcmp.lt.s32.totalorder %v16310_v6, 0  ;;  %v2718_v19 = vor.u32 %v2717_v2, %v2716_v62 }
 0x2c8   : > { %v2721_v42 = vshll.u32 %v2720_v33, 23  ;;  %v4191_v53 = vand.u32 2139095040, %v16553_v46  ;;  %9733 = vperm.xlu1 %13865, %v2848_v1   ;;  %v2730_v31 = vsel %vm2645_vm10, %v2729_v34, %v16458_v48  ;;  %v2863_v37 = vand.u32 31, %v2861_v63  ;;  %v16580_v34 = vld [vmem:[%s14431_s21 + $0x50] sm:$0xff] }
 0x2c9   : > { %v16559_v0 = vshrl.u32 %v3013_v3, 30  ;;  %v16562_v40 = vadd.s32 1, %v16331_v5  ;;  %v6772_v26 = vsel %vm2838_vm13, nan, %v6771_v25  ;;  %v2725_v28 = vcvt.s32.f32 %v2718_v19 }
 0x2ca   : > { %v2722_v51 = vor.u32 4788187, %v2721_v42  ;;  %v16568_v11 = vshrl.u32 %v3573_v24, 23  ;;  %vm16572_vm11 = vcmp.le.f32.partialorder %v2643_v59, 0.7853982  ;;  %v2864_v47 = vsub.s32 32, %v2863_v37 }
 0x2cb   : > { %v3015_v48 = vshll.u32 %v16559_v0, 30  ;;  %v2732_v50 = vsel %vm16572_vm11, 0, %v2730_v31  ;;  %v2849_v45 = vand.u32 2147483647, %v16580_v34  ;;  %v2866_v18 = vshll.u32 %v20983_v32, %v2863_v37 }
 0x2cc   : > { %v2723_v5 = vand.u32 2147483647, %v2722_v51  ;;  %10011 = vperm.xlu1 %13865, %v6772_v26   ;;  %v2867_v59 = vshrl.u32 %v20976_v61, %v2864_v47  ;;  %v2869_v38 = vshll.u32 %v20976_v61, %v2863_v37  ;;  %v2872_v23 = vshll.u32 %v20974_v16, %v2863_v37 }
 0x2cd   : > { %v16584_v24 = vsub.s32 %v3012_v9, %v3015_v48  ;;  %v2870_v56 = vshrl.u32 %v20974_v16, %v2864_v47  ;;  %v2873_v22 = vshrl.u32 %v20972_v20, %v2864_v47  ;;  %v2875_v29 = vshll.u32 %v20972_v20, %v2863_v37 }
 0x2ce   : > { %v2726_v62 = vmul.f32 %v2725_v28, %v2723_v5  ;;  %v16594_v49 = vshrl.u32 %v3779_v10, 23  ;;  %v16596_v7 = vand.u32 3, %v2732_v50  ;;  %v2862_v2 = vshrl.u32 %v2861_v63, 5 }
 0x2cf   : > { %v3018_v9 = vsub.s32 0, %v16584_v24  ;;  %v6658_v17 = vadd.s32 3, %v2732_v50  ;;  %v2856_v25 = vand.u32 8388607, %v2849_v45  ;;  %v2876_v3 = vshrl.u32 %v20981_v57, %v2864_v47 }
 0x2d0   : > { %v2727_v33 = vxor.u32 2147483648, %v2726_v62  ;;  %vm2954_vm4 = vcmp.lt.s32.totalorder %v16380_v27, 0  ;;  %v2865_v52 = vshrl.u32 %v20983_v32, %v2864_v47  ;;  %v2868_v10 = vor.u32 %v2867_v59, %v2866_v18 }
 0x2d1   : > { %v12772_v1 = vmin.u32 %v3018_v9, %v16584_v24  ;;  %v2871_v19 = vor.u32 %v2870_v56, %v2869_v38  ;;  %v2874_v31 = vor.u32 %v2873_v22, %v2872_v23  ;;  %v2877_v63 = vor.u32 %v2876_v3, %v2875_v29 }
 0x2d2   : > { %v2728_v42 = vsel %vm2645_vm10, %v2727_v33, %v2726_v62  ;;  %v2878_v26 = vshll.u32 %v20981_v57, %v2863_v37  ;;  %vm3169_vm3 = vcmp.gt.s32.totalorder %v16322_v14, 0  ;;  %v2879_v48 = vshrl.u32 %v20980_v41, %v2864_v47 }
 0x2d3   : > { %v2731_v51 = vsel %vm16572_vm11, %v16310_v6, %v2728_v42  ;;  %v3020_v28 = vclz %v12772_v1  ;;  %vm2881_vm12 = vcmp.lt.s32.totalorder %v2862_v2, 1  ;;  %vm16615_vm13 = vcmp.le.f32.partialorder %v2952_v15, 0.7853982 }
 0x2d4   : > { %14007 = vcosq.f32 %v2731_v51  ;;  %v3008_v37 = vadd.s32 %v16513_v8, %v16511_v54  ;;  %v3038_v50 = vsub.s32 4, %v16559_v0  ;;  %v2857_v18 = vor.u32 8388608, %v2856_v25 }
 0x2d5   : > { %14009 = vsinq.f32 %v2731_v51  ;;  %v12773_v58 = vadd.s32 4294967294, %v3020_v28  ;;  %v2880_v59 = vor.u32 %v2879_v48, %v2878_v26  ;;  %vm2882_vm14 = vcmp.lt.s32.totalorder %v2862_v2, 2 }
 0x2d6   : > { %vm2741_vm15 = vcmp.eq.s32.totalorder %v16596_v7, 2  ;;  %vm2883_vm2 = vcmp.lt.s32.totalorder %v2862_v2, 3  ;;  %vm2884_vm5 = vcmp.lt.s32.totalorder %v2862_v2, 4  ;;  %v2885_v47 = vsel %vm2881_vm12, %v2865_v52, %v2868_v10 }
 0x2d7   : > { %v2889_v15 = vsel %vm2881_vm12, %v2868_v10, %v2871_v19  ;;  %vm2738_vm6 = vcmp.eq.s32.totalorder %v16596_v7, 0  ;;  %vm12774_vm8 = vcmp.lt.s32.totalorder %v12773_v58, 0  ;;  %v2886_v38 = vsel %vm2884_vm5, %v2874_v31, 2102212464 }
 0x2d8   : > { %v2890_v54 = vsel %vm2884_vm5, %v2877_v63, 920167782  ;;  %v2893_v8 = vsel %vm2881_vm12, %v2871_v19, %v2874_v31  ;;  %vm2737_vm9 = vcmp.lt.s32.totalorder %v16596_v7, 2  ;;  %v3023_v23 = vsel %vm12774_vm8, 0, %v12773_v58 }
 0x2d9   : > { %v2887_v62 = vsel %vm2883_vm2, %v2871_v19, %v2886_v38  ;;  %v2891_v56 = vsel %vm2883_vm2, %v2874_v31, %v2890_v54  ;;  %v2894_v22 = vsel %vm2884_vm5, %v2880_v59, 1326507024  ;;  %vm2735_vm7 = vweird.f32 %v16310_v6 }
 0x2da   : > { %v3024_v29 = vsub.s32 32, %v3023_v23  ;;  %v3025_v9 = vshll.u32 %v16584_v24, %v3023_v23  ;;  %v3028_v33 = vsub.s32 4294967266, %v3023_v23  ;;  %v6659_v25 = vand.u32 3, %v6658_v17 }
 0x2db   : > { %v3039_v3 = vsel %vm2954_vm4, %v3038_v50, %v16559_v0  ;;  %v2892_v1 = vsel %vm2882_vm14, %v2889_v15, %v2891_v56  ;;  %v2895_v52 = vsel %vm2883_vm2, %v2877_v63, %v2894_v22  ;;  %v2897_v10 = vshll.u32 %v2857_v18, 8 }
 0x2dc   : > { %v3026_v19 = vshrl.u32 %v3008_v37, %v3024_v29  ;;  %v3029_v42 = vadd.s32 127, %v3028_v33  ;;  %v2888_v31 = vsel %vm2882_vm14, %v2885_v47, %v2887_v62  ;;  %v2896_v26 = vsel %vm2882_vm14, %v2893_v8, %v2895_v52  ;;  %v16649_v37 = vld [vmem:[%s14431_s21 + $0x68] sm:$0xff] }
 0x2dd   : > { %v16639_v51 = vmul.u32.u64.low %v2897_v10, %v2896_v26  ;;  %v16640_v24 = vmul.u32.u64.high %v2897_v10, %v2896_v26, %v16639_v51  ;;  %v16642_v17 = vmul.u32.u64.low %v2897_v10, %v2892_v1  ;;  %v16643_v28 = vmul.u32.u64.high %v2897_v10, %v2892_v1, %v16642_v17 }
 0x2de   : > { %v3027_v0 = vor.u32 %v3026_v19, %v3025_v9  ;;  %v3030_v48 = vshll.u32 %v3029_v42, 23  ;;  %v3041_v50 = vsel %vm16615_vm13, 0, %v3039_v3  ;;  %vm6660_vm1 = vcmp.lt.s32.totalorder %v6659_v25, 2  ;;  %v14008_v63 = vpop.eup %14007 }
 0x2df   : > { %vm6661_vm10 = vcmp.eq.s32.totalorder %v6659_v25, 0  ;;  %vm6664_vm11 = vcmp.eq.s32.totalorder %v6659_v25, 2  ;;  %v3158_v2 = vand.u32 2147483647, %v16649_v37  ;;  %v3170_v18 = vsel %vm3169_vm3, %v16322_v14, 0  ;;  %v14010_v58 = vpop.eup %14009 }
 0x2e0   : > { %v2742_v59 = vxor.u32 2147483648, %v14008_v63  ;;  %v3031_v47 = vor.u32 4788187, %v3030_v48  ;;  %v3034_v15 = vcvt.s32.f32 %v3027_v0  ;;  %v2904_v38 = vmul.u32 %v2897_v10, %v2888_v31 }
 0x2e1   : > { %v2739_v54 = vxor.u32 2147483648, %v14010_v58  ;;  %v16655_v8 = vand.u32 3, %v3041_v50  ;;  %vm2906_vm12 = vc.u32 %v16640_v24, %v16642_v17  ;;  %v2907_v23 = vadd.s32 1, %v16643_v28 }
 0x2e2   : > { %v2743_v62 = vsel %vm2741_vm15, %v2742_v59, %v14010_v58  ;;  %v3032_v56 = vand.u32 2147483647, %v3031_v47  ;;  %v6666_v22 = vsel %vm6664_vm11, %v2742_v59, %v14010_v58  ;;  %v3172_v14 = vand.u32 31, %v3170_v18 }
 0x2e3   : > { %v2740_v29 = vsel %vm2738_vm6, %v14008_v63, %v2739_v54  ;;  %v6663_v9 = vsel %vm6661_vm10, %v14008_v63, %v2739_v54  ;;  %v6970_v33 = vadd.s32 3, %v3041_v50  ;;  %v2908_v3 = vsel %vm2906_vm12, %v2907_v23, %v16643_v28 }
 0x2e4   : > { %v2744_v1 = vsel %vm2737_vm9, %v2740_v29, %v2743_v62  ;;  %v3035_v52 = vmul.f32 %v3034_v15, %v3032_v56  ;;  %v6667_v10 = vsel %vm6660_vm1, %v6663_v9, %v6666_v22  ;;  %v2909_v19 = vadd.s32 %v2908_v3, %v2904_v38 }
 0x2e5   : > { %v2745_v42 = vsel %vm2735_vm7, nan, %v2744_v1  ;;  %v16672_v31 = vshrl.u32 %v3170_v18, 5  ;;  %v3173_v26 = vsub.s32 32, %v3172_v14  ;;  %v3175_v51 = vshll.u32 %v20983_v32, %v3172_v14  ;;  %v16704_v1 = vld [vmem:[%s14431_s21 + $0xb0] sm:$0xff] }
 0x2e6   : > { %9728 = vperm.xlu0 %13866, %v2745_v42   ;;  %v3036_v0 = vxor.u32 2147483648, %v3035_v52  ;;  %v2910_v48 = vadd.s32 536870912, %v2909_v19  ;;  %v3178_v28 = vshll.u32 %v20976_v61, %v3172_v14  ;;  %v3181_v7 = vshll.u32 %v20974_v16, %v3172_v14 }
 0x2e7   : > { %v6668_v25 = vsel %vm2735_vm7, nan, %v6667_v10  ;;  %v3176_v50 = vshrl.u32 %v20976_v61, %v3173_v26  ;;  %v3179_v63 = vshrl.u32 %v20974_v16, %v3173_v26  ;;  %v3182_v18 = vshrl.u32 %v20972_v20, %v3173_v26 }
 0x2e8   : > { %v3037_v58 = vsel %vm2954_vm4, %v3036_v0, %v3035_v52  ;;  %v16684_v59 = vshrl.u32 %v2910_v48, 30  ;;  %v3184_v47 = vshll.u32 %v20972_v20, %v3172_v14  ;;  %v3185_v15 = vshrl.u32 %v20981_v57, %v3173_v26 }
 0x2e9   : > { %v3040_v6 = vsel %vm16615_vm13, %v16380_v27, %v3037_v58  ;;  %v16691_v38 = vand.u32 3, %v6970_v33  ;;  %v3165_v54 = vand.u32 8388607, %v3158_v2  ;;  %v3177_v23 = vor.u32 %v3176_v50, %v3175_v51 }
 0x2ea   : > { %14011 = vcosq.f32 %v3040_v6  ;;  %10006 = vperm.xlu0 %13866, %v6668_v25   ;;  %v2912_v62 = vshll.u32 %v16684_v59, 30  ;;  %v3180_v56 = vor.u32 %v3179_v63, %v3178_v28  ;;  %v3183_v22 = vor.u32 %v3182_v18, %v3181_v7 }
 0x2eb   : > { %14013 = vsinq.f32 %v3040_v6  ;;  %v3186_v29 = vor.u32 %v3185_v15, %v3184_v47  ;;  %v3187_v9 = vshll.u32 %v20981_v57, %v3172_v14  ;;  %v3188_v5 = vshrl.u32 %v20980_v41, %v3173_v26  ;;  %v16741_v15 = vld [vmem:[%s21026_s6] ss:$0 sm:$0xff] }
 0x2ec   : > { %v16698_v3 = vsub.s32 %v2909_v19, %v2912_v62  ;;  %v3174_v33 = vshrl.u32 %v20983_v32, %v3173_v26  ;;  %vm3190_vm4 = vcmp.lt.s32.totalorder %v16672_v31, 1  ;;  %vm3193_vm3 = vcmp.lt.s32.totalorder %v16672_v31, 4 }
 0x2ed   : > { %v4088_v52 = vand.u32 2139095040, %v16704_v1  ;;  %v3166_v10 = vor.u32 8388608, %v3165_v54  ;;  %v3189_v42 = vor.u32 %v3188_v5, %v3187_v9  ;;  %v3195_v51 = vsel %vm3193_vm3, %v3183_v22, 2102212464 }
 0x2ee   : > { %vm3046_vm13 = vcmp.lt.s32.totalorder %v16655_v8, 2  ;;  %vm3047_vm14 = vcmp.eq.s32.totalorder %v16655_v8, 0  ;;  %vm3050_vm15 = vcmp.eq.s32.totalorder %v16655_v8, 2  ;;  %v2915_v14 = vsub.s32 0, %v16698_v3 }
 0x2ef   : > { %vm3192_vm2 = vcmp.lt.s32.totalorder %v16672_v31, 3  ;;  %vm3044_vm5 = vweird.f32 %v16380_v27  ;;  %vm6972_vm6 = vcmp.lt.s32.totalorder %v16691_v38, 2  ;;  %vm3191_vm8 = vcmp.lt.s32.totalorder %v16672_v31, 2 }
 0x2f0   : > { %v3198_v19 = vsel %vm3190_vm4, %v3177_v23, %v3180_v56  ;;  %v3199_v26 = vsel %vm3193_vm3, %v3186_v29, 920167782  ;;  %v12768_v0 = vmin.u32 %v2915_v14, %v16698_v3  ;;  %v3194_v48 = vsel %vm3190_vm4, %v3174_v33, %v3177_v23 }
 0x2f1   : > { %v3196_v28 = vsel %vm3192_vm2, %v3180_v56, %v3195_v51  ;;  %v3202_v7 = vsel %vm3190_vm4, %v3180_v56, %v3183_v22  ;;  %vm3066_vm9 = vcmp.gt.s32.totalorder %v16317_v43, 0  ;;  %vm6973_vm7 = vcmp.eq.s32.totalorder %v16691_v38, 0 }
 0x2f2   : > { %v3200_v25 = vsel %vm3192_vm2, %v3183_v22, %v3199_v26  ;;  %v3203_v50 = vsel %vm3193_vm3, %v3189_v42, 1326507024  ;;  %v3206_v63 = vshll.u32 %v3166_v10, 8  ;;  %v2917_v18 = vclz %v12768_v0 }
 0x2f3   : > { %v3201_v58 = vsel %vm3191_vm8, %v3198_v19, %v3200_v25  ;;  %v3204_v47 = vsel %vm3192_vm2, %v3186_v29, %v3203_v50  ;;  %v1674_v6 = vadd.f32 %v16741_v15, %v16460_v44  ;;  %v3197_v54 = vsel %vm3191_vm8, %v3194_v48, %v3196_v28 }
 0x2f4   : > { %v3205_v23 = vsel %vm3191_vm8, %v3202_v7, %v3204_v47  ;;  %v16749_v62 = vmul.u32.u64.low %v3206_v63, %v3201_v58  ;;  %v16750_v56 = vmul.u32.u64.high %v3206_v63, %v3201_v58, %v16749_v62  ;;  %v14012_v22 = vpop.eup %14011  ;;  %vm6976_vm1 = vcmp.eq.s32.totalorder %v16691_v38, 2 }
 0x2f5   : > { %v12769_v29 = vadd.s32 4294967294, %v2917_v18  ;;  %v16754_v9 = vmul.u32.u64.low %v3206_v63, %v3205_v23  ;;  %v16755_v5 = vmul.u32.u64.high %v3206_v63, %v3205_v23, %v16754_v9  ;;  %v14014_v33 = vpop.eup %14013  ;;  %v3051_v10 = vxor.u32 2147483648, %v14012_v22 }
 0x2f6   : > { %v2905_v44 = vadd.s32 %v16642_v17, %v16640_v24  ;;  %v2935_v42 = vsub.s32 4, %v16684_v59  ;;  %v1671_v31 = vadd.f32 %v16741_v15, %v16447_v39  ;;  %v3048_v51 = vxor.u32 2147483648, %v14014_v33 }
 0x2f7   : > { %vm12770_vm10 = vcmp.lt.s32.totalorder %v12769_v29, 0  ;;  %v3213_v14 = vmul.u32 %v3206_v63, %v3197_v54  ;;  %v1792_v19 = vmax.f32 %v1674_v6, 0.0  ;;  %v3052_v26 = vsel %vm3050_vm15, %v3051_v10, %v14014_v33 }
 0x2f8   : > { %v6978_v0 = vsel %vm6976_vm1, %v3051_v10, %v14014_v33  ;;  %v2920_v48 = vsel %vm12770_vm10, 0, %v12769_v29  ;;  %v3216_v28 = vadd.s32 1, %v16750_v56  ;;  %v3049_v7 = vsel %vm3047_vm14, %v14012_v22, %v3048_v51 }
 0x2f9   : > { %v6975_v24 = vsel %vm6973_vm7, %v14012_v22, %v3048_v51  ;;  %v2921_v17 = vsub.s32 32, %v2920_v48  ;;  %v2922_v39 = vshll.u32 %v16698_v3, %v2920_v48  ;;  %v3053_v25 = vsel %vm3046_vm13, %v3049_v7, %v3052_v26 }
 0x2fa   : > { %v6979_v50 = vsel %vm6972_vm6, %v6975_v24, %v6978_v0  ;;  %v2925_v63 = vsub.s32 4294967266, %v2920_v48  ;;  %v1791_v18 = vmax.f32 %v1671_v31, 0.0  ;;  %v16775_v58 = vadd.s32 1, %v16501_v60 }
 0x2fb   : > { %v3054_v47 = vsel %vm3044_vm5, nan, %v3053_v25  ;;  %v2923_v6 = vshrl.u32 %v2905_v44, %v2921_v17  ;;  %vm3215_vm11 = vc.u32 %v16755_v5, %v16749_v62  ;;  %vm2851_vm12 = vcmp.lt.s32.totalorder %v16580_v34, 0 }
 0x2fc   : > { %9743 = vperm.xlu1 %13865, %v3054_v47   ;;  %v2926_v8 = vadd.s32 127, %v2925_v63  ;;  %v3217_v3 = vsel %vm3215_vm11, %v3216_v28, %v16750_v56  ;;  %v10863_v38 = vpack.c.bf16 %v1792_v19, %v1791_v18  ;;  %v6980_v54 = vsel %vm3044_vm5, nan, %v6979_v50 }
 0x2fd   : > { %v2924_v23 = vor.u32 %v2923_v6, %v2922_v39  ;;  %v3218_v60 = vadd.s32 %v3217_v3, %v3213_v14  ;;  %v3067_v22 = vsel %vm3066_vm9, %v16317_v43, 0  ;;  %v3883_v29 = vshrl.u32 %v3882_v55, 23 }
 0x2fe   : > { %v2927_v9 = vshll.u32 %v2926_v8, 23  ;;  %v2936_v33 = vsel %vm2851_vm12, %v2935_v42, %v16684_v59  ;;  %v3069_v10 = vand.u32 31, %v3067_v22  ;;  %11056 = vmatmul.mubr.bf16.gmra.mrb[60].mxu0 %v10863_v38  ;;  %v16794_v27 = vadd.s32 4294967169, %v16568_v11 }
 0x2ff   : > { %v3986_v56 = vshrl.u32 %v3985_v35, 23  ;;  %v16800_v43 = vshrl.u32 %v4191_v53, 23  ;;  %v3219_v30 = vadd.s32 536870912, %v3218_v60  ;;  %11065 = vmatprep.mubr.bf16.mxu0 %v20978_v4  ;;  %vm16805_vm4 = vcmp.le.f32.partialorder %v2849_v45, 0.7853982  ;;  %v16821_v45 = vld [vmem:[%s14431_s21 + $0x60] sm:$0xff] }
 0x300   : > { %10021 = vperm.xlu1 %13865, %v6980_v54   ;;  %v2928_v59 = vor.u32 4788187, %v2927_v9  ;;  %v2931_v11 = vcvt.s32.f32 %v2924_v23  ;;  %v3070_v44 = vsub.s32 32, %v3069_v10  ;;  %v16810_v21 = vadd.s32 4294967169, %v16594_v49 }
 0x301   : > { %v16814_v35 = vshrl.u32 %v4088_v52, 23  ;;  %v2938_v46 = vsel %vm16805_vm4, 0, %v2936_v33  ;;  %v16818_v53 = vshrl.u32 %v3219_v30, 30  ;;  %v3055_v31 = vand.u32 2147483647, %v16821_v45 }
 0x302   : > { %v2929_v42 = vand.u32 2147483647, %v2928_v59  ;;  %v3072_v51 = vshll.u32 %v20983_v32, %v3069_v10  ;;  %v3075_v14 = vshll.u32 %v20976_v61, %v3069_v10  ;;  %v3073_v1 = vshrl.u32 %v20976_v61, %v3070_v44 }
 0x303   : > { %v3221_v49 = vshll.u32 %v16818_v53, 30  ;;  %v3078_v52 = vshll.u32 %v20974_v16, %v3069_v10  ;;  %v3081_v19 = vshll.u32 %v20972_v20, %v3069_v10  ;;  %v3076_v0 = vshrl.u32 %v20974_v16, %v3070_v44 }
 0x304   : > { %v2932_v26 = vmul.f32 %v2931_v11, %v2929_v42  ;;  %v3079_v48 = vshrl.u32 %v20972_v20, %v3070_v44  ;;  %v3082_v28 = vshrl.u32 %v20981_v57, %v3070_v44  ;;  %v3068_v24 = vshrl.u32 %v3067_v22, 5 }
 0x305   : > { %v16833_v7 = vsub.s32 %v3218_v60, %v3221_v49  ;;  %v3084_v17 = vshll.u32 %v20981_v57, %v3069_v10  ;;  %v3085_v39 = vshrl.u32 %v20980_v41, %v3070_v44  ;;  %v16837_v25 = vadd.s32 4294967169, %v3883_v29 }
 0x306   : > { %v2933_v50 = vxor.u32 2147483648, %v2932_v26  ;;  %v16839_v63 = vand.u32 3, %v2938_v46  ;;  %v3062_v18 = vand.u32 8388607, %v3055_v31  ;;  %vm3375_vm3 = vcmp.gt.s32.totalorder %v16325_v13, 0 }
 0x307   : > { %v6866_v47 = vadd.s32 3, %v2938_v46  ;;  %v3224_v6 = vsub.s32 0, %v16833_v7  ;;  %v3071_v8 = vshrl.u32 %v20983_v32, %v3070_v44  ;;  %v3074_v3 = vor.u32 %v3073_v1, %v3072_v51 }
 0x308   : > { %v2934_v38 = vsel %vm2851_vm12, %v2933_v50, %v2932_v26  ;;  %v3077_v54 = vor.u32 %v3076_v0, %v3075_v14  ;;  %v3080_v23 = vor.u32 %v3079_v48, %v3078_v52  ;;  %v3083_v60 = vor.u32 %v3082_v28, %v3081_v19 }
 0x309   : > { %v2937_v22 = vsel %vm16805_vm4, %v16580_v34, %v2934_v38  ;;  %v12780_v29 = vmin.u32 %v3224_v6, %v16833_v7  ;;  %v3086_v9 = vor.u32 %v3085_v39, %v3084_v17  ;;  %vm3087_vm13 = vcmp.lt.s32.totalorder %v3068_v24, 1 }
 0x30a   : > { %v16852_v33 = vadd.s32 4294967169, %v3986_v56  ;;  %14015 = vcosq.f32 %v2937_v22  ;;  %v3063_v10 = vor.u32 8388608, %v3062_v18  ;;  %vm3090_vm14 = vcmp.lt.s32.totalorder %v3068_v24, 4 }
 0x30b   : > { %14017 = vsinq.f32 %v2937_v22  ;;  %vm3160_vm15 = vcmp.lt.s32.totalorder %v16649_v37, 0  ;;  %v3226_v30 = vclz %v12780_v29  ;;  %vm3089_vm2 = vcmp.lt.s32.totalorder %v3068_v24, 3 }
 0x30c   : > { %v3092_v59 = vsel %vm3090_vm14, %v3080_v23, 2102212464  ;;  %vm2947_vm5 = vcmp.eq.s32.totalorder %v16839_v63, 2  ;;  %v16856_v11 = vand.u32 3, %v6866_v47  ;;  %vm3088_vm6 = vcmp.lt.s32.totalorder %v3068_v24, 2 }
 0x30d   : > { %v3091_v55 = vsel %vm3087_vm13, %v3071_v8, %v3074_v3  ;;  %v3095_v44 = vsel %vm3087_vm13, %v3074_v3, %v3077_v54  ;;  %vm2944_vm8 = vcmp.eq.s32.totalorder %v16839_v63, 0  ;;  %v12781_v56 = vadd.s32 4294967294, %v3226_v30 }
 0x30e   : > { %v3096_v46 = vsel %vm3090_vm14, %v3083_v60, 920167782  ;;  %v3099_v42 = vsel %vm3087_vm13, %v3077_v54, %v3080_v23  ;;  %v3100_v51 = vsel %vm3090_vm14, %v3086_v9, 1326507024  ;;  %vm2943_vm9 = vcmp.lt.s32.totalorder %v16839_v63, 2 }
 0x30f   : > { %v3093_v14 = vsel %vm3089_vm2, %v3077_v54, %v3092_v59  ;;  %v3097_v49 = vsel %vm3089_vm2, %v3080_v23, %v3096_v46  ;;  %v3101_v1 = vsel %vm3089_vm2, %v3083_v60, %v3100_v51  ;;  %v3103_v52 = vshll.u32 %v3063_v10, 8 }
 0x310   : > { %vm2941_vm7 = vweird.f32 %v16580_v34  ;;  %v3214_v19 = vadd.s32 %v16749_v62, %v16755_v5  ;;  %vm12782_vm1 = vcmp.lt.s32.totalorder %v12781_v56, 0  ;;  %v3098_v26 = vsel %vm3088_vm6, %v3095_v44, %v3097_v49  ;;  %v16879_v62 = vld [vmem:[%s14431_s21 + $0x78] sm:$0xff] }
 0x311   : > { %v3102_v0 = vsel %vm3088_vm6, %v3099_v42, %v3101_v1  ;;  %v3229_v48 = vsel %vm12782_vm1, 0, %v12781_v56  ;;  %v3244_v28 = vsub.s32 4, %v16818_v53  ;;  %v3094_v6 = vsel %vm3088_vm6, %v3091_v55, %v3093_v14 }
 0x312   : > { %v16869_v17 = vmul.u32.u64.low %v3103_v52, %v3102_v0  ;;  %v16870_v39 = vmul.u32.u64.high %v3103_v52, %v3102_v0, %v16869_v17  ;;  %v3230_v50 = vsub.s32 32, %v3229_v48  ;;  %v3231_v18 = vshll.u32 %v16833_v7, %v3229_v48 }
 0x313   : > { %v3234_v47 = vsub.s32 4294967266, %v3229_v48  ;;  %v16874_v8 = vmul.u32.u64.low %v3103_v52, %v3098_v26  ;;  %v16875_v3 = vmul.u32.u64.high %v3103_v52, %v3098_v26, %v16874_v8  ;;  %v3364_v5 = vand.u32 2147483647, %v16879_v62  ;;  %v16919_v48 = vpop.f32.mrb[60].mxu1 }
 0x314   : > { %v3376_v38 = vsel %vm3375_vm3, %v16325_v13, 0  ;;  %v3232_v54 = vshrl.u32 %v3214_v19, %v3230_v50  ;;  %vm6868_vm10 = vcmp.lt.s32.totalorder %v16856_v11, 2  ;;  %vm6869_vm11 = vcmp.eq.s32.totalorder %v16856_v11, 0  ;;  %v14016_v7 = vpop.eup %14015 }
 0x315   : > { %v3235_v23 = vadd.s32 127, %v3234_v47  ;;  %vm16889_vm12 = vcmp.le.f32.partialorder %v3158_v2, 0.7853982  ;;  %v3245_v60 = vsel %vm3160_vm15, %v3244_v28, %v16818_v53  ;;  %vm6872_vm4 = vcmp.eq.s32.totalorder %v16856_v11, 2  ;;  %v14018_v29 = vpop.eup %14017  ;;  %v13312_v47 = vpop.f32.mrb[61].mxu1 }
 0x316   : > { %v3110_v13 = vmul.u32 %v3103_v52, %v3094_v6  ;;  %v3378_v22 = vand.u32 31, %v3376_v38  ;;  %v2948_v9 = vxor.u32 2147483648, %v14016_v7  ;;  %v3233_v10 = vor.u32 %v3232_v54, %v3231_v18 }
 0x317   : > { %v3236_v30 = vshll.u32 %v3235_v23, 23  ;;  %vm3112_vm3 = vc.u32 %v16870_v39, %v16874_v8  ;;  %v2945_v59 = vxor.u32 2147483648, %v14018_v29  ;;  %v3113_v2 = vadd.s32 1, %v16875_v3 }
 0x318   : > { %v16902_v55 = vand.u32 8388607, %v3364_v5  ;;  %v3379_v44 = vsub.s32 32, %v3378_v22  ;;  %v2949_v53 = vsel %vm2947_vm5, %v2948_v9, %v14018_v29  ;;  %v3240_v46 = vcvt.s32.f32 %v3233_v10 }
 0x319   : > { %v3237_v56 = vor.u32 4788187, %v3236_v30  ;;  %v6874_v42 = vsel %vm6872_vm4, %v2948_v9, %v14018_v29  ;;  %v2946_v51 = vsel %vm2944_vm8, %v14016_v7, %v2945_v59  ;;  %v6871_v14 = vsel %vm6869_vm11, %v14016_v7, %v2945_v59 }
 0x31a   : > { %v3114_v49 = vsel %vm3112_vm3, %v3113_v2, %v16875_v3  ;;  %v16913_v1 = vshrl.u32 %v3376_v38, 5  ;;  %v2950_v52 = vsel %vm2943_vm9, %v2946_v51, %v2949_v53  ;;  %v6875_v26 = vsel %vm6868_vm10, %v6871_v14, %v6874_v42  ;;  %v16929_v38 = vpop.f32.mrb[62].mxu1 }
 0x31b   : > { %v3238_v19 = vand.u32 2147483647, %v3237_v56  ;;  %v3115_v0 = vadd.s32 %v3114_v49, %v3110_v13  ;;  %v2951_v28 = vsel %vm2941_vm7, nan, %v2950_v52  ;;  %v6876_v17 = vsel %vm2941_vm7, nan, %v6875_v26  ;;  %v13313_v13 = vpop.f32.mrb[63].mxu1 }
 0x31c   : > { %v3381_v50 = vshll.u32 %v20983_v32, %v3378_v22  ;;  %v3382_v18 = vshrl.u32 %v20976_v61, %v3379_v44  ;;  %9738 = vperm.xlu0 %13866, %v2951_v28   ;;  %v3384_v11 = vshll.u32 %v20976_v61, %v3378_v22  ;;  %v3385_v3 = vshrl.u32 %v20974_v16, %v3379_v44 }
 0x31d   : > { %v3241_v63 = vmul.f32 %v3240_v46, %v3238_v19  ;;  %v3116_v6 = vadd.s32 536870912, %v3115_v0  ;;  %v3387_v54 = vshll.u32 %v20974_v16, %v3378_v22  ;;  %v3388_v23 = vshrl.u32 %v20972_v20, %v3379_v44 }
 0x31e   : > { %v3390_v34 = vshll.u32 %v20972_v20, %v3378_v22  ;;  %v3391_v7 = vshrl.u32 %v20981_v57, %v3379_v44  ;;  %v3247_v9 = vsel %vm16889_vm12, 0, %v3245_v60  ;;  %v3393_v30 = vshll.u32 %v20981_v57, %v3378_v22 }
 0x31f   : > { %v3242_v29 = vxor.u32 2147483648, %v3241_v63  ;;  %v16937_v10 = vshrl.u32 %v3116_v6, 30  ;;  %vm3272_vm13 = vcmp.gt.s32.totalorder %v16327_v36, 0  ;;  %v3372_v59 = vor.u32 8388608, %v16902_v55 }
 0x320   : > { %v3383_v2 = vor.u32 %v3382_v18, %v3381_v50  ;;  %v3394_v53 = vshrl.u32 %v20980_v41, %v3379_v44  ;;  %vm3396_vm14 = vcmp.lt.s32.totalorder %v16913_v1, 1  ;;  %10016 = vperm.xlu0 %13866, %v6876_v17   ;;  %v3386_v60 = vor.u32 %v3385_v3, %v3384_v11 }
 0x321   : > { %v3243_v56 = vsel %vm3160_vm15, %v3242_v29, %v3241_v63  ;;  %v3118_v46 = vshll.u32 %v16937_v10, 30  ;;  %v3392_v42 = vor.u32 %v3391_v7, %v3390_v34  ;;  %v3389_v51 = vor.u32 %v3388_v23, %v3387_v54 }
 0x322   : > { %v3246_v22 = vsel %vm16889_vm12, %v16649_v37, %v3243_v56  ;;  %v3395_v14 = vor.u32 %v3394_v53, %v3393_v30  ;;  %vm3399_vm2 = vcmp.lt.s32.totalorder %v16913_v1, 4  ;;  %v7178_v55 = vadd.s32 3, %v3247_v9 }
 0x323   : > { %14019 = vcosq.f32 %v3246_v22  ;;  %v16951_v49 = vsub.s32 %v3115_v0, %v3118_v46  ;;  %vm3398_vm5 = vcmp.lt.s32.totalorder %v16913_v1, 3  ;;  %v3251_v52 = vand.u32 3, %v3247_v9 }
 0x324   : > { %14021 = vsinq.f32 %v3246_v22  ;;  %v3380_v19 = vshrl.u32 %v20983_v32, %v3379_v44  ;;  %vm3397_vm15 = vcmp.lt.s32.totalorder %v16913_v1, 2  ;;  %v3401_v24 = vsel %vm3399_vm2, %v3389_v51, 2102212464 }
 0x325   : > { %v3121_v26 = vsub.s32 0, %v16951_v49  ;;  %v3404_v28 = vsel %vm3396_vm14, %v3383_v2, %v3386_v60  ;;  %v3405_v17 = vsel %vm3399_vm2, %v3392_v42, 920167782  ;;  %v3408_v0 = vsel %vm3396_vm14, %v3386_v60, %v3389_v51 }
 0x326   : > { %v3406_v50 = vsel %vm3398_vm5, %v3389_v51, %v3405_v17  ;;  %v3409_v18 = vsel %vm3399_vm2, %v3395_v14, 1326507024  ;;  %v3412_v47 = vshll.u32 %v3372_v59, 8  ;;  %v16964_v63 = vadd.s32 1, %v16794_v27 }
 0x327   : > { %v16967_v44 = vadd.s32 4294967169, %v16800_v43  ;;  %v7179_v6 = vand.u32 3, %v7178_v55  ;;  %v12776_v11 = vmin.u32 %v3121_v26, %v16951_v49  ;;  %vm3250_vm6 = vweird.f32 %v16649_v37 }
 0x328   : > { %v3400_v3 = vsel %vm3396_vm14, %v3380_v19, %v3383_v2  ;;  %v3402_v54 = vsel %vm3398_vm5, %v3386_v60, %v3401_v24  ;;  %v3407_v23 = vsel %vm3397_vm15, %v3404_v28, %v3406_v50  ;;  %v3410_v27 = vsel %vm3398_vm5, %v3392_v42, %v3409_v18 }
 0x329   : > { %v3123_v34 = vclz %v12776_v11  ;;  %v3411_v43 = vsel %vm3397_vm15, %v3408_v0, %v3410_v27  ;;  %v16981_v7 = vmul.u32.u64.low %v3412_v47, %v3407_v23  ;;  %v16982_v13 = vmul.u32.u64.high %v3412_v47, %v3407_v23, %v16981_v7 }
 0x32a   : > { %vm3252_vm8 = vcmp.lt.s32.totalorder %v3251_v52, 2  ;;  %vm3253_vm9 = vcmp.eq.s32.totalorder %v3251_v52, 0  ;;  %v16985_v29 = vmul.u32.u64.low %v3412_v47, %v3411_v43  ;;  %v16986_v9 = vmul.u32.u64.high %v3412_v47, %v3411_v43, %v16985_v29 }
 0x32b   : > { %vm3256_vm7 = vcmp.eq.s32.totalorder %v3251_v52, 2  ;;  %vm3057_vm1 = vcmp.lt.s32.totalorder %v16821_v45, 0  ;;  %v12777_v30 = vadd.s32 4294967294, %v3123_v34  ;;  %v3403_v59 = vsel %vm3397_vm15, %v3400_v3, %v3402_v54  ;;  %v17017_v34 = vld [vmem:[%s14431_s21 + $0x70] sm:$0xff] }
 0x32c   : > { %v3273_v2 = vsel %vm3272_vm13, %v16327_v36, 0  ;;  %vm7180_vm10 = vcmp.lt.s32.totalorder %v7179_v6, 2  ;;  %vm7181_vm11 = vcmp.eq.s32.totalorder %v7179_v6, 0  ;;  %vm7184_vm12 = vcmp.eq.s32.totalorder %v7179_v6, 2 }
 0x32d   : > { %v3111_v53 = vadd.s32 %v16874_v8, %v16870_v39  ;;  %v14020_v56 = vpop.eup %14019  ;;  %vm12778_vm4 = vcmp.lt.s32.totalorder %v12777_v30, 0  ;;  %v3141_v46 = vsub.s32 4, %v16937_v10  ;;  %v3422_v60 = vadd.s32 1, %v16982_v13 }
 0x32e   : > { %v3275_v42 = vand.u32 31, %v3273_v2  ;;  %v14022_v22 = vpop.eup %14021  ;;  %v3257_v1 = vxor.u32 2147483648, %v14020_v56  ;;  %v3126_v51 = vsel %vm12778_vm4, 0, %v12777_v30  ;;  %v3419_v14 = vmul.u32 %v3412_v47, %v3403_v59 }
 0x32f   : > { %vm3421_vm3 = vc.u32 %v16986_v9, %v16981_v7  ;;  %v3254_v36 = vxor.u32 2147483648, %v14022_v22  ;;  %v3127_v55 = vsub.s32 32, %v3126_v51  ;;  %v3128_v19 = vshll.u32 %v16951_v49, %v3126_v51 }
 0x330   : > { %v3131_v26 = vsub.s32 4294967266, %v3126_v51  ;;  %v3258_v39 = vsel %vm3256_vm7, %v3257_v1, %v14022_v22  ;;  %v7186_v8 = vsel %vm7184_vm12, %v3257_v1, %v14022_v22  ;;  %v3423_v24 = vsel %vm3421_vm3, %v3422_v60, %v16982_v13 }
 0x331   : > { %v3276_v28 = vsub.s32 32, %v3275_v42  ;;  %v3255_v17 = vsel %vm3253_vm9, %v14020_v56, %v3254_v36  ;;  %v7183_v50 = vsel %vm7181_vm11, %v14020_v56, %v3254_v36  ;;  %v3129_v0 = vshrl.u32 %v3111_v53, %v3127_v55 }
 0x332   : > { %v3132_v18 = vadd.s32 127, %v3131_v26  ;;  %v3259_v47 = vsel %vm3252_vm8, %v3255_v17, %v3258_v39  ;;  %v7187_v11 = vsel %vm7180_vm10, %v7183_v50, %v7186_v8  ;;  %vm17010_vm13 = vcmp.le.f32.partialorder %v3055_v31, 0.7853982 }
 0x333   : > { %v3424_v3 = vadd.s32 %v3423_v24, %v3419_v14  ;;  %v3260_v54 = vsel %vm3250_vm6, nan, %v3259_v47  ;;  %v3130_v23 = vor.u32 %v3129_v0, %v3128_v19  ;;  %v3261_v43 = vand.u32 2147483647, %v17017_v34 }
 0x334   : > { %v3133_v27 = vshll.u32 %v3132_v18, 23  ;;  %9753 = vperm.xlu1 %13865, %v3260_v54   ;;  %v7188_v52 = vsel %vm3250_vm6, nan, %v7187_v11  ;;  %v3142_v31 = vsel %vm3057_vm1, %v3141_v46, %v16937_v10  ;;  %v17025_v13 = vshrl.u32 %v3273_v2, 5 }
 0x335   : > { %v3425_v6 = vadd.s32 536870912, %v3424_v3  ;;  %v3137_v30 = vcvt.s32.f32 %v3130_v23  ;;  %v3278_v59 = vshll.u32 %v20983_v32, %v3275_v42  ;;  %v3279_v53 = vshrl.u32 %v20976_v61, %v3276_v28 }
 0x336   : > { %v3134_v29 = vor.u32 4788187, %v3133_v27  ;;  %v3281_v60 = vshll.u32 %v20976_v61, %v3275_v42  ;;  %v3282_v37 = vshrl.u32 %v20974_v16, %v3276_v28  ;;  %v3287_v22 = vshll.u32 %v20972_v20, %v3275_v42 }
 0x337   : > { %v17029_v56 = vshrl.u32 %v3425_v6, 30  ;;  %v3284_v10 = vshll.u32 %v20974_v16, %v3275_v42  ;;  %v3285_v2 = vshrl.u32 %v20972_v20, %v3276_v28  ;;  %v3288_v46 = vshrl.u32 %v20981_v57, %v3276_v28 }
 0x338   : > { %v3135_v1 = vand.u32 2147483647, %v3134_v29  ;;  %v17038_v51 = vadd.s32 1, %v16810_v21  ;;  %10031 = vperm.xlu1 %13865, %v7188_v52   ;;  %v3144_v14 = vsel %vm17010_vm13, 0, %v3142_v31  ;;  %v3268_v55 = vand.u32 8388607, %v3261_v43 }
 0x339   : > { %v3427_v36 = vshll.u32 %v17029_v56, 30  ;;  %v3277_v26 = vshrl.u32 %v20983_v32, %v3276_v28  ;;  %v3280_v39 = vor.u32 %v3279_v53, %v3278_v59  ;;  %v3289_v8 = vor.u32 %v3288_v46, %v3287_v22 }
 0x33a   : > { %v3138_v19 = vmul.f32 %v3137_v30, %v3135_v1  ;;  %v3283_v17 = vor.u32 %v3282_v37, %v3281_v60  ;;  %v3290_v21 = vshll.u32 %v20981_v57, %v3275_v42  ;;  %v3291_v50 = vshrl.u32 %v20980_v41, %v3276_v28 }
 0x33b   : > { %v17046_v24 = vsub.s32 %v3424_v3, %v3427_v36  ;;  %v3286_v18 = vor.u32 %v3285_v2, %v3284_v10  ;;  %vm3293_vm14 = vcmp.lt.s32.totalorder %v17025_v13, 1  ;;  %vm3296_vm2 = vcmp.lt.s32.totalorder %v17025_v13, 4 }
 0x33c   : > { %v3139_v0 = vxor.u32 2147483648, %v3138_v19  ;;  %v7074_v11 = vadd.s32 3, %v3144_v14  ;;  %v3269_v54 = vor.u32 8388608, %v3268_v55  ;;  %vm3294_vm5 = vcmp.lt.s32.totalorder %v17025_v13, 2 }
 0x33d   : > { %v3430_v47 = vsub.s32 0, %v17046_v24  ;;  %vm3295_vm15 = vcmp.lt.s32.totalorder %v17025_v13, 3  ;;  %v3298_v42 = vsel %vm3296_vm2, %v3286_v18, 2102212464  ;;  %v3302_v28 = vsel %vm3296_vm2, %v3289_v8, 920167782 }
 0x33e   : > { %v3140_v3 = vsel %vm3057_vm1, %v3139_v0, %v3138_v19  ;;  %v3292_v52 = vor.u32 %v3291_v50, %v3290_v21  ;;  %v3301_v31 = vsel %vm3293_vm14, %v3280_v39, %v3283_v17  ;;  %vm3581_vm6 = vcmp.gt.s32.totalorder %v16964_v63, 0  ;;  %v17117_v0 = vld [vmem:[%s14431_s21 + $0x88] sm:$0xff] }
 0x33f   : > { %v3143_v23 = vsel %vm17010_vm13, %v16821_v45, %v3140_v3  ;;  %v12788_v27 = vmin.u32 %v3430_v47, %v17046_v24  ;;  %v17068_v6 = vand.u32 3, %v3144_v14  ;;  %v3297_v29 = vsel %vm3293_vm14, %v3277_v26, %v3280_v39 }
 0x340   : > { %14023 = vcosq.f32 %v3143_v23  ;;  %vm17074_vm8 = vcmp.le.f32.partialorder %v3364_v5, 0.7853982  ;;  %v3299_v59 = vsel %vm3295_vm15, %v3283_v17, %v3298_v42  ;;  %v3303_v53 = vsel %vm3295_vm15, %v3286_v18, %v3302_v28 }
 0x341   : > { %14025 = vsinq.f32 %v3143_v23  ;;  %v3432_v30 = vclz %v12788_v27  ;;  %vm3366_vm9 = vcmp.lt.s32.totalorder %v16879_v62, 0  ;;  %v7075_v60 = vand.u32 3, %v7074_v11 }
 0x342   : > { %v3304_v37 = vsel %vm3294_vm5, %v3301_v31, %v3303_v53  ;;  %v3305_v22 = vsel %vm3293_vm14, %v3283_v17, %v3286_v18  ;;  %v3450_v1 = vsub.s32 4, %v17029_v56  ;;  %v3306_v10 = vsel %vm3296_vm2, %v3292_v52, 1326507024 }
 0x343   : > { %v12789_v5 = vadd.s32 4294967294, %v3432_v30  ;;  %v3309_v2 = vshll.u32 %v3269_v54, 8  ;;  %vm3149_vm7 = vcmp.lt.s32.totalorder %v17068_v6, 2  ;;  %v3420_v46 = vadd.s32 %v16981_v7, %v16986_v9 }
 0x344   : > { %v3300_v14 = vsel %vm3294_vm5, %v3297_v29, %v3299_v59  ;;  %v3307_v36 = vsel %vm3295_vm15, %v3289_v8, %v3306_v10  ;;  %v3582_v55 = vsel %vm3581_vm6, %v16964_v63, 0  ;;  %vm3147_vm1 = vweird.f32 %v16821_v45 }
 0x345   : > { %vm12790_vm10 = vcmp.lt.s32.totalorder %v12789_v5, 0  ;;  %v3308_v19 = vsel %vm3294_vm5, %v3305_v22, %v3307_v36  ;;  %v17103_v26 = vmul.u32.u64.low %v3309_v2, %v3304_v37  ;;  %v17104_v39 = vmul.u32.u64.high %v3309_v2, %v3304_v37, %v17103_v26 }
 0x346   : > { %vm3150_vm11 = vcmp.eq.s32.totalorder %v17068_v6, 0  ;;  %v3435_v7 = vsel %vm12790_vm10, 0, %v12789_v5  ;;  %v17108_v9 = vmul.u32.u64.low %v3309_v2, %v3308_v19  ;;  %v17109_v17 = vmul.u32.u64.high %v3309_v2, %v3308_v19, %v17108_v9 }
 0x347   : > { %v3436_v8 = vsub.s32 32, %v3435_v7  ;;  %v3437_v21 = vshll.u32 %v17046_v24, %v3435_v7  ;;  %v3440_v63 = vsub.s32 4294967266, %v3435_v7  ;;  %v3451_v50 = vsel %vm3366_vm9, %v3450_v1, %v17029_v56 }
 0x348   : > { %vm3153_vm12 = vcmp.eq.s32.totalorder %v17068_v6, 2  ;;  %v3316_v13 = vmul.u32 %v3309_v2, %v3300_v14  ;;  %v3570_v18 = vand.u32 2147483647, %v17117_v0  ;;  %v3584_v47 = vand.u32 31, %v3582_v55  ;;  %v17137_v14 = vpop.f32.mrb[64].mxu1 }
 0x349   : > { %v3438_v11 = vshrl.u32 %v3420_v46, %v3436_v8  ;;  %v3441_v54 = vadd.s32 127, %v3440_v63  ;;  %vm7076_vm4 = vcmp.lt.s32.totalorder %v7075_v60, 2  ;;  %v3319_v3 = vadd.s32 1, %v17104_v39  ;;  %v13316_v9 = vpop.f32.mrb[65].mxu1 }
 0x34a   : > { %v14024_v42 = vpop.eup %14023  ;;  %v3453_v24 = vsel %vm17074_vm8, 0, %v3451_v50  ;;  %vm7077_vm3 = vcmp.eq.s32.totalorder %v7075_v60, 0  ;;  %vm7080_vm13 = vcmp.eq.s32.totalorder %v7075_v60, 2  ;;  %vm3318_vm14 = vc.u32 %v17109_v17, %v17103_v26 }
 0x34b   : > { %v14026_v56 = vpop.eup %14025  ;;  %v3154_v28 = vxor.u32 2147483648, %v14024_v42  ;;  %v3439_v23 = vor.u32 %v3438_v11, %v3437_v21  ;;  %v3442_v27 = vshll.u32 %v3441_v54, 23  ;;  %v3320_v52 = vsel %vm3318_vm14, %v3319_v3, %v17104_v39 }
 0x34c   : > { %v3151_v31 = vxor.u32 2147483648, %v14026_v56  ;;  %v3321_v29 = vadd.s32 %v3320_v52, %v3316_v13  ;;  %v17128_v30 = vand.u32 8388607, %v3570_v18  ;;  %v3585_v59 = vsub.s32 32, %v3584_v47 }
 0x34d   : > { %v3155_v53 = vsel %vm3153_vm12, %v3154_v28, %v14026_v56  ;;  %v3443_v37 = vor.u32 4788187, %v3442_v27  ;;  %v3446_v22 = vcvt.s32.f32 %v3439_v23  ;;  %v7082_v5 = vsel %vm7080_vm13, %v3154_v28, %v14026_v56  ;;  %v17157_v56 = vpop.f32.mrb[66].mxu1 }
 0x34e   : > { %v3152_v1 = vsel %vm3150_vm11, %v14024_v42, %v3151_v31  ;;  %v7079_v10 = vsel %vm7077_vm3, %v14024_v42, %v3151_v31  ;;  %v3322_v2 = vadd.s32 536870912, %v3321_v29  ;;  %v17135_v46 = vshrl.u32 %v3582_v55, 5  ;;  %v13317_v52 = vpop.f32.mrb[67].mxu1 }
 0x34f   : > { %v3156_v36 = vsel %vm3149_vm7, %v3152_v1, %v3155_v53  ;;  %v3444_v19 = vand.u32 2147483647, %v3443_v37  ;;  %v7083_v39 = vsel %vm7076_vm4, %v7079_v10, %v7082_v5  ;;  %v3587_v7 = vshll.u32 %v20983_v32, %v3584_v47 }
 0x350   : > { %v3157_v8 = vsel %vm3147_vm1, nan, %v3156_v36  ;;  %v17145_v21 = vshrl.u32 %v3322_v2, 30  ;;  %v3588_v63 = vshrl.u32 %v20976_v61, %v3585_v59  ;;  %v3590_v55 = vshll.u32 %v20976_v61, %v3584_v47 }
 0x351   : > { %9748 = vperm.xlu0 %13866, %v3157_v8   ;;  %v3447_v50 = vmul.f32 %v3446_v22, %v3444_v19  ;;  %v7084_v6 = vsel %vm3147_vm1, nan, %v7083_v39  ;;  %v3591_v60 = vshrl.u32 %v20974_v16, %v3585_v59  ;;  %v3593_v13 = vshll.u32 %v20974_v16, %v3584_v47 }
 0x352   : > { %v3324_v11 = vshll.u32 %v17145_v21, 30  ;;  %v3594_v54 = vshrl.u32 %v20972_v20, %v3585_v59  ;;  %v3596_v3 = vshll.u32 %v20972_v20, %v3584_v47  ;;  %v3597_v42 = vshrl.u32 %v20981_v57, %v3585_v59 }
 0x353   : > { %v3448_v28 = vxor.u32 2147483648, %v3447_v50  ;;  %v17159_v23 = vand.u32 3, %v3453_v24  ;;  %v7386_v27 = vadd.s32 3, %v3453_v24  ;;  %v3599_v45 = vshll.u32 %v20981_v57, %v3584_v47 }
 0x354   : > { %v17162_v31 = vsub.s32 %v3321_v29, %v3324_v11  ;;  %v3578_v53 = vor.u32 8388608, %v17128_v30  ;;  %v3586_v37 = vshrl.u32 %v20983_v32, %v3585_v59  ;;  %v3600_v22 = vshrl.u32 %v20980_v41, %v3585_v59 }
 0x355   : > { %v3449_v5 = vsel %vm3366_vm9, %v3448_v28, %v3447_v50  ;;  %10026 = vperm.xlu0 %13866, %v7084_v6   ;;  %v3589_v1 = vor.u32 %v3588_v63, %v3587_v7  ;;  %v3592_v10 = vor.u32 %v3591_v60, %v3590_v55  ;;  %v3598_v2 = vor.u32 %v3597_v42, %v3596_v3 }
 0x356   : > { %v3452_v47 = vsel %vm17074_vm8, %v16879_v62, %v3449_v5  ;;  %v3327_v24 = vsub.s32 0, %v17162_v31  ;;  %v3595_v29 = vor.u32 %v3594_v54, %v3593_v13  ;;  %vm3602_vm2 = vcmp.lt.s32.totalorder %v17135_v46, 1 }
 0x357   : > { %14027 = vcosq.f32 %v3452_v47  ;;  %v3601_v30 = vor.u32 %v3600_v22, %v3599_v45  ;;  %vm3604_vm5 = vcmp.lt.s32.totalorder %v17135_v46, 3  ;;  %vm3605_vm15 = vcmp.lt.s32.totalorder %v17135_v46, 4 }
 0x358   : > { %14029 = vsinq.f32 %v3452_v47  ;;  %v17176_v59 = vand.u32 3, %v7386_v27  ;;  %v12784_v36 = vmin.u32 %v3327_v24, %v17162_v31  ;;  %vm3603_vm6 = vcmp.lt.s32.totalorder %v17135_v46, 2 }
 0x359   : > { %v3607_v49 = vsel %vm3605_vm15, %v3595_v29, 2102212464  ;;  %v3610_v19 = vsel %vm3602_vm2, %v3589_v1, %v3592_v10  ;;  %v3611_v39 = vsel %vm3605_vm15, %v3598_v2, 920167782  ;;  %v1679_v7 = vadd.f32 %v16741_v15, %v16919_v48 }
 0x35a   : > { %v3317_v9 = vadd.s32 %v17103_v26, %v17109_v17  ;;  %v3329_v8 = vclz %v12784_v36  ;;  %v3612_v63 = vsel %vm3604_vm5, %v3595_v29, %v3611_v39  ;;  %v3614_v55 = vsel %vm3602_vm2, %v3592_v10, %v3595_v29 }
 0x35b   : > { %v3606_v50 = vsel %vm3602_vm2, %v3586_v37, %v3589_v1  ;;  %v3613_v6 = vsel %vm3603_vm6, %v3610_v19, %v3612_v63  ;;  %v3615_v60 = vsel %vm3605_vm15, %v3601_v30, 1326507024  ;;  %v3618_v13 = vshll.u32 %v3578_v53, 8 }
 0x35c   : > { %vm3456_vm8 = vweird.f32 %v16879_v62  ;;  %vm3263_vm9 = vcmp.lt.s32.totalorder %v17017_v34, 0  ;;  %v12785_v48 = vadd.s32 4294967294, %v3329_v8  ;;  %v3608_v26 = vsel %vm3604_vm5, %v3592_v10, %v3607_v49 }
 0x35d   : > { %v3616_v17 = vsel %vm3604_vm5, %v3598_v2, %v3615_v60  ;;  %v1682_v11 = vadd.f32 %v16741_v15, %v16929_v38  ;;  %vm3478_vm7 = vcmp.gt.s32.totalorder %v16562_v40, 0  ;;  %v1793_v28 = vmax.f32 %v1679_v7, 0.0 }
 0x35e   : > { %v3617_v54 = vsel %vm3603_vm6, %v3614_v55, %v3616_v17  ;;  %v17205_v3 = vmul.u32.u64.low %v3618_v13, %v3613_v6  ;;  %v17206_v42 = vmul.u32.u64.high %v3618_v13, %v3613_v6, %v17205_v3  ;;  %vm12786_vm1 = vcmp.lt.s32.totalorder %v12785_v48, 0  ;;  %v17248_v17 = vld [vmem:[%s14431_s21 + $0x80] sm:$0xff] }
 0x35f   : > { %v17209_v27 = vmul.u32.u64.low %v3618_v13, %v3617_v54  ;;  %v17210_v45 = vmul.u32.u64.high %v3618_v13, %v3617_v54, %v17209_v27  ;;  %v1794_v52 = vmax.f32 %v1682_v11, 0.0  ;;  %vm3458_vm10 = vcmp.lt.s32.totalorder %v17159_v23, 2  ;;  %v17255_v54 = vld [vmem:[%s14431_s21 + $0xc0] sm:$0xff] }
 0x360   : > { %vm3459_vm11 = vcmp.eq.s32.totalorder %v17159_v23, 0  ;;  %v3332_v15 = vsel %vm12786_vm1, 0, %v12785_v48  ;;  %v3609_v38 = vsel %vm3603_vm6, %v3606_v50, %v3608_v26  ;;  %vm3462_vm12 = vcmp.eq.s32.totalorder %v17159_v23, 2  ;;  %v17308_v48 = vld [vmem:[%s14431_s21 + $0x98] sm:$0xff] }
 0x361   : > { %v3333_v53 = vsub.s32 32, %v3332_v15  ;;  %v3334_v37 = vshll.u32 %v17162_v31, %v3332_v15  ;;  %v3337_v22 = vsub.s32 4294967266, %v3332_v15  ;;  %v10864_v5 = vpack.c.bf16 %v1794_v52, %v1793_v28  ;;  %v14028_v1 = vpop.eup %14027 }
 0x362   : > { %vm7392_vm4 = vcmp.eq.s32.totalorder %v17176_v59, 2  ;;  %v3347_v10 = vsub.s32 4, %v17145_v21  ;;  %v3628_v2 = vadd.s32 1, %v17206_v42  ;;  %v14030_v47 = vpop.eup %14029  ;;  %v3463_v24 = vxor.u32 2147483648, %v14028_v1 }
 0x363   : > { %vm7389_vm3 = vcmp.eq.s32.totalorder %v17176_v59, 0  ;;  %v3335_v46 = vshrl.u32 %v3317_v9, %v3333_v53  ;;  %v3338_v29 = vadd.s32 127, %v3337_v22  ;;  %11066 = vmatmul.mubr.bf16.gmra.mrb[64].mxu0 %v10864_v5  ;;  %v3460_v30 = vxor.u32 2147483648, %v14030_v47 }
 0x364   : > { %vm7388_vm13 = vcmp.lt.s32.totalorder %v17176_v59, 2  ;;  %v3625_v31 = vmul.u32 %v3618_v13, %v3609_v38  ;;  %vm3627_vm14 = vc.u32 %v17210_v45, %v17205_v3  ;;  %11075 = vmatprep.mubr.bf16.mxu0 %v20978_v4  ;;  %v3464_v36 = vsel %vm3462_vm12, %v3463_v24, %v14030_v47 }
 0x365   : > { %v7394_v49 = vsel %vm7392_vm4, %v3463_v24, %v14030_v47  ;;  %v3336_v19 = vor.u32 %v3335_v46, %v3334_v37  ;;  %v3339_v39 = vshll.u32 %v3338_v29, 23  ;;  %v3461_v7 = vsel %vm3459_vm11, %v14028_v1, %v3460_v30 }
 0x366   : > { %v7391_v9 = vsel %vm7389_vm3, %v14028_v1, %v3460_v30  ;;  %v3348_v8 = vsel %vm3263_vm9, %v3347_v10, %v17145_v21  ;;  %v3629_v59 = vsel %vm3627_vm14, %v3628_v2, %v17206_v42  ;;  %v3465_v63 = vsel %vm3458_vm10, %v3461_v7, %v3464_v36 }
 0x367   : > { %v7395_v55 = vsel %vm7388_vm13, %v7391_v9, %v7394_v49  ;;  %v3340_v50 = vor.u32 4788187, %v3339_v39  ;;  %v3343_v6 = vcvt.s32.f32 %v3336_v19  ;;  %v17235_v60 = vadd.s32 4294967169, %v16814_v35 }
 0x368   : > { %v3466_v13 = vsel %vm3456_vm8, nan, %v3465_v63  ;;  %vm17241_vm2 = vcmp.le.f32.partialorder %v3261_v43, 0.7853982  ;;  %v3630_v21 = vadd.s32 %v3629_v59, %v3625_v31  ;;  %v3467_v35 = vand.u32 2147483647, %v17248_v17 }
 0x369   : > { %9763 = vperm.xlu1 %13865, %v3466_v13   ;;  %v3341_v23 = vand.u32 2147483647, %v3340_v50  ;;  %v3350_v26 = vsel %vm17241_vm2, 0, %v3348_v8  ;;  %v3479_v11 = vsel %vm3478_vm7, %v16562_v40, 0  ;;  %v4294_v43 = vand.u32 2139095040, %v17255_v54  ;;  %v17270_v40 = vld [vmem:[%s14431_s21 + $0xd0] sm:$0xff] }
 0x36a   : > { %v7396_v42 = vsel %vm3456_vm8, nan, %v7395_v55  ;;  %v3631_v28 = vadd.s32 536870912, %v3630_v21  ;;  %v3481_v27 = vand.u32 31, %v3479_v11  ;;  %v17261_v52 = vadd.s32 1, %v16837_v25 }
 0x36b   : > { %v17264_v15 = vadd.s32 1, %v16852_v33  ;;  %v17267_v38 = vadd.s32 1, %v16967_v44  ;;  %v3344_v53 = vmul.f32 %v3343_v6, %v3341_v23  ;;  %v4500_v37 = vand.u32 2139095040, %v17270_v40 }
 0x36c   : > { %v17273_v22 = vand.u32 3, %v3350_v26  ;;  %v17275_v62 = vshrl.u32 %v3631_v28, 30  ;;  %v3482_v5 = vsub.s32 32, %v3481_v27  ;;  %v7282_v25 = vadd.s32 3, %v3350_v26 }
 0x36d   : > { %10041 = vperm.xlu1 %13865, %v7396_v42   ;;  %v3345_v1 = vxor.u32 2147483648, %v3344_v53  ;;  %v3474_v33 = vand.u32 8388607, %v3467_v35  ;;  %v17279_v10 = vshrl.u32 %v3479_v11, 5  ;;  %v3484_v2 = vshll.u32 %v20983_v32, %v3481_v27 }
 0x36e   : > { %v3633_v44 = vshll.u32 %v17275_v62, 30  ;;  %v3487_v47 = vshll.u32 %v20976_v61, %v3481_v27  ;;  %v3490_v24 = vshll.u32 %v20974_v16, %v3481_v27  ;;  %vm3787_vm5 = vcmp.gt.s32.totalorder %v17038_v51, 0 }
 0x36f   : > { %v3346_v46 = vsel %vm3263_vm9, %v3345_v1, %v3344_v53  ;;  %v3485_v29 = vshrl.u32 %v20976_v61, %v3482_v5  ;;  %v3488_v30 = vshrl.u32 %v20974_v16, %v3482_v5  ;;  %v3493_v31 = vshll.u32 %v20972_v20, %v3481_v27 }
 0x370   : > { %v3349_v36 = vsel %vm17241_vm2, %v17017_v34, %v3346_v46  ;;  %v17294_v49 = vsub.s32 %v3630_v21, %v3633_v44  ;;  %v3491_v19 = vshrl.u32 %v20972_v20, %v3482_v5  ;;  %v3494_v39 = vshrl.u32 %v20981_v57, %v3482_v5 }
 0x371   : > { %14031 = vcosq.f32 %v3349_v36  ;;  %v3626_v7 = vadd.s32 %v17205_v3, %v17210_v45  ;;  %v17300_v9 = vand.u32 3, %v7282_v25  ;;  %v3496_v8 = vshll.u32 %v20981_v57, %v3481_v27 }
 0x372   : > { %14033 = vsinq.f32 %v3349_v36  ;;  %v3636_v59 = vsub.s32 0, %v17294_v49  ;;  %v3475_v63 = vor.u32 8388608, %v3474_v33  ;;  %v3483_v55 = vshrl.u32 %v20983_v32, %v3482_v5 }
 0x373   : > { %vm3359_vm15 = vcmp.eq.s32.totalorder %v17273_v22, 2  ;;  %v3486_v50 = vor.u32 %v3485_v29, %v3484_v2  ;;  %v3489_v6 = vor.u32 %v3488_v30, %v3487_v47  ;;  %v3497_v13 = vshrl.u32 %v20980_v41, %v3482_v5 }
 0x374   : > { %v3776_v3 = vand.u32 2147483647, %v17308_v48  ;;  %vm3356_vm6 = vcmp.eq.s32.totalorder %v17273_v22, 0  ;;  %v12796_v45 = vmin.u32 %v3636_v59, %v17294_v49  ;;  %v3492_v21 = vor.u32 %v3491_v19, %v3490_v24 }
 0x375   : > { %v3495_v23 = vor.u32 %v3494_v39, %v3493_v31  ;;  %vm3499_vm8 = vcmp.lt.s32.totalorder %v17279_v10, 1  ;;  %vm3355_vm9 = vcmp.lt.s32.totalorder %v17273_v22, 2  ;;  %vm7284_vm7 = vcmp.lt.s32.totalorder %v17300_v9, 2 }
 0x376   : > { %vm7285_vm1 = vcmp.eq.s32.totalorder %v17300_v9, 0  ;;  %vm7288_vm10 = vcmp.eq.s32.totalorder %v17300_v9, 2  ;;  %v3498_v26 = vor.u32 %v3497_v13, %v3496_v8  ;;  %vm3502_vm11 = vcmp.lt.s32.totalorder %v17279_v10, 4 }
 0x377   : > { %vm3353_vm12 = vweird.f32 %v17017_v34  ;;  %v3638_v11 = vclz %v12796_v45  ;;  %vm3501_vm4 = vcmp.lt.s32.totalorder %v17279_v10, 3  ;;  %v3503_v42 = vsel %vm3499_vm8, %v3483_v55, %v3486_v50 }
 0x378   : > { %v3504_v28 = vsel %vm3502_vm11, %v3492_v21, 2102212464  ;;  %vm3500_vm3 = vcmp.lt.s32.totalorder %v17279_v10, 2  ;;  %v3507_v53 = vsel %vm3499_vm8, %v3486_v50, %v3489_v6  ;;  %v3515_v5 = vshll.u32 %v3475_v63, 8 }
 0x379   : > { %v3505_v27 = vsel %vm3501_vm4, %v3489_v6, %v3504_v28  ;;  %vm3572_vm13 = vcmp.lt.s32.totalorder %v17117_v0, 0  ;;  %v12797_v1 = vadd.s32 4294967294, %v3638_v11  ;;  %v3508_v25 = vsel %vm3502_vm11, %v3495_v23, 920167782 }
 0x37a   : > { %v3511_v33 = vsel %vm3499_vm8, %v3489_v6, %v3492_v21  ;;  %v17337_v44 = vand.u32 8388607, %v3776_v3  ;;  %v3656_v2 = vsub.s32 4, %v17275_v62  ;;  %v3506_v47 = vsel %vm3500_vm3, %v3503_v42, %v3505_v27 }
 0x37b   : > { %v3509_v24 = vsel %vm3501_vm4, %v3492_v21, %v3508_v25  ;;  %v3512_v46 = vsel %vm3502_vm11, %v3498_v26, 1326507024  ;;  %vm12798_vm14 = vcmp.lt.s32.totalorder %v12797_v1, 0  ;;  %v3788_v31 = vsel %vm3787_vm5, %v17038_v51, 0  ;;  %v14032_v36 = vpop.eup %14031 }
 0x37c   : > { %v3510_v29 = vsel %vm3500_vm3, %v3507_v53, %v3509_v24  ;;  %v3513_v30 = vsel %vm3501_vm4, %v3495_v23, %v3512_v46  ;;  %v3641_v19 = vsel %vm12798_vm14, 0, %v12797_v1  ;;  %v14034_v63 = vpop.eup %14033  ;;  %v3360_v55 = vxor.u32 2147483648, %v14032_v36 }
 0x37d   : > { %v3514_v39 = vsel %vm3500_vm3, %v3511_v33, %v3513_v30  ;;  %v17355_v8 = vmul.u32.u64.low %v3515_v5, %v3510_v29  ;;  %v17356_v59 = vmul.u32.u64.high %v3515_v5, %v3510_v29, %v17355_v8  ;;  %v3642_v50 = vsub.s32 32, %v3641_v19 }
 0x37e   : > { %v3643_v6 = vshll.u32 %v17294_v49, %v3641_v19  ;;  %v3646_v13 = vsub.s32 4294967266, %v3641_v19  ;;  %v3357_v45 = vxor.u32 2147483648, %v14034_v63  ;;  %vm17362_vm2 = vcmp.le.f32.partialorder %v3570_v18, 0.7853982 }
 0x37f   : > { %v17366_v21 = vmul.u32.u64.low %v3515_v5, %v3514_v39  ;;  %v17367_v10 = vmul.u32.u64.high %v3515_v5, %v3514_v39, %v17366_v21  ;;  %v3522_v23 = vmul.u32 %v3515_v5, %v3506_v47  ;;  %v3361_v26 = vsel %vm3359_vm15, %v3360_v55, %v14034_v63 }
 0x380   : > { %v3644_v11 = vshrl.u32 %v3626_v7, %v3642_v50  ;;  %v3647_v42 = vadd.s32 127, %v3646_v13  ;;  %v7290_v49 = vsel %vm7288_vm10, %v3360_v55, %v14034_v63  ;;  %v3358_v28 = vsel %vm3356_vm6, %v14032_v36, %v3357_v45 }
 0x381   : > { %v7287_v18 = vsel %vm7285_vm1, %v14032_v36, %v3357_v45  ;;  %v3525_v27 = vadd.s32 1, %v17356_v59  ;;  %v3790_v53 = vand.u32 31, %v3788_v31  ;;  %v3362_v5 = vsel %vm3355_vm9, %v3358_v28, %v3361_v26 }
 0x382   : > { %v3645_v1 = vor.u32 %v3644_v11, %v3643_v6  ;;  %v3648_v25 = vshll.u32 %v3647_v42, 23  ;;  %v7291_v7 = vsel %vm7284_vm7, %v7287_v18, %v7290_v49  ;;  %v3363_v33 = vsel %vm3353_vm12, nan, %v3362_v5 }
 0x383   : > { %v3657_v47 = vsel %vm3572_vm13, %v3656_v2, %v17275_v62  ;;  %vm3524_vm5 = vc.u32 %v17367_v10, %v17355_v8  ;;  %v17389_v24 = vshrl.u32 %v3788_v31, 5  ;;  %9758 = vperm.xlu0 %13866, %v3363_v33   ;;  %v3791_v30 = vsub.s32 32, %v3790_v53 }
 0x384   : > { %v3649_v22 = vor.u32 4788187, %v3648_v25  ;;  %v3652_v46 = vcvt.s32.f32 %v3645_v1  ;;  %v3526_v29 = vsel %vm3524_vm5, %v3525_v27, %v17356_v59  ;;  %v7292_v9 = vsel %vm3353_vm12, nan, %v7291_v7 }
 0x385   : > { %v3527_v36 = vadd.s32 %v3526_v29, %v3522_v23  ;;  %v3793_v19 = vshll.u32 %v20983_v32, %v3790_v53  ;;  %v3796_v39 = vshll.u32 %v20976_v61, %v3790_v53  ;;  %v3794_v2 = vshrl.u32 %v20976_v61, %v3791_v30 }
 0x386   : > { %v3650_v62 = vand.u32 2147483647, %v3649_v22  ;;  %v3797_v31 = vshrl.u32 %v20974_v16, %v3791_v30  ;;  %v3799_v63 = vshll.u32 %v20974_v16, %v3790_v53  ;;  %v3800_v50 = vshrl.u32 %v20972_v20, %v3791_v30 }
 0x387   : > { %v3528_v55 = vadd.s32 536870912, %v3527_v36  ;;  %v3802_v59 = vshll.u32 %v20972_v20, %v3790_v53  ;;  %v3803_v34 = vshrl.u32 %v20981_v57, %v3791_v30  ;;  %v17403_v6 = vadd.s32 1, %v17235_v60  ;;  %10036 = vperm.xlu0 %13866, %v7292_v9  }
 0x388   : > { %v3653_v13 = vmul.f32 %v3652_v46, %v3650_v62  ;;  %v3659_v45 = vsel %vm17362_vm2, 0, %v3657_v47  ;;  %v3805_v21 = vshll.u32 %v20981_v57, %v3790_v53  ;;  %v3795_v26 = vor.u32 %v3794_v2, %v3793_v19 }
 0x389   : > { %v17408_v23 = vshrl.u32 %v3528_v55, 30  ;;  %v3798_v11 = vor.u32 %v3797_v31, %v3796_v39  ;;  %v3806_v42 = vshrl.u32 %v20980_v41, %v3791_v30  ;;  %v7594_v28 = vadd.s32 3, %v3659_v45 }
 0x38a   : > { %v3654_v49 = vxor.u32 2147483648, %v3653_v13  ;;  %v3804_v18 = vor.u32 %v3803_v34, %v3802_v59  ;;  %vm3808_vm15 = vcmp.lt.s32.totalorder %v17389_v24, 1  ;;  %v3784_v27 = vor.u32 8388608, %v17337_v44 }
 0x38b   : > { %v3530_v60 = vshll.u32 %v17408_v23, 30  ;;  %v3801_v5 = vor.u32 %v3800_v50, %v3799_v63  ;;  %vm3811_vm6 = vcmp.lt.s32.totalorder %v17389_v24, 4  ;;  %v3792_v1 = vshrl.u32 %v20983_v32, %v3791_v30 }
 0x38c   : > { %v3655_v53 = vsel %vm3572_vm13, %v3654_v49, %v3653_v13  ;;  %v3807_v25 = vor.u32 %v3806_v42, %v3805_v21  ;;  %vm3810_vm8 = vcmp.lt.s32.totalorder %v17389_v24, 3  ;;  %vm3809_vm9 = vcmp.lt.s32.totalorder %v17389_v24, 2 }
 0x38d   : > { %v3658_v7 = vsel %vm17362_vm2, %v17117_v0, %v3655_v53  ;;  %v17422_v33 = vsub.s32 %v3527_v36, %v3530_v60  ;;  %v3816_v44 = vsel %vm3808_vm15, %v3795_v26, %v3798_v11  ;;  %v4295_v47 = vshrl.u32 %v4294_v43, 23 }
 0x38e   : > { %14035 = vcosq.f32 %v3658_v7  ;;  %v17429_v22 = vand.u32 3, %v3659_v45  ;;  %v3817_v46 = vsel %vm3811_vm6, %v3804_v18, 920167782  ;;  %vm3684_vm7 = vcmp.gt.s32.totalorder %v16775_v58, 0  ;;  %v17470_v45 = vld [vmem:[%s21026_s6] ss:$0 sm:$0xff] }
 0x38f   : > { %14037 = vsinq.f32 %v3658_v7  ;;  %v3533_v51 = vsub.s32 0, %v17422_v33  ;;  %v3813_v29 = vsel %vm3811_vm6, %v3801_v5, 2102212464  ;;  %v3818_v30 = vsel %vm3810_vm8, %v3801_v5, %v3817_v46 }
 0x390   : > { %v3819_v54 = vsel %vm3809_vm9, %v3816_v44, %v3818_v30  ;;  %v3820_v43 = vsel %vm3808_vm15, %v3798_v11, %v3801_v5  ;;  %v3821_v9 = vsel %vm3811_vm6, %v3807_v25, 1326507024  ;;  %v3824_v36 = vshll.u32 %v3784_v27, 8 }
 0x391   : > { %v4501_v19 = vshrl.u32 %v4500_v37, 23  ;;  %v7595_v39 = vand.u32 3, %v7594_v28  ;;  %v12792_v62 = vmin.u32 %v3533_v51, %v17422_v33  ;;  %v3812_v2 = vsel %vm3808_vm15, %v3792_v1, %v3795_v26 }
 0x392   : > { %v3814_v31 = vsel %vm3810_vm8, %v3798_v11, %v3813_v29  ;;  %v3822_v63 = vsel %vm3810_vm8, %v3804_v18, %v3821_v9  ;;  %v17454_v55 = vmul.u32.u64.low %v3824_v36, %v3819_v54  ;;  %v17455_v50 = vmul.u32.u64.high %v3824_v36, %v3819_v54, %v17454_v55 }
 0x393   : > { %v17458_v59 = vadd.s32 4294967169, %v4295_v47  ;;  %vm3662_vm1 = vweird.f32 %v17117_v0  ;;  %v3535_v40 = vclz %v12792_v62  ;;  %v3823_v37 = vsel %vm3809_vm9, %v3820_v43, %v3822_v63 }
 0x394   : > { %vm3664_vm10 = vcmp.lt.s32.totalorder %v17429_v22, 2  ;;  %v17464_v34 = vmul.u32.u64.low %v3824_v36, %v3823_v37  ;;  %v17465_v13 = vmul.u32.u64.high %v3824_v36, %v3823_v37, %v17464_v34  ;;  %v1690_v21 = vadd.f32 %v17470_v45, %v17157_v56 }
 0x395   : > { %vm3665_vm11 = vcmp.eq.s32.totalorder %v17429_v22, 0  ;;  %vm3668_vm12 = vcmp.eq.s32.totalorder %v17429_v22, 2  ;;  %vm3469_vm4 = vcmp.lt.s32.totalorder %v17248_v17, 0  ;;  %v12793_v26 = vadd.s32 4294967294, %v3535_v40 }
 0x396   : > { %v3815_v11 = vsel %vm3809_vm9, %v3812_v2, %v3814_v31  ;;  %vm7596_vm3 = vcmp.lt.s32.totalorder %v7595_v39, 2  ;;  %vm7597_vm13 = vcmp.eq.s32.totalorder %v7595_v39, 0  ;;  %v3834_v42 = vadd.s32 1, %v17455_v50 }
 0x397   : > { %v1687_v49 = vadd.f32 %v17470_v45, %v17137_v14  ;;  %vm7600_vm14 = vcmp.eq.s32.totalorder %v7595_v39, 2  ;;  %v3523_v56 = vadd.s32 %v17355_v8, %v17367_v10  ;;  %vm12794_vm2 = vcmp.lt.s32.totalorder %v12793_v26, 0 }
 0x398   : > { %v3553_v28 = vsub.s32 4, %v17408_v23  ;;  %v14036_v18 = vpop.eup %14035  ;;  %v3538_v60 = vsel %vm12794_vm2, 0, %v12793_v26  ;;  %v3831_v27 = vmul.u32 %v3824_v36, %v3815_v11  ;;  %vm3833_vm5 = vc.u32 %v17465_v13, %v17454_v55 }
 0x399   : > { %v1796_v24 = vmax.f32 %v1690_v21, 0.0  ;;  %v14038_v5 = vpop.eup %14037  ;;  %v3669_v53 = vxor.u32 2147483648, %v14036_v18  ;;  %v3539_v1 = vsub.s32 32, %v3538_v60  ;;  %v3540_v25 = vshll.u32 %v17422_v33, %v3538_v60  ;;  %v17514_v21 = vld [vmem:[%s14431_s21 + $0xc8] sm:$0xff] }
 0x39a   : > { %v3543_v14 = vsub.s32 4294967266, %v3538_v60  ;;  %v3666_v7 = vxor.u32 2147483648, %v14038_v5  ;;  %v3835_v44 = vsel %vm3833_vm5, %v3834_v42, %v17455_v50  ;;  %v1795_v8 = vmax.f32 %v1687_v49, 0.0  ;;  %v17507_v50 = vld [vmem:[%s14431_s21 + $0x90] sm:$0xff]  ;;  %v17528_v42 = vld [vmem:[%s14431_s21 + $0xd8] sm:$0xff] }
 0x39b   : > { %v3685_v10 = vsel %vm3684_vm7, %v16775_v58, 0  ;;  %v3670_v47 = vsel %vm3668_vm12, %v3669_v53, %v14038_v5  ;;  %v7602_v46 = vsel %vm7600_vm14, %v3669_v53, %v14038_v5  ;;  %v3541_v51 = vshrl.u32 %v3523_v56, %v3539_v1 }
 0x39c   : > { %v3544_v29 = vadd.s32 127, %v3543_v14  ;;  %v3667_v33 = vsel %vm3665_vm11, %v14036_v18, %v3666_v7  ;;  %v7599_v30 = vsel %vm7597_vm13, %v14036_v18, %v3666_v7  ;;  %v3836_v54 = vadd.s32 %v3835_v44, %v3831_v27 }
 0x39d   : > { %v10865_v43 = vpack.c.bf16 %v1796_v24, %v1795_v8  ;;  %v3671_v9 = vsel %vm3664_vm10, %v3667_v33, %v3670_v47  ;;  %v7603_v58 = vsel %vm7596_vm3, %v7599_v30, %v7602_v46  ;;  %v3542_v36 = vor.u32 %v3541_v51, %v3540_v25 }
 0x39e   : > { %v3545_v62 = vshll.u32 %v3544_v29, 23  ;;  %v3672_v2 = vsel %vm3662_vm1, nan, %v3671_v9  ;;  %v3554_v31 = vsel %vm3469_vm4, %v3553_v28, %v17408_v23  ;;  %v3837_v63 = vadd.s32 536870912, %v3836_v54 }
 0x39f   : > { %v3673_v40 = vand.u32 2147483647, %v17507_v50  ;;  %11076 = vmatmul.mubr.bf16.gmra.mrb[68].mxu0 %v10865_v43  ;;  %v17510_v22 = vadd.s32 4294967169, %v4501_v19  ;;  %9773 = vperm.xlu1 %13865, %v3672_v2   ;;  %v3549_v37 = vcvt.s32.f32 %v3542_v36  ;;  %v3687_v34 = vand.u32 31, %v3685_v10 }
 0x3a0   : > { %v3546_v39 = vor.u32 4788187, %v3545_v62  ;;  %11085 = vmatprep.mubr.bf16.mxu0 %v20978_v4  ;;  %v4397_v26 = vand.u32 2139095040, %v17514_v21  ;;  %v7604_v23 = vsel %vm3662_vm1, nan, %v7603_v58  ;;  %vm17521_vm15 = vcmp.le.f32.partialorder %v3467_v35, 0.7853982 }
 0x3a1   : > { %v17525_v19 = vshrl.u32 %v3837_v63, 30  ;;  %v4603_v49 = vand.u32 2139095040, %v17528_v42  ;;  %v3556_v28 = vsel %vm17521_vm15, 0, %v3554_v31  ;;  %v3688_v18 = vsub.s32 32, %v3687_v34 }
 0x3a2   : > { %v3547_v56 = vand.u32 2147483647, %v3546_v39  ;;  %v3680_v60 = vand.u32 8388607, %v3673_v40  ;;  %v3690_v35 = vshll.u32 %v20983_v32, %v3687_v34  ;;  %v3693_v27 = vshll.u32 %v20976_v61, %v3687_v34 }
 0x3a3   : > { %v3839_v0 = vshll.u32 %v17525_v19, 30  ;;  %10051 = vperm.xlu1 %13865, %v7604_v23   ;;  %v3691_v5 = vshrl.u32 %v20976_v61, %v3688_v18  ;;  %v3694_v53 = vshrl.u32 %v20974_v16, %v3688_v18  ;;  %v3696_v1 = vshll.u32 %v20974_v16, %v3687_v34 }
 0x3a4   : > { %v3550_v24 = vmul.f32 %v3549_v37, %v3547_v56  ;;  %v3697_v14 = vshrl.u32 %v20972_v20, %v3688_v18  ;;  %v3699_v7 = vshll.u32 %v20972_v20, %v3687_v34  ;;  %v3700_v44 = vshrl.u32 %v20981_v57, %v3688_v18 }
 0x3a5   : > { %v17541_v25 = vsub.s32 %v3836_v54, %v3839_v0  ;;  %v17546_v47 = vand.u32 3, %v3556_v28  ;;  %v7490_v46 = vadd.s32 3, %v3556_v28  ;;  %v3686_v51 = vshrl.u32 %v3685_v10, 5 }
 0x3a6   : > { %v3551_v8 = vxor.u32 2147483648, %v3550_v24  ;;  %v3681_v33 = vor.u32 8388608, %v3680_v60  ;;  %v3689_v30 = vshrl.u32 %v20983_v32, %v3688_v18  ;;  %v3692_v43 = vor.u32 %v3691_v5, %v3690_v35 }
 0x3a7   : > { %v3842_v29 = vsub.s32 0, %v17541_v25  ;;  %vm3993_vm6 = vcmp.gt.s32.totalorder %v17264_v15, 0  ;;  %v3695_v9 = vor.u32 %v3694_v53, %v3693_v27  ;;  %v3702_v58 = vshll.u32 %v20981_v57, %v3687_v34 }
 0x3a8   : > { %v3552_v54 = vsel %vm3469_vm4, %v3551_v8, %v3550_v24  ;;  %v3703_v36 = vshrl.u32 %v20980_v41, %v3688_v18  ;;  %v3698_v2 = vor.u32 %v3697_v14, %v3696_v1  ;;  %v3701_v31 = vor.u32 %v3700_v44, %v3699_v7 }
 0x3a9   : > { %v3555_v10 = vsel %vm17521_vm15, %v17248_v17, %v3552_v54  ;;  %v12804_v62 = vmin.u32 %v3842_v29, %v17541_v25  ;;  %vm3778_vm8 = vcmp.lt.s32.totalorder %v17308_v48, 0  ;;  %vm3705_vm9 = vcmp.lt.s32.totalorder %v3686_v51, 1 }
 0x3aa   : > { %14039 = vcosq.f32 %v3555_v10  ;;  %v3704_v63 = vor.u32 %v3703_v36, %v3702_v58  ;;  %vm3708_vm7 = vcmp.lt.s32.totalorder %v3686_v51, 4  ;;  %vm3707_vm1 = vcmp.lt.s32.totalorder %v3686_v51, 3 }
 0x3ab   : > { %14041 = vsinq.f32 %v3555_v10  ;;  %v3844_v39 = vclz %v12804_v62  ;;  %v3710_v37 = vsel %vm3708_vm7, %v3698_v2, 2102212464  ;;  %v3832_v34 = vadd.s32 %v17454_v55, %v17465_v13 }
 0x3ac   : > { %v7491_v23 = vand.u32 3, %v7490_v46  ;;  %vm3706_vm10 = vcmp.lt.s32.totalorder %v3686_v51, 2  ;;  %v3709_v11 = vsel %vm3705_vm9, %v3689_v30, %v3692_v43  ;;  %vm17566_vm11 = vcmp.le.f32.partialorder %v3776_v3, 0.7853982 }
 0x3ad   : > { %v12805_v28 = vadd.s32 4294967294, %v3844_v39  ;;  %v3711_v18 = vsel %vm3707_vm1, %v3695_v9, %v3710_v37  ;;  %v3713_v0 = vsel %vm3705_vm9, %v3692_v43, %v3695_v9  ;;  %v3714_v60 = vsel %vm3708_vm7, %v3701_v31, 920167782 }
 0x3ae   : > { %vm3561_vm12 = vcmp.lt.s32.totalorder %v17546_v47, 2  ;;  %v3715_v55 = vsel %vm3707_vm1, %v3698_v2, %v3714_v60  ;;  %v3717_v13 = vsel %vm3705_vm9, %v3695_v9, %v3698_v2  ;;  %v3718_v35 = vsel %vm3708_vm7, %v3704_v63, 1326507024 }
 0x3af   : > { %v3721_v27 = vshll.u32 %v3681_v33, 8  ;;  %vm3559_vm4 = vweird.f32 %v17248_v17  ;;  %vm12806_vm3 = vcmp.lt.s32.totalorder %v12805_v28, 0  ;;  %v3862_v3 = vsub.s32 4, %v17525_v19 }
 0x3b0   : > { %v3716_v24 = vsel %vm3706_vm10, %v3713_v0, %v3715_v55  ;;  %v3719_v5 = vsel %vm3707_vm1, %v3701_v31, %v3718_v35  ;;  %v3847_v53 = vsel %vm12806_vm3, 0, %v12805_v28  ;;  %v3712_v29 = vsel %vm3706_vm10, %v3709_v11, %v3711_v18 }
 0x3b1   : > { %v3720_v1 = vsel %vm3706_vm10, %v3717_v13, %v3719_v5  ;;  %v17582_v14 = vmul.u32.u64.low %v3721_v27, %v3716_v24  ;;  %v17583_v7 = vmul.u32.u64.high %v3721_v27, %v3716_v24, %v17582_v14  ;;  %v3848_v44 = vsub.s32 32, %v3847_v53 }
 0x3b2   : > { %v3849_v8 = vshll.u32 %v17541_v25, %v3847_v53  ;;  %v3852_v46 = vsub.s32 4294967266, %v3847_v53  ;;  %vm3562_vm13 = vcmp.eq.s32.totalorder %v17546_v47, 0  ;;  %vm3565_vm14 = vcmp.eq.s32.totalorder %v17546_v47, 2  ;;  %v17622_v53 = vld [vmem:[%s14431_s21 + $0xa8] sm:$0xff] }
 0x3b3   : > { %v17590_v33 = vmul.u32.u64.low %v3721_v27, %v3720_v1  ;;  %v17591_v30 = vmul.u32.u64.high %v3721_v27, %v3720_v1, %v17590_v33  ;;  %v3850_v43 = vshrl.u32 %v3832_v34, %v3848_v44  ;;  %v3863_v9 = vsel %vm3778_vm8, %v3862_v3, %v17525_v19  ;;  %v17615_v3 = vpop.f32.mrb[68].mxu1 }
 0x3b4   : > { %v3853_v54 = vadd.s32 127, %v3852_v46  ;;  %v3994_v25 = vsel %vm3993_vm6, %v17264_v15, 0  ;;  %v14040_v58 = vpop.eup %14039  ;;  %vm7493_vm2 = vcmp.eq.s32.totalorder %v7491_v23, 0  ;;  %vm7496_vm5 = vcmp.eq.s32.totalorder %v7491_v23, 2 }
 0x3b5   : > { %v3728_v51 = vmul.u32 %v3721_v27, %v3712_v29  ;;  %v3731_v36 = vadd.s32 1, %v17583_v7  ;;  %v14042_v10 = vpop.eup %14041  ;;  %v3566_v62 = vxor.u32 2147483648, %v14040_v58  ;;  %v3851_v2 = vor.u32 %v3850_v43, %v3849_v8 }
 0x3b6   : > { %v3854_v31 = vshll.u32 %v3853_v54, 23  ;;  %v3996_v63 = vand.u32 31, %v3994_v25  ;;  %v3563_v39 = vxor.u32 2147483648, %v14042_v10  ;;  %v17602_v37 = vsel %vm17566_vm11, 0, %v3863_v9 }
 0x3b7   : > { %vm7492_vm15 = vcmp.lt.s32.totalorder %v7491_v23, 2  ;;  %vm3730_vm6 = vc.u32 %v17591_v30, %v17582_v14  ;;  %v3567_v15 = vsel %vm3565_vm14, %v3566_v62, %v14042_v10  ;;  %v3858_v34 = vcvt.s32.f32 %v3851_v2 }
 0x3b8   : > { %v3855_v19 = vor.u32 4788187, %v3854_v31  ;;  %v7498_v11 = vsel %vm7496_vm5, %v3566_v62, %v14042_v10  ;;  %v3564_v28 = vsel %vm3562_vm13, %v14040_v58, %v3563_v39  ;;  %v7495_v18 = vsel %vm7493_vm2, %v14040_v58, %v3563_v39 }
 0x3b9   : > { %v3732_v0 = vsel %vm3730_vm6, %v3731_v36, %v17583_v7  ;;  %v3997_v60 = vsub.s32 32, %v3996_v63  ;;  %v3568_v55 = vsel %vm3561_vm12, %v3564_v28, %v3567_v15  ;;  %v7499_v35 = vsel %vm7492_vm15, %v7495_v18, %v7498_v11  ;;  %v13320_v7 = vpop.f32.mrb[69].mxu1 }
 0x3ba   : > { %v3856_v13 = vand.u32 2147483647, %v3855_v19  ;;  %v3733_v27 = vadd.s32 %v3732_v0, %v3728_v51  ;;  %v3569_v24 = vsel %vm3559_vm4, nan, %v3568_v55  ;;  %v7500_v5 = vsel %vm3559_vm4, nan, %v7499_v35  ;;  %v17628_v29 = vpop.f32.mrb[70].mxu1 }
 0x3bb   : > { %v3982_v23 = vand.u32 2147483647, %v17622_v53  ;;  %v3999_v1 = vshll.u32 %v20983_v32, %v3996_v63  ;;  %9768 = vperm.xlu0 %13866, %v3569_v24   ;;  %v4000_v8 = vshrl.u32 %v20976_v61, %v3997_v60  ;;  %v4002_v46 = vshll.u32 %v20976_v61, %v3996_v63  ;;  %v13321_v9 = vpop.f32.mrb[71].mxu1 }
 0x3bc   : > { %v3859_v47 = vmul.f32 %v3858_v34, %v3856_v13  ;;  %v3734_v44 = vadd.s32 536870912, %v3733_v27  ;;  %v4003_v33 = vshrl.u32 %v20974_v16, %v3997_v60  ;;  %v4005_v17 = vshll.u32 %v20974_v16, %v3996_v63 }
 0x3bd   : > { %v4006_v43 = vshrl.u32 %v20972_v20, %v3997_v60  ;;  %v4008_v54 = vshll.u32 %v20972_v20, %v3996_v63  ;;  %v3995_v36 = vshrl.u32 %v3994_v25, 5  ;;  %v4009_v10 = vshrl.u32 %v20981_v57, %v3997_v60 }
 0x3be   : > { %v3860_v58 = vxor.u32 2147483648, %v3859_v47  ;;  %v17634_v51 = vshrl.u32 %v3734_v44, 30  ;;  %v7802_v62 = vadd.s32 3, %v17602_v37  ;;  %v3989_v2 = vand.u32 8388607, %v3982_v23 }
 0x3bf   : > { %v4011_v31 = vshll.u32 %v20981_v57, %v3996_v63  ;;  %v4012_v39 = vshrl.u32 %v20980_v41, %v3997_v60  ;;  %10046 = vperm.xlu0 %13866, %v7500_v5   ;;  %v4001_v34 = vor.u32 %v4000_v8, %v3999_v1  ;;  %v4004_v11 = vor.u32 %v4003_v33, %v4002_v46 }
 0x3c0   : > { %v3861_v15 = vsel %vm3778_vm8, %v3860_v58, %v3859_v47  ;;  %v3736_v19 = vshll.u32 %v17634_v51, 30  ;;  %v4007_v28 = vor.u32 %v4006_v43, %v4005_v17  ;;  %v4010_v18 = vor.u32 %v4009_v10, %v4008_v54 }
 0x3c1   : > { %v3864_v25 = vsel %vm17566_vm11, %v17308_v48, %v3861_v15  ;;  %v4013_v0 = vor.u32 %v4012_v39, %v4011_v31  ;;  %v3998_v63 = vshrl.u32 %v20983_v32, %v3997_v60  ;;  %vm4014_vm9 = vcmp.lt.s32.totalorder %v3995_v36, 1 }
 0x3c2   : > { %14043 = vcosq.f32 %v3864_v25  ;;  %v17648_v55 = vsub.s32 %v3733_v27, %v3736_v19  ;;  %v17652_v13 = vadd.s32 1, %v17458_v59  ;;  %v3990_v35 = vor.u32 8388608, %v3989_v2 }
 0x3c3   : > { %14045 = vsinq.f32 %v3864_v25  ;;  %vm4017_vm8 = vcmp.lt.s32.totalorder %v3995_v36, 4  ;;  %vm3890_vm7 = vcmp.gt.s32.totalorder %v17261_v52, 0  ;;  %vm4015_vm1 = vcmp.lt.s32.totalorder %v3995_v36, 2 }
 0x3c4   : > { %v3739_v56 = vsub.s32 0, %v17648_v55  ;;  %vm4016_vm10 = vcmp.lt.s32.totalorder %v3995_v36, 3  ;;  %v4019_v24 = vsel %vm4017_vm8, %v4007_v28, 2102212464  ;;  %v4022_v5 = vsel %vm4014_vm9, %v4001_v34, %v4004_v11 }
 0x3c5   : > { %v4023_v27 = vsel %vm4017_vm8, %v4010_v18, 920167782  ;;  %v4026_v1 = vsel %vm4014_vm9, %v4004_v11, %v4007_v28  ;;  %v4027_v60 = vsel %vm4017_vm8, %v4013_v0, 1326507024  ;;  %v3869_v7 = vand.u32 3, %v17602_v37 }
 0x3c6   : > { %v7803_v59 = vand.u32 3, %v7802_v62  ;;  %v12800_v47 = vmin.u32 %v3739_v56, %v17648_v55  ;;  %v4018_v44 = vsel %vm4014_vm9, %v3998_v63, %v4001_v34  ;;  %v4020_v8 = vsel %vm4016_vm10, %v4004_v11, %v4019_v24 }
 0x3c7   : > { %v4024_v46 = vsel %vm4016_vm10, %v4007_v28, %v4023_v27  ;;  %v4028_v33 = vsel %vm4016_vm10, %v4010_v18, %v4027_v60  ;;  %v4030_v17 = vshll.u32 %v3990_v35, 8  ;;  %v4398_v43 = vshrl.u32 %v4397_v26, 23 }
 0x3c8   : > { %v3741_v54 = vclz %v12800_v47  ;;  %v4025_v9 = vsel %vm4015_vm1, %v4022_v5, %v4024_v46  ;;  %v4029_v58 = vsel %vm4015_vm1, %v4026_v1, %v4028_v33  ;;  %vm3868_vm11 = vweird.f32 %v17308_v48 }
 0x3c9   : > { %v17665_v10 = vmul.u32.u64.low %v4030_v17, %v4029_v58  ;;  %v17666_v2 = vmul.u32.u64.high %v4030_v17, %v4029_v58, %v17665_v10  ;;  %v17668_v37 = vmul.u32.u64.low %v4030_v17, %v4025_v9  ;;  %v17669_v62 = vmul.u32.u64.high %v4030_v17, %v4025_v9, %v17668_v37 }
 0x3ca   : > { %vm3870_vm12 = vcmp.lt.s32.totalorder %v3869_v7, 2  ;;  %v12801_v31 = vadd.s32 4294967294, %v3741_v54  ;;  %v4021_v39 = vsel %vm4015_vm1, %v4018_v44, %v4020_v8  ;;  %vm3871_vm4 = vcmp.eq.s32.totalorder %v3869_v7, 0  ;;  %v17697_v8 = vld [vmem:[%s14431_s21 + $0xa0] sm:$0xff] }
 0x3cb   : > { %vm3874_vm3 = vcmp.eq.s32.totalorder %v3869_v7, 2  ;;  %vm7804_vm13 = vcmp.lt.s32.totalorder %v7803_v59, 2  ;;  %vm7805_vm14 = vcmp.eq.s32.totalorder %v7803_v59, 0  ;;  %vm7808_vm2 = vcmp.eq.s32.totalorder %v7803_v59, 2 }
 0x3cc   : > { %v14044_v21 = vpop.eup %14043  ;;  %v3729_v26 = vadd.s32 %v17582_v14, %v17591_v30  ;;  %vm12802_vm5 = vcmp.lt.s32.totalorder %v12801_v31, 0  ;;  %v3759_v15 = vsub.s32 4, %v17634_v51  ;;  %v4037_v25 = vmul.u32 %v4030_v17, %v4021_v39 }
 0x3cd   : > { %v14046_v19 = vpop.eup %14045  ;;  %v3875_v34 = vxor.u32 2147483648, %v14044_v21  ;;  %v3744_v11 = vsel %vm12802_vm5, 0, %v12801_v31  ;;  %vm4039_vm15 = vc.u32 %v17666_v2, %v17668_v37  ;;  %v4040_v14 = vadd.s32 1, %v17669_v62 }
 0x3ce   : > { %v3872_v36 = vxor.u32 2147483648, %v14046_v19  ;;  %v3745_v28 = vsub.s32 32, %v3744_v11  ;;  %v3746_v18 = vshll.u32 %v17648_v55, %v3744_v11  ;;  %v3749_v0 = vsub.s32 4294967266, %v3744_v11 }
 0x3cf   : > { %v3876_v63 = vsel %vm3874_vm3, %v3875_v34, %v14046_v19  ;;  %v7810_v35 = vsel %vm7808_vm2, %v3875_v34, %v14046_v19  ;;  %v3891_v30 = vsel %vm3890_vm7, %v17261_v52, 0  ;;  %vm3675_vm6 = vcmp.lt.s32.totalorder %v17507_v50, 0 }
 0x3d0   : > { %v3873_v56 = vsel %vm3871_vm4, %v14044_v21, %v3872_v36  ;;  %v7807_v24 = vsel %vm7805_vm14, %v14044_v21, %v3872_v36  ;;  %v3747_v5 = vshrl.u32 %v3729_v26, %v3745_v28  ;;  %v3750_v27 = vadd.s32 127, %v3749_v0 }
 0x3d1   : > { %v3877_v1 = vsel %vm3870_vm12, %v3873_v56, %v3876_v63  ;;  %v7811_v55 = vsel %vm7804_vm13, %v7807_v24, %v7810_v35  ;;  %v4041_v60 = vsel %vm4039_vm15, %v4040_v14, %v17669_v62  ;;  %v3879_v7 = vand.u32 2147483647, %v17697_v8  ;;  %v14174_v62 = vld [vmem:[%s14431_s21 + $0xe0] sm:$0xff] }
 0x3d2   : > { %v3878_v52 = vsel %vm3868_vm11, nan, %v3877_v1  ;;  %v3748_v47 = vor.u32 %v3747_v5, %v3746_v18  ;;  %v3751_v44 = vshll.u32 %v3750_v27, 23  ;;  %v17702_v59 = vshrl.u32 %v4603_v49, 23 }
 0x3d3   : > { %9783 = vperm.xlu1 %13865, %v3878_v52   ;;  %v3760_v46 = vsel %vm3675_vm6, %v3759_v15, %v17634_v51  ;;  %v4042_v33 = vadd.s32 %v4041_v60, %v4037_v25  ;;  %v3893_v17 = vand.u32 31, %v3891_v30  ;;  %v17707_v54 = vadd.s32 4294967169, %v4398_v43 }
 0x3d4   : > { %v7812_v9 = vsel %vm3868_vm11, nan, %v7811_v55  ;;  %v3752_v58 = vor.u32 4788187, %v3751_v44  ;;  %v3755_v10 = vcvt.s32.f32 %v3748_v47  ;;  %v4706_v31 = vand.u32 2139095040, %v14174_v62 }
 0x3d5   : > { %vm17714_vm9 = vcmp.le.f32.partialorder %v3673_v40, 0.7853982  ;;  %v4043_v49 = vadd.s32 536870912, %v4042_v33  ;;  %v3894_v39 = vsub.s32 32, %v3893_v17  ;;  %v3886_v48 = vand.u32 8388607, %v3879_v7 }
 0x3d6   : > { %v3753_v51 = vand.u32 2147483647, %v3752_v58  ;;  %v3762_v43 = vsel %vm17714_vm9, 0, %v3760_v46  ;;  %v3896_v21 = vshll.u32 %v20983_v32, %v3893_v17  ;;  %v3899_v40 = vshll.u32 %v20976_v61, %v3893_v17 }
 0x3d7   : > { %10061 = vperm.xlu1 %13865, %v7812_v9   ;;  %v4044_v26 = vshrl.u32 %v4043_v49, 30  ;;  %v3897_v15 = vshrl.u32 %v20976_v61, %v3894_v39  ;;  %v3900_v19 = vshrl.u32 %v20974_v16, %v3894_v39  ;;  %v17726_v11 = vshrl.u32 %v3891_v30, 5 }
 0x3d8   : > { %v3756_v34 = vmul.f32 %v3755_v10, %v3753_v51  ;;  %v3905_v25 = vshll.u32 %v20972_v20, %v3893_v17  ;;  %v3906_v36 = vshrl.u32 %v20981_v57, %v3894_v39  ;;  %vm4199_vm8 = vcmp.gt.s32.totalorder %v17267_v38, 0 }
 0x3d9   : > { %v17731_v28 = vshrl.u32 %v4706_v31, 23  ;;  %v4045_v18 = vshll.u32 %v4044_v26, 30  ;;  %v3902_v0 = vshll.u32 %v20974_v16, %v3893_v17  ;;  %v3903_v63 = vshrl.u32 %v20972_v20, %v3894_v39 }
 0x3da   : > { %v3757_v35 = vxor.u32 2147483648, %v3756_v34  ;;  %v17735_v14 = vand.u32 3, %v3762_v43  ;;  %vm3984_vm7 = vcmp.lt.s32.totalorder %v17622_v53, 0  ;;  %v3908_v30 = vshll.u32 %v20981_v57, %v3893_v17 }
 0x3db   : > { %v3909_v56 = vshrl.u32 %v20980_v41, %v3894_v39  ;;  %v17740_v24 = vsub.s32 %v4042_v33, %v4045_v18  ;;  %v7698_v5 = vadd.s32 3, %v3762_v43  ;;  %v3898_v27 = vor.u32 %v3897_v15, %v3896_v21  ;;  %v17778_v21 = vld [vmem:[%s14431_s21 + $0xb8] sm:$0xff] }
 0x3dc   : > { %v3901_v1 = vor.u32 %v3900_v19, %v3899_v40  ;;  %v3758_v55 = vsel %vm3675_vm6, %v3757_v35, %v3756_v34  ;;  %v3887_v60 = vor.u32 8388608, %v3886_v48  ;;  %v3907_v52 = vor.u32 %v3906_v36, %v3905_v25 }
 0x3dd   : > { %vm3911_vm1 = vcmp.lt.s32.totalorder %v17726_v11, 1  ;;  %v3761_v47 = vsel %vm17714_vm9, %v17507_v50, %v3758_v55  ;;  %v4048_v44 = vsub.s32 0, %v17740_v24  ;;  %v3904_v46 = vor.u32 %v3903_v63, %v3902_v0 }
 0x3de   : > { %vm3914_vm10 = vcmp.lt.s32.totalorder %v17726_v11, 4  ;;  %14047 = vcosq.f32 %v3761_v47  ;;  %v4068_v33 = vsub.s32 4, %v4044_v26  ;;  %v3910_v17 = vor.u32 %v3909_v56, %v3908_v30 }
 0x3df   : > { %vm3913_vm11 = vcmp.lt.s32.totalorder %v17726_v11, 3  ;;  %14049 = vsinq.f32 %v3761_v47  ;;  %v12812_v9 = vmin.u32 %v4048_v44, %v17740_v24  ;;  %vm3912_vm12 = vcmp.lt.s32.totalorder %v17726_v11, 2 }
 0x3e0   : > { %v3919_v58 = vsel %vm3911_vm1, %v3898_v27, %v3901_v1  ;;  %vm3771_vm4 = vcmp.eq.s32.totalorder %v17735_v14, 2  ;;  %vm17758_vm3 = vcmp.le.f32.partialorder %v3982_v23, 0.7853982  ;;  %v3895_v62 = vshrl.u32 %v20983_v32, %v3894_v39 }
 0x3e1   : > { %v3920_v31 = vsel %vm3914_vm10, %v3907_v52, 920167782  ;;  %vm3768_vm13 = vcmp.eq.s32.totalorder %v17735_v14, 0  ;;  %v4050_v42 = vclz %v12812_v9  ;;  %v7699_v49 = vand.u32 3, %v7698_v5 }
 0x3e2   : > { %v3916_v51 = vsel %vm3914_vm10, %v3904_v46, 2102212464  ;;  %v3921_v43 = vsel %vm3913_vm11, %v3904_v46, %v3920_v31  ;;  %vm3767_vm14 = vcmp.lt.s32.totalorder %v17735_v14, 2  ;;  %v4038_v23 = vadd.s32 %v17668_v37, %v17666_v2 }
 0x3e3   : > { %v3922_v39 = vsel %vm3912_vm12, %v3919_v58, %v3921_v43  ;;  %v3923_v48 = vsel %vm3911_vm1, %v3901_v1, %v3904_v46  ;;  %v4188_v15 = vand.u32 2147483647, %v17778_v21  ;;  %vm3765_vm2 = vweird.f32 %v17507_v50 }
 0x3e4   : > { %v12813_v40 = vadd.s32 4294967294, %v4050_v42  ;;  %v4069_v19 = vsel %vm3984_vm7, %v4068_v33, %v4044_v26  ;;  %v3924_v34 = vsel %vm3914_vm10, %v3910_v17, 1326507024  ;;  %v3927_v2 = vshll.u32 %v3887_v60, 8 }
 0x3e5   : > { %v3915_v37 = vsel %vm3911_vm1, %v3895_v62, %v3898_v27  ;;  %v3917_v25 = vsel %vm3913_vm11, %v3901_v1, %v3916_v51  ;;  %v3925_v36 = vsel %vm3913_vm11, %v3907_v52, %v3924_v34  ;;  %v4200_v18 = vsel %vm4199_vm8, %v17267_v38, 0 }
 0x3e6   : > { %vm12814_vm5 = vcmp.lt.s32.totalorder %v12813_v40, 0  ;;  %v3926_v26 = vsel %vm3912_vm12, %v3923_v48, %v3925_v36  ;;  %v17797_v0 = vmul.u32.u64.low %v3927_v2, %v3922_v39  ;;  %v17798_v63 = vmul.u32.u64.high %v3927_v2, %v3922_v39, %v17797_v0 }
 0x3e7   : > { %v4053_v35 = vsel %vm12814_vm5, 0, %v12813_v40  ;;  %vm7700_vm15 = vcmp.lt.s32.totalorder %v7699_v49, 2  ;;  %v17801_v30 = vmul.u32.u64.low %v3927_v2, %v3926_v26  ;;  %v17802_v56 = vmul.u32.u64.high %v3927_v2, %v3926_v26, %v17801_v30 }
 0x3e8   : > { %v4054_v5 = vsub.s32 32, %v4053_v35  ;;  %v4055_v27 = vshll.u32 %v17740_v24, %v4053_v35  ;;  %v4058_v1 = vsub.s32 4294967266, %v4053_v35  ;;  %v3918_v38 = vsel %vm3912_vm12, %v3915_v37, %v3917_v25  ;;  %v14048_v55 = vpop.eup %14047 }
 0x3e9   : > { %v4071_v60 = vsel %vm17758_vm3, 0, %v4069_v19  ;;  %vm7701_vm6 = vcmp.eq.s32.totalorder %v7699_v49, 0  ;;  %vm7704_vm9 = vcmp.eq.s32.totalorder %v7699_v49, 2  ;;  %v4202_v52 = vand.u32 31, %v4200_v18  ;;  %v14050_v47 = vpop.eup %14049 }
 0x3ea   : > { %v3772_v44 = vxor.u32 2147483648, %v14048_v55  ;;  %v4056_v46 = vshrl.u32 %v4038_v23, %v4054_v5  ;;  %v4059_v33 = vadd.s32 127, %v4058_v1  ;;  %v3937_v17 = vadd.s32 1, %v17798_v63 }
 0x3eb   : > { %v3769_v9 = vxor.u32 2147483648, %v14050_v47  ;;  %v3934_v58 = vmul.u32 %v3927_v2, %v3918_v38  ;;  %vm3936_vm8 = vc.u32 %v17802_v56, %v17797_v0  ;;  %v4203_v11 = vsub.s32 32, %v4202_v52  ;;  %v17823_v2 = vpop.f32.mrb[72].mxu1 }
 0x3ec   : > { %v3773_v24 = vsel %vm3771_vm4, %v3772_v44, %v14050_v47  ;;  %v4057_v62 = vor.u32 %v4056_v46, %v4055_v27  ;;  %v4060_v31 = vshll.u32 %v4059_v33, 23  ;;  %v7706_v42 = vsel %vm7704_vm9, %v3772_v44, %v14050_v47 }
 0x3ed   : > { %v3770_v51 = vsel %vm3768_vm13, %v14048_v55, %v3769_v9  ;;  %v7703_v43 = vsel %vm7701_vm6, %v14048_v55, %v3769_v9  ;;  %v3938_v23 = vsel %vm3936_vm8, %v3937_v17, %v17798_v63  ;;  %v4195_v39 = vand.u32 8388607, %v4188_v15  ;;  %v13324_v63 = vpop.f32.mrb[73].mxu1 }
 0x3ee   : > { %v3774_v48 = vsel %vm3767_vm14, %v3770_v51, %v3773_v24  ;;  %v4061_v40 = vor.u32 4788187, %v4060_v31  ;;  %v4064_v19 = vcvt.s32.f32 %v4057_v62  ;;  %v7707_v34 = vsel %vm7700_vm15, %v7703_v43, %v7706_v42  ;;  %v17839_v46 = vpop.f32.mrb[74].mxu1 }
 0x3ef   : > { %v3775_v37 = vsel %vm3765_vm2, nan, %v3774_v48  ;;  %v7708_v25 = vsel %vm3765_vm2, nan, %v7707_v34  ;;  %v3939_v36 = vadd.s32 %v3938_v23, %v3934_v58  ;;  %v4205_v26 = vshll.u32 %v20983_v32, %v4202_v52  ;;  %v13325_v24 = vpop.f32.mrb[75].mxu1 }
 0x3f0   : > { %9778 = vperm.xlu0 %13866, %v3775_v37   ;;  %v4062_v35 = vand.u32 2147483647, %v4061_v40  ;;  %v4206_v14 = vshrl.u32 %v20976_v61, %v4203_v11  ;;  %v4208_v30 = vshll.u32 %v20976_v61, %v4202_v52  ;;  %v4209_v49 = vshrl.u32 %v20974_v16, %v4203_v11 }
 0x3f1   : > { %v3940_v5 = vadd.s32 536870912, %v3939_v36  ;;  %v4211_v27 = vshll.u32 %v20974_v16, %v4202_v52  ;;  %v4212_v1 = vshrl.u32 %v20972_v20, %v4203_v11  ;;  %v4214_v50 = vshll.u32 %v20972_v20, %v4202_v52 }
 0x3f2   : > { %v4065_v38 = vmul.f32 %v4064_v19, %v4062_v35  ;;  %v17836_v55 = vand.u32 3, %v4071_v60  ;;  %v4201_v47 = vshrl.u32 %v4200_v18, 5  ;;  %v4215_v44 = vshrl.u32 %v20981_v57, %v4203_v11 }
 0x3f3   : > { %v8010_v33 = vadd.s32 3, %v4071_v60  ;;  %v17841_v17 = vshrl.u32 %v3940_v5, 30  ;;  %v4217_v9 = vshll.u32 %v20981_v57, %v4202_v52  ;;  %v4218_v58 = vshrl.u32 %v20980_v41, %v4203_v11 }
 0x3f4   : > { %v4066_v62 = vxor.u32 2147483648, %v4065_v38  ;;  %10056 = vperm.xlu0 %13866, %v7708_v25   ;;  %v4196_v31 = vor.u32 8388608, %v4195_v39  ;;  %v4216_v42 = vor.u32 %v4215_v44, %v4214_v50  ;;  %v1695_v51 = vadd.f32 %v17470_v45, %v17615_v3 }
 0x3f5   : > { %v3942_v18 = vshll.u32 %v17841_v17, 30  ;;  %v4207_v43 = vor.u32 %v4206_v14, %v4205_v26  ;;  %v4210_v23 = vor.u32 %v4209_v49, %v4208_v30  ;;  %v4213_v48 = vor.u32 %v4212_v1, %v4211_v27 }
 0x3f6   : > { %vm4096_vm1 = vcmp.gt.s32.totalorder %v17403_v6, 0  ;;  %v4067_v60 = vsel %vm3984_vm7, %v4066_v62, %v4065_v38  ;;  %v4219_v52 = vor.u32 %v4218_v58, %v4217_v9  ;;  %vm4220_vm10 = vcmp.lt.s32.totalorder %v4201_v47, 1 }
 0x3f7   : > { %vm4223_vm11 = vcmp.lt.s32.totalorder %v4201_v47, 4  ;;  %v4070_v39 = vsel %vm17758_vm3, %v17622_v53, %v4067_v60  ;;  %v17854_v40 = vsub.s32 %v3939_v36, %v3942_v18  ;;  %v4204_v3 = vshrl.u32 %v20983_v32, %v4203_v11 }
 0x3f8   : > { %vm4222_vm12 = vcmp.lt.s32.totalorder %v4201_v47, 3  ;;  %14051 = vcosq.f32 %v4070_v39  ;;  %vm4221_vm4 = vcmp.lt.s32.totalorder %v4201_v47, 2  ;;  %v4229_v19 = vsel %vm4223_vm11, %v4216_v42, 920167782 }
 0x3f9   : > { %v1698_v34 = vadd.f32 %v17470_v45, %v17628_v29  ;;  %14053 = vsinq.f32 %v4070_v39  ;;  %v3945_v37 = vsub.s32 0, %v17854_v40  ;;  %v4225_v25 = vsel %vm4223_vm11, %v4213_v48, 2102212464 }
 0x3fa   : > { %v4228_v26 = vsel %vm4220_vm10, %v4207_v43, %v4210_v23  ;;  %v4230_v10 = vsel %vm4222_vm12, %v4213_v48, %v4229_v19  ;;  %v4232_v36 = vsel %vm4220_vm10, %v4210_v23, %v4213_v48  ;;  %v4233_v63 = vsel %vm4223_vm11, %v4219_v52, 1326507024 }
 0x3fb   : > { %v4236_v35 = vshll.u32 %v4196_v31, 8  ;;  %v8011_v11 = vand.u32 3, %v8010_v33  ;;  %v12808_v14 = vmin.u32 %v3945_v37, %v17854_v40  ;;  %v4224_v30 = vsel %vm4220_vm10, %v4204_v3, %v4207_v43 }
 0x3fc   : > { %v1797_v49 = vmax.f32 %v1695_v51, 0.0  ;;  %v4226_v45 = vsel %vm4222_vm12, %v4210_v23, %v4225_v25  ;;  %v4231_v29 = vsel %vm4221_vm4, %v4228_v26, %v4230_v10  ;;  %v4234_v5 = vsel %vm4222_vm12, %v4216_v42, %v4233_v63 }
 0x3fd   : > { %v1798_v27 = vmax.f32 %v1698_v34, 0.0  ;;  %v3947_v1 = vclz %v12808_v14  ;;  %v4235_v50 = vsel %vm4221_vm4, %v4232_v36, %v4234_v5  ;;  %vm4074_vm7 = vweird.f32 %v17622_v53 }
 0x3fe   : > { %v17869_v38 = vmul.u32.u64.low %v4236_v35, %v4231_v29  ;;  %v17870_v44 = vmul.u32.u64.high %v4236_v35, %v4231_v29, %v17869_v38  ;;  %v17874_v33 = vmul.u32.u64.low %v4236_v35, %v4235_v50  ;;  %v17875_v9 = vmul.u32.u64.high %v4236_v35, %v4235_v50, %v17874_v33 }
 0x3ff   : > { %v10866_v58 = vpack.c.bf16 %v1798_v27, %v1797_v49  ;;  %vm4076_vm3 = vcmp.lt.s32.totalorder %v17836_v55, 2  ;;  %vm3881_vm13 = vcmp.lt.s32.totalorder %v17697_v8, 0  ;;  %v12809_v24 = vadd.s32 4294967294, %v3947_v1  ;;  %v17929_v33 = vld [vmem:[%s14431_s21 + $0xb0] sm:$0xff] }
 0x400   : > { %v4227_v62 = vsel %vm4221_vm4, %v4224_v30, %v4226_v45  ;;  %vm4077_vm14 = vcmp.eq.s32.totalorder %v17836_v55, 0  ;;  %vm4080_vm2 = vcmp.eq.s32.totalorder %v17836_v55, 2  ;;  %vm8013_vm5 = vcmp.eq.s32.totalorder %v8011_v11, 0 }
 0x401   : > { %vm8016_vm15 = vcmp.eq.s32.totalorder %v8011_v11, 2  ;;  %11086 = vmatmul.mubr.bf16.gmra.mrb[72].mxu0 %v10866_v58  ;;  %v3935_v31 = vadd.s32 %v17797_v0, %v17802_v56  ;;  %vm12810_vm6 = vcmp.lt.s32.totalorder %v12809_v24, 0  ;;  %v4246_v42 = vadd.s32 1, %v17870_v44 }
 0x402   : > { %v4097_v51 = vsel %vm4096_vm1, %v17403_v6, 0  ;;  %11095 = vmatprep.mubr.bf16.mxu0 %v20978_v4  ;;  %v14052_v47 = vpop.eup %14051  ;;  %v3950_v18 = vsel %vm12810_vm6, 0, %v12809_v24  ;;  %v3965_v43 = vsub.s32 4, %v17841_v17  ;;  %v4243_v23 = vmul.u32 %v4236_v35, %v4227_v62 }
 0x403   : > { %vm4245_vm9 = vc.u32 %v17875_v9, %v17869_v38  ;;  %v14054_v48 = vpop.eup %14053  ;;  %v4081_v60 = vxor.u32 2147483648, %v14052_v47  ;;  %v3951_v0 = vsub.s32 32, %v3950_v18  ;;  %v3952_v56 = vshll.u32 %v17854_v40, %v3950_v18 }
 0x404   : > { %v3955_v52 = vsub.s32 4294967266, %v3950_v18  ;;  %v4078_v39 = vxor.u32 2147483648, %v14054_v48  ;;  %vm8012_vm8 = vcmp.lt.s32.totalorder %v8011_v11, 2  ;;  %v4247_v6 = vsel %vm4245_vm9, %v4246_v42, %v17870_v44 }
 0x405   : > { %v4099_v3 = vand.u32 31, %v4097_v51  ;;  %v4082_v19 = vsel %vm4080_vm2, %v4081_v60, %v14054_v48  ;;  %v8018_v34 = vsel %vm8016_vm15, %v4081_v60, %v14054_v48  ;;  %v3953_v37 = vshrl.u32 %v3935_v31, %v3951_v0  ;;  %v17948_v0 = vld [vmem:[%s14431_s21 + $0xe8] sm:$0xff] }
 0x406   : > { %v3956_v25 = vadd.s32 127, %v3955_v52  ;;  %v4079_v26 = vsel %vm4077_vm14, %v14052_v47, %v4078_v39  ;;  %v8015_v10 = vsel %vm8013_vm5, %v14052_v47, %v4078_v39  ;;  %v3966_v40 = vsel %vm3881_vm13, %v3965_v43, %v17841_v17 }
 0x407   : > { %v4248_v36 = vadd.s32 %v4247_v6, %v4243_v23  ;;  %v4083_v63 = vsel %vm4076_vm3, %v4079_v26, %v4082_v19  ;;  %v8019_v35 = vsel %vm8012_vm8, %v8015_v10, %v8018_v34  ;;  %v3954_v14 = vor.u32 %v3953_v37, %v3952_v56 }
 0x408   : > { %v3957_v30 = vshll.u32 %v3956_v25, 23  ;;  %v17906_v49 = vadd.s32 4294967169, %v17702_v59  ;;  %v4084_v45 = vsel %vm4074_vm7, nan, %v4083_v63  ;;  %v4100_v29 = vsub.s32 32, %v4099_v3 }
 0x409   : > { %v4249_v11 = vadd.s32 536870912, %v4248_v36  ;;  %v17911_v5 = vadd.s32 1, %v17707_v54  ;;  %9793 = vperm.xlu1 %13865, %v4084_v45   ;;  %vm17915_vm1 = vcmp.le.f32.partialorder %v3879_v7, 0.7853982  ;;  %v3961_v27 = vcvt.s32.f32 %v3954_v14 }
 0x40a   : > { %v3958_v17 = vor.u32 4788187, %v3957_v30  ;;  %v17920_v59 = vadd.s32 4294967169, %v17731_v28  ;;  %v8020_v1 = vsel %vm4074_vm7, nan, %v8019_v35  ;;  %v3968_v50 = vsel %vm17915_vm1, 0, %v3966_v40 }
 0x40b   : > { %v17926_v54 = vshrl.u32 %v4249_v11, 30  ;;  %v4085_v7 = vand.u32 2147483647, %v17929_v33  ;;  %v17932_v58 = vshrl.u32 %v4097_v51, 5  ;;  %v4102_v24 = vshll.u32 %v20983_v32, %v4099_v3 }
 0x40c   : > { %v3959_v44 = vand.u32 2147483647, %v3958_v17  ;;  %v4103_v53 = vshrl.u32 %v20976_v61, %v4100_v29  ;;  %v4105_v62 = vshll.u32 %v20976_v61, %v4099_v3  ;;  %v4106_v31 = vshrl.u32 %v20974_v16, %v4100_v29 }
 0x40d   : > { %v4251_v28 = vshll.u32 %v17926_v54, 30  ;;  %10071 = vperm.xlu1 %13865, %v8020_v1   ;;  %v4108_v47 = vshll.u32 %v20974_v16, %v4099_v3  ;;  %v4109_v18 = vshrl.u32 %v20972_v20, %v4100_v29  ;;  %v4111_v43 = vshll.u32 %v20972_v20, %v4099_v3 }
 0x40e   : > { %v3962_v42 = vmul.f32 %v3961_v27, %v3959_v44  ;;  %v4112_v23 = vshrl.u32 %v20981_v57, %v4100_v29  ;;  %v4114_v48 = vshll.u32 %v20981_v57, %v4099_v3  ;;  %v4115_v60 = vshrl.u32 %v20980_v41, %v4100_v29 }
 0x40f   : > { %v17942_v51 = vsub.s32 %v4248_v36, %v4251_v28  ;;  %v4809_v56 = vand.u32 2139095040, %v17948_v0  ;;  %v7906_v39 = vadd.s32 3, %v3968_v50  ;;  %v4092_v6 = vand.u32 8388607, %v4085_v7 }
 0x410   : > { %v3963_v52 = vxor.u32 2147483648, %v3962_v42  ;;  %vm4405_vm10 = vcmp.gt.s32.totalorder %v17911_v5, 0  ;;  %v17954_v19 = vand.u32 3, %v3968_v50  ;;  %vm4190_vm11 = vcmp.lt.s32.totalorder %v17778_v21, 0 }
 0x411   : > { %v4254_v34 = vsub.s32 0, %v17942_v51  ;;  %v4101_v3 = vshrl.u32 %v20983_v32, %v4100_v29  ;;  %v4104_v37 = vor.u32 %v4103_v53, %v4102_v24  ;;  %v4107_v26 = vor.u32 %v4106_v31, %v4105_v62 }
 0x412   : > { %v3964_v25 = vsel %vm3881_vm13, %v3963_v52, %v3962_v42  ;;  %v4110_v10 = vor.u32 %v4109_v18, %v4108_v47  ;;  %vm4117_vm12 = vcmp.lt.s32.totalorder %v17932_v58, 1  ;;  %v4113_v63 = vor.u32 %v4112_v23, %v4111_v43 }
 0x413   : > { %v3967_v40 = vsel %vm17915_vm1, %v17697_v8, %v3964_v25  ;;  %v12820_v36 = vmin.u32 %v4254_v34, %v17942_v51  ;;  %v4116_v35 = vor.u32 %v4115_v60, %v4114_v48  ;;  %v17966_v14 = vand.u32 3, %v7906_v39  ;;  %v18008_v34 = vld [vmem:[%s14431_s21 + $0xc8] sm:$0xff] }
 0x414   : > { %14055 = vcosq.f32 %v3967_v40  ;;  %v4093_v30 = vor.u32 8388608, %v4092_v6  ;;  %vm4120_vm4 = vcmp.lt.s32.totalorder %v17932_v58, 4  ;;  %vm17971_vm7 = vcmp.le.f32.partialorder %v4188_v15, 0.7853982 }
 0x415   : > { %14057 = vsinq.f32 %v3967_v40  ;;  %v4256_v11 = vclz %v12820_v36  ;;  %vm4119_vm3 = vcmp.lt.s32.totalorder %v17932_v58, 3  ;;  %v4122_v29 = vsel %vm4120_vm4, %v4110_v10, 2102212464 }
 0x416   : > { %vm3977_vm13 = vcmp.eq.s32.totalorder %v17954_v19, 2  ;;  %v4274_v55 = vsub.s32 4, %v17926_v54  ;;  %vm4118_vm14 = vcmp.lt.s32.totalorder %v17932_v58, 2  ;;  %v4121_v17 = vsel %vm4117_vm12, %v4101_v3, %v4104_v37 }
 0x417   : > { %v4125_v27 = vsel %vm4117_vm12, %v4104_v37, %v4107_v26  ;;  %vm3974_vm2 = vcmp.eq.s32.totalorder %v17954_v19, 0  ;;  %v12821_v15 = vadd.s32 4294967294, %v4256_v11  ;;  %v4126_v1 = vsel %vm4120_vm4, %v4113_v63, 920167782 }
 0x418   : > { %v4129_v50 = vsel %vm4117_vm12, %v4107_v26, %v4110_v10  ;;  %v4130_v44 = vsel %vm4120_vm4, %v4116_v35, 1326507024  ;;  %vm3973_vm5 = vcmp.lt.s32.totalorder %v17954_v19, 2  ;;  %v4123_v24 = vsel %vm4119_vm3, %v4107_v26, %v4122_v29 }
 0x419   : > { %v4127_v28 = vsel %vm4119_vm3, %v4110_v10, %v4126_v1  ;;  %v4131_v53 = vsel %vm4119_vm3, %v4113_v63, %v4130_v44  ;;  %v4133_v62 = vshll.u32 %v4093_v30, 8  ;;  %vm3971_vm15 = vweird.f32 %v17697_v8 }
 0x41a   : > { %v4244_v31 = vadd.s32 %v17869_v38, %v17875_v9  ;;  %vm12822_vm6 = vcmp.lt.s32.totalorder %v12821_v15, 0  ;;  %v4128_v42 = vsel %vm4118_vm14, %v4125_v27, %v4127_v28  ;;  %v4132_v47 = vsel %vm4118_vm14, %v4129_v50, %v4131_v53 }
 0x41b   : > { %v4259_v18 = vsel %vm12822_vm6, 0, %v12821_v15  ;;  %v4275_v43 = vsel %vm4190_vm11, %v4274_v55, %v17926_v54  ;;  %v17997_v23 = vmul.u32.u64.low %v4133_v62, %v4132_v47  ;;  %v17998_v48 = vmul.u32.u64.high %v4133_v62, %v4132_v47, %v17997_v23 }
 0x41c   : > { %v4260_v60 = vsub.s32 32, %v4259_v18  ;;  %v4261_v52 = vshll.u32 %v17942_v51, %v4259_v18  ;;  %v4264_v39 = vsub.s32 4294967266, %v4259_v18  ;;  %v4124_v38 = vsel %vm4118_vm14, %v4121_v17, %v4123_v24 }
 0x41d   : > { %v18003_v9 = vmul.u32.u64.low %v4133_v62, %v4128_v42  ;;  %v18004_v6 = vmul.u32.u64.high %v4133_v62, %v4128_v42, %v18003_v9  ;;  %v4394_v3 = vand.u32 2147483647, %v18008_v34  ;;  %v4406_v54 = vsel %vm4405_vm10, %v17911_v5, 0 }
 0x41e   : > { %v4262_v37 = vshrl.u32 %v4244_v31, %v4260_v60  ;;  %v4265_v25 = vadd.s32 127, %v4264_v39  ;;  %vm7908_vm9 = vcmp.lt.s32.totalorder %v17966_v14, 2  ;;  %v4408_v51 = vand.u32 31, %v4406_v54  ;;  %v14056_v26 = vpop.eup %14055 }
 0x41f   : > { %v4277_v58 = vsel %vm17971_vm7, 0, %v4275_v43  ;;  %vm7909_vm8 = vcmp.eq.s32.totalorder %v17966_v14, 0  ;;  %vm7912_vm1 = vcmp.eq.s32.totalorder %v17966_v14, 2  ;;  %v4140_v10 = vmul.u32 %v4133_v62, %v4124_v38  ;;  %v14058_v40 = vpop.eup %14057 }
 0x420   : > { %v3978_v36 = vxor.u32 2147483648, %v14056_v26  ;;  %v4263_v63 = vor.u32 %v4262_v37, %v4261_v52  ;;  %v4266_v35 = vshll.u32 %v4265_v25, 23  ;;  %vm4142_vm10 = vc.u32 %v17998_v48, %v18003_v9 }
 0x421   : > { %v3975_v5 = vxor.u32 2147483648, %v14058_v40  ;;  %v4143_v30 = vadd.s32 1, %v18004_v6  ;;  %v4401_v11 = vand.u32 8388607, %v4394_v3  ;;  %v4409_v29 = vsub.s32 32, %v4408_v51 }
 0x422   : > { %v3979_v55 = vsel %vm3977_vm13, %v3978_v36, %v14058_v40  ;;  %v4267_v17 = vor.u32 4788187, %v4266_v35  ;;  %v4270_v27 = vcvt.s32.f32 %v4263_v63  ;;  %v7914_v15 = vsel %vm7912_vm1, %v3978_v36, %v14058_v40 }
 0x423   : > { %v3976_v1 = vsel %vm3974_vm2, %v14056_v26, %v3975_v5  ;;  %v7911_v50 = vsel %vm7909_vm8, %v14056_v26, %v3975_v5  ;;  %v4144_v44 = vsel %vm4142_vm10, %v4143_v30, %v18004_v6  ;;  %v4411_v24 = vshll.u32 %v20983_v32, %v4408_v51 }
 0x424   : > { %v3980_v28 = vsel %vm3973_vm5, %v3976_v1, %v3979_v55  ;;  %v4268_v53 = vand.u32 2147483647, %v4267_v17  ;;  %v7915_v62 = vsel %vm7908_vm9, %v7911_v50, %v7914_v15  ;;  %v4145_v31 = vadd.s32 %v4144_v44, %v4140_v10 }
 0x425   : > { %v3981_v42 = vsel %vm3971_vm15, nan, %v3980_v28  ;;  %v4412_v47 = vshrl.u32 %v20976_v61, %v4409_v29  ;;  %v4414_v18 = vshll.u32 %v20976_v61, %v4408_v51  ;;  %v4415_v43 = vshrl.u32 %v20974_v16, %v4409_v29 }
 0x426   : > { %9788 = vperm.xlu0 %13866, %v3981_v42   ;;  %v4271_v23 = vmul.f32 %v4270_v27, %v4268_v53  ;;  %v4146_v60 = vadd.s32 536870912, %v4145_v31  ;;  %v4417_v19 = vshll.u32 %v20974_v16, %v4408_v51  ;;  %v4418_v52 = vshrl.u32 %v20972_v20, %v4409_v29 }
 0x427   : > { %v7916_v14 = vsel %vm3971_vm15, nan, %v7915_v62  ;;  %v4407_v39 = vshrl.u32 %v4406_v54, 5  ;;  %v4420_v38 = vshll.u32 %v20972_v20, %v4408_v51  ;;  %v4421_v6 = vshrl.u32 %v20981_v57, %v4409_v29 }
 0x428   : > { %v4272_v37 = vxor.u32 2147483648, %v4271_v23  ;;  %v8218_v25 = vadd.s32 3, %v4277_v58  ;;  %v18047_v26 = vshrl.u32 %v4146_v60, 30  ;;  %v4423_v10 = vshll.u32 %v20981_v57, %v4408_v51 }
 0x429   : > { %v4402_v40 = vor.u32 8388608, %v4401_v11  ;;  %v4413_v36 = vor.u32 %v4412_v47, %v4411_v24  ;;  %v4416_v63 = vor.u32 %v4415_v43, %v4414_v18  ;;  %v4424_v35 = vshrl.u32 %v20980_v41, %v4409_v29 }
 0x42a   : > { %v4273_v8 = vsel %vm4190_vm11, %v4272_v37, %v4271_v23  ;;  %10066 = vperm.xlu0 %13866, %v7916_v14   ;;  %v4148_v54 = vshll.u32 %v18047_v26, 30  ;;  %v4419_v5 = vor.u32 %v4418_v52, %v4417_v19  ;;  %v4422_v30 = vor.u32 %v4421_v6, %v4420_v38  ;;  %v18088_v38 = vld [vmem:[%s21026_s6] ss:$0 sm:$0xff] }
 0x42b   : > { %v4276_v55 = vsel %vm17971_vm7, %v17778_v21, %v4273_v8  ;;  %v4425_v17 = vor.u32 %v4424_v35, %v4423_v10  ;;  %vm4426_vm12 = vcmp.lt.s32.totalorder %v4407_v39, 1  ;;  %vm4429_vm4 = vcmp.lt.s32.totalorder %v4407_v39, 4 }
 0x42c   : > { %14059 = vcosq.f32 %v4276_v55  ;;  %v18057_v51 = vsub.s32 %v4145_v31, %v4148_v54  ;;  %v4410_v11 = vshrl.u32 %v20983_v32, %v4409_v29  ;;  %vm4428_vm3 = vcmp.lt.s32.totalorder %v4407_v39, 3 }
 0x42d   : > { %v18062_v27 = vshrl.u32 %v4809_v56, 23  ;;  %14061 = vsinq.f32 %v4276_v55  ;;  %v4281_v15 = vand.u32 3, %v4277_v58  ;;  %v4431_v1 = vsel %vm4429_vm4, %v4419_v5, 2102212464 }
 0x42e   : > { %v4151_v50 = vsub.s32 0, %v18057_v51  ;;  %vm4427_vm11 = vcmp.lt.s32.totalorder %v4407_v39, 2  ;;  %v4434_v45 = vsel %vm4426_vm12, %v4413_v36, %v4416_v63  ;;  %v4435_v44 = vsel %vm4429_vm4, %v4422_v30, 920167782 }
 0x42f   : > { %v4436_v24 = vsel %vm4428_vm3, %v4419_v5, %v4435_v44  ;;  %v4438_v28 = vsel %vm4426_vm12, %v4416_v63, %v4419_v5  ;;  %v4439_v53 = vsel %vm4429_vm4, %v4425_v17, 1326507024  ;;  %v4442_v29 = vshll.u32 %v4402_v40, 8 }
 0x430   : > { %vm4302_vm7 = vcmp.gt.s32.totalorder %v17652_v13, 0  ;;  %v8219_v62 = vand.u32 3, %v8218_v25  ;;  %v12816_v56 = vmin.u32 %v4151_v50, %v18057_v51  ;;  %v4430_v58 = vsel %vm4426_vm12, %v4410_v11, %v4413_v36 }
 0x431   : > { %v4432_v31 = vsel %vm4428_vm3, %v4416_v63, %v4431_v1  ;;  %vm4280_vm13 = vweird.f32 %v17778_v21  ;;  %vm4282_vm14 = vcmp.lt.s32.totalorder %v4281_v15, 2  ;;  %v4437_v42 = vsel %vm4427_vm11, %v4434_v45, %v4436_v24 }
 0x432   : > { %v4440_v47 = vsel %vm4428_vm3, %v4422_v30, %v4439_v53  ;;  %v4153_v18 = vclz %v12816_v56  ;;  %v18076_v23 = vmul.u32.u64.low %v4442_v29, %v4437_v42  ;;  %v18077_v60 = vmul.u32.u64.high %v4442_v29, %v4437_v42, %v18076_v23 }
 0x433   : > { %v4441_v43 = vsel %vm4427_vm11, %v4438_v28, %v4440_v47  ;;  %vm4087_vm2 = vcmp.lt.s32.totalorder %v17929_v33, 0  ;;  %v4433_v19 = vsel %vm4427_vm11, %v4430_v58, %v4432_v31  ;;  %v1703_v6 = vadd.f32 %v18088_v38, %v17823_v2 }
 0x434   : > { %v18082_v52 = vmul.u32.u64.low %v4442_v29, %v4441_v43  ;;  %v18083_v14 = vmul.u32.u64.high %v4442_v29, %v4441_v43, %v18082_v52  ;;  %vm4283_vm5 = vcmp.eq.s32.totalorder %v4281_v15, 0  ;;  %vm4286_vm15 = vcmp.eq.s32.totalorder %v4281_v15, 2 }
 0x435   : > { %vm8220_vm6 = vcmp.lt.s32.totalorder %v8219_v62, 2  ;;  %v12817_v37 = vadd.s32 4294967294, %v4153_v18  ;;  %vm8221_vm9 = vcmp.eq.s32.totalorder %v8219_v62, 0  ;;  %vm8224_vm8 = vcmp.eq.s32.totalorder %v8219_v62, 2 }
 0x436   : > { %v4141_v39 = vadd.s32 %v18003_v9, %v17998_v48  ;;  %v1706_v25 = vadd.f32 %v18088_v38, %v17839_v46  ;;  %v14060_v10 = vpop.eup %14059  ;;  %v4171_v40 = vsub.s32 4, %v18047_v26  ;;  %v4449_v36 = vmul.u32 %v4442_v29, %v4433_v19 }
 0x437   : > { %vm12818_vm1 = vcmp.lt.s32.totalorder %v12817_v37, 0  ;;  %v4452_v63 = vadd.s32 1, %v18077_v60  ;;  %v14062_v2 = vpop.eup %14061  ;;  %v4287_v35 = vxor.u32 2147483648, %v14060_v10  ;;  %vm4451_vm10 = vc.u32 %v18083_v14, %v18076_v23 }
 0x438   : > { %v4156_v8 = vsel %vm12818_vm1, 0, %v12817_v37  ;;  %v1799_v54 = vmax.f32 %v1703_v6, 0.0  ;;  %v4284_v5 = vxor.u32 2147483648, %v14062_v2  ;;  %v1800_v11 = vmax.f32 %v1706_v25, 0.0  ;;  %v18143_v25 = vld [vmem:[%s14431_s21 + $0xc0] sm:$0xff] }
 0x439   : > { %v4157_v30 = vsub.s32 32, %v4156_v8  ;;  %v4158_v48 = vshll.u32 %v18057_v51, %v4156_v8  ;;  %v4161_v9 = vsub.s32 4294967266, %v4156_v8  ;;  %v4288_v46 = vsel %vm4286_vm15, %v4287_v35, %v14062_v2 }
 0x43a   : > { %v8226_v55 = vsel %vm8224_vm8, %v4287_v35, %v14062_v2  ;;  %v4453_v17 = vsel %vm4451_vm10, %v4452_v63, %v18077_v60  ;;  %v4285_v1 = vsel %vm4283_vm5, %v14060_v10, %v4284_v5  ;;  %v8223_v50 = vsel %vm8221_vm9, %v14060_v10, %v4284_v5 }
 0x43b   : > { %v4159_v45 = vshrl.u32 %v4141_v39, %v4157_v30  ;;  %v4162_v44 = vadd.s32 127, %v4161_v9  ;;  %v4289_v24 = vsel %vm4282_vm14, %v4285_v1, %v4288_v46  ;;  %v8227_v28 = vsel %vm8220_vm6, %v8223_v50, %v8226_v55 }
 0x43c   : > { %v4454_v53 = vadd.s32 %v4453_v17, %v4449_v36  ;;  %v4303_v51 = vsel %vm4302_vm7, %v17652_v13, 0  ;;  %v4290_v29 = vsel %vm4280_vm13, nan, %v4289_v24  ;;  %v4172_v31 = vsel %vm4087_vm2, %v4171_v40, %v18047_v26 }
 0x43d   : > { %v4160_v56 = vor.u32 %v4159_v45, %v4158_v48  ;;  %v4163_v58 = vshll.u32 %v4162_v44, 23  ;;  %v12843_v42 = vadd.s32 4294967169, %v18062_v27  ;;  %9803 = vperm.xlu1 %13865, %v4290_v29   ;;  %vm18119_vm12 = vcmp.le.f32.partialorder %v4085_v7, 0.7853982 }
 0x43e   : > { %v4455_v62 = vadd.s32 536870912, %v4454_v53  ;;  %v10867_v13 = vpack.c.bf16 %v1800_v11, %v1799_v54  ;;  %v8228_v47 = vsel %vm4280_vm13, nan, %v8227_v28  ;;  %v4305_v60 = vand.u32 31, %v4303_v51 }
 0x43f   : > { %v4164_v18 = vor.u32 4788187, %v4163_v58  ;;  %v4167_v43 = vcvt.s32.f32 %v4160_v56  ;;  %v18126_v26 = vadd.s32 1, %v17510_v22  ;;  %v4174_v27 = vsel %vm18119_vm12, 0, %v4172_v31 }
 0x440   : > { %v18130_v19 = vshrl.u32 %v4455_v62, 30  ;;  %11096 = vmatmul.mubr.bf16.gmra.mrb[76].mxu0 %v10867_v13  ;;  %v18133_v7 = vadd.s32 1, %v17906_v49  ;;  %v18136_v52 = vadd.s32 1, %v17920_v59  ;;  %v4306_v6 = vsub.s32 32, %v4305_v60 }
 0x441   : > { %v4165_v21 = vand.u32 2147483647, %v4164_v18  ;;  %11105 = vmatprep.mubr.bf16.mxu0 %v20978_v4  ;;  %v18139_v37 = vadd.s32 1, %v12843_v42  ;;  %10081 = vperm.xlu1 %13865, %v8228_v47   ;;  %v8114_v39 = vadd.s32 3, %v4174_v27  ;;  %v4291_v10 = vand.u32 2147483647, %v18143_v25 }
 0x442   : > { %v4457_v22 = vshll.u32 %v18130_v19, 30  ;;  %v18146_v49 = vand.u32 3, %v4174_v27  ;;  %v4308_v59 = vshll.u32 %v20983_v32, %v4305_v60  ;;  %v4311_v36 = vshll.u32 %v20976_v61, %v4305_v60 }
 0x443   : > { %v4168_v40 = vmul.f32 %v4167_v43, %v4165_v21  ;;  %v4309_v2 = vshrl.u32 %v20976_v61, %v4306_v6  ;;  %v4312_v35 = vshrl.u32 %v20974_v16, %v4306_v6  ;;  %v4314_v8 = vshll.u32 %v20974_v16, %v4305_v60 }
 0x444   : > { %v18150_v63 = vsub.s32 %v4454_v53, %v4457_v22  ;;  %v4315_v5 = vshrl.u32 %v20972_v20, %v4306_v6  ;;  %v4317_v30 = vshll.u32 %v20972_v20, %v4305_v60  ;;  %v4318_v48 = vshrl.u32 %v20981_v57, %v4306_v6 }
 0x445   : > { %v4169_v54 = vxor.u32 2147483648, %v4168_v40  ;;  %vm4611_vm4 = vcmp.gt.s32.totalorder %v18133_v7, 0  ;;  %v18160_v46 = vand.u32 3, %v8114_v39  ;;  %v4298_v55 = vand.u32 8388607, %v4291_v10 }
 0x446   : > { %v4460_v9 = vsub.s32 0, %v18150_v63  ;;  %v4304_v17 = vshrl.u32 %v4303_v51, 5  ;;  %v4307_v1 = vshrl.u32 %v20983_v32, %v4306_v6  ;;  %v4320_v50 = vshll.u32 %v20981_v57, %v4305_v60 }
 0x447   : > { %v4170_v11 = vsel %vm4087_vm2, %v4169_v54, %v4168_v40  ;;  %v4321_v45 = vshrl.u32 %v20980_v41, %v4306_v6  ;;  %vm4396_vm3 = vcmp.lt.s32.totalorder %v18008_v34, 0  ;;  %v4310_v28 = vor.u32 %v4309_v2, %v4308_v59  ;;  %v18193_v40 = vld [vmem:[%s14431_s21 + $0xd8] sm:$0xff] }
 0x448   : > { %v4173_v44 = vsel %vm18119_vm12, %v17929_v33, %v4170_v11  ;;  %v12828_v24 = vmin.u32 %v4460_v9, %v18150_v63  ;;  %v4313_v53 = vor.u32 %v4312_v35, %v4311_v36  ;;  %v4316_v51 = vor.u32 %v4315_v5, %v4314_v8 }
 0x449   : > { %14063 = vcosq.f32 %v4173_v44  ;;  %v4319_v29 = vor.u32 %v4318_v48, %v4317_v30  ;;  %v4322_v56 = vor.u32 %v4321_v45, %v4320_v50  ;;  %v4450_v58 = vadd.s32 %v18076_v23, %v18083_v14 }
 0x44a   : > { %14065 = vsinq.f32 %v4173_v44  ;;  %v4462_v31 = vclz %v12828_v24  ;;  %vm4323_vm11 = vcmp.lt.s32.totalorder %v4304_v17, 1  ;;  %vm4183_vm7 = vcmp.eq.s32.totalorder %v18146_v49, 2 }
 0x44b   : > { %v4480_v42 = vsub.s32 4, %v18130_v19  ;;  %v4299_v15 = vor.u32 8388608, %v4298_v55  ;;  %vm4324_vm13 = vcmp.lt.s32.totalorder %v4304_v17, 2  ;;  %vm4325_vm14 = vcmp.lt.s32.totalorder %v4304_v17, 3 }
 0x44c   : > { %vm4180_vm2 = vcmp.eq.s32.totalorder %v18146_v49, 0  ;;  %vm18181_vm5 = vcmp.le.f32.partialorder %v4394_v3, 0.7853982  ;;  %v12829_v13 = vadd.s32 4294967294, %v4462_v31  ;;  %vm4326_vm15 = vcmp.lt.s32.totalorder %v4304_v17, 4 }
 0x44d   : > { %v4327_v23 = vsel %vm4323_vm11, %v4307_v1, %v4310_v28  ;;  %v4331_v14 = vsel %vm4323_vm11, %v4310_v28, %v4313_v53  ;;  %vm4179_vm6 = vcmp.lt.s32.totalorder %v18146_v49, 2  ;;  %v4328_v47 = vsel %vm4326_vm15, %v4316_v51, 2102212464 }
 0x44e   : > { %v4332_v18 = vsel %vm4326_vm15, %v4319_v29, 920167782  ;;  %v4335_v43 = vsel %vm4323_vm11, %v4313_v53, %v4316_v51  ;;  %v4336_v60 = vsel %vm4326_vm15, %v4322_v56, 1326507024  ;;  %vm4177_vm9 = vweird.f32 %v17929_v33 }
 0x44f   : > { %vm12830_vm8 = vcmp.lt.s32.totalorder %v12829_v13, 0  ;;  %v4329_v27 = vsel %vm4325_vm14, %v4313_v53, %v4328_v47  ;;  %v4333_v3 = vsel %vm4325_vm14, %v4316_v51, %v4332_v18  ;;  %v4337_v21 = vsel %vm4325_vm14, %v4319_v29, %v4336_v60 }
 0x450   : > { %v4465_v6 = vsel %vm12830_vm8, 0, %v12829_v13  ;;  %v4334_v22 = vsel %vm4324_vm13, %v4331_v14, %v4333_v3  ;;  %v4338_v39 = vsel %vm4324_vm13, %v4335_v43, %v4337_v21  ;;  %v4600_v59 = vand.u32 2147483647, %v18193_v40  ;;  %v18239_v21 = vpop.f32.mrb[76].mxu1 }
 0x451   : > { %v4466_v36 = vsub.s32 32, %v4465_v6  ;;  %v4467_v2 = vshll.u32 %v18150_v63, %v4465_v6  ;;  %v4470_v35 = vsub.s32 4294967266, %v4465_v6  ;;  %v4339_v8 = vshll.u32 %v4299_v15, 8 }
 0x452   : > { %v4481_v54 = vsel %vm4396_vm3, %v4480_v42, %v18130_v19  ;;  %vm8116_vm1 = vcmp.lt.s32.totalorder %v18160_v46, 2  ;;  %v4330_v5 = vsel %vm4324_vm13, %v4327_v23, %v4329_v27  ;;  %v4612_v30 = vsel %vm4611_vm4, %v18133_v7, 0 }
 0x453   : > { %v4468_v48 = vshrl.u32 %v4450_v58, %v4466_v36  ;;  %v4471_v9 = vadd.s32 127, %v4470_v35  ;;  %v18205_v55 = vmul.u32.u64.low %v4339_v8, %v4338_v39  ;;  %v18206_v11 = vmul.u32.u64.high %v4339_v8, %v4338_v39, %v18205_v55  ;;  %v14064_v63 = vpop.eup %14063  ;;  %v13328_v39 = vpop.f32.mrb[77].mxu1 }
 0x454   : > { %vm8120_vm10 = vcmp.eq.s32.totalorder %v18160_v46, 2  ;;  %v18209_v1 = vmul.u32.u64.low %v4339_v8, %v4334_v22  ;;  %v18210_v50 = vmul.u32.u64.high %v4339_v8, %v4334_v22, %v18209_v1  ;;  %v18215_v19 = vand.u32 8388607, %v4600_v59  ;;  %v14066_v17 = vpop.eup %14065 }
 0x455   : > { %v4184_v45 = vxor.u32 2147483648, %v14064_v63  ;;  %v4469_v44 = vor.u32 %v4468_v48, %v4467_v2  ;;  %v4472_v7 = vshll.u32 %v4471_v9, 23  ;;  %vm8117_vm12 = vcmp.eq.s32.totalorder %v18160_v46, 0 }
 0x456   : > { %v4181_v24 = vxor.u32 2147483648, %v14066_v17  ;;  %v4483_v28 = vsel %vm18181_vm5, 0, %v4481_v54  ;;  %v4346_v53 = vmul.u32 %v4339_v8, %v4330_v5  ;;  %v4614_v51 = vand.u32 31, %v4612_v30  ;;  %v18248_v54 = vpop.f32.mrb[78].mxu1 }
 0x457   : > { %v4185_v29 = vsel %vm4183_vm7, %v4184_v45, %v14066_v17  ;;  %v4473_v56 = vor.u32 4788187, %v4472_v7  ;;  %v4476_v58 = vcvt.s32.f32 %v4469_v44  ;;  %v8122_v31 = vsel %vm8120_vm10, %v4184_v45, %v14066_v17  ;;  %v13329_v9 = vpop.f32.mrb[79].mxu1 }
 0x458   : > { %v4182_v42 = vsel %vm4180_vm2, %v14064_v63, %v4181_v24  ;;  %v8119_v15 = vsel %vm8117_vm12, %v14064_v63, %v4181_v24  ;;  %vm4348_vm4 = vc.u32 %v18206_v11, %v18209_v1  ;;  %v4608_v13 = vor.u32 8388608, %v18215_v19 }
 0x459   : > { %v4186_v23 = vsel %vm4179_vm6, %v4182_v42, %v4185_v29  ;;  %v4474_v14 = vand.u32 2147483647, %v4473_v56  ;;  %v8123_v47 = vsel %vm8116_vm1, %v8119_v15, %v8122_v31  ;;  %v4349_v18 = vadd.s32 1, %v18210_v50 }
 0x45a   : > { %v4187_v43 = vsel %vm4177_vm9, nan, %v4186_v23  ;;  %v18236_v60 = vshrl.u32 %v4612_v30, 5  ;;  %v4615_v27 = vsub.s32 32, %v4614_v51  ;;  %v4617_v3 = vshll.u32 %v20983_v32, %v4614_v51 }
 0x45b   : > { %9798 = vperm.xlu0 %13866, %v4187_v43   ;;  %v4477_v6 = vmul.f32 %v4476_v58, %v4474_v14  ;;  %v8124_v49 = vsel %vm4177_vm9, nan, %v8123_v47  ;;  %v4350_v46 = vsel %vm4348_vm4, %v4349_v18, %v18210_v50  ;;  %v4620_v22 = vshll.u32 %v20976_v61, %v4614_v51 }
 0x45c   : > { %v4351_v36 = vadd.s32 %v4350_v46, %v4346_v53  ;;  %v4618_v2 = vshrl.u32 %v20976_v61, %v4615_v27  ;;  %v4621_v35 = vshrl.u32 %v20974_v16, %v4615_v27  ;;  %v4623_v8 = vshll.u32 %v20974_v16, %v4614_v51 }
 0x45d   : > { %v4478_v5 = vxor.u32 2147483648, %v4477_v6  ;;  %v4624_v30 = vshrl.u32 %v20972_v20, %v4615_v27  ;;  %v4626_v33 = vshll.u32 %v20972_v20, %v4614_v51  ;;  %v4627_v48 = vshrl.u32 %v20981_v57, %v4615_v27 }
 0x45e   : > { %v4352_v55 = vadd.s32 536870912, %v4351_v36  ;;  %v4616_v63 = vshrl.u32 %v20983_v32, %v4615_v27  ;;  %v4619_v50 = vor.u32 %v4618_v2, %v4617_v3  ;;  %v4629_v19 = vshll.u32 %v20981_v57, %v4614_v51 }
 0x45f   : > { %vm4508_vm11 = vcmp.gt.s32.totalorder %v18126_v26, 0  ;;  %v4479_v17 = vsel %vm4396_vm3, %v4478_v5, %v4477_v6  ;;  %10076 = vperm.xlu0 %13866, %v8124_v49   ;;  %v4622_v45 = vor.u32 %v4621_v35, %v4620_v22  ;;  %v4628_v44 = vor.u32 %v4627_v48, %v4626_v33  ;;  %v18291_v49 = vld [vmem:[%s14431_s21 + $0xf0] sm:$0xff] }
 0x460   : > { %v4630_v7 = vshrl.u32 %v20980_v41, %v4615_v27  ;;  %v4482_v24 = vsel %vm18181_vm5, %v18008_v34, %v4479_v17  ;;  %v4353_v53 = vshrl.u32 %v4352_v55, 30  ;;  %v4625_v29 = vor.u32 %v4624_v30, %v4623_v8 }
 0x461   : > { %vm4632_vm7 = vcmp.lt.s32.totalorder %v18236_v60, 1  ;;  %14067 = vcosq.f32 %v4482_v24  ;;  %vm4634_vm13 = vcmp.lt.s32.totalorder %v18236_v60, 3  ;;  %vm4635_vm14 = vcmp.lt.s32.totalorder %v18236_v60, 4 }
 0x462   : > { %v4631_v51 = vor.u32 %v4630_v7, %v4629_v19  ;;  %14069 = vsinq.f32 %v4482_v24  ;;  %v8426_v56 = vadd.s32 3, %v4483_v28  ;;  %v4354_v58 = vshll.u32 %v4353_v53, 30 }
 0x463   : > { %vm4633_vm3 = vcmp.lt.s32.totalorder %v18236_v60, 2  ;;  %v4637_v62 = vsel %vm4635_vm14, %v4625_v29, 2102212464  ;;  %v4640_v31 = vsel %vm4632_vm7, %v4619_v50, %v4622_v45  ;;  %v4641_v42 = vsel %vm4635_vm14, %v4628_v44, 920167782 }
 0x464   : > { %v4648_v15 = vshll.u32 %v4608_v13, 8  ;;  %v4487_v23 = vand.u32 3, %v4483_v28  ;;  %v18272_v14 = vsub.s32 %v4351_v36, %v4354_v58  ;;  %v4642_v47 = vsel %vm4634_vm13, %v4625_v29, %v4641_v42  ;;  %v18287_v13 = vld [vmem:[%s14431_s21 + $0xf8] sm:$0xff] }
 0x465   : > { %v4644_v18 = vsel %vm4632_vm7, %v4622_v45, %v4625_v29  ;;  %v4636_v43 = vsel %vm4632_vm7, %v4616_v63, %v4619_v50  ;;  %v4638_v27 = vsel %vm4634_vm13, %v4622_v45, %v4637_v62  ;;  %v4643_v3 = vsel %vm4633_vm3, %v4640_v31, %v4642_v47 }
 0x466   : > { %v4645_v28 = vsel %vm4635_vm14, %v4631_v51, 1326507024  ;;  %v5015_v6 = vand.u32 2139095040, %v18287_v13  ;;  %v4912_v46 = vand.u32 2139095040, %v18291_v49  ;;  %v4357_v22 = vsub.s32 0, %v18272_v14 }
 0x467   : > { %v4646_v39 = vsel %vm4634_vm13, %v4628_v44, %v4645_v28  ;;  %v8427_v36 = vand.u32 3, %v8426_v56  ;;  %v18299_v35 = vmul.u32.u64.low %v4648_v15, %v4643_v3  ;;  %v18300_v8 = vmul.u32.u64.high %v4648_v15, %v4643_v3, %v18299_v35 }
 0x468   : > { %v4647_v2 = vsel %vm4633_vm3, %v4644_v18, %v4646_v39  ;;  %vm4486_vm2 = vweird.f32 %v18008_v34  ;;  %vm4293_vm5 = vcmp.lt.s32.totalorder %v18143_v25, 0  ;;  %v12824_v5 = vmin.u32 %v4357_v22, %v18272_v14  ;;  %v18338_v22 = vld [vmem:[%s14431_s21 + $0xd0] sm:$0xff] }
 0x469   : > { %v4639_v30 = vsel %vm4633_vm3, %v4636_v43, %v4638_v27  ;;  %vm4488_vm15 = vcmp.lt.s32.totalorder %v4487_v23, 2  ;;  %v4377_v33 = vsub.s32 4, %v4353_v53  ;;  %vm4489_vm6 = vcmp.eq.s32.totalorder %v4487_v23, 0 }
 0x46a   : > { %v18308_v48 = vmul.u32.u64.low %v4648_v15, %v4647_v2  ;;  %v18309_v9 = vmul.u32.u64.high %v4648_v15, %v4647_v2, %v18308_v48  ;;  %vm4492_vm9 = vcmp.eq.s32.totalorder %v4487_v23, 2  ;;  %v4359_v55 = vclz %v12824_v5 }
 0x46b   : > { %v4509_v63 = vsel %vm4508_vm11, %v18126_v26, 0  ;;  %v14068_v50 = vpop.eup %14067  ;;  %vm8428_vm8 = vcmp.lt.s32.totalorder %v8427_v36, 2  ;;  %vm8432_vm1 = vcmp.eq.s32.totalorder %v8427_v36, 2  ;;  %v4655_v19 = vmul.u32 %v4648_v15, %v4639_v30 }
 0x46c   : > { %v4658_v17 = vadd.s32 1, %v18300_v8  ;;  %v14070_v60 = vpop.eup %14069  ;;  %v4493_v45 = vxor.u32 2147483648, %v14068_v50  ;;  %vm8429_vm10 = vcmp.eq.s32.totalorder %v8427_v36, 0  ;;  %v4347_v44 = vadd.s32 %v18209_v1, %v18206_v11 }
 0x46d   : > { %v12825_v7 = vadd.s32 4294967294, %v4359_v55  ;;  %v4490_v24 = vxor.u32 2147483648, %v14070_v60  ;;  %v4378_v29 = vsel %vm4293_vm5, %v4377_v33, %v4353_v53  ;;  %vm4657_vm12 = vc.u32 %v18309_v9, %v18299_v35 }
 0x46e   : > { %v4511_v26 = vand.u32 31, %v4509_v63  ;;  %v4494_v51 = vsel %vm4492_vm9, %v4493_v45, %v14070_v60  ;;  %v8434_v56 = vsel %vm8432_vm1, %v4493_v45, %v14070_v60  ;;  %v4659_v58 = vsel %vm4657_vm12, %v4658_v17, %v18300_v8 }
 0x46f   : > { %vm12826_vm4 = vcmp.lt.s32.totalorder %v12825_v7, 0  ;;  %v4491_v62 = vsel %vm4489_vm6, %v14068_v50, %v4490_v24  ;;  %v8431_v31 = vsel %vm8429_vm10, %v14068_v50, %v4490_v24  ;;  %v4660_v1 = vadd.s32 %v4659_v58, %v4655_v19 }
 0x470   : > { %v4362_v11 = vsel %vm12826_vm4, 0, %v12825_v7  ;;  %v4495_v42 = vsel %vm4488_vm15, %v4491_v62, %v4494_v51  ;;  %v8435_v53 = vsel %vm8428_vm8, %v8431_v31, %v8434_v56  ;;  %v18327_v18 = vshrl.u32 %v5015_v6, 23 }
 0x471   : > { %v4363_v15 = vsub.s32 32, %v4362_v11  ;;  %v4364_v47 = vshll.u32 %v18272_v14, %v4362_v11  ;;  %v4496_v43 = vsel %vm4486_vm2, nan, %v4495_v42  ;;  %v4367_v27 = vsub.s32 4294967266, %v4362_v11 }
 0x472   : > { %v4661_v3 = vadd.s32 536870912, %v4660_v1  ;;  %9813 = vperm.xlu1 %13865, %v4496_v43   ;;  %vm18333_vm11 = vcmp.le.f32.partialorder %v4291_v10, 0.7853982  ;;  %v4497_v39 = vand.u32 2147483647, %v18338_v22  ;;  %v4512_v14 = vsub.s32 32, %v4511_v26 }
 0x473   : > { %v4365_v23 = vshrl.u32 %v4347_v44, %v4363_v15  ;;  %v8436_v6 = vsel %vm4486_vm2, nan, %v8435_v53  ;;  %v4368_v36 = vadd.s32 127, %v4367_v27  ;;  %v4380_v2 = vsel %vm18333_vm11, 0, %v4378_v29 }
 0x474   : > { %v4662_v8 = vshrl.u32 %v4661_v3, 30  ;;  %v8322_v30 = vadd.s32 3, %v4380_v2  ;;  %v18345_v10 = vshrl.u32 %v4509_v63, 5  ;;  %v4514_v33 = vshll.u32 %v20983_v32, %v4511_v26 }
 0x475   : > { %v4366_v5 = vor.u32 %v4365_v23, %v4364_v47  ;;  %v4369_v48 = vshll.u32 %v4368_v36, 23  ;;  %vm4602_vm7 = vcmp.lt.s32.totalorder %v18193_v40, 0  ;;  %v4517_v50 = vshll.u32 %v20976_v61, %v4511_v26 }
 0x476   : > { %v4663_v55 = vshll.u32 %v4662_v8, 30  ;;  %v4520_v34 = vshll.u32 %v20974_v16, %v4511_v26  ;;  %10091 = vperm.xlu1 %13865, %v8436_v6   ;;  %v4515_v19 = vshrl.u32 %v20976_v61, %v4512_v14  ;;  %v4518_v17 = vshrl.u32 %v20974_v16, %v4512_v14 }
 0x477   : > { %v4521_v60 = vshrl.u32 %v20972_v20, %v4512_v14  ;;  %v4523_v63 = vshll.u32 %v20972_v20, %v4511_v26  ;;  %v4370_v45 = vor.u32 4788187, %v4369_v48  ;;  %v4373_v44 = vcvt.s32.f32 %v4366_v5 }
 0x478   : > { %v18355_v7 = vsub.s32 %v4660_v1, %v4663_v55  ;;  %v4524_v24 = vshrl.u32 %v20981_v57, %v4512_v14  ;;  %v18358_v29 = vand.u32 3, %v4380_v2  ;;  %v4504_v51 = vand.u32 8388607, %v4497_v39 }
 0x479   : > { %v4526_v56 = vshll.u32 %v20981_v57, %v4511_v26  ;;  %v4527_v58 = vshrl.u32 %v20980_v41, %v4512_v14  ;;  %v4371_v62 = vand.u32 2147483647, %v4370_v45  ;;  %v18365_v11 = vand.u32 3, %v8322_v30 }
 0x47a   : > { %v4666_v31 = vsub.s32 0, %v18355_v7  ;;  %v4513_v42 = vshrl.u32 %v20983_v32, %v4512_v14  ;;  %v4686_v1 = vsub.s32 4, %v4662_v8  ;;  %v4516_v53 = vor.u32 %v4515_v19, %v4514_v33 }
 0x47b   : > { %v4519_v15 = vor.u32 %v4518_v17, %v4517_v50  ;;  %v4522_v47 = vor.u32 %v4521_v60, %v4520_v34  ;;  %vm4817_vm13 = vcmp.gt.s32.totalorder %v18139_v37, 0  ;;  %v4374_v43 = vmul.f32 %v4373_v44, %v4371_v62 }
 0x47c   : > { %v12836_v27 = vmin.u32 %v4666_v31, %v18355_v7  ;;  %v4525_v3 = vor.u32 %v4524_v24, %v4523_v63  ;;  %vm4529_vm14 = vcmp.lt.s32.totalorder %v18345_v10, 1  ;;  %vm18373_vm3 = vcmp.le.f32.partialorder %v4600_v59, 0.7853982 }
 0x47d   : > { %v4656_v23 = vadd.s32 %v18299_v35, %v18309_v9  ;;  %v4505_v14 = vor.u32 8388608, %v4504_v51  ;;  %v4528_v6 = vor.u32 %v4527_v58, %v4526_v56  ;;  %vm4532_vm2 = vcmp.lt.s32.totalorder %v18345_v10, 4 }
 0x47e   : > { %v4375_v36 = vxor.u32 2147483648, %v4374_v43  ;;  %v4668_v2 = vclz %v12836_v27  ;;  %vm4531_vm15 = vcmp.lt.s32.totalorder %v18345_v10, 3  ;;  %v4534_v5 = vsel %vm4532_vm2, %v4522_v47, 2102212464 }
 0x47f   : > { %v4687_v59 = vsel %vm4602_vm7, %v4686_v1, %v4662_v8  ;;  %vm4530_vm6 = vcmp.lt.s32.totalorder %v18345_v10, 2  ;;  %v4533_v30 = vsel %vm4529_vm14, %v4513_v42, %v4516_v53  ;;  %v4537_v35 = vsel %vm4529_vm14, %v4516_v53, %v4519_v15 }
 0x480   : > { %v4376_v9 = vsel %vm4293_vm5, %v4375_v36, %v4374_v43  ;;  %v12837_v33 = vadd.s32 4294967294, %v4668_v2  ;;  %v4535_v48 = vsel %vm4531_vm15, %v4519_v15, %v4534_v5  ;;  %v4538_v55 = vsel %vm4532_vm2, %v4525_v3, 920167782 }
 0x481   : > { %v4379_v8 = vsel %vm18333_vm11, %v18143_v25, %v4376_v9  ;;  %v4539_v50 = vsel %vm4531_vm15, %v4522_v47, %v4538_v55  ;;  %v4541_v34 = vsel %vm4529_vm14, %v4519_v15, %v4522_v47  ;;  %v4542_v19 = vsel %vm4532_vm2, %v4528_v6, 1326507024 }
 0x482   : > { %14071 = vcosq.f32 %v4379_v8  ;;  %vm12838_vm5 = vcmp.lt.s32.totalorder %v12837_v33, 0  ;;  %v4540_v17 = vsel %vm4530_vm6, %v4537_v35, %v4539_v50  ;;  %v4543_v60 = vsel %vm4531_vm15, %v4525_v3, %v4542_v19  ;;  %v18449_v50 = vpop.f32.mrb[80].mxu1 }
 0x483   : > { %14073 = vsinq.f32 %v4379_v8  ;;  %v4671_v28 = vsel %vm12838_vm5, 0, %v12837_v33  ;;  %v4544_v63 = vsel %vm4530_vm6, %v4541_v34, %v4543_v60  ;;  %v4545_v45 = vshll.u32 %v4505_v14, 8 }
 0x484   : > { %v4672_v44 = vsub.s32 32, %v4671_v28  ;;  %v4673_v24 = vshll.u32 %v18355_v7, %v4671_v28  ;;  %v4676_v51 = vsub.s32 4294967266, %v4671_v28  ;;  %v4536_v56 = vsel %vm4530_vm6, %v4533_v30, %v4535_v48 }
 0x485   : > { %vm4386_vm9 = vcmp.eq.s32.totalorder %v18358_v29, 0  ;;  %v18415_v58 = vmul.u32.u64.low %v4545_v45, %v4544_v63  ;;  %v18416_v62 = vmul.u32.u64.high %v4545_v45, %v4544_v63, %v18415_v58  ;;  %vm4385_vm8 = vcmp.lt.s32.totalorder %v18358_v29, 2  ;;  %v13332_v63 = vpop.f32.mrb[81].mxu1 }
 0x486   : > { %v18418_v31 = vmul.u32.u64.low %v4545_v45, %v4540_v17  ;;  %v18419_v42 = vmul.u32.u64.high %v4545_v45, %v4540_v17, %v18418_v31  ;;  %vm4389_vm1 = vcmp.eq.s32.totalorder %v18358_v29, 2  ;;  %v4674_v1 = vshrl.u32 %v4656_v23, %v4672_v44 }
 0x487   : > { %v4677_v53 = vadd.s32 127, %v4676_v51  ;;  %v4689_v7 = vsel %vm18373_vm3, 0, %v4687_v59  ;;  %vm4383_vm10 = vweird.f32 %v18143_v25  ;;  %vm8324_vm12 = vcmp.lt.s32.totalorder %v18365_v11, 2 }
 0x488   : > { %vm8325_vm4 = vcmp.eq.s32.totalorder %v18365_v11, 0  ;;  %v4806_v10 = vand.u32 2147483647, %v17948_v0  ;;  %v4818_v15 = vsel %vm4817_vm13, %v18139_v37, 0  ;;  %v4675_v47 = vor.u32 %v4674_v1, %v4673_v24 }
 0x489   : > { %v4678_v43 = vshll.u32 %v4677_v53, 23  ;;  %v4552_v27 = vmul.u32 %v4545_v45, %v4536_v56  ;;  %v4820_v3 = vand.u32 31, %v4818_v15  ;;  %v18433_v23 = vand.u32 3, %v4689_v7 }
 0x48a   : > { %vm8328_vm11 = vcmp.eq.s32.totalorder %v18365_v11, 2  ;;  %vm4554_vm14 = vc.u32 %v18416_v62, %v18418_v31  ;;  %v4555_v14 = vadd.s32 1, %v18419_v42  ;;  %v4682_v36 = vcvt.s32.f32 %v4675_v47 }
 0x48b   : > { %v4679_v6 = vor.u32 4788187, %v4678_v43  ;;  %v8634_v2 = vadd.s32 3, %v4689_v7  ;;  %v4821_v5 = vsub.s32 32, %v4820_v3  ;;  %v18442_v37 = vand.u32 8388607, %v4806_v10 }
 0x48c   : > { %v4556_v59 = vsel %vm4554_vm14, %v4555_v14, %v18419_v42  ;;  %v18444_v30 = vshrl.u32 %v4818_v15, 5  ;;  %v4823_v35 = vshll.u32 %v20983_v32, %v4820_v3  ;;  %v14072_v9 = vpop.eup %14071  ;;  %v4826_v55 = vshll.u32 %v20976_v61, %v4820_v3  ;;  %v18467_v43 = vpop.f32.mrb[82].mxu1 }
 0x48d   : > { %v4680_v33 = vand.u32 2147483647, %v4679_v6  ;;  %v4557_v48 = vadd.s32 %v4556_v59, %v4552_v27  ;;  %v4829_v8 = vshll.u32 %v20974_v16, %v4820_v3  ;;  %v14074_v34 = vpop.eup %14073  ;;  %v4390_v19 = vxor.u32 2147483648, %v14072_v9  ;;  %v13333_v59 = vpop.f32.mrb[83].mxu1 }
 0x48e   : > { %v4824_v17 = vshrl.u32 %v20976_v61, %v4821_v5  ;;  %v4827_v60 = vshrl.u32 %v20974_v16, %v4821_v5  ;;  %v4832_v28 = vshll.u32 %v20972_v20, %v4820_v3  ;;  %v4387_v45 = vxor.u32 2147483648, %v14074_v34 }
 0x48f   : > { %v4683_v44 = vmul.f32 %v4682_v36, %v4680_v33  ;;  %v4558_v24 = vadd.s32 536870912, %v4557_v48  ;;  %v4822_v51 = vshrl.u32 %v20983_v32, %v4821_v5  ;;  %v4391_v56 = vsel %vm4389_vm1, %v4390_v19, %v14074_v34 }
 0x490   : > { %v8330_v58 = vsel %vm8328_vm11, %v4390_v19, %v14074_v34  ;;  %v4830_v42 = vshrl.u32 %v20972_v20, %v4821_v5  ;;  %v4833_v1 = vshrl.u32 %v20981_v57, %v4821_v5  ;;  %v4388_v53 = vsel %vm4386_vm9, %v14072_v9, %v4387_v45 }
 0x491   : > { %v4684_v7 = vxor.u32 2147483648, %v4683_v44  ;;  %v8327_v15 = vsel %vm8325_vm4, %v14072_v9, %v4387_v45  ;;  %v18465_v47 = vshrl.u32 %v4558_v24, 30  ;;  %v4392_v27 = vsel %vm4385_vm8, %v4388_v53, %v4391_v56 }
 0x492   : > { %v8331_v14 = vsel %vm8324_vm12, %v8327_v15, %v8330_v58  ;;  %v4825_v6 = vor.u32 %v4824_v17, %v4823_v35  ;;  %v4828_v36 = vor.u32 %v4827_v60, %v4826_v55  ;;  %v4393_v33 = vsel %vm4383_vm10, nan, %v4392_v27 }
 0x493   : > { %v4685_v34 = vsel %vm4602_vm7, %v4684_v7, %v4683_v44  ;;  %v4560_v9 = vshll.u32 %v18465_v47, 30  ;;  %v4835_v19 = vshll.u32 %v20981_v57, %v4820_v3  ;;  %9808 = vperm.xlu0 %13866, %v4393_v33   ;;  %v4831_v11 = vor.u32 %v4830_v42, %v4829_v8 }
 0x494   : > { %v4688_v29 = vsel %vm18373_vm3, %v18193_v40, %v4685_v34  ;;  %v4834_v63 = vor.u32 %v4833_v1, %v4832_v28  ;;  %v4836_v35 = vshrl.u32 %v20980_v41, %v4821_v5  ;;  %v8332_v55 = vsel %vm4383_vm10, nan, %v8331_v14 }
 0x495   : > { %14075 = vcosq.f32 %v4688_v29  ;;  %v18485_v17 = vsub.s32 %v4557_v48, %v4560_v9  ;;  %vm4838_vm7 = vcmp.lt.s32.totalorder %v18444_v30, 1  ;;  %v4814_v3 = vor.u32 8388608, %v18442_v37 }
 0x496   : > { %14077 = vsinq.f32 %v4688_v29  ;;  %vm4840_vm13 = vcmp.lt.s32.totalorder %v18444_v30, 3  ;;  %vm4841_vm2 = vcmp.lt.s32.totalorder %v18444_v30, 4  ;;  %v4837_v8 = vor.u32 %v4836_v35, %v4835_v19 }
 0x497   : > { %v4563_v26 = vsub.s32 0, %v18485_v17  ;;  %vm4839_vm3 = vcmp.lt.s32.totalorder %v18444_v30, 2  ;;  %v4843_v25 = vsel %vm4841_vm2, %v4831_v11, 2102212464  ;;  %10086 = vperm.xlu0 %13866, %v8332_v55   ;;  %v8635_v5 = vand.u32 3, %v8634_v2 }
 0x498   : > { %vm4499_vm15 = vcmp.lt.s32.totalorder %v18338_v22, 0  ;;  %v4846_v48 = vsel %vm4838_vm7, %v4825_v6, %v4828_v36  ;;  %v4847_v37 = vsel %vm4841_vm2, %v4834_v63, 920167782  ;;  %vm4694_vm6 = vcmp.lt.s32.totalorder %v18433_v23, 2 }
 0x499   : > { %v12832_v60 = vmin.u32 %v4563_v26, %v18485_v17  ;;  %v4842_v28 = vsel %vm4838_vm7, %v4822_v51, %v4825_v6  ;;  %v4844_v45 = vsel %vm4840_vm13, %v4828_v36, %v4843_v25  ;;  %v4848_v2 = vsel %vm4840_vm13, %v4831_v11, %v4847_v37 }
 0x49a   : > { %vm4692_vm5 = vweird.f32 %v18193_v40  ;;  %vm4695_vm9 = vcmp.eq.s32.totalorder %v18433_v23, 0  ;;  %vm4698_vm8 = vcmp.eq.s32.totalorder %v18433_v23, 2  ;;  %v4849_v44 = vsel %vm4839_vm3, %v4846_v48, %v4848_v2 }
 0x49b   : > { %v4850_v24 = vsel %vm4838_vm7, %v4828_v36, %v4831_v11  ;;  %v4565_v56 = vclz %v12832_v60  ;;  %v4583_v51 = vsub.s32 4, %v18465_v47  ;;  %v4851_v58 = vsel %vm4841_vm2, %v4837_v8, 1326507024 }
 0x49c   : > { %v4854_v42 = vshll.u32 %v4814_v3, 8  ;;  %vm8636_vm1 = vcmp.lt.s32.totalorder %v8635_v5, 2  ;;  %v4845_v1 = vsel %vm4839_vm3, %v4842_v28, %v4844_v45  ;;  %v4852_v53 = vsel %vm4840_vm13, %v4834_v63, %v4851_v58 }
 0x49d   : > { %v1714_v7 = vadd.f32 %v18088_v38, %v18248_v54  ;;  %vm4714_vm10 = vcmp.gt.s32.totalorder %v18136_v52, 0  ;;  %v12833_v15 = vadd.s32 4294967294, %v4565_v56  ;;  %v4853_v27 = vsel %vm4839_vm3, %v4850_v24, %v4852_v53 }
 0x49e   : > { %v18527_v14 = vmul.u32.u64.low %v4854_v42, %v4849_v44  ;;  %v18528_v6 = vmul.u32.u64.high %v4854_v42, %v4849_v44, %v18527_v14  ;;  %vm8637_vm12 = vcmp.eq.s32.totalorder %v8635_v5, 0  ;;  %v1711_v33 = vadd.f32 %v18088_v38, %v18239_v21 }
 0x49f   : > { %v18531_v36 = vmul.u32.u64.low %v4854_v42, %v4853_v27  ;;  %v18532_v59 = vmul.u32.u64.high %v4854_v42, %v4853_v27, %v18531_v36  ;;  %v14076_v34 = vpop.eup %14075  ;;  %vm8640_vm4 = vcmp.eq.s32.totalorder %v8635_v5, 2  ;;  %v4553_v54 = vadd.s32 %v18418_v31, %v18416_v62 }
 0x4a0   : > { %vm12834_vm11 = vcmp.lt.s32.totalorder %v12833_v15, 0  ;;  %v4584_v30 = vsel %vm4499_vm15, %v4583_v51, %v18465_v47  ;;  %v14078_v9 = vpop.eup %14077  ;;  %v4699_v19 = vxor.u32 2147483648, %v14076_v34  ;;  %v4861_v11 = vmul.u32 %v4854_v42, %v4845_v1  ;;  %v18575_v1 = vld [vmem:[%s14431_s21 + $0xe0] sm:$0xff] }
 0x4a1   : > { %v4568_v29 = vsel %vm12834_vm11, 0, %v12833_v15  ;;  %v1802_v63 = vmax.f32 %v1714_v7, 0.0  ;;  %v4696_v35 = vxor.u32 2147483648, %v14078_v9  ;;  %vm4863_vm14 = vc.u32 %v18532_v59, %v18527_v14 }
 0x4a2   : > { %v4569_v55 = vsub.s32 32, %v4568_v29  ;;  %v4570_v3 = vshll.u32 %v18485_v17, %v4568_v29  ;;  %v4573_v38 = vsub.s32 4294967266, %v4568_v29  ;;  %v4700_v21 = vsel %vm4698_vm8, %v4699_v19, %v14078_v9 }
 0x4a3   : > { %v8642_v62 = vsel %vm8640_vm4, %v4699_v19, %v14078_v9  ;;  %v1801_v31 = vmax.f32 %v1711_v33, 0.0  ;;  %v4697_v47 = vsel %vm4695_vm9, %v14076_v34, %v4696_v35  ;;  %v8639_v26 = vsel %vm8637_vm12, %v14076_v34, %v4696_v35 }
 0x4a4   : > { %v4571_v8 = vshrl.u32 %v4553_v54, %v4569_v55  ;;  %v4574_v25 = vadd.s32 127, %v4573_v38  ;;  %v4701_v17 = vsel %vm4694_vm6, %v4697_v47, %v4700_v21  ;;  %v8643_v48 = vsel %vm8636_vm1, %v8639_v26, %v8642_v62 }
 0x4a5   : > { %v4864_v37 = vadd.s32 1, %v18528_v6  ;;  %v10868_v60 = vpack.c.bf16 %v1802_v63, %v1801_v31  ;;  %v4702_v28 = vsel %vm4692_vm5, nan, %v4701_v17  ;;  %vm18558_vm7 = vcmp.le.f32.partialorder %v4497_v39, 0.7853982 }
 0x4a6   : > { %v4572_v2 = vor.u32 %v4571_v8, %v4570_v3  ;;  %v4575_v44 = vshll.u32 %v4574_v25, 23  ;;  %v4913_v23 = vshrl.u32 %v4912_v46, 23  ;;  %9823 = vperm.xlu1 %13865, %v4702_v28   ;;  %v4586_v5 = vsel %vm18558_vm7, 0, %v4584_v30 }
 0x4a7   : > { %v4865_v24 = vsel %vm4863_vm14, %v4864_v37, %v18528_v6  ;;  %11106 = vmatmul.mubr.bf16.gmra.mrb[80].mxu0 %v10868_v60  ;;  %v8644_v39 = vsel %vm4692_vm5, nan, %v8643_v48  ;;  %v12851_v46 = vadd.s32 4294967169, %v18327_v18  ;;  %v8530_v42 = vadd.s32 3, %v4586_v5 }
 0x4a8   : > { %v4576_v56 = vor.u32 4788187, %v4575_v44  ;;  %v4579_v51 = vcvt.s32.f32 %v4572_v2  ;;  %v4866_v58 = vadd.s32 %v4865_v24, %v4861_v11  ;;  %11115 = vmatprep.mubr.bf16.mxu0 %v20978_v4  ;;  %v4703_v53 = vand.u32 2147483647, %v18575_v1 }
 0x4a9   : > { %v4715_v7 = vsel %vm4714_vm10, %v18136_v52, 0  ;;  %v18581_v6 = vadd.s32 4294967169, %v4913_v23  ;;  %v5022_v18 = vadd.s32 1, %v12851_v46  ;;  %v18585_v54 = vand.u32 3, %v4586_v5 }
 0x4aa   : > { %v4577_v15 = vand.u32 2147483647, %v4576_v56  ;;  %v4867_v27 = vadd.s32 536870912, %v4866_v58  ;;  %v4717_v40 = vand.u32 31, %v4715_v7  ;;  %10101 = vperm.xlu1 %13865, %v8644_v39   ;;  %v18587_v30 = vand.u32 3, %v8530_v42 }
 0x4ab   : > { %v4710_v9 = vand.u32 8388607, %v4703_v53  ;;  %v4716_v26 = vshrl.u32 %v4715_v7, 5  ;;  %vm5023_vm13 = vcmp.gt.s32.totalorder %v5022_v18, 0  ;;  %vm4595_vm2 = vcmp.eq.s32.totalorder %v18585_v54, 2 }
 0x4ac   : > { %v4580_v36 = vmul.f32 %v4579_v51, %v4577_v15  ;;  %v18583_v33 = vshrl.u32 %v4867_v27, 30  ;;  %v4718_v34 = vsub.s32 32, %v4717_v40  ;;  %v4720_v29 = vshll.u32 %v20983_v32, %v4717_v40 }
 0x4ad   : > { %v4723_v11 = vshll.u32 %v20976_v61, %v4717_v40  ;;  %v4726_v55 = vshll.u32 %v20974_v16, %v4717_v40  ;;  %v4729_v3 = vshll.u32 %v20972_v20, %v4717_v40  ;;  %v4732_v8 = vshll.u32 %v20981_v57, %v4717_v40 }
 0x4ae   : > { %v4581_v19 = vxor.u32 2147483648, %v4580_v36  ;;  %v4869_v52 = vshll.u32 %v18583_v33, 30  ;;  %v4721_v63 = vshrl.u32 %v20976_v61, %v4718_v34  ;;  %v4724_v35 = vshrl.u32 %v20974_v16, %v4718_v34 }
 0x4af   : > { %v4727_v62 = vshrl.u32 %v20972_v20, %v4718_v34  ;;  %v4730_v31 = vshrl.u32 %v20981_v57, %v4718_v34  ;;  %v4733_v25 = vshrl.u32 %v20980_v41, %v4718_v34  ;;  %v4711_v48 = vor.u32 8388608, %v4710_v9 }
 0x4b0   : > { %v4582_v38 = vsel %vm4499_vm15, %v4581_v19, %v4580_v36  ;;  %v18600_v21 = vsub.s32 %v4866_v58, %v4869_v52  ;;  %v4719_v37 = vshrl.u32 %v20983_v32, %v4718_v34  ;;  %v4722_v60 = vor.u32 %v4721_v63, %v4720_v29  ;;  %v18625_v58 = vld [vmem:[%s14431_s21 + $0xe8] sm:$0xff] }
 0x4b1   : > { %v4585_v47 = vsel %vm18558_vm7, %v18338_v22, %v4582_v38  ;;  %v4725_v28 = vor.u32 %v4724_v35, %v4723_v11  ;;  %v4862_v45 = vadd.s32 %v18527_v14, %v18532_v59  ;;  %v4728_v44 = vor.u32 %v4727_v62, %v4726_v55 }
 0x4b2   : > { %14079 = vcosq.f32 %v4585_v47  ;;  %v4872_v17 = vsub.s32 0, %v18600_v21  ;;  %v4731_v23 = vor.u32 %v4730_v31, %v4729_v3  ;;  %vm4592_vm3 = vcmp.eq.s32.totalorder %v18585_v54, 0 }
 0x4b3   : > { %14081 = vsinq.f32 %v4585_v47  ;;  %vm8533_vm15 = vcmp.eq.s32.totalorder %v18587_v30, 0  ;;  %vm8536_vm6 = vcmp.eq.s32.totalorder %v18587_v30, 2  ;;  %v4734_v5 = vor.u32 %v4733_v25, %v4732_v8 }
 0x4b4   : > { %v12844_v2 = vmin.u32 %v4872_v17, %v18600_v21  ;;  %vm4735_vm5 = vcmp.lt.s32.totalorder %v4716_v26, 1  ;;  %v5012_v24 = vand.u32 2147483647, %v18287_v13  ;;  %vm4591_vm9 = vcmp.lt.s32.totalorder %v18585_v54, 2 }
 0x4b5   : > { %vm8532_vm8 = vcmp.lt.s32.totalorder %v18587_v30, 2  ;;  %vm4737_vm1 = vcmp.lt.s32.totalorder %v4716_v26, 3  ;;  %vm4738_vm10 = vcmp.lt.s32.totalorder %v4716_v26, 4  ;;  %v4751_v14 = vshll.u32 %v4711_v48, 8 }
 0x4b6   : > { %v4874_v39 = vclz %v12844_v2  ;;  %vm4589_vm12 = vweird.f32 %v18338_v22  ;;  %vm4736_vm4 = vcmp.lt.s32.totalorder %v4716_v26, 2  ;;  %v4739_v59 = vsel %vm4735_vm5, %v4719_v37, %v4722_v60 }
 0x4b7   : > { %v4740_v56 = vsel %vm4738_vm10, %v4728_v44, 2102212464  ;;  %v4743_v51 = vsel %vm4735_vm5, %v4722_v60, %v4725_v28  ;;  %vm4808_vm11 = vcmp.lt.s32.totalorder %v18625_v58, 0  ;;  %v4744_v7 = vsel %vm4738_vm10, %v4731_v23, 920167782 }
 0x4b8   : > { %v12845_v46 = vadd.s32 4294967294, %v4874_v39  ;;  %v4741_v42 = vsel %vm4737_vm1, %v4725_v28, %v4740_v56  ;;  %v4747_v15 = vsel %vm4735_vm5, %v4725_v28, %v4728_v44  ;;  %v4745_v27 = vsel %vm4737_vm1, %v4728_v44, %v4744_v7 }
 0x4b9   : > { %v4748_v40 = vsel %vm4738_vm10, %v4734_v5, 1326507024  ;;  %v18633_v36 = vand.u32 8388607, %v5012_v24  ;;  %v5024_v34 = vsel %vm5023_vm13, %v5022_v18, 0  ;;  %v4742_v9 = vsel %vm4736_vm4, %v4739_v59, %v4741_v42 }
 0x4ba   : > { %vm12846_vm14 = vcmp.lt.s32.totalorder %v12845_v46, 0  ;;  %v4746_v19 = vsel %vm4736_vm4, %v4743_v51, %v4745_v27  ;;  %v4749_v52 = vsel %vm4737_vm1, %v4731_v23, %v4748_v40  ;;  %vm18646_vm7 = vcmp.le.f32.partialorder %v4806_v10, 0.7853982 }
 0x4bb   : > { %v4877_v29 = vsel %vm12846_vm14, 0, %v12845_v46  ;;  %v4750_v11 = vsel %vm4736_vm4, %v4747_v15, %v4749_v52  ;;  %v18640_v63 = vmul.u32.u64.low %v4751_v14, %v4746_v19  ;;  %v18641_v35 = vmul.u32.u64.high %v4751_v14, %v4746_v19, %v18640_v63 }
 0x4bc   : > { %v14080_v55 = vpop.eup %14079  ;;  %v4878_v18 = vsub.s32 32, %v4877_v29  ;;  %v4879_v38 = vshll.u32 %v18600_v21, %v4877_v29  ;;  %v4882_v62 = vsub.s32 4294967266, %v4877_v29  ;;  %v4892_v31 = vsub.s32 4, %v18583_v33 }
 0x4bd   : > { %v14082_v47 = vpop.eup %14081  ;;  %v4596_v26 = vxor.u32 2147483648, %v14080_v55  ;;  %v18652_v8 = vmul.u32.u64.low %v4751_v14, %v4750_v11  ;;  %v18653_v25 = vmul.u32.u64.high %v4751_v14, %v4750_v11, %v18652_v8  ;;  %v5026_v17 = vand.u32 31, %v5024_v34 }
 0x4be   : > { %v4593_v48 = vxor.u32 2147483648, %v14082_v47  ;;  %v4880_v37 = vshrl.u32 %v4862_v45, %v4878_v18  ;;  %v4883_v60 = vadd.s32 127, %v4882_v62  ;;  %v4758_v0 = vmul.u32 %v4751_v14, %v4742_v9 }
 0x4bf   : > { %v4597_v10 = vsel %vm4595_vm2, %v4596_v26, %v14082_v47  ;;  %v8538_v28 = vsel %vm8536_vm6, %v4596_v26, %v14082_v47  ;;  %v4761_v21 = vadd.s32 1, %v18641_v35  ;;  %v5027_v2 = vsub.s32 32, %v5026_v17 }
 0x4c0   : > { %v4594_v44 = vsel %vm4592_vm3, %v14080_v55, %v4593_v48  ;;  %v4881_v23 = vor.u32 %v4880_v37, %v4879_v38  ;;  %v4884_v5 = vshll.u32 %v4883_v60, 23  ;;  %v8535_v39 = vsel %vm8533_vm15, %v14080_v55, %v4593_v48 }
 0x4c1   : > { %v4598_v45 = vsel %vm4591_vm9, %v4594_v44, %v4597_v10  ;;  %v4893_v14 = vsel %vm4808_vm11, %v4892_v31, %v18583_v33  ;;  %v8539_v59 = vsel %vm8532_vm8, %v8535_v39, %v8538_v28  ;;  %vm4760_vm13 = vc.u32 %v18653_v25, %v18640_v63 }
 0x4c2   : > { %v4599_v56 = vsel %vm4589_vm12, nan, %v4598_v45  ;;  %v4885_v51 = vor.u32 4788187, %v4884_v5  ;;  %v4888_v46 = vcvt.s32.f32 %v4881_v23  ;;  %v18675_v42 = vshrl.u32 %v5024_v34, 5  ;;  %v18717_v5 = vld [vmem:[%s14431_s21 + $0x108] sm:$0xff] }
 0x4c3   : > { %9818 = vperm.xlu0 %13866, %v4599_v56   ;;  %v8540_v54 = vsel %vm4589_vm12, nan, %v8539_v59  ;;  %v4762_v7 = vsel %vm4760_vm13, %v4761_v21, %v18641_v35  ;;  %v5029_v33 = vshll.u32 %v20983_v32, %v5026_v17  ;;  %v5030_v30 = vshrl.u32 %v20976_v61, %v5027_v2 }
 0x4c4   : > { %v4886_v15 = vand.u32 2147483647, %v4885_v51  ;;  %v4763_v27 = vadd.s32 %v4762_v7, %v4758_v0  ;;  %v5032_v40 = vshll.u32 %v20976_v61, %v5026_v17  ;;  %v5033_v9 = vshrl.u32 %v20974_v16, %v5027_v2 }
 0x4c5   : > { %v4895_v34 = vsel %vm18646_vm7, 0, %v4893_v14  ;;  %v5035_v19 = vshll.u32 %v20974_v16, %v5026_v17  ;;  %v5036_v22 = vshrl.u32 %v20972_v20, %v5027_v2  ;;  %v5038_v52 = vshll.u32 %v20972_v20, %v5026_v17 }
 0x4c6   : > { %v4889_v29 = vmul.f32 %v4888_v46, %v4886_v15  ;;  %v4764_v11 = vadd.s32 536870912, %v4763_v27  ;;  %v5039_v35 = vshrl.u32 %v20981_v57, %v5027_v2  ;;  %vm5044_vm2 = vcmp.lt.s32.totalorder %v18675_v42, 1 }
 0x4c7   : > { %10096 = vperm.xlu0 %13866, %v8540_v54   ;;  %v5031_v55 = vor.u32 %v5030_v30, %v5029_v33  ;;  %v5034_v18 = vor.u32 %v5033_v9, %v5032_v40  ;;  %v5041_v38 = vshll.u32 %v20981_v57, %v5026_v17  ;;  %v5042_v62 = vshrl.u32 %v20980_v41, %v5027_v2 }
 0x4c8   : > { %v4890_v31 = vxor.u32 2147483648, %v4889_v29  ;;  %v18693_v47 = vshrl.u32 %v4764_v11, 30  ;;  %v5037_v26 = vor.u32 %v5036_v22, %v5035_v19  ;;  %v5040_v8 = vor.u32 %v5039_v35, %v5038_v52  ;;  %v18747_v22 = vld [vmem:[%s14431_s21 + $0x100] sm:$0xff] }
 0x4c9   : > { %v8842_v48 = vadd.s32 3, %v4895_v34  ;;  %v5020_v37 = vor.u32 8388608, %v18633_v36  ;;  %v5043_v60 = vor.u32 %v5042_v62, %v5041_v38  ;;  %vm5047_vm3 = vcmp.lt.s32.totalorder %v18675_v42, 4 }
 0x4ca   : > { %v4891_v0 = vsel %vm4808_vm11, %v4890_v31, %v4889_v29  ;;  %v4766_v10 = vshll.u32 %v18693_v47, 30  ;;  %v5028_v17 = vshrl.u32 %v20983_v32, %v5027_v2  ;;  %vm5046_vm15 = vcmp.lt.s32.totalorder %v18675_v42, 3 }
 0x4cb   : > { %v4894_v28 = vsel %vm18646_vm7, %v18625_v58, %v4891_v0  ;;  %vm5045_vm6 = vcmp.lt.s32.totalorder %v18675_v42, 2  ;;  %v5052_v36 = vsel %vm5044_vm2, %v5031_v55, %v5034_v18  ;;  %v5053_v21 = vsel %vm5047_vm3, %v5040_v8, 920167782  ;;  %v18759_v42 = vld [vmem:[%s21026_s6] ss:$0 sm:$0xff] }
 0x4cc   : > { %14083 = vcosq.f32 %v4894_v28  ;;  %v18710_v44 = vsub.s32 %v4763_v27, %v4766_v10  ;;  %v5049_v2 = vsel %vm5047_vm3, %v5037_v26, 2102212464  ;;  %v5056_v23 = vsel %vm5044_vm2, %v5034_v18, %v5037_v26 }
 0x4cd   : > { %v5221_v3 = vand.u32 2139095040, %v18717_v5  ;;  %14085 = vsinq.f32 %v4894_v28  ;;  %v5054_v39 = vsel %vm5046_vm15, %v5037_v26, %v5053_v21  ;;  %v5057_v45 = vsel %vm5047_vm3, %v5043_v60, 1326507024 }
 0x4ce   : > { %v4899_v14 = vand.u32 3, %v4895_v34  ;;  %v4769_v59 = vsub.s32 0, %v18710_v44  ;;  %v5055_v56 = vsel %vm5045_vm6, %v5052_v36, %v5054_v39  ;;  %v5058_v51 = vsel %vm5046_vm15, %v5040_v8, %v5057_v45 }
 0x4cf   : > { %v5048_v46 = vsel %vm5044_vm2, %v5028_v17, %v5031_v55  ;;  %v5050_v54 = vsel %vm5046_vm15, %v5034_v18, %v5049_v2  ;;  %v5059_v7 = vsel %vm5045_vm6, %v5056_v23, %v5058_v51  ;;  %v5060_v33 = vshll.u32 %v5020_v37, 8 }
 0x4d0   : > { %v8843_v30 = vand.u32 3, %v8842_v48  ;;  %v12840_v15 = vmin.u32 %v4769_v59, %v18710_v44  ;;  %v18744_v19 = vadd.s32 1, %v18581_v6  ;;  %v5118_v52 = vand.u32 2139095040, %v18747_v22 }
 0x4d1   : > { %v18736_v27 = vmul.u32.u64.low %v5060_v33, %v5059_v7  ;;  %v18737_v40 = vmul.u32.u64.high %v5060_v33, %v5059_v7, %v18736_v27  ;;  %v18739_v9 = vmul.u32.u64.low %v5060_v33, %v5055_v56  ;;  %v18740_v34 = vmul.u32.u64.high %v5060_v33, %v5055_v56, %v18739_v9 }
 0x4d2   : > { %v4771_v29 = vclz %v12840_v15  ;;  %v5051_v11 = vsel %vm5045_vm6, %v5048_v46, %v5050_v54  ;;  %v5222_v35 = vshrl.u32 %v5221_v3, 23  ;;  %vm4898_vm5 = vweird.f32 %v18625_v58 }
 0x4d3   : > { %vm4900_vm9 = vcmp.lt.s32.totalorder %v4899_v14, 2  ;;  %vm4901_vm8 = vcmp.eq.s32.totalorder %v4899_v14, 0  ;;  %vm4904_vm1 = vcmp.eq.s32.totalorder %v4899_v14, 2  ;;  %vm8844_vm10 = vcmp.lt.s32.totalorder %v8843_v30, 2 }
 0x4d4   : > { %vm8845_vm12 = vcmp.eq.s32.totalorder %v8843_v30, 0  ;;  %v12841_v55 = vadd.s32 4294967294, %v4771_v29  ;;  %v5067_v18 = vmul.u32 %v5060_v33, %v5051_v11  ;;  %vm5069_vm4 = vc.u32 %v18737_v40, %v18739_v9 }
 0x4d5   : > { %v5070_v6 = vadd.s32 1, %v18740_v34  ;;  %v1722_v38 = vadd.f32 %v18759_v42, %v18467_v43  ;;  %vm8848_vm11 = vcmp.eq.s32.totalorder %v8843_v30, 2  ;;  %v4759_v31 = vadd.s32 %v18640_v63, %v18653_v25 }
 0x4d6   : > { %v14084_v62 = vpop.eup %14083  ;;  %vm12842_vm14 = vcmp.lt.s32.totalorder %v12841_v55, 0  ;;  %v4789_v26 = vsub.s32 4, %v18693_v47  ;;  %v1719_v0 = vadd.f32 %v18759_v42, %v18449_v50  ;;  %vm4705_vm7 = vcmp.lt.s32.totalorder %v18575_v1, 0 }
 0x4d7   : > { %v14086_v8 = vpop.eup %14085  ;;  %v4905_v48 = vxor.u32 2147483648, %v14084_v62  ;;  %v4774_v37 = vsel %vm12842_vm14, 0, %v12841_v55  ;;  %v5071_v60 = vsel %vm5069_vm4, %v5070_v6, %v18740_v34  ;;  %v1804_v25 = vmax.f32 %v1722_v38, 0.0 }
 0x4d8   : > { %v4902_v10 = vxor.u32 2147483648, %v14086_v8  ;;  %v4775_v17 = vsub.s32 32, %v4774_v37  ;;  %v4776_v43 = vshll.u32 %v18710_v44, %v4774_v37  ;;  %v4779_v28 = vsub.s32 4294967266, %v4774_v37 }
 0x4d9   : > { %v4906_v36 = vsel %vm4904_vm1, %v4905_v48, %v14086_v8  ;;  %v8850_v21 = vsel %vm8848_vm11, %v4905_v48, %v14086_v8  ;;  %v5072_v63 = vadd.s32 %v5071_v60, %v5067_v18  ;;  %v1803_v56 = vmax.f32 %v1719_v0, 0.0 }
 0x4da   : > { %v4903_v2 = vsel %vm4901_vm8, %v14084_v62, %v4902_v10  ;;  %v8847_v23 = vsel %vm8845_vm12, %v14084_v62, %v4902_v10  ;;  %v4777_v3 = vshrl.u32 %v4759_v31, %v4775_v17  ;;  %v4780_v39 = vadd.s32 127, %v4779_v28 }
 0x4db   : > { %v4907_v45 = vsel %vm4900_vm9, %v4903_v2, %v4906_v36  ;;  %v8851_v50 = vsel %vm8844_vm10, %v8847_v23, %v8850_v21  ;;  %v5073_v59 = vadd.s32 536870912, %v5072_v63  ;;  %vm4920_vm13 = vcmp.gt.s32.totalorder %v18744_v19, 0 }
 0x4dc   : > { %v4908_v44 = vsel %vm4898_vm5, nan, %v4907_v45  ;;  %v4778_v51 = vor.u32 %v4777_v3, %v4776_v43  ;;  %v4781_v46 = vshll.u32 %v4780_v39, 23  ;;  %v4790_v54 = vsel %vm4705_vm7, %v4789_v26, %v18693_v47 }
 0x4dd   : > { %9833 = vperm.xlu1 %13865, %v4908_v44   ;;  %v18782_v14 = vshrl.u32 %v5073_v59, 30  ;;  %v10869_v7 = vpack.c.bf16 %v1804_v25, %v1803_v56  ;;  %v8852_v33 = vsel %vm4898_vm5, nan, %v8851_v50  ;;  %v4909_v27 = vand.u32 2147483647, %v18291_v49  ;;  %v18846_v44 = vld [vmem:[%s14431_s21 + $0xf8] sm:$0xff] }
 0x4de   : > { %v4782_v30 = vor.u32 4788187, %v4781_v46  ;;  %v4785_v15 = vcvt.s32.f32 %v4778_v51  ;;  %v5119_v34 = vshrl.u32 %v5118_v52, 23  ;;  %vm18789_vm2 = vcmp.le.f32.partialorder %v4703_v53, 0.7853982 }
 0x4df   : > { %v5075_v11 = vshll.u32 %v18782_v14, 30  ;;  %11116 = vmatmul.mubr.bf16.gmra.mrb[84].mxu0 %v10869_v7  ;;  %v12859_v47 = vadd.s32 4294967169, %v5222_v35  ;;  %v4792_v58 = vsel %vm18789_vm2, 0, %v4790_v54  ;;  %v4921_v18 = vsel %vm4920_vm13, %v18744_v19, 0 }
 0x4e0   : > { %v4783_v55 = vand.u32 2147483647, %v4782_v30  ;;  %11125 = vmatprep.mubr.bf16.mxu0 %v20978_v4  ;;  %v8738_v53 = vadd.s32 3, %v4792_v58  ;;  %v18804_v38 = vand.u32 8388607, %v4909_v27  ;;  %v18806_v35 = vshrl.u32 %v4921_v18, 5 }
 0x4e1   : > { %10111 = vperm.xlu1 %13865, %v8852_v33   ;;  %v18800_v52 = vsub.s32 %v5072_v63, %v5075_v11  ;;  %v4923_v31 = vand.u32 31, %v4921_v18  ;;  %v18809_v26 = vadd.s32 4294967169, %v5119_v34  ;;  %v18811_v8 = vadd.s32 1, %v12859_v47 }
 0x4e2   : > { %v4786_v6 = vmul.f32 %v4785_v15, %v4783_v55  ;;  %v18813_v48 = vand.u32 3, %v4792_v58  ;;  %v5068_v37 = vadd.s32 %v18739_v9, %v18737_v40  ;;  %v18818_v0 = vand.u32 3, %v8738_v53 }
 0x4e3   : > { %v5078_v62 = vsub.s32 0, %v18800_v52  ;;  %v4917_v17 = vor.u32 8388608, %v18804_v38  ;;  %v4924_v43 = vsub.s32 32, %v4923_v31  ;;  %vm4941_vm3 = vcmp.lt.s32.totalorder %v18806_v35, 1 }
 0x4e4   : > { %v4787_v19 = vxor.u32 2147483648, %v4786_v6  ;;  %v4926_v21 = vshll.u32 %v20983_v32, %v4923_v31  ;;  %vm4942_vm15 = vcmp.lt.s32.totalorder %v18806_v35, 2  ;;  %v4929_v40 = vshll.u32 %v20976_v61, %v4923_v31 }
 0x4e5   : > { %v12852_v60 = vmin.u32 %v5078_v62, %v18800_v52  ;;  %v4932_v9 = vshll.u32 %v20974_v16, %v4923_v31  ;;  %vm4943_vm6 = vcmp.lt.s32.totalorder %v18806_v35, 3  ;;  %v4925_v25 = vshrl.u32 %v20983_v32, %v4924_v43 }
 0x4e6   : > { %v4788_v10 = vsel %vm4705_vm7, %v4787_v19, %v4786_v6  ;;  %v4927_v2 = vshrl.u32 %v20976_v61, %v4924_v43  ;;  %vm4801_vm5 = vcmp.eq.s32.totalorder %v18813_v48, 2  ;;  %vm8744_vm9 = vcmp.eq.s32.totalorder %v18818_v0, 2 }
 0x4e7   : > { %v4791_v28 = vsel %vm18789_vm2, %v18575_v1, %v4788_v10  ;;  %v5080_v36 = vclz %v12852_v60  ;;  %v4930_v23 = vshrl.u32 %v20974_v16, %v4924_v43  ;;  %v4933_v3 = vshrl.u32 %v20972_v20, %v4924_v43 }
 0x4e8   : > { %14087 = vcosq.f32 %v4791_v28  ;;  %v4935_v39 = vshll.u32 %v20972_v20, %v4923_v31  ;;  %v4936_v45 = vshrl.u32 %v20981_v57, %v4924_v43  ;;  %vm4798_vm8 = vcmp.eq.s32.totalorder %v18813_v48, 0 }
 0x4e9   : > { %14089 = vsinq.f32 %v4791_v28  ;;  %v12853_v63 = vadd.s32 4294967294, %v5080_v36  ;;  %vm8741_vm10 = vcmp.eq.s32.totalorder %v18818_v0, 0  ;;  %v4928_v50 = vor.u32 %v4927_v2, %v4926_v21 }
 0x4ea   : > { %v4938_v59 = vshll.u32 %v20981_v57, %v4923_v31  ;;  %v4939_v56 = vshrl.u32 %v20980_v41, %v4924_v43  ;;  %vm4797_vm12 = vcmp.lt.s32.totalorder %v18813_v48, 2  ;;  %vm5014_vm4 = vcmp.lt.s32.totalorder %v18846_v44, 0 }
 0x4eb   : > { %vm12854_vm1 = vcmp.lt.s32.totalorder %v12853_v63, 0  ;;  %v4931_v46 = vor.u32 %v4930_v23, %v4929_v40  ;;  %v4934_v54 = vor.u32 %v4933_v3, %v4932_v9  ;;  %v4937_v7 = vor.u32 %v4936_v45, %v4935_v39 }
 0x4ec   : > { %v5083_v51 = vsel %vm12854_vm1, 0, %v12853_v63  ;;  %vm4795_vm11 = vweird.f32 %v18575_v1  ;;  %v4940_v34 = vor.u32 %v4939_v56, %v4938_v59  ;;  %vm5229_vm14 = vcmp.gt.s32.totalorder %v18811_v8, 0 }
 0x4ed   : > { %v5084_v33 = vsub.s32 32, %v5083_v51  ;;  %v5085_v30 = vshll.u32 %v18800_v52, %v5083_v51  ;;  %v5088_v15 = vsub.s32 4294967266, %v5083_v51  ;;  %vm4944_vm7 = vcmp.lt.s32.totalorder %v18806_v35, 4 }
 0x4ee   : > { %v4945_v29 = vsel %vm4941_vm3, %v4925_v25, %v4928_v50  ;;  %v4949_v11 = vsel %vm4941_vm3, %v4928_v50, %v4931_v46  ;;  %v4953_v47 = vsel %vm4941_vm3, %v4931_v46, %v4934_v54  ;;  %vm18861_vm13 = vcmp.le.f32.partialorder %v5012_v24, 0.7853982 }
 0x4ef   : > { %v5086_v58 = vshrl.u32 %v5068_v37, %v5084_v33  ;;  %v5089_v18 = vadd.s32 127, %v5088_v15  ;;  %v4946_v52 = vsel %vm4944_vm7, %v4934_v54, 2102212464  ;;  %v4950_v53 = vsel %vm4944_vm7, %v4937_v7, 920167782 }
 0x4f0   : > { %v4947_v6 = vsel %vm4943_vm6, %v4931_v46, %v4946_v52  ;;  %v4951_v38 = vsel %vm4943_vm6, %v4934_v54, %v4950_v53  ;;  %v4954_v62 = vsel %vm4944_vm7, %v4940_v34, 1326507024  ;;  %v4957_v31 = vshll.u32 %v4917_v17, 8  ;;  %v18920_v52 = vpop.f32.mrb[84].mxu1 }
 0x4f1   : > { %v5087_v19 = vor.u32 %v5086_v58, %v5085_v30  ;;  %v5090_v60 = vshll.u32 %v5089_v18, 23  ;;  %v5098_v13 = vsub.s32 4, %v18782_v14  ;;  %v4952_v24 = vsel %vm4942_vm15, %v4949_v11, %v4951_v38  ;;  %v13336_v38 = vpop.f32.mrb[85].mxu1 }
 0x4f2   : > { %v14088_v10 = vpop.eup %14087  ;;  %v4948_v37 = vsel %vm4942_vm15, %v4945_v29, %v4947_v6  ;;  %v4955_v43 = vsel %vm4943_vm6, %v4937_v7, %v4954_v62  ;;  %v18876_v28 = vmul.u32.u64.low %v4957_v31, %v4952_v24  ;;  %v18877_v36 = vmul.u32.u64.high %v4957_v31, %v4952_v24, %v18876_v28  ;;  %v18915_v29 = vld [vmem:[%s14431_s21 + $0x110] sm:$0xff] }
 0x4f3   : > { %v14090_v21 = vpop.eup %14089  ;;  %v4802_v17 = vxor.u32 2147483648, %v14088_v10  ;;  %v5091_v40 = vor.u32 4788187, %v5090_v60  ;;  %v5094_v9 = vcvt.s32.f32 %v5087_v19  ;;  %v4956_v63 = vsel %vm4942_vm15, %v4953_v47, %v4955_v43  ;;  %v18932_v60 = vpop.f32.mrb[86].mxu1 }
 0x4f4   : > { %v4799_v25 = vxor.u32 2147483648, %v14090_v21  ;;  %vm8740_vm2 = vcmp.lt.s32.totalorder %v18818_v0, 2  ;;  %v18883_v2 = vmul.u32.u64.low %v4957_v31, %v4956_v63  ;;  %v18884_v23 = vmul.u32.u64.high %v4957_v31, %v4956_v63, %v18883_v2 }
 0x4f5   : > { %v4803_v3 = vsel %vm4801_vm5, %v4802_v17, %v14090_v21  ;;  %v5092_v39 = vand.u32 2147483647, %v5091_v40  ;;  %v5099_v45 = vsel %vm5014_vm4, %v5098_v13, %v18782_v14  ;;  %v8746_v50 = vsel %vm8744_vm9, %v4802_v17, %v14090_v21  ;;  %v13899_v21 = vld [vmem:[%s20958_s12] ss:$8 sps:$4 sm:$0xff]   ;;  %v13901_v17 = vld [vmem:[%s20958_s12 + $0x4] ss:$8 sps:$4 sm:$0xff]  }
 0x4f6   : > { %v4800_v35 = vsel %vm4798_vm8, %v14088_v10, %v4799_v25  ;;  %v8743_v59 = vsel %vm8741_vm10, %v14088_v10, %v4799_v25  ;;  %v4964_v56 = vmul.u32 %v4957_v31, %v4948_v37  ;;  %v4967_v51 = vadd.s32 1, %v18877_v36  ;;  %v13337_v37 = vpop.f32.mrb[87].mxu1  ;;  %v18951_v2 = vld [vmem:[%s14431_s21 + $0x118] sm:$0xff]  ;;  %11590 = vmatprep.subr.bf16.mxu1 %v13901_v17 }
 0x4f7   : > { %v4804_v46 = vsel %vm4797_vm12, %v4800_v35, %v4803_v3  ;;  %v5095_v54 = vmul.f32 %v5094_v9, %v5092_v39  ;;  %v8747_v7 = vsel %vm8740_vm2, %v8743_v59, %v8746_v50  ;;  %v5218_v14 = vand.u32 2147483647, %v18717_v5  ;;  %11591 = vmatpush1.bf16.msra.mxu1 %v13899_v21 }
 0x4f8   : > { %v4805_v33 = vsel %vm4795_vm11, nan, %v4804_v46  ;;  %v5101_v30 = vsel %vm18861_vm13, 0, %v5099_v45  ;;  %vm4966_vm3 = vc.u32 %v18884_v23, %v18876_v28  ;;  %v18908_v0 = vadd.s32 1, %v18809_v26 }
 0x4f9   : > { %9828 = vperm.xlu0 %13866, %v4805_v33   ;;  %v5096_v15 = vxor.u32 2147483648, %v5095_v54  ;;  %v4968_v48 = vsel %vm4966_vm3, %v4967_v51, %v18877_v36  ;;  %v5230_v34 = vsel %vm5229_vm14, %v18811_v8, 0  ;;  %v5324_v11 = vand.u32 2139095040, %v18915_v29 }
 0x4fa   : > { %v8748_v47 = vsel %vm4795_vm11, nan, %v8747_v7  ;;  %v4969_v58 = vadd.s32 %v4968_v48, %v4964_v56  ;;  %v5232_v18 = vand.u32 31, %v5230_v34  ;;  %v18924_v53 = vand.u32 3, %v5101_v30 }
 0x4fb   : > { %v5097_v26 = vsel %vm5014_vm4, %v5096_v15, %v5095_v54  ;;  %v9050_v6 = vadd.s32 3, %v5101_v30  ;;  %v5225_v8 = vand.u32 8388607, %v5218_v14  ;;  %v5231_v55 = vshrl.u32 %v5230_v34, 5 }
 0x4fc   : > { %v5100_v62 = vsel %vm18861_vm13, %v18846_v44, %v5097_v26  ;;  %v4970_v1 = vadd.s32 536870912, %v4969_v58  ;;  %v5233_v31 = vsub.s32 32, %v5232_v18  ;;  %v5235_v19 = vshll.u32 %v20983_v32, %v5232_v18 }
 0x4fd   : > { %14091 = vcosq.f32 %v5100_v62  ;;  %10106 = vperm.xlu0 %13866, %v8748_v47   ;;  %v5238_v13 = vshll.u32 %v20976_v61, %v5232_v18  ;;  %v5241_v24 = vshll.u32 %v20974_v16, %v5232_v18  ;;  %v5244_v10 = vshll.u32 %v20972_v20, %v5232_v18 }
 0x4fe   : > { %14093 = vsinq.f32 %v5100_v62  ;;  %v18937_v43 = vshrl.u32 %v4970_v1, 30  ;;  %v5236_v36 = vshrl.u32 %v20976_v61, %v5233_v31  ;;  %v5239_v40 = vshrl.u32 %v20974_v16, %v5233_v31 }
 0x4ff   : > { %v5242_v9 = vshrl.u32 %v20972_v20, %v5233_v31  ;;  %v5245_v63 = vshrl.u32 %v20981_v57, %v5233_v31  ;;  %v5247_v25 = vshll.u32 %v20981_v57, %v5232_v18  ;;  %v5427_v3 = vand.u32 2139095040, %v18951_v2 }
 0x500   : > { %v9051_v39 = vand.u32 3, %v9050_v6  ;;  %v4972_v45 = vshll.u32 %v18937_v43, 30  ;;  %v5248_v50 = vshrl.u32 %v20980_v41, %v5233_v31  ;;  %vm5106_vm15 = vcmp.lt.s32.totalorder %v18924_v53, 2 }
 0x501   : > { %v5237_v35 = vor.u32 %v5236_v36, %v5235_v19  ;;  %v5240_v59 = vor.u32 %v5239_v40, %v5238_v13  ;;  %v5243_v56 = vor.u32 %v5242_v9, %v5241_v24  ;;  %v5246_v51 = vor.u32 %v5245_v63, %v5244_v10 }
 0x502   : > { %vm5104_vm6 = vweird.f32 %v18846_v44  ;;  %v18958_v46 = vsub.s32 %v4969_v58, %v4972_v45  ;;  %v5234_v54 = vshrl.u32 %v20983_v32, %v5233_v31  ;;  %v5249_v7 = vor.u32 %v5248_v50, %v5247_v25 }
 0x503   : > { %vm5250_vm5 = vcmp.lt.s32.totalorder %v5231_v55, 1  ;;  %vm5107_vm9 = vcmp.eq.s32.totalorder %v18924_v53, 0  ;;  %vm5110_vm8 = vcmp.eq.s32.totalorder %v18924_v53, 2  ;;  %v5226_v33 = vor.u32 8388608, %v5225_v8 }
 0x504   : > { %vm5253_vm1 = vcmp.lt.s32.totalorder %v5231_v55, 4  ;;  %v4975_v30 = vsub.s32 0, %v18958_v46  ;;  %vm5251_vm10 = vcmp.lt.s32.totalorder %v5231_v55, 2  ;;  %vm5252_vm12 = vcmp.lt.s32.totalorder %v5231_v55, 3 }
 0x505   : > { %v5255_v15 = vsel %vm5253_vm1, %v5243_v56, 2102212464  ;;  %v5258_v48 = vsel %vm5250_vm5, %v5237_v35, %v5240_v59  ;;  %v5259_v34 = vsel %vm5253_vm1, %v5246_v51, 920167782  ;;  %v5262_v47 = vsel %vm5250_vm5, %v5240_v59, %v5243_v56 }
 0x506   : > { %v5263_v58 = vsel %vm5253_vm1, %v5249_v7, 1326507024  ;;  %vm5126_vm4 = vcmp.gt.s32.totalorder %v18908_v0, 0  ;;  %vm9053_vm11 = vcmp.eq.s32.totalorder %v9051_v39, 0  ;;  %vm9056_vm14 = vcmp.eq.s32.totalorder %v9051_v39, 2 }
 0x507   : > { %v12848_v18 = vmin.u32 %v4975_v30, %v18958_v46  ;;  %v5254_v26 = vsel %vm5250_vm5, %v5234_v54, %v5237_v35  ;;  %v14092_v6 = vpop.eup %14091  ;;  %v5256_v8 = vsel %vm5252_vm12, %v5240_v59, %v5255_v15  ;;  %v5260_v38 = vsel %vm5252_vm12, %v5243_v56, %v5259_v34 }
 0x508   : > { %v5264_v62 = vsel %vm5252_vm12, %v5246_v51, %v5263_v58  ;;  %v5266_v1 = vshll.u32 %v5226_v33, 8  ;;  %v14094_v31 = vpop.eup %14093  ;;  %v5111_v19 = vxor.u32 2147483648, %v14092_v6  ;;  %v5261_v24 = vsel %vm5251_vm10, %v5258_v48, %v5260_v38 }
 0x509   : > { %v4977_v13 = vclz %v12848_v18  ;;  %v5265_v10 = vsel %vm5251_vm10, %v5262_v47, %v5264_v62  ;;  %v5108_v37 = vxor.u32 2147483648, %v14094_v31  ;;  %vm9052_vm7 = vcmp.lt.s32.totalorder %v9051_v39, 2  ;;  %v19005_v18 = vld [vmem:[%s14431_s21 + $0xf0] sm:$0xff] }
 0x50a   : > { %v18971_v36 = vmul.u32.u64.low %v5266_v1, %v5265_v10  ;;  %v18972_v21 = vmul.u32.u64.high %v5266_v1, %v5265_v10, %v18971_v36  ;;  %v5112_v17 = vsel %vm5110_vm8, %v5111_v19, %v14094_v31  ;;  %v9058_v40 = vsel %vm9056_vm14, %v5111_v19, %v14094_v31 }
 0x50b   : > { %v12849_v9 = vadd.s32 4294967294, %v4977_v13  ;;  %v5257_v63 = vsel %vm5251_vm10, %v5254_v26, %v5256_v8  ;;  %v5109_v25 = vsel %vm5107_vm9, %v14092_v6, %v5108_v37  ;;  %v9055_v45 = vsel %vm9053_vm11, %v14092_v6, %v5108_v37 }
 0x50c   : > { %v18981_v50 = vmul.u32.u64.low %v5266_v1, %v5261_v24  ;;  %v18982_v35 = vmul.u32.u64.high %v5266_v1, %v5261_v24, %v18981_v50  ;;  %v5113_v59 = vsel %vm5106_vm15, %v5109_v25, %v5112_v17  ;;  %v9059_v56 = vsel %vm9052_vm7, %v9055_v45, %v9058_v40 }
 0x50d   : > { %v4965_v51 = vadd.s32 %v18876_v28, %v18884_v23  ;;  %vm12850_vm13 = vcmp.lt.s32.totalorder %v12849_v9, 0  ;;  %v5428_v54 = vshrl.u32 %v5427_v3, 23  ;;  %v5114_v55 = vsel %vm5104_vm6, nan, %v5113_v59 }
 0x50e   : > { %v4980_v7 = vsel %vm12850_vm13, 0, %v12849_v9  ;;  %v5273_v33 = vmul.u32 %v5266_v1, %v5257_v63  ;;  %9843 = vperm.xlu1 %13865, %v5114_v55   ;;  %vm5275_vm2 = vc.u32 %v18972_v21, %v18981_v50  ;;  %v9060_v53 = vsel %vm5104_vm6, nan, %v9059_v56 }
 0x50f   : > { %v4981_v39 = vsub.s32 32, %v4980_v7  ;;  %v4982_v30 = vshll.u32 %v18958_v46, %v4980_v7  ;;  %v4985_v15 = vsub.s32 4294967266, %v4980_v7  ;;  %v4995_v28 = vsub.s32 4, %v18937_v43 }
 0x510   : > { %v5276_v23 = vadd.s32 1, %v18982_v35  ;;  %v5325_v34 = vshrl.u32 %v5324_v11, 23  ;;  %v12867_v47 = vadd.s32 4294967169, %v5428_v54  ;;  %v5127_v46 = vsel %vm5126_vm4, %v18908_v0, 0 }
 0x511   : > { %v4983_v3 = vshrl.u32 %v4965_v51, %v4981_v39  ;;  %v4986_v48 = vadd.s32 127, %v4985_v15  ;;  %vm4911_vm3 = vcmp.lt.s32.totalorder %v19005_v18, 0  ;;  %v5129_v11 = vand.u32 31, %v5127_v46 }
 0x512   : > { %v5277_v58 = vsel %vm5275_vm2, %v5276_v23, %v18982_v35  ;;  %10121 = vperm.xlu1 %13865, %v9060_v53   ;;  %v4996_v8 = vsel %vm4911_vm3, %v4995_v28, %v18937_v43  ;;  %v19011_v31 = vadd.s32 4294967169, %v5325_v34  ;;  %vm19015_vm15 = vcmp.le.f32.partialorder %v4909_v27, 0.7853982 }
 0x513   : > { %v4984_v44 = vor.u32 %v4983_v3, %v4982_v30  ;;  %v4987_v26 = vshll.u32 %v4986_v48, 23  ;;  %v5278_v6 = vadd.s32 %v5277_v58, %v5273_v33  ;;  %v5130_v19 = vsub.s32 32, %v5129_v11 }
 0x514   : > { %v19019_v13 = vadd.s32 1, %v12867_v47  ;;  %v4998_v10 = vsel %vm19015_vm15, 0, %v4996_v8  ;;  %v5115_v36 = vand.u32 2147483647, %v18747_v22  ;;  %v19026_v17 = vshrl.u32 %v5127_v46, 5 }
 0x515   : > { %v4988_v38 = vor.u32 4788187, %v4987_v26  ;;  %v4991_v62 = vcvt.s32.f32 %v4984_v44  ;;  %v5279_v1 = vadd.s32 536870912, %v5278_v6  ;;  %v8946_v37 = vadd.s32 3, %v4998_v10 }
 0x516   : > { %v5132_v49 = vshll.u32 %v20983_v32, %v5129_v11  ;;  %v5141_v9 = vshll.u32 %v20972_v20, %v5129_v11  ;;  %v5142_v63 = vshrl.u32 %v20981_v57, %v5130_v19  ;;  %v5133_v25 = vshrl.u32 %v20976_v61, %v5130_v19 }
 0x517   : > { %v4989_v24 = vand.u32 2147483647, %v4988_v38  ;;  %v19023_v43 = vshrl.u32 %v5279_v1, 30  ;;  %v5135_v45 = vshll.u32 %v20976_v61, %v5129_v11  ;;  %v5136_v35 = vshrl.u32 %v20974_v16, %v5130_v19 }
 0x518   : > { %v5138_v59 = vshll.u32 %v20974_v16, %v5129_v11  ;;  %vm5435_vm6 = vcmp.gt.s32.totalorder %v19019_v13, 0  ;;  %v5139_v54 = vshrl.u32 %v20972_v20, %v5130_v19  ;;  %v5144_v55 = vshll.u32 %v20981_v57, %v5129_v11 }
 0x519   : > { %v4992_v27 = vmul.f32 %v4991_v62, %v4989_v24  ;;  %v5281_v40 = vshll.u32 %v19023_v43, 30  ;;  %v19041_v7 = vand.u32 3, %v4998_v10  ;;  %v19043_v33 = vand.u32 3, %v8946_v37 }
 0x51a   : > { %v5122_v39 = vand.u32 8388607, %v5115_v36  ;;  %v5145_v30 = vshrl.u32 %v20980_v41, %v5130_v19  ;;  %v5143_v28 = vor.u32 %v5142_v63, %v5141_v9  ;;  %vm5147_vm5 = vcmp.lt.s32.totalorder %v19026_v17, 1 }
 0x51b   : > { %v4993_v56 = vxor.u32 2147483648, %v4992_v27  ;;  %v19037_v51 = vsub.s32 %v5278_v6, %v5281_v40  ;;  %v5134_v3 = vor.u32 %v5133_v25, %v5132_v49  ;;  %v5137_v48 = vor.u32 %v5136_v35, %v5135_v45 }
 0x51c   : > { %vm5150_vm9 = vcmp.lt.s32.totalorder %v19026_v17, 4  ;;  %v5140_v47 = vor.u32 %v5139_v54, %v5138_v59  ;;  %v5146_v58 = vor.u32 %v5145_v30, %v5144_v55  ;;  %vm5220_vm8 = vcmp.lt.s32.totalorder %v18717_v5, 0 }
 0x51d   : > { %v4994_v15 = vsel %vm4911_vm3, %v4993_v56, %v4992_v27  ;;  %v5284_v53 = vsub.s32 0, %v19037_v51  ;;  %v5123_v46 = vor.u32 8388608, %v5122_v39  ;;  %v5131_v44 = vshrl.u32 %v20983_v32, %v5130_v19 }
 0x51e   : > { %v4997_v23 = vsel %vm19015_vm15, %v19005_v18, %v4994_v15  ;;  %vm5149_vm1 = vcmp.lt.s32.totalorder %v19026_v17, 3  ;;  %vm5007_vm10 = vcmp.eq.s32.totalorder %v19041_v7, 2  ;;  %v5152_v6 = vsel %vm5150_vm9, %v5140_v47, 2102212464 }
 0x51f   : > { %14095 = vcosq.f32 %v4997_v23  ;;  %v12860_v34 = vmin.u32 %v5284_v53, %v19037_v51  ;;  %v5156_v8 = vsel %vm5150_vm9, %v5143_v28, 920167782  ;;  %vm5004_vm12 = vcmp.eq.s32.totalorder %v19041_v7, 0 }
 0x520   : > { %14097 = vsinq.f32 %v4997_v23  ;;  %v5274_v11 = vadd.s32 %v18981_v50, %v18972_v21  ;;  %v5304_v38 = vsub.s32 4, %v19023_v43  ;;  %vm5148_vm4 = vcmp.lt.s32.totalorder %v19026_v17, 2 }
 0x521   : > { %v5286_v26 = vclz %v12860_v34  ;;  %v5155_v62 = vsel %vm5147_vm5, %v5134_v3, %v5137_v48  ;;  %vm5003_vm11 = vcmp.lt.s32.totalorder %v19041_v7, 2  ;;  %vm8948_vm14 = vcmp.lt.s32.totalorder %v19043_v33, 2 }
 0x522   : > { %v5157_v0 = vsel %vm5149_vm1, %v5140_v47, %v5156_v8  ;;  %v5159_v19 = vsel %vm5147_vm5, %v5137_v48, %v5140_v47  ;;  %v5160_v21 = vsel %vm5150_vm9, %v5146_v58, 1326507024  ;;  %vm5001_vm7 = vweird.f32 %v19005_v18 }
 0x523   : > { %v12861_v1 = vadd.s32 4294967294, %v5286_v26  ;;  %v5151_v50 = vsel %vm5147_vm5, %v5131_v44, %v5134_v3  ;;  %v5153_v24 = vsel %vm5149_vm1, %v5137_v48, %v5152_v6  ;;  %v5161_v10 = vsel %vm5149_vm1, %v5143_v28, %v5160_v21 }
 0x524   : > { %v5163_v37 = vshll.u32 %v5123_v46, 8  ;;  %v5158_v49 = vsel %vm5148_vm4, %v5155_v62, %v5157_v0  ;;  %v5162_v27 = vsel %vm5148_vm4, %v5159_v19, %v5161_v10  ;;  %v5424_v40 = vand.u32 2147483647, %v18951_v2 }
 0x525   : > { %vm12862_vm13 = vcmp.lt.s32.totalorder %v12861_v1, 0  ;;  %v5436_v45 = vsel %vm5435_vm6, %v19019_v13, 0  ;;  %v5154_v54 = vsel %vm5148_vm4, %v5151_v50, %v5153_v24  ;;  %vm8949_vm2 = vcmp.eq.s32.totalorder %v19043_v33, 0 }
 0x526   : > { %v5289_v9 = vsel %vm12862_vm13, 0, %v12861_v1  ;;  %v19092_v63 = vmul.u32.u64.low %v5163_v37, %v5162_v27  ;;  %v19093_v25 = vmul.u32.u64.high %v5163_v37, %v5162_v27, %v19092_v63  ;;  %vm8952_vm3 = vcmp.eq.s32.totalorder %v19043_v33, 2 }
 0x527   : > { %v5290_v35 = vsub.s32 32, %v5289_v9  ;;  %v5291_v59 = vshll.u32 %v19037_v51, %v5289_v9  ;;  %v5294_v56 = vsub.s32 4294967266, %v5289_v9  ;;  %vm19109_vm15 = vcmp.le.f32.partialorder %v5218_v14, 0.7853982 }
 0x528   : > { %v19103_v55 = vmul.u32.u64.low %v5163_v37, %v5158_v49  ;;  %v19104_v39 = vmul.u32.u64.high %v5163_v37, %v5158_v49, %v19103_v55  ;;  %v5305_v17 = vsel %vm5220_vm8, %v5304_v38, %v19023_v43  ;;  %v5438_v53 = vand.u32 31, %v5436_v45 }
 0x529   : > { %v14096_v30 = vpop.eup %14095  ;;  %v5292_v51 = vshrl.u32 %v5274_v11, %v5290_v35  ;;  %v5295_v15 = vadd.s32 127, %v5294_v56  ;;  %v5170_v3 = vmul.u32 %v5163_v37, %v5154_v54  ;;  %v19118_v48 = vand.u32 8388607, %v5424_v40  ;;  %v19149_v35 = vpop.f32.mrb[88].mxu1 }
 0x52a   : > { %v14098_v28 = vpop.eup %14097  ;;  %v5008_v23 = vxor.u32 2147483648, %v14096_v30  ;;  %v19120_v34 = vshrl.u32 %v5436_v45, 5  ;;  %vm5172_vm6 = vc.u32 %v19093_v25, %v19103_v55  ;;  %v5173_v44 = vadd.s32 1, %v19104_v39 }
 0x52b   : > { %v5005_v14 = vxor.u32 2147483648, %v14098_v28  ;;  %v5293_v47 = vor.u32 %v5292_v51, %v5291_v59  ;;  %v5296_v58 = vshll.u32 %v5295_v15, 23  ;;  %v5439_v26 = vsub.s32 32, %v5438_v53 }
 0x52c   : > { %v5009_v46 = vsel %vm5007_vm10, %v5008_v23, %v14098_v28  ;;  %v8954_v43 = vsel %vm8952_vm3, %v5008_v23, %v14098_v28  ;;  %v5174_v0 = vsel %vm5172_vm6, %v5173_v44, %v19104_v39  ;;  %v5441_v19 = vshll.u32 %v20983_v32, %v5438_v53  ;;  %v13340_v39 = vpop.f32.mrb[89].mxu1 }
 0x52d   : > { %v5006_v6 = vsel %vm5004_vm12, %v14096_v30, %v5005_v14  ;;  %v5297_v8 = vor.u32 4788187, %v5296_v58  ;;  %v5300_v11 = vcvt.s32.f32 %v5293_v47  ;;  %v8951_v38 = vsel %vm8949_vm2, %v14096_v30, %v5005_v14 }
 0x52e   : > { %v5010_v62 = vsel %vm5003_vm11, %v5006_v6, %v5009_v46  ;;  %v8955_v1 = vsel %vm8948_vm14, %v8951_v38, %v8954_v43  ;;  %v5175_v10 = vadd.s32 %v5174_v0, %v5170_v3  ;;  %v5442_v37 = vshrl.u32 %v20976_v61, %v5439_v26 }
 0x52f   : > { %v5011_v21 = vsel %vm5001_vm7, nan, %v5010_v62  ;;  %v5298_v50 = vand.u32 2147483647, %v5297_v8  ;;  %v8956_v24 = vsel %vm5001_vm7, nan, %v8955_v1  ;;  %v5444_v7 = vshll.u32 %v20976_v61, %v5438_v53 }
 0x530   : > { %9838 = vperm.xlu0 %13866, %v5011_v21   ;;  %v5445_v33 = vshrl.u32 %v20974_v16, %v5439_v26  ;;  %v5447_v49 = vshll.u32 %v20974_v16, %v5438_v53  ;;  %v5176_v9 = vadd.s32 536870912, %v5175_v10  ;;  %v5448_v63 = vshrl.u32 %v20972_v20, %v5439_v26 }
 0x531   : > { %v5301_v27 = vmul.f32 %v5300_v11, %v5298_v50  ;;  %v5450_v45 = vshll.u32 %v20972_v20, %v5438_v53  ;;  %v5307_v18 = vsel %vm19109_vm15, 0, %v5305_v17  ;;  %v5443_v59 = vor.u32 %v5442_v37, %v5441_v19  ;;  %v19160_v17 = vpop.f32.mrb[90].mxu1 }
 0x532   : > { %v5451_v56 = vshrl.u32 %v20981_v57, %v5439_v26  ;;  %v5453_v54 = vshll.u32 %v20981_v57, %v5438_v53  ;;  %v19155_v51 = vshrl.u32 %v5176_v9, 30  ;;  %v5446_v15 = vor.u32 %v5445_v33, %v5444_v7  ;;  %v13341_v43 = vpop.f32.mrb[91].mxu1  ;;  %v19192_v7 = vld [vmem:[%s14431_s21 + $0x128] sm:$0xff] }
 0x533   : > { %v5302_v30 = vxor.u32 2147483648, %v5301_v27  ;;  %v5454_v28 = vshrl.u32 %v20980_v41, %v5439_v26  ;;  %v9258_v23 = vadd.s32 3, %v5307_v18  ;;  %v5432_v3 = vor.u32 8388608, %v19118_v48 }
 0x534   : > { %10116 = vperm.xlu0 %13866, %v8956_v24   ;;  %v5452_v14 = vor.u32 %v5451_v56, %v5450_v45  ;;  %vm5456_vm5 = vcmp.lt.s32.totalorder %v19120_v34, 1  ;;  %v5178_v53 = vshll.u32 %v19155_v51, 30  ;;  %v5440_v58 = vshrl.u32 %v20983_v32, %v5439_v26 }
 0x535   : > { %v5303_v47 = vsel %vm5220_vm8, %v5302_v30, %v5301_v27  ;;  %v5449_v46 = vor.u32 %v5448_v63, %v5447_v49  ;;  %v5455_v6 = vor.u32 %v5454_v28, %v5453_v54  ;;  %vm5458_vm9 = vcmp.lt.s32.totalorder %v19120_v34, 3 }
 0x536   : > { %v5306_v44 = vsel %vm19109_vm15, %v18717_v5, %v5303_v47  ;;  %vm5459_vm1 = vcmp.lt.s32.totalorder %v19120_v34, 4  ;;  %v19171_v48 = vsub.s32 %v5175_v10, %v5178_v53  ;;  %vm5457_vm8 = vcmp.lt.s32.totalorder %v19120_v34, 2 }
 0x537   : > { %14099 = vcosq.f32 %v5306_v44  ;;  %v5464_v8 = vsel %vm5456_vm5, %v5443_v59, %v5446_v15  ;;  %v5461_v26 = vsel %vm5459_vm1, %v5449_v46, 2102212464  ;;  %v5465_v11 = vsel %vm5459_vm1, %v5452_v14, 920167782 }
 0x538   : > { %14101 = vsinq.f32 %v5306_v44  ;;  %v19177_v13 = vadd.s32 1, %v19011_v31  ;;  %v5311_v38 = vand.u32 3, %v5307_v18  ;;  %v5181_v62 = vsub.s32 0, %v19171_v48 }
 0x539   : > { %v5466_v1 = vsel %vm5458_vm9, %v5449_v46, %v5465_v11  ;;  %v5468_v19 = vsel %vm5456_vm5, %v5446_v15, %v5449_v46  ;;  %v5469_v21 = vsel %vm5459_vm1, %v5455_v6, 1326507024  ;;  %v5472_v50 = vshll.u32 %v5432_v3, 8 }
 0x53a   : > { %v5467_v0 = vsel %vm5457_vm8, %v5464_v8, %v5466_v1  ;;  %v9259_v24 = vand.u32 3, %v9258_v23  ;;  %v12856_v10 = vmin.u32 %v5181_v62, %v19171_v48  ;;  %v5460_v31 = vsel %vm5456_vm5, %v5440_v58, %v5443_v59 }
 0x53b   : > { %v5462_v37 = vsel %vm5458_vm9, %v5446_v15, %v5461_v26  ;;  %v5633_v33 = vand.u32 2139095040, %v19192_v7  ;;  %v5470_v49 = vsel %vm5458_vm9, %v5452_v14, %v5469_v21  ;;  %vm5310_vm10 = vweird.f32 %v18717_v5 }
 0x53c   : > { %v19197_v27 = vmul.u32.u64.low %v5472_v50, %v5467_v0  ;;  %v19198_v9 = vmul.u32.u64.high %v5472_v50, %v5467_v0, %v19197_v27  ;;  %vm5312_vm12 = vcmp.lt.s32.totalorder %v5311_v38, 2  ;;  %v5183_v63 = vclz %v12856_v10 }
 0x53d   : > { %v5471_v45 = vsel %vm5457_vm8, %v5468_v19, %v5470_v49  ;;  %v5463_v18 = vsel %vm5457_vm8, %v5460_v31, %v5462_v37  ;;  %v1727_v54 = vadd.f32 %v18759_v42, %v18920_v52  ;;  %vm5313_vm4 = vcmp.eq.s32.totalorder %v5311_v38, 0 }
 0x53e   : > { %v19206_v59 = vmul.u32.u64.low %v5472_v50, %v5471_v45  ;;  %v19207_v56 = vmul.u32.u64.high %v5472_v50, %v5471_v45, %v19206_v59  ;;  %vm5316_vm11 = vcmp.eq.s32.totalorder %v5311_v38, 2  ;;  %vm9260_vm14 = vcmp.lt.s32.totalorder %v9259_v24, 2 }
 0x53f   : > { %v12857_v39 = vadd.s32 4294967294, %v5183_v63  ;;  %vm9261_vm7 = vcmp.eq.s32.totalorder %v9259_v24, 0  ;;  %vm9264_vm13 = vcmp.eq.s32.totalorder %v9259_v24, 2  ;;  %v5482_v30 = vadd.s32 1, %v19198_v9 }
 0x540   : > { %v1730_v15 = vadd.f32 %v18759_v42, %v18932_v60  ;;  %v5171_v34 = vadd.s32 %v19103_v55, %v19093_v25  ;;  %v5201_v23 = vsub.s32 4, %v19155_v51  ;;  %v5479_v3 = vmul.u32 %v5472_v50, %v5463_v18 }
 0x541   : > { %v14100_v28 = vpop.eup %14099  ;;  %vm12858_vm2 = vcmp.lt.s32.totalorder %v12857_v39, 0  ;;  %vm5481_vm3 = vc.u32 %v19207_v56, %v19197_v27  ;;  %v1805_v53 = vmax.f32 %v1727_v54, 0.0  ;;  %vm5117_vm15 = vcmp.lt.s32.totalorder %v18747_v22, 0  ;;  %v19278_v22 = vpop.permute.xlu1 %9688 }
 0x542   : > { %v14102_v52 = vpop.eup %14101  ;;  %v5317_v14 = vxor.u32 2147483648, %v14100_v28  ;;  %v5186_v47 = vsel %vm12858_vm2, 0, %v12857_v39  ;;  %v5483_v55 = vsel %vm5481_vm3, %v5482_v30, %v19198_v9  ;;  %v1806_v44 = vmax.f32 %v1730_v15, 0.0  ;;  %v19248_v30 = vld [vmem:[%s14431_s21 + $0x120] sm:$0xff] }
 0x543   : > { %v5314_v58 = vxor.u32 2147483648, %v14102_v52  ;;  %v5187_v46 = vsub.s32 32, %v5186_v47  ;;  %v5188_v43 = vshll.u32 %v19171_v48, %v5186_v47  ;;  %v5191_v42 = vsub.s32 4294967266, %v5186_v47  ;;  %v13907_v9 = vld [vmem:[%s20958_s12 + $0x24] ss:$8 sps:$4 sm:$0xff]  }
 0x544   : > { %v5318_v60 = vsel %vm5316_vm11, %v5317_v14, %v14102_v52  ;;  %v9266_v25 = vsel %vm9264_vm13, %v5317_v14, %v14102_v52  ;;  %v5484_v0 = vadd.s32 %v5483_v55, %v5479_v3  ;;  %v10870_v48 = vpack.c.bf16 %v1806_v44, %v1805_v53 }
 0x545   : > { %v5315_v6 = vsel %vm5313_vm4, %v14100_v28, %v5314_v58  ;;  %v9263_v8 = vsel %vm9261_vm7, %v14100_v28, %v5314_v58  ;;  %v5189_v26 = vshrl.u32 %v5171_v34, %v5187_v46  ;;  %v5192_v11 = vadd.s32 127, %v5191_v42 }
 0x546   : > { %v5319_v62 = vsel %vm5312_vm12, %v5315_v6, %v5318_v60  ;;  %v9267_v1 = vsel %vm9260_vm14, %v9263_v8, %v9266_v25  ;;  %vm5332_vm6 = vcmp.gt.s32.totalorder %v19177_v13, 0  ;;  %v5202_v10 = vsel %vm5117_vm15, %v5201_v23, %v19155_v51  ;;  %11126 = vmatmul.mubr.bf16.gmra.mrb[88].mxu0 %v10870_v48  ;;  %v19271_v25 = vld [vmem:[%s14431_s21 + $0x100] sm:$0xff] }
 0x547   : > { %v5320_v19 = vsel %vm5310_vm10, nan, %v5319_v62  ;;  %v5190_v21 = vor.u32 %v5189_v26, %v5188_v43  ;;  %v5193_v50 = vshll.u32 %v5192_v11, 23  ;;  %v5485_v38 = vadd.s32 536870912, %v5484_v0  ;;  %11135 = vmatprep.mubr.bf16.mxu0 %v20978_v4  ;;  %v13902_v11 = vld [vmem:[%s20958_s12 + $0x10] ss:$8 sps:$4 sm:$0xff]  }
 0x548   : > { %9853 = vperm.xlu1 %13865, %v5320_v19   ;;  %v9268_v24 = vsel %vm5310_vm10, nan, %v9267_v1  ;;  %v5634_v49 = vshrl.u32 %v5633_v33, 23  ;;  %vm19239_vm5 = vcmp.le.f32.partialorder %v5115_v36, 0.7853982  ;;  %v5333_v5 = vsel %vm5332_vm6, %v19177_v13, 0 }
 0x549   : > { %v5194_v31 = vor.u32 4788187, %v5193_v50  ;;  %v5197_v37 = vcvt.s32.f32 %v5190_v21  ;;  %v5486_v63 = vshrl.u32 %v5485_v38, 30  ;;  %v5204_v51 = vsel %vm19239_vm5, 0, %v5202_v10  ;;  %v13904_v62 = vld [vmem:[%s20958_s12 + $0x14] ss:$8 sps:$4 sm:$0xff]  }
 0x54a   : > { %v9154_v59 = vadd.s32 3, %v5204_v51  ;;  %v20985_v54 = vand.u32 2147483647, %v18915_v29  ;;  %v5335_v33 = vand.u32 31, %v5333_v5  ;;  %v5530_v36 = vand.u32 2139095040, %v19248_v30  ;;  %11592 = vmatprep.subr.bf16.mxu1 %v13904_v62 }
 0x54b   : > { %v5195_v45 = vand.u32 2147483647, %v5194_v31  ;;  %v5487_v18 = vshll.u32 %v5486_v63, 30  ;;  %v12875_v15 = vadd.s32 4294967169, %v5634_v49  ;;  %v19253_v23 = vand.u32 3, %v5204_v51  ;;  %11593 = vmatpush1.bf16.msra.mxu1 %v13902_v11  ;;  %v19327_v51 = vpop.f32.mrb[40].mxu0 }
 0x54c   : > { %10131 = vperm.xlu1 %13865, %v9268_v24   ;;  %v5510_v3 = vsub.s32 4, %v5486_v63  ;;  %v5336_v13 = vsub.s32 32, %v5335_v33  ;;  %v19256_v14 = vand.u32 3, %v9154_v59  ;;  %v19260_v47 = vand.u32 8388607, %v20985_v54  ;;  %21085 = vst [vmem:[#allocation5_spill] sm:$0xff] %v19327_v51  ;;  %11594 = vmatprep.subr.bf16.mxu1 %v13907_v9 }
 0x54d   : > { %v5198_v39 = vmul.f32 %v5197_v37, %v5195_v45  ;;  %v19251_v28 = vsub.s32 %v5484_v0, %v5487_v18  ;;  %v5338_v53 = vshll.u32 %v20983_v32, %v5335_v33  ;;  %v5341_v43 = vshll.u32 %v20976_v61, %v5335_v33  ;;  %v13905_v49 = vld [vmem:[%s20958_s12 + $0x20] ss:$8 sps:$4 sm:$0xff]   ;;  %v19325_v45 = vpop.f32.mrb[92].mxu1  ;;  %v13913_v11 = vld [vmem:[%s20958_s12 + $0x44] ss:$8 sps:$4 sm:$0xff]  }
 0x54e   : > { %v5339_v46 = vshrl.u32 %v20976_v61, %v5336_v13  ;;  %v5342_v42 = vshrl.u32 %v20974_v16, %v5336_v13  ;;  %v19268_v60 = vadd.s32 1, %v12875_v15  ;;  %vm5426_vm9 = vcmp.lt.s32.totalorder %v18951_v2, 0  ;;  %v13344_v15 = vpop.f32.mrb[93].mxu1 }
 0x54f   : > { %v5199_v34 = vxor.u32 2147483648, %v5198_v39  ;;  %v5490_v52 = vsub.s32 0, %v19251_v28  ;;  %v5480_v6 = vadd.s32 %v19197_v27, %v19207_v56  ;;  %v19284_v8 = vsel %vm5426_vm9, %v5510_v3, %v5486_v63  ;;  %11595 = vmatpush1.bf16.msra.mxu1 %v13905_v49  ;;  %v13916_v15 = vld [vmem:[%s20958_s12 + $0x54] ss:$8 sps:$4 sm:$0xff]  }
 0x550   : > { %v19286_v26 = vshrl.u32 %v5333_v5, 5  ;;  %vm19296_vm1 = vcmp.le.f32.partialorder %v5424_v40, 0.7853982  ;;  %v5329_v56 = vor.u32 8388608, %v19260_v47  ;;  %v5344_v0 = vshll.u32 %v20974_v16, %v5335_v33  ;;  %v19330_v5 = vpop.permute.xlu1 %9966 }
 0x551   : > { %v5200_v58 = vsel %vm5117_vm15, %v5199_v34, %v5198_v39  ;;  %v12868_v44 = vmin.u32 %v5490_v52, %v19251_v28  ;;  %vm5213_vm8 = vcmp.eq.s32.totalorder %v19253_v23, 2  ;;  %vm9160_vm10 = vcmp.eq.s32.totalorder %v19256_v14, 2  ;;  %v13910_v34 = vld [vmem:[%s20958_s12 + $0x34] ss:$8 sps:$4 sm:$0xff]  }
 0x552   : > { %v5203_v55 = vsel %vm19239_vm5, %v19271_v25, %v5200_v58  ;;  %v5337_v48 = vshrl.u32 %v20983_v32, %v5336_v13  ;;  %v5340_v19 = vor.u32 %v5339_v46, %v5338_v53  ;;  %v5343_v21 = vor.u32 %v5342_v42, %v5341_v43  ;;  %v19342_v58 = vpop.f32.mrb[94].mxu1  ;;  %v13908_v46 = vld [vmem:[%s20958_s12 + $0x30] ss:$8 sps:$4 sm:$0xff]   ;;  %v19347_v43 = vpop.f32.mrb[41].mxu0  ;;  %11596 = vmatprep.subr.bf16.mxu1 %v13910_v34 }
 0x553   : > { %14103 = vcosq.f32 %v5203_v55  ;;  %v5492_v27 = vclz %v12868_v44  ;;  %v5345_v50 = vshrl.u32 %v20972_v20, %v5336_v13  ;;  %vm5210_vm12 = vcmp.eq.s32.totalorder %v19253_v23, 0  ;;  %21086 = vst [vmem:[#allocation6_spill] sm:$0xff] %v19347_v43  ;;  %11597 = vmatpush1.bf16.msra.mxu1 %v13908_v46 }
 0x554   : > { %14105 = vsinq.f32 %v5203_v55  ;;  %vm9157_vm4 = vcmp.eq.s32.totalorder %v19256_v14, 0  ;;  %v5347_v10 = vshll.u32 %v20972_v20, %v5335_v33  ;;  %v5348_v38 = vshrl.u32 %v20981_v57, %v5336_v13  ;;  %v19381_v47 = vpop.permute.xlu1 %9971  ;;  %11598 = vmatprep.subr.bf16.mxu1 %v13913_v11 }
 0x555   : > { %v12869_v40 = vadd.s32 4294967294, %v5492_v27  ;;  %v5350_v24 = vshll.u32 %v20981_v57, %v5335_v33  ;;  %vm5209_vm11 = vcmp.lt.s32.totalorder %v19253_v23, 2  ;;  %vm9156_vm14 = vcmp.lt.s32.totalorder %v19256_v14, 2  ;;  %v13919_v14 = vld [vmem:[%s20958_s12 + $0x64] ss:$8 sps:$4 sm:$0xff]  }
 0x556   : > { %v5346_v31 = vor.u32 %v5345_v50, %v5344_v0  ;;  %v5351_v37 = vshrl.u32 %v20980_v41, %v5336_v13  ;;  %vm5353_vm7 = vcmp.lt.s32.totalorder %v19286_v26, 1  ;;  %vm5354_vm13 = vcmp.lt.s32.totalorder %v19286_v26, 2 }
 0x557   : > { %vm5207_vm2 = vweird.f32 %v19271_v25  ;;  %vm12870_vm3 = vcmp.lt.s32.totalorder %v12869_v40, 0  ;;  %v5349_v63 = vor.u32 %v5348_v38, %v5347_v10  ;;  %vm5355_vm15 = vcmp.lt.s32.totalorder %v19286_v26, 3  ;;  %v19460_v25 = vpop.permute.xlu0 %9693 }
 0x558   : > { %vm5356_vm6 = vcmp.lt.s32.totalorder %v19286_v26, 4  ;;  %vm5641_vm5 = vcmp.gt.s32.totalorder %v19268_v60, 0  ;;  %v5495_v18 = vsel %vm12870_vm3, 0, %v12869_v40  ;;  %v5352_v59 = vor.u32 %v5351_v37, %v5350_v24  ;;  %v19398_v26 = vpop.f32.mrb[42].mxu0 }
 0x559   : > { %v5357_v39 = vsel %vm5353_vm7, %v5337_v48, %v5340_v19  ;;  %v5358_v33 = vsel %vm5356_vm6, %v5346_v31, 2102212464  ;;  %v5496_v3 = vsub.s32 32, %v5495_v18  ;;  %v5497_v13 = vshll.u32 %v19251_v28, %v5495_v18  ;;  %21087 = vst [vmem:[#allocation7_spill] sm:$0xff] %v19398_v26  ;;  %v19412_v11 = vpop.f32.mrb[43].mxu0 }
 0x55a   : > { %v5500_v52 = vsub.s32 4294967266, %v5495_v18  ;;  %v5361_v53 = vsel %vm5353_vm7, %v5340_v19, %v5343_v21  ;;  %v5359_v42 = vsel %vm5355_vm15, %v5343_v21, %v5358_v33  ;;  %v5362_v55 = vsel %vm5356_vm6, %v5349_v63, 920167782  ;;  %v13345_v19 = vpop.f32.mrb[95].mxu1  ;;  %21088 = vst [vmem:[#allocation8_spill] sm:$0xff] %v19412_v11 }
 0x55b   : > { %v5365_v28 = vsel %vm5353_vm7, %v5343_v21, %v5346_v31  ;;  %v5366_v44 = vsel %vm5356_vm6, %v5352_v59, 1326507024  ;;  %v5498_v62 = vshrl.u32 %v5480_v6, %v5496_v3  ;;  %v5363_v0 = vsel %vm5355_vm15, %v5346_v31, %v5362_v55  ;;  %v19374_v38 = vpop.f32.mrb[96].mxu1 }
 0x55c   : > { %v5501_v27 = vadd.s32 127, %v5500_v52  ;;  %v5367_v48 = vsel %vm5355_vm15, %v5349_v63, %v5366_v44  ;;  %v5513_v21 = vsel %vm19296_vm1, 0, %v19284_v8  ;;  %v19371_v10 = vshll.u32 %v5329_v56, 8  ;;  %v13348_v63 = vpop.f32.mrb[97].mxu1  ;;  %v13911_v8 = vld [vmem:[%s20958_s12 + $0x40] ss:$8 sps:$4 sm:$0xff]  }
 0x55d   : > { %v14104_v50 = vpop.eup %14103  ;;  %v5368_v40 = vsel %vm5354_vm13, %v5365_v28, %v5367_v48  ;;  %v20971_v6 = vand.u32 2147483647, %v19192_v7  ;;  %v5499_v37 = vor.u32 %v5498_v62, %v5497_v13  ;;  %v5364_v9 = vsel %vm5354_vm13, %v5361_v53, %v5363_v0  ;;  %v19396_v53 = vpop.f32.mrb[98].mxu1  ;;  %v13914_v44 = vld [vmem:[%s20958_s12 + $0x50] ss:$8 sps:$4 sm:$0xff]   ;;  %11599 = vmatpush1.bf16.msra.mxu1 %v13911_v8 }
 0x55e   : > { %v14106_v24 = vpop.eup %14105  ;;  %v5214_v31 = vxor.u32 2147483648, %v14104_v50  ;;  %v5502_v49 = vshll.u32 %v5501_v27, 23  ;;  %v5360_v18 = vsel %vm5354_vm13, %v5357_v39, %v5359_v42  ;;  %v13349_v28 = vpop.f32.mrb[99].mxu1  ;;  %11600 = vmatprep.subr.bf16.mxu1 %v13916_v15  ;;  %v21120_v43 = vmov 2131351028  }
 0x55f   : > { %v5211_v56 = vxor.u32 2147483648, %v14106_v24  ;;  %v19386_v59 = vmul.u32.u64.low %v19371_v10, %v5368_v40  ;;  %v19387_v33 = vmul.u32.u64.high %v19371_v10, %v5368_v40, %v19386_v59  ;;  %v5506_v13 = vcvt.s32.f32 %v5499_v37  ;;  %v19422_v19 = vpop.f32.mrb[100].mxu1  ;;  %v19445_v63 = vpop.permute.xlu1 %9703  ;;  %v13922_v28 = vld [vmem:[%s20958_s12 + $0x74] ss:$8 sps:$4 sm:$0xff]  }
 0x560   : > { %v5215_v34 = vsel %vm5213_vm8, %v5214_v31, %v14106_v24  ;;  %v5503_v3 = vor.u32 4788187, %v5502_v49  ;;  %v9162_v52 = vsel %vm9160_vm10, %v5214_v31, %v14106_v24  ;;  %v19420_v48 = vand.u32 8388607, %v20971_v6  ;;  %v13352_v49 = vpop.f32.mrb[101].mxu1 }
 0x561   : > { %v5212_v39 = vsel %vm5210_vm12, %v14104_v50, %v5211_v56  ;;  %v9159_v46 = vsel %vm9157_vm4, %v14104_v50, %v5211_v56  ;;  %v19405_v42 = vmul.u32.u64.low %v19371_v10, %v5364_v9  ;;  %v19406_v55 = vmul.u32.u64.high %v19371_v10, %v5364_v9, %v19405_v42  ;;  %v19424_v50 = vpop.f32.mrb[44].mxu0  ;;  %11601 = vmatpush1.bf16.msra.mxu1 %v13914_v44  ;;  %v13925_v6 = vld [vmem:[%s20958_s12 + $0x84] ss:$8 sps:$4 sm:$0xff]  }
 0x562   : > { %v5216_v62 = vsel %vm5209_vm11, %v5212_v39, %v5215_v34  ;;  %v5504_v27 = vand.u32 2147483647, %v5503_v3  ;;  %v9163_v0 = vsel %vm9156_vm14, %v9159_v46, %v9162_v52  ;;  %21089 = vst [vmem:[#allocation9_spill] sm:$0xff] %v19424_v50  ;;  %v19428_v40 = vshrl.u32 %v5530_v36, 23  ;;  %v19443_v9 = vpop.f32.mrb[45].mxu0  ;;  %11602 = vmatprep.subr.bf16.mxu1 %v13919_v14 }
 0x563   : > { %v5217_v23 = vsel %vm5207_vm2, nan, %v5216_v62  ;;  %v19432_v24 = vand.u32 3, %v5513_v21  ;;  %v5376_v37 = vmul.u32 %v19371_v10, %v5360_v18  ;;  %vm5378_vm8 = vc.u32 %v19387_v33, %v19405_v42  ;;  %21090 = vst [vmem:[#allocation10_spill] sm:$0xff] %v19443_v9  ;;  %v19452_v18 = vpop.f32.mrb[102].mxu1  ;;  %v13917_v3 = vld [vmem:[%s20958_s12 + $0x60] ss:$8 sps:$4 sm:$0xff]  }
 0x564   : > { %9848 = vperm.xlu0 %13866, %v5217_v23   ;;  %v5507_v31 = vmul.f32 %v5506_v13, %v5504_v27  ;;  %v5642_v36 = vsel %vm5641_vm5, %v19268_v60, 0  ;;  %v9164_v8 = vsel %vm5207_vm2, nan, %v9163_v0  ;;  %v19449_v56 = vadd.s32 3, %v5513_v21  ;;  %v13353_v60 = vpop.f32.mrb[103].mxu1  ;;  %v19458_v13 = vpop.f32.mrb[46].mxu0 }
 0x565   : > { %v5379_v59 = vadd.s32 1, %v19406_v55  ;;  %v5644_v10 = vand.u32 31, %v5642_v36  ;;  %v5638_v34 = vor.u32 8388608, %v19420_v48  ;;  %21091 = vst [vmem:[#allocation11_spill] sm:$0xff] %v19458_v13  ;;  %v19477_v23 = vpop.f32.mrb[47].mxu0  ;;  %v19482_v49 = vshrl.u32 %v5642_v36, 5  ;;  %11603 = vmatpush1.bf16.msra.mxu1 %v13917_v3  ;;  %v19495_v36 = vpop.permute.xlu1 %9981 }
 0x566   : > { %v5508_v15 = vxor.u32 2147483648, %v5507_v31  ;;  %21093 = vst [vmem:[#allocation13_spill] sm:$0xff] %v19477_v23  ;;  %11604 = vmatprep.subr.bf16.mxu1 %v13922_v28  ;;  %vm5519_vm11 = vcmp.eq.s32.totalorder %v19432_v24, 0  ;;  %vm5522_vm14 = vcmp.eq.s32.totalorder %v19432_v24, 2  ;;  %vm5518_vm2 = vcmp.lt.s32.totalorder %v19432_v24, 2 }
 0x567   : > { %v5380_v21 = vsel %vm5378_vm8, %v5379_v59, %v19406_v55  ;;  %v5645_v52 = vsub.s32 32, %v5644_v10  ;;  %v5647_v39 = vshll.u32 %v20983_v32, %v5644_v10  ;;  %v5650_v46 = vshll.u32 %v20976_v61, %v5644_v10  ;;  %v19475_v55 = vpop.f32.mrb[104].mxu1 }
 0x568   : > { %v5509_v44 = vsel %vm5426_vm9, %v5508_v15, %v5507_v31  ;;  %10126 = vperm.xlu0 %13866, %v9164_v8   ;;  %v5381_v62 = vadd.s32 %v5380_v21, %v5376_v37  ;;  %v5653_v27 = vshll.u32 %v20974_v16, %v5644_v10  ;;  %v5656_v0 = vshll.u32 %v20972_v20, %v5644_v10  ;;  %v13356_v8 = vpop.f32.mrb[105].mxu1  ;;  %v19486_v37 = vpop.f32.mrb[48].mxu0 }
 0x569   : > { %21092 = vst [vmem:[#allocation12_spill] sm:$0xff] %v19475_v55  ;;  %v5512_v14 = vsel %vm19296_vm1, %v18951_v2, %v5509_v44  ;;  %v5648_v59 = vshrl.u32 %v20976_v61, %v5645_v52  ;;  %v5651_v31 = vshrl.u32 %v20974_v16, %v5645_v52  ;;  %21094 = vst [vmem:[#allocation14_spill] sm:$0xff] %v19486_v37  ;;  %v13920_v2 = vld [vmem:[%s20958_s12 + $0x70] ss:$8 sps:$4 sm:$0xff]   ;;  %v19493_v1 = vpop.f32.mrb[106].mxu1  ;;  %vm5662_vm9 = vcmp.lt.s32.totalorder %v19482_v49, 1 }
 0x56a   : > { %14107 = vcosq.f32 %v5512_v14  ;;  %v5382_v15 = vadd.s32 536870912, %v5381_v62  ;;  %v5654_v60 = vshrl.u32 %v20972_v20, %v5645_v52  ;;  %v5657_v21 = vshrl.u32 %v20981_v57, %v5645_v52  ;;  %21095 = vst [vmem:[#allocation15_spill] sm:$0xff] %v19493_v1  ;;  %v13357_v4 = vpop.f32.mrb[107].mxu1  ;;  %11605 = vmatpush1.bf16.msra.mxu1 %v13920_v2 }
 0x56b   : > { %14109 = vsinq.f32 %v5512_v14  ;;  %v5649_v44 = vor.u32 %v5648_v59, %v5647_v39  ;;  %v5652_v8 = vor.u32 %v5651_v31, %v5650_v46  ;;  %v5659_v12 = vshll.u32 %v20981_v57, %v5644_v10  ;;  %v13923_v14 = vld [vmem:[%s20958_s12 + $0x80] ss:$8 sps:$4 sm:$0xff]   ;;  %v19507_v39 = vpop.f32.mrb[49].mxu0  ;;  %v19513_v46 = vpop.f32.mrb[108].mxu1  ;;  %11606 = vmatprep.subr.bf16.mxu1 %v13925_v6 }
 0x56c   : > { %v19501_v20 = vshrl.u32 %v5382_v15, 30  ;;  %v5655_v3 = vor.u32 %v5654_v60, %v5653_v27  ;;  %v5658_v16 = vor.u32 %v5657_v21, %v5656_v0  ;;  %v5660_v61 = vshrl.u32 %v20980_v41, %v5645_v52  ;;  %21096 = vst [vmem:[#allocation16_spill] sm:$0xff] %v19507_v39  ;;  %21097 = vst [vmem:[#allocation17_spill] sm:$0xff] %v19513_v46  ;;  %v19515_v28 = vpop.f32.mrb[50].mxu0  ;;  %v13360_v0 = vpop.f32.mrb[109].mxu1 }
 0x56d   : > { %v5646_v10 = vshrl.u32 %v20983_v32, %v5645_v52  ;;  %vm5664_vm1 = vcmp.lt.s32.totalorder %v19482_v49, 3  ;;  %vm5665_vm10 = vcmp.lt.s32.totalorder %v19482_v49, 4  ;;  %21098 = vst [vmem:[#allocation18_spill] sm:$0xff] %v19515_v28  ;;  %vm5663_vm12 = vcmp.lt.s32.totalorder %v19482_v49, 2  ;;  %v13928_v52 = vld [vmem:[%s20958_s12 + $0x94] ss:$8 sps:$4 sm:$0xff]   ;;  %v19524_v31 = vpop.permute.xlu0 %9698 }
 0x56e   : > { %v5384_v4 = vshll.u32 %v19501_v20, 30  ;;  %v5661_v27 = vor.u32 %v5660_v61, %v5659_v12  ;;  %v19522_v59 = vpop.f32.mrb[51].mxu0  ;;  %v5667_v15 = vsel %vm5665_vm10, %v5655_v3, 2102212464  ;;  %v5670_v60 = vsel %vm5662_vm9, %v5649_v44, %v5652_v8  ;;  %v19543_v57 = vpop.f32.mrb[110].mxu1  ;;  %11607 = vmatpush1.bf16.msra.mxu1 %v13923_v14 }
 0x56f   : > { %21099 = vst [vmem:[#allocation19_spill] sm:$0xff] %v19522_v59  ;;  %v5671_v12 = vsel %vm5665_vm10, %v5658_v16, 920167782  ;;  %v19534_v61 = vshll.u32 %v5638_v34, 8  ;;  %v9467_v21 = vand.u32 3, %v19449_v56  ;;  %v5674_v41 = vsel %vm5662_vm9, %v5652_v8, %v5655_v3  ;;  %21100 = vst [vmem:[#allocation20_spill] sm:$0xff] %v19543_v57  ;;  %11608 = vmatprep.subr.bf16.mxu1 %v13928_v52 }
 0x570   : > { %v19537_v2 = vsub.s32 %v5381_v62, %v5384_v4  ;;  %v5672_v0 = vsel %vm5664_vm1, %v5655_v3, %v5671_v12  ;;  %v19545_v32 = vpop.f32.mrb[52].mxu0  ;;  %v5666_v48 = vsel %vm5662_vm9, %v5646_v10, %v5649_v44  ;;  %v5668_v6 = vsel %vm5664_vm1, %v5652_v8, %v5667_v15  ;;  %v13361_v62 = vpop.f32.mrb[111].mxu1  ;;  %v14197_v12 = vld [vmem:[%s14431_s21 + $0x118] sm:$0xff]  ;;  %v13929_v49 = vld [vmem:[%s20958_s12 + $0xa0] ss:$8 sps:$4 sm:$0xff]  }
 0x571   : > { %21101 = vst [vmem:[#allocation21_spill] sm:$0xff] %v19545_v32  ;;  %v5673_v56 = vsel %vm5663_vm12, %v5670_v60, %v5672_v0  ;;  %v5675_v34 = vsel %vm5665_vm10, %v5661_v27, 1326507024  ;;  %v19555_v4 = vpop.f32.mrb[53].mxu0  ;;  %v12871_v3 = vadd.s32 4294967169, %v19428_v40  ;;  %vm5516_vm4 = vweird.f32 %v14197_v12  ;;  %v19568_v27 = vpop.permute.xlu1 %9713 }
 0x572   : > { %21102 = vst [vmem:[#allocation22_spill] sm:$0xff] %v19555_v4  ;;  %v5387_v54 = vsub.s32 0, %v19537_v2  ;;  %v5676_v44 = vsel %vm5664_vm1, %v5658_v16, %v5675_v34  ;;  %v13926_v8 = vld [vmem:[%s20958_s12 + $0x90] ss:$8 sps:$4 sm:$0xff]   ;;  %v19565_v10 = vpop.f32.mrb[54].mxu0  ;;  %v19573_v15 = vmul.u32.u64.low %v19534_v61, %v5673_v56  ;;  %v19574_v60 = vmul.u32.u64.high %v19534_v61, %v5673_v56, %v19573_v15 }
 0x573   : > { %21103 = vst [vmem:[#allocation23_spill] sm:$0xff] %v19565_v10  ;;  %v5677_v40 = vsel %vm5663_vm12, %v5674_v41, %v5676_v44  ;;  %v13931_v16 = vld [vmem:[%s20958_s12 + $0xa4] ss:$8 sps:$4 sm:$0xff]   ;;  %vm9472_vm7 = vcmp.eq.s32.totalorder %v9467_v21, 2  ;;  %v5669_v34 = vsel %vm5663_vm12, %v5666_v48, %v5668_v6  ;;  %v19584_v41 = vpop.f32.mrb[55].mxu0  ;;  %vm9469_vm13 = vcmp.eq.s32.totalorder %v9467_v21, 0  ;;  %v19590_v10 = vpop.permute.xlu0 %9976  ;;  %11609 = vmatpush1.bf16.msra.mxu1 %v13926_v8 }
 0x574   : > { %v14108_v14 = vpop.eup %14107  ;;  %v12864_v0 = vmin.u32 %v5387_v54, %v19537_v2  ;;  %21104 = vst [vmem:[#allocation24_spill] sm:$0xff] %v19584_v41  ;;  %v19587_v52 = vmul.u32.u64.low %v19534_v61, %v5677_v40  ;;  %v19588_v44 = vmul.u32.u64.high %v19534_v61, %v5677_v40, %v19587_v52  ;;  %v19592_v4 = vpop.f32.mrb[56].mxu0  ;;  %vm9468_vm3 = vcmp.lt.s32.totalorder %v9467_v21, 2  ;;  %11610 = vmatprep.subr.bf16.mxu1 %v13931_v16  ;;  %v13934_v8 = vld [vmem:[%s20958_s12 + $0xb4] ss:$8 sps:$4 sm:$0xff]  }
 0x575   : > { %v14110_v62 = vpop.eup %14109  ;;  %v5523_v56 = vxor.u32 2147483648, %v14108_v14  ;;  %21105 = vst [vmem:[#allocation25_spill] sm:$0xff] %v19592_v4  ;;  %v19598_v48 = vpop.f32.mrb[57].mxu0  ;;  %v5685_v52 = vmul.u32 %v19534_v61, %v5669_v34  ;;  %v5688_v4 = vadd.s32 1, %v19574_v60  ;;  %v5377_v61 = vadd.s32 %v19405_v42, %v19387_v33  ;;  %v13932_v33 = vld [vmem:[%s20958_s12 + $0xb0] ss:$8 sps:$4 sm:$0xff]  }
 0x576   : > { %v5520_v32 = vxor.u32 2147483648, %v14110_v62  ;;  %v5389_v54 = vclz %v12864_v0  ;;  %21106 = vst [vmem:[#allocation26_spill] sm:$0xff] %v19598_v48  ;;  %v9877_v0 = vlaneseq  ;;  %vm5687_vm15 = vc.u32 %v19588_v44, %v19573_v15  ;;  %v19618_v16 = vpop.permute.xlu1 %9991 }
 0x577   : > { %v5524_v6 = vsel %vm5522_vm14, %v5523_v56, %v14110_v62  ;;  %v9474_v40 = vsel %vm9472_vm7, %v5523_v56, %v14110_v62  ;;  %v5689_v56 = vsel %vm5687_vm15, %v5688_v4, %v19574_v60  ;;  %11611 = vmatpush1.bf16.msra.mxu1 %v13929_v49  ;;  %v5537_v42 = vadd.s32 1, %v12871_v3  ;;  %v19633_v4 = vpop.permute.xlu0 %9708  ;;  %v13937_v60 = vld [vmem:[%s20958_s12 + $0xc4] ss:$8 sps:$4 sm:$0xff]   ;;  %v19641_v3 = vpop.f32.mrb[58].mxu0 }
 0x578   : > { %v5521_v41 = vsel %vm5519_vm11, %v14108_v14, %v5520_v32  ;;  %v9471_v48 = vsel %vm9469_vm13, %v14108_v14, %v5520_v32  ;;  %v12865_v59 = vadd.s32 4294967294, %v5389_v54  ;;  %v19625_v32 = vld [vmem:[%s21026_s6] ss:$0 sm:$0xff]  ;;  %v5690_v14 = vadd.s32 %v5689_v56, %v5685_v52  ;;  %11612 = vmatprep.subr.bf16.mxu1 %v13934_v8  ;;  %21107 = vst [vmem:[#allocation27_spill] sm:$0xff] %v19641_v3  ;;  %v19660_v56 = vld [vmem:[%s14431_s21 + $0x110] sm:$0xff] }
 0x579   : > { %v5525_v28 = vsel %vm5518_vm2, %v5521_v41, %v5524_v6  ;;  %v9475_v62 = vsel %vm9468_vm3, %v9471_v48, %v9474_v40  ;;  %v1735_v24 = vadd.f32 %v19625_v32, %v19149_v35  ;;  %v1738_v49 = vadd.f32 %v19625_v32, %v19160_v17  ;;  %v19644_v6 = vpop.f32.mrb[59].mxu0 }
 0x57a   : > { %v5526_v34 = vsel %vm5516_vm4, nan, %v5525_v28  ;;  %vm12866_vm6 = vcmp.lt.s32.totalorder %v12865_v59, 0  ;;  %v9476_v28 = vsel %vm5516_vm4, nan, %v9475_v62  ;;  %v9878_v12 = vshrl.u32 %v9877_v0, 7  ;;  %21108 = vst [vmem:[#allocation28_spill] sm:$0xff] %v19644_v6  ;;  %v19651_v0 = vpop.permute.xlu1 %9723 }
 0x57b   : > { %9863 = vperm.xlu1 %13865, %v5526_v34   ;;  %v5392_v21 = vsel %vm12866_vm6, 0, %v12865_v59  ;;  %v5407_v59 = vsub.s32 4, %v19501_v20  ;;  %v5691_v48 = vadd.s32 536870912, %v5690_v14  ;;  %v1807_v8 = vmax.f32 %v1735_v24, 0.0  ;;  %11613 = vmatpush1.bf16.msra.mxu1 %v13932_v33  ;;  %v13940_v34 = vld [vmem:[%s20958_s12 + $0xd4] ss:$8 sps:$4 sm:$0xff]  }
 0x57c   : > { %v5393_v41 = vsub.s32 32, %v5392_v21  ;;  %v5394_v35 = vshll.u32 %v19537_v2, %v5392_v21  ;;  %v5397_v54 = vsub.s32 4294967266, %v5392_v21  ;;  %v1808_v62 = vmax.f32 %v1738_v49, 0.0  ;;  %v13935_v2 = vld [vmem:[%s20958_s12 + $0xc0] ss:$8 sps:$4 sm:$0xff]   ;;  %11614 = vmatprep.subr.bf16.mxu1 %v13937_v60  ;;  %v19671_v49 = vpop.permute.xlu0 %9986 }
 0x57d   : > { %vm5538_vm5 = vcmp.gt.s32.totalorder %v5537_v42, 0  ;;  %v19649_v17 = vshrl.u32 %v5691_v48, 30  ;;  %vm5323_vm8 = vcmp.lt.s32.totalorder %v19660_v56, 0  ;;  %v19663_v21 = vsub.s32 0, %v9878_v12  ;;  %v13938_v48 = vld [vmem:[%s20958_s12 + $0xd0] ss:$8 sps:$4 sm:$0xff]  }
 0x57e   : > { %v5395_v40 = vshrl.u32 %v5377_v61, %v5393_v41  ;;  %v5398_v52 = vadd.s32 127, %v5397_v54  ;;  %v9685_v61 = vld [vmem:[%s21109_s7] sm:$0x3]  ;;  %v19665_v41 = vsub.s32 1, %v9878_v12  ;;  %v5408_v60 = vsel %vm5323_vm8, %v5407_v59, %v19501_v20 }
 0x57f   : > { %10141 = vperm.xlu1 %13865, %v9476_v28   ;;  %v10871_v28 = vpack.c.bf16 %v1808_v62, %v1807_v8  ;;  %21110 = vst [vmem:[#allocation29_spill] sm:$0xff] %v19663_v21  ;;  %v5693_v54 = vshll.u32 %v19649_v17, 30  ;;  %11615 = vmatpush1.bf16.msra.mxu1 %v13935_v2  ;;  %v21112_v12 = vand.u32 2147483647, %v18915_v29  ;;  %v21115_v8 = vmov 0  }
 0x580   : > { %v5396_v24 = vor.u32 %v5395_v40, %v5394_v35  ;;  %v5399_v33 = vshll.u32 %v5398_v52, 23  ;;  %21111 = vst [vmem:[#allocation30_spill] sm:$0xff] %v19665_v41  ;;  %v20986_v40 = vand.u32 2147483647, %v19248_v30  ;;  %v5539_v52 = vsel %vm5538_vm5, %v5537_v42, 0  ;;  %11616 = vmatprep.subr.bf16.mxu1 %v13940_v34 }
 0x581   : > { %11136 = vmatmul.mubr.bf16.gmra.mrb[92].mxu0 %v10871_v28  ;;  %vm19680_vm9 = vcmp.le.f32.partialorder %v21112_v12, 0.7853982  ;;  %v19684_v59 = vsub.s32 %v5690_v14, %v5693_v54  ;;  %v13943_v62 = vld [vmem:[%s20958_s12 + $0xe4] ss:$8 sps:$4 sm:$0xff]   ;;  %v19693_v42 = vld [vmem:[%s20954_s8] sm:$0x3]  ;;  %v19698_v14 = vrot.slane %v9685_v61, %v19663_v21  ;;  %v19701_v28 = vpop.permute.xlu1 %10001  ;;  %v19704_v54 = vrot.slane %v9685_v61, %v19665_v41 }
 0x582   : > { %v5400_v6 = vor.u32 4788187, %v5399_v33  ;;  %v5403_v35 = vcvt.s32.f32 %v5396_v24  ;;  %11145 = vmatprep.mubr.bf16.mxu0 %v21115_v8  ;;  %v5410_v29 = vsel %vm19680_vm9, 0, %v5408_v60  ;;  %v5541_v24 = vand.u32 31, %v5539_v52  ;;  %v13941_v60 = vld [vmem:[%s20958_s12 + $0xe0] ss:$8 sps:$4 sm:$0xff]  }
 0x583   : > { %21116 = vst [vmem:[#allocation31_spill] sm:$0xff] %v19698_v14  ;;  %v5696_v33 = vsub.s32 0, %v19684_v59  ;;  %v9362_v34 = vadd.s32 3, %v5410_v29  ;;  %21117 = vst [vmem:[#allocation32_spill] sm:$0xff] %v19704_v54  ;;  %v19708_v3 = vand.u32 8388607, %v20986_v40  ;;  %11617 = vmatpush1.bf16.msra.mxu1 %v13938_v48  ;;  %v19715_v39 = vrot.slane %v19693_v42, %v19663_v21 }
 0x584   : > { %v5401_v2 = vand.u32 2147483647, %v5400_v6  ;;  %v5542_v6 = vsub.s32 32, %v5541_v24  ;;  %v19717_v37 = vand.u32 3, %v5410_v29  ;;  %v21118_v23 = vmov 683565275   ;;  %11618 = vmatprep.subr.bf16.mxu1 %v13943_v62 }
 0x585   : > { %v12876_v61 = vmin.u32 %v5696_v33, %v19684_v59  ;;  %v13946_v48 = vld [vmem:[%s20958_s12 + $0xf4] ss:$8 sps:$4 sm:$0xff]   ;;  %v5686_v13 = vadd.s32 %v19573_v15, %v19588_v44  ;;  %v21119_v9 = vmov 2475754826   ;;  %v19730_v26 = vand.u32 3, %v9362_v34 }
 0x586   : > { %v5404_v12 = vmul.f32 %v5403_v35, %v5401_v2  ;;  %v5544_v35 = vshll.u32 %v21118_v23, %v5541_v24  ;;  %v19721_v2 = vpop.permute.xlu0 %9718  ;;  %v5545_v50 = vshrl.u32 %v21119_v9, %v5542_v6  ;;  %v5547_v29 = vshll.u32 %v21119_v9, %v5541_v24  ;;  %v13944_v9 = vld [vmem:[%s20958_s12 + $0xf0] ss:$8 sps:$4 sm:$0xff]  }
 0x587   : > { %v5698_v11 = vclz %v12876_v61  ;;  %v19732_v33 = vshrl.u32 %v5539_v52, 5  ;;  %v5548_v51 = vshrl.u32 %v21120_v43, %v5542_v6  ;;  %v5535_v21 = vor.u32 8388608, %v19708_v3  ;;  %11619 = vmatpush1.bf16.msra.mxu1 %v13941_v60 }
 0x588   : > { %v5405_v40 = vxor.u32 2147483648, %v5404_v12  ;;  %v5550_v57 = vshll.u32 %v21120_v43, %v5541_v24  ;;  %v21121_v46 = vmov 2102212464   ;;  %v5543_v34 = vshrl.u32 %v21118_v23, %v5542_v6  ;;  %11620 = vmatprep.subr.bf16.mxu1 %v13946_v48 }
 0x589   : > { %v5551_v15 = vshrl.u32 %v21121_v46, %v5542_v6  ;;  %v12877_v52 = vadd.s32 4294967294, %v5698_v11  ;;  %v5546_v61 = vor.u32 %v5545_v50, %v5544_v35  ;;  %v5549_v43 = vor.u32 %v5548_v51, %v5547_v29 }
 0x58a   : > { %v5406_v62 = vsel %vm5323_vm8, %v5405_v40, %v5404_v12  ;;  %v19747_v40 = vpop.permute.xlu1 %9733  ;;  %v5553_v3 = vshll.u32 %v21121_v46, %v5541_v24  ;;  %v21122_v12 = vmov 920167782   ;;  %v21123_v55 = vmov 1326507024  }
 0x58b   : > { %v5409_v44 = vsel %vm19680_vm9, %v19660_v56, %v5406_v62  ;;  %v5554_v60 = vshrl.u32 %v21122_v12, %v5542_v6  ;;  %vm12878_vm1 = vcmp.lt.s32.totalorder %v12877_v52, 0  ;;  %v5556_v1 = vshll.u32 %v21122_v12, %v5541_v24  ;;  %v19753_v62 = vpop.permute.xlu0 %9996  ;;  %11621 = vmatpush1.bf16.msra.mxu1 %v13944_v9 }
 0x58c   : > { %14111 = vcosq.f32 %v5409_v44  ;;  %v5557_v20 = vshrl.u32 %v21123_v55, %v5542_v6  ;;  %v5701_v11 = vsel %vm12878_vm1, 0, %v12877_v52  ;;  %v5552_v23 = vor.u32 %v5551_v15, %v5550_v57  ;;  %12062 = vmatprep.subr.bf16.mxu1 %v21115_v8 }
 0x58d   : > { %14113 = vsinq.f32 %v5409_v44  ;;  %v5555_v50 = vor.u32 %v5554_v60, %v5553_v3  ;;  %vm5559_vm10 = vcmp.lt.s32.totalorder %v19732_v33, 1  ;;  %v5702_v35 = vsub.s32 32, %v5701_v11 }
 0x58e   : > { %v5703_v51 = vshll.u32 %v19684_v59, %v5701_v11  ;;  %v5706_v46 = vsub.s32 4294967266, %v5701_v11  ;;  %v5558_v48 = vor.u32 %v5557_v20, %v5556_v1  ;;  %vm5560_vm12 = vcmp.lt.s32.totalorder %v19732_v33, 2  ;;  %v19764_v59 = vpop.permute.xlu1 %10011 }
 0x58f   : > { %vm5561_vm4 = vcmp.lt.s32.totalorder %v19732_v33, 3  ;;  %vm5562_vm11 = vcmp.lt.s32.totalorder %v19732_v33, 4  ;;  %v5567_v57 = vsel %vm5559_vm10, %v5546_v61, %v5549_v43  ;;  %vm5413_vm14 = vweird.f32 %v19660_v56  ;;  %v19780_v60 = vpop.permute.xlu0 %9728 }
 0x590   : > { %v5704_v55 = vshrl.u32 %v5686_v13, %v5702_v35  ;;  %v5707_v24 = vadd.s32 127, %v5706_v46  ;;  %v5564_v6 = vsel %vm5562_vm11, %v5552_v23, 2102212464  ;;  %v5568_v29 = vsel %vm5562_vm11, %v5555_v50, 920167782 }
 0x591   : > { %vm5416_vm7 = vcmp.eq.s32.totalorder %v19717_v37, 0  ;;  %v5569_v1 = vsel %vm5561_vm4, %v5552_v23, %v5568_v29  ;;  %v5571_v15 = vsel %vm5559_vm10, %v5549_v43, %v5552_v23  ;;  %v5572_v9 = vsel %vm5562_vm11, %v5558_v48, 1326507024 }
 0x592   : > { %vm5419_vm13 = vcmp.eq.s32.totalorder %v19717_v37, 2  ;;  %v21124_v44 = vand.u32 2147483647, %v19192_v7  ;;  %v5705_v52 = vor.u32 %v5704_v55, %v5703_v51  ;;  %v5708_v3 = vshll.u32 %v5707_v24, 23 }
 0x593   : > { %v5570_v12 = vsel %vm5560_vm12, %v5567_v57, %v5569_v1  ;;  %v5563_v20 = vsel %vm5559_vm10, %v5543_v34, %v5546_v61  ;;  %v5565_v11 = vsel %vm5561_vm4, %v5549_v43, %v5564_v6  ;;  %v5573_v23 = vsel %vm5561_vm4, %v5555_v50, %v5572_v9  ;;  %v19801_v50 = vpop.permute.xlu1 %9743  ;;  %v19811_v33 = vpop.permute.xlu0 %10006 }
 0x594   : > { %vm19774_vm2 = vcmp.le.f32.partialorder %v21124_v44, 0.7853982  ;;  %v5575_v35 = vshll.u32 %v5535_v21, 8  ;;  %v5709_v46 = vor.u32 4788187, %v5708_v3  ;;  %v5712_v48 = vcvt.s32.f32 %v5705_v52 }
 0x595   : > { %vm9368_vm3 = vcmp.eq.s32.totalorder %v19730_v26, 2  ;;  %v5574_v51 = vsel %vm5560_vm12, %v5571_v15, %v5573_v23  ;;  %vm9365_vm15 = vcmp.eq.s32.totalorder %v19730_v26, 0  ;;  %v5566_v21 = vsel %vm5560_vm12, %v5563_v20, %v5565_v11 }
 0x596   : > { %v14112_v57 = vpop.eup %14111  ;;  %v19791_v55 = vmul.u32.u64.low %v5575_v35, %v5574_v51  ;;  %v19792_v24 = vmul.u32.u64.high %v5575_v35, %v5574_v51, %v19791_v55  ;;  %v19794_v29 = vmul.u32.u64.low %v5575_v35, %v5570_v12  ;;  %v19795_v34 = vmul.u32.u64.high %v5575_v35, %v5570_v12, %v19794_v29 }
 0x597   : > { %v14114_v61 = vpop.eup %14113  ;;  %v5420_v43 = vxor.u32 2147483648, %v14112_v57  ;;  %v5710_v6 = vand.u32 2147483647, %v5709_v46  ;;  %vm5415_vm6 = vcmp.lt.s32.totalorder %v19717_v37, 2  ;;  %vm5632_vm5 = vcmp.lt.s32.totalorder %v19192_v7, 0 }
 0x598   : > { %v5417_v1 = vxor.u32 2147483648, %v14114_v61  ;;  %vm9364_vm8 = vcmp.lt.s32.totalorder %v19730_v26, 2  ;;  %v5716_v44 = vsub.s32 4, %v19649_v17  ;;  %v5582_v20 = vmul.u32 %v5575_v35, %v5566_v21 }
 0x599   : > { %v5421_v15 = vsel %vm5419_vm13, %v5420_v43, %v14114_v61  ;;  %v5713_v9 = vmul.f32 %v5712_v48, %v5710_v6  ;;  %v9370_v52 = vsel %vm9368_vm3, %v5420_v43, %v14114_v61  ;;  %vm5584_vm9 = vc.u32 %v19792_v24, %v19794_v29  ;;  %v19832_v61 = vpop.permute.xlu1 %10021  ;;  %v19837_v43 = vld [vmem:[%s14431_s21 + $0x128] sm:$0xff] }
 0x59a   : > { %v5418_v3 = vsel %vm5416_vm7, %v14112_v57, %v5417_v1  ;;  %v9367_v12 = vsel %vm9365_vm15, %v14112_v57, %v5417_v1  ;;  %v5585_v48 = vadd.s32 1, %v19795_v34  ;;  %v19820_v26 = vrot.slane %v19693_v42, %v19665_v41 }
 0x59b   : > { %v5422_v11 = vsel %vm5415_vm6, %v5418_v3, %v5421_v15  ;;  %v5714_v23 = vxor.u32 2147483648, %v5713_v9  ;;  %v9371_v46 = vsel %vm9364_vm8, %v9367_v12, %v9370_v52  ;;  %v9887_v37 = vmul.f32 %v19698_v14, %v19278_v22 }
 0x59c   : > { %v5423_v51 = vsel %vm5413_vm14, nan, %v5422_v11  ;;  %v5717_v57 = vsel %vm5632_vm5, %v5716_v44, %v19649_v17  ;;  %v5586_v55 = vsel %vm5584_vm9, %v5585_v48, %v19795_v34  ;;  %v10165_v42 = vmul.f32 %v19715_v39, %v19330_v5  ;;  %v19848_v34 = vpop.permute.xlu0 %9738 }
 0x59d   : > { %9858 = vperm.xlu0 %13866, %v5423_v51   ;;  %v5715_v35 = vsel %vm5632_vm5, %v5714_v23, %v5713_v9  ;;  %v9372_v21 = vsel %vm5413_vm14, nan, %v9371_v46  ;;  %v5587_v1 = vadd.s32 %v5586_v55, %v5582_v20  ;;  %v9888_v7 = vmul.f32 %v19704_v54, %v19278_v22  ;;  %v19864_v20 = vpop.permute.xlu1 %9753 }
 0x59e   : > { %v5718_v6 = vsel %vm19774_vm2, %v19837_v43, %v5715_v35  ;;  %v1743_v17 = vadd.f32 %v19625_v32, %v19325_v45  ;;  %v10166_v15 = vmul.f32 %v19820_v26, %v19330_v5  ;;  %v5719_v9 = vsel %vm19774_vm2, 0, %v5717_v57 }
 0x59f   : > { %14115 = vcosq.f32 %v5718_v6  ;;  %v5588_v44 = vadd.s32 536870912, %v5587_v1  ;;  %v9674_v56 = vadd.s32 3, %v5719_v9  ;;  %v1746_v52 = vadd.f32 %v19625_v32, %v19342_v58 }
 0x5a0   : > { %14117 = vsinq.f32 %v5718_v6  ;;  %v19856_v22 = vadd.f32 %v10165_v42, %v9887_v37  ;;  %v10167_v45 = vmul.f32 %v19715_v39, %v19381_v47  ;;  %v9889_v5 = vmul.f32 %v19698_v14, %v19460_v25  ;;  %v19875_v57 = vpop.permute.xlu0 %10016 }
 0x5a1   : > { %10136 = vperm.xlu0 %13866, %v9372_v21   ;;  %v19858_v3 = vshrl.u32 %v5588_v44, 30  ;;  %v1809_v12 = vmax.f32 %v1743_v17, 0.0  ;;  %v1810_v13 = vmax.f32 %v1746_v52, 0.0  ;;  %v19866_v11 = vadd.f32 %v10166_v15, %v9888_v7  ;;  %v19900_v44 = vpop.permute.xlu1 %10031 }
 0x5a2   : > { %21127 = vst [vmem:[#allocation33_spill] sm:$0xff] %v19856_v22  ;;  %v10168_v23 = vmul.f32 %v19820_v26, %v19381_v47  ;;  %v9893_v58 = vmul.f32 %v19698_v14, %v19445_v63  ;;  %v5723_v48 = vand.u32 3, %v5719_v9  ;;  %v9675_v51 = vand.u32 3, %v9674_v56 }
 0x5a3   : > { %21128 = vst [vmem:[#allocation34_spill] sm:$0xff] %v19866_v11  ;;  %v5590_v46 = vshll.u32 %v19858_v3, 30  ;;  %v10872_v37 = vpack.c.bf16 %v1810_v13, %v1809_v12  ;;  %v1751_v35 = vadd.f32 %v19625_v32, %v19374_v38  ;;  %v9894_v55 = vmul.f32 %v19704_v54, %v19445_v63 }
 0x5a4   : > { %v9890_v42 = vmul.f32 %v19704_v54, %v19460_v25  ;;  %v10171_v47 = vmul.f32 %v19715_v39, %v19495_v36  ;;  %v19885_v21 = vadd.f32 %v10167_v45, %v9889_v5  ;;  %v10172_v7 = vmul.f32 %v19820_v26, %v19495_v36  ;;  %v19903_v5 = vpop.permute.xlu0 %9748 }
 0x5a5   : > { %v19883_v6 = vsub.s32 %v5587_v1, %v5590_v46  ;;  %v9891_v38 = vmul.f32 %v19698_v14, %v19524_v31  ;;  %11146 = vmatmul.mubr.bf16.gmra.mrb[96].mxu0 %v10872_v37  ;;  %v1754_v63 = vadd.f32 %v19625_v32, %v19396_v53  ;;  %v9892_v25 = vmul.f32 %v19704_v54, %v19524_v31 }
 0x5a6   : > { %21129 = vst [vmem:[#allocation35_spill] sm:$0xff] %v19885_v21  ;;  %vm5722_vm1 = vweird.f32 %v19837_v43  ;;  %v10169_v1 = vmul.f32 %v19715_v39, %v19590_v10  ;;  %11155 = vmatprep.mubr.bf16.mxu0 %v21115_v8  ;;  %vm5728_vm10 = vcmp.eq.s32.totalorder %v5723_v48, 2  ;;  %vm9680_vm12 = vcmp.eq.s32.totalorder %v9675_v51, 2  ;;  %21130 = vst [vmem:[#allocation36_spill] sm:$0xff] %v19903_v5 }
 0x5a7   : > { %v5593_v17 = vsub.s32 0, %v19883_v6  ;;  %v1811_v15 = vmax.f32 %v1751_v35, 0.0  ;;  %v1812_v9 = vmax.f32 %v1754_v63, 0.0  ;;  %vm5725_vm4 = vcmp.eq.s32.totalorder %v5723_v48, 0 }
 0x5a8   : > { %vm9677_vm11 = vcmp.eq.s32.totalorder %v9675_v51, 0  ;;  %vm5724_vm14 = vcmp.lt.s32.totalorder %v5723_v48, 2  ;;  %vm9676_vm7 = vcmp.lt.s32.totalorder %v9675_v51, 2  ;;  %v10170_v13 = vmul.f32 %v19820_v26, %v19590_v10 }
 0x5a9   : > { %v14116_v36 = vpop.eup %14115  ;;  %v12872_v31 = vmin.u32 %v5593_v17, %v19883_v6  ;;  %v10873_v45 = vpack.c.bf16 %v1812_v9, %v1811_v15  ;;  %v9897_v35 = vmul.f32 %v19698_v14, %v19568_v27  ;;  %v10175_v17 = vmul.f32 %v19715_v39, %v19618_v16 }
 0x5aa   : > { %v14118_v53 = vpop.eup %14117  ;;  %v5729_v56 = vxor.u32 2147483648, %v14116_v36  ;;  %v19912_v21 = vadd.f32 %v10168_v23, %v9890_v42  ;;  %v19914_v11 = vadd.f32 %v10171_v47, %v9893_v58  ;;  %v19916_v22 = vadd.f32 %v10172_v7, %v9894_v55  ;;  %v19931_v55 = vpop.f32.mrb[60].mxu0 }
 0x5ab   : > { %v5726_v52 = vxor.u32 2147483648, %v14118_v53  ;;  %v5595_v37 = vclz %v12872_v31  ;;  %v9898_v10 = vmul.f32 %v19704_v54, %v19568_v27  ;;  %v19926_v23 = vadd.f32 %v10170_v13, %v9892_v25  ;;  %v19941_v25 = vpop.f32.mrb[61].mxu0 }
 0x5ac   : > { %v5730_v12 = vsel %vm5728_vm10, %v5729_v56, %v14118_v53  ;;  %v9682_v46 = vsel %vm9680_vm12, %v5729_v56, %v14118_v53  ;;  %v19922_v53 = vpop.permute.xlu1 %9763  ;;  %v5583_v58 = vadd.s32 %v19794_v29, %v19792_v24  ;;  %v10176_v27 = vmul.f32 %v19820_v26, %v19618_v16  ;;  %21131 = vst [vmem:[#allocation37_spill] sm:$0xff] %v19941_v25  ;;  %v19946_v31 = vpop.f32.mrb[62].mxu0 }
 0x5ad   : > { %v5727_v63 = vsel %vm5725_vm4, %v14116_v36, %v5726_v52  ;;  %v9679_v48 = vsel %vm9677_vm11, %v14116_v36, %v5726_v52  ;;  %v12873_v5 = vadd.s32 4294967294, %v5595_v37  ;;  %11156 = vmatmul.mubr.bf16.gmra.mrb[100].mxu0 %v10873_v45  ;;  %v19924_v36 = vadd.f32 %v10169_v1, %v9891_v38  ;;  %v19939_v38 = vpop.permute.xlu0 %10026  ;;  %21132 = vst [vmem:[#allocation38_spill] sm:$0xff] %v19946_v31 }
 0x5ae   : > { %v5731_v15 = vsel %vm5724_vm14, %v5727_v63, %v5730_v12  ;;  %v9683_v9 = vsel %vm9676_vm7, %v9679_v48, %v9682_v46  ;;  %11165 = vmatprep.mubr.bf16.mxu0 %v21115_v8  ;;  %v19935_v42 = vadd.f32 %v10175_v17, %v9897_v35  ;;  %v9895_v24 = vmul.f32 %v19698_v14, %v19633_v4  ;;  %v19960_v46 = vpop.f32.mrb[63].mxu0  ;;  %v19973_v17 = vld [vmem:[%s14431_s21 + $0x120] sm:$0xff]  ;;  %s14208_s21 = scalar_lea.vmem %s14207_s19, 9728 }
 0x5af   : > { %v5732_v51 = vsel %vm5722_vm1, nan, %v5731_v15  ;;  %vm12874_vm13 = vcmp.lt.s32.totalorder %v12873_v5, 0  ;;  %v9684_v47 = vsel %vm5722_vm1, nan, %v9683_v9  ;;  %v9896_v16 = vmul.f32 %v19704_v54, %v19633_v4  ;;  %21133 = vst [vmem:[#allocation39_spill] sm:$0xff] %v19960_v46  ;;  %v21150_v46 = vld [vmem:[#allocation7_spill] sm:$0xff]  ;;  %p14210_p1 = scmp.lt.s32.totalorder %s14208_s21, %s14202_s5 }
 0x5b0   : > { %9873 = vperm.xlu1 %13865, %v5732_v51   ;;  %v5598_v7 = vsel %vm12874_vm13, 0, %v12873_v5  ;;  %v9901_v43 = vmul.f32 %v19698_v14, %v19651_v0  ;;  %v10173_v52 = vmul.f32 %v19715_v39, %v19671_v49  ;;  %v1759_v45 = vadd.f32 %v19625_v32, %v19422_v19  ;;  %v19968_v19 = vpop.permute.xlu1 %10041 }
 0x5b1   : > { %v5599_v29 = vsub.s32 32, %v5598_v7  ;;  %v5600_v1 = vshll.u32 %v19883_v6, %v5598_v7  ;;  %v5603_v56 = vsub.s32 4294967266, %v5598_v7  ;;  %v10174_v6 = vmul.f32 %v19820_v26, %v19671_v49  ;;  %p14211_p2 = por %p14210_p1, %p14209_p0 }
 0x5b2   : > { %v10179_v13 = vmul.f32 %v19715_v39, %v19701_v28  ;;  %v19962_v4 = vadd.f32 %v10176_v27, %v9898_v10  ;;  %v9902_v37 = vmul.f32 %v19704_v54, %v19651_v0  ;;  %v10180_v35 = vmul.f32 %v19820_v26, %v19701_v28 }
 0x5b3   : > { %v5601_v5 = vshrl.u32 %v5583_v58, %v5599_v29  ;;  %v5604_v12 = vadd.s32 127, %v5603_v56  ;;  %v1762_v63 = vadd.f32 %v19625_v32, %v19452_v18  ;;  %vm5529_vm2 = vcmp.lt.s32.totalorder %v19973_v17, 0  ;;  %v19985_v58 = vpop.permute.xlu0 %9758  ;;  %p14212_p3 = pnand %p14211_p2, %p14205_p13 }
 0x5b4   : > { %10151 = vperm.xlu1 %13865, %v9684_v47   ;;  %v5613_v15 = vsub.s32 4, %v19858_v3  ;;  %v21134_v9 = vand.u32 2147483647, %v19248_v30  ;;  %v19983_v28 = vadd.f32 %v10173_v52, %v9895_v24  ;;  %v1813_v10 = vmax.f32 %v1759_v45, 0.0  ;;  %v21137_v45 = vld [vmem:[#allocation12_spill] sm:$0xff] }
 0x5b5   : > { %v5602_v49 = vor.u32 %v5601_v5, %v5600_v1  ;;  %v5605_v48 = vshll.u32 %v5604_v12, 23  ;;  %v1814_v51 = vmax.f32 %v1762_v63, 0.0  ;;  %v19987_v47 = vadd.f32 %v10174_v6, %v9896_v16  ;;  %v21138_v5 = vld [vmem:[#allocation15_spill] sm:$0xff] }
 0x5b6   : > { %vm19979_vm3 = vcmp.le.f32.partialorder %v21134_v9, 0.7853982  ;;  %v19989_v7 = vadd.f32 %v10179_v13, %v9901_v43  ;;  %v19991_v29 = vadd.f32 %v10180_v35, %v9902_v37  ;;  %v9899_v30 = vmul.f32 %v19698_v14, %v19721_v2  ;;  %v20012_v35 = vpop.permute.xlu1 %9773 }
 0x5b7   : > { %v5606_v18 = vor.u32 4788187, %v5605_v48  ;;  %v5609_v27 = vcvt.s32.f32 %v5602_v49  ;;  %v10177_v1 = vmul.f32 %v19715_v39, %v19753_v62  ;;  %v10874_v24 = vpack.c.bf16 %v1814_v51, %v1813_v10  ;;  %v20025_v9 = vpop.permute.xlu0 %10036 }
 0x5b8   : > { %v5614_v52 = vsel %vm5529_vm2, %v5613_v15, %v19858_v3  ;;  %v1767_v16 = vadd.f32 %v19625_v32, %v21137_v45  ;;  %v1770_v43 = vadd.f32 %v19625_v32, %v21138_v5  ;;  %v9900_v12 = vmul.f32 %v19704_v54, %v19721_v2 }
 0x5b9   : > { %v5607_v56 = vand.u32 2147483647, %v5606_v18  ;;  %v9905_v6 = vmul.f32 %v19698_v14, %v19747_v40  ;;  %v9906_v13 = vmul.f32 %v19704_v54, %v19747_v40  ;;  %v10178_v37 = vmul.f32 %v19820_v26, %v19753_v62  ;;  %11166 = vmatmul.mubr.bf16.gmra.mrb[104].mxu0 %v10874_v24 }
 0x5ba   : > { %v10183_v63 = vmul.f32 %v19715_v39, %v19764_v59  ;;  %v1815_v49 = vmax.f32 %v1767_v16, 0.0  ;;  %v1816_v48 = vmax.f32 %v1770_v43, 0.0  ;;  %11175 = vmatprep.mubr.bf16.mxu0 %v21115_v8  ;;  %v5616_v2 = vsel %vm19979_vm3, 0, %v5614_v52  ;;  %v20052_v43 = vpop.permute.xlu1 %10051 }
 0x5bb   : > { %v5610_v3 = vmul.f32 %v5609_v27, %v5607_v56  ;;  %v20019_v15 = vadd.f32 %v10177_v1, %v9899_v30  ;;  %v10184_v40 = vmul.f32 %v19820_v26, %v19764_v59  ;;  %v9903_v62 = vmul.f32 %v19698_v14, %v19780_v60 }
 0x5bc   : > { %v9570_v51 = vadd.s32 3, %v5616_v2  ;;  %v10181_v18 = vmul.f32 %v19715_v39, %v19811_v33  ;;  %v10875_v27 = vpack.c.bf16 %v1816_v48, %v1815_v49  ;;  %v9904_v24 = vmul.f32 %v19704_v54, %v19780_v60  ;;  %v21139_v49 = vld [vmem:[#allocation17_spill] sm:$0xff] }
 0x5bd   : > { %v5611_v10 = vxor.u32 2147483648, %v5610_v3  ;;  %v9909_v30 = vmul.f32 %v19698_v14, %v19801_v50  ;;  %v10182_v59 = vmul.f32 %v19820_v26, %v19811_v33  ;;  %v10187_v1 = vmul.f32 %v19715_v39, %v19832_v61 }
 0x5be   : > { %v20039_v52 = vadd.f32 %v10178_v37, %v9900_v12  ;;  %v9910_v45 = vmul.f32 %v19704_v54, %v19801_v50  ;;  %v10188_v60 = vmul.f32 %v19820_v26, %v19832_v61  ;;  %v20048_v5 = vadd.f32 %v10183_v63, %v9905_v6  ;;  %v20066_v6 = vpop.permute.xlu0 %9768 }
 0x5bf   : > { %v5612_v56 = vsel %vm5529_vm2, %v5611_v10, %v5610_v3  ;;  %v20050_v33 = vadd.f32 %v10184_v40, %v9906_v13  ;;  %v1775_v12 = vadd.f32 %v19625_v32, %v21139_v49  ;;  %v20056_v37 = vand.u32 3, %v5616_v2  ;;  %v21141_v13 = vld [vmem:[#allocation20_spill] sm:$0xff]  ;;  %v10317_v10 = vld [vmem:[%s20957_s11] sm:$0x3] }
 0x5c0   : > { %v5615_v16 = vsel %vm19979_vm3, %v19973_v17, %v5612_v56  ;;  %v20058_v50 = vand.u32 3, %v9570_v51  ;;  %v20060_v3 = vadd.f32 %v10181_v18, %v9903_v62  ;;  %v20062_v61 = vadd.f32 %v10182_v59, %v9904_v24  ;;  %v20094_v24 = vpop.permute.xlu1 %9783 }
 0x5c1   : > { %14119 = vcosq.f32 %v5615_v16  ;;  %v20064_v0 = vadd.f32 %v10187_v1, %v9909_v30  ;;  %11176 = vmatmul.mubr.bf16.gmra.mrb[108].mxu0 %v10875_v27  ;;  %v1778_v63 = vadd.f32 %v19625_v32, %v21141_v13  ;;  %v20070_v48 = vadd.f32 %v10188_v60, %v9910_v45  ;;  %v21143_v30 = vld [vmem:[#allocation29_spill] sm:$0xff] }
 0x5c2   : > { %14121 = vsinq.f32 %v5615_v16  ;;  %v9907_v2 = vmul.f32 %v19698_v14, %v19848_v34  ;;  %v9908_v40 = vmul.f32 %v19704_v54, %v19848_v34  ;;  %v10185_v62 = vmul.f32 %v19715_v39, %v19875_v57  ;;  %11185 = vmatprep.mubr.bf16.mxu0 %v21115_v8  ;;  %v20109_v60 = vpop.permute.xlu0 %10046  ;;  %v21144_v16 = vld [vmem:[#allocation33_spill] sm:$0xff] }
 0x5c3   : > { %21140 = vst [vmem:[#allocation12_spill] sm:$0xff] %v20064_v0  ;;  %21142 = vst [vmem:[#allocation15_spill] sm:$0xff] %v20070_v48  ;;  %v9913_v32 = vmul.f32 %v19698_v14, %v19864_v20  ;;  %v9914_v51 = vmul.f32 %v19704_v54, %v19864_v20  ;;  %v1817_v18 = vmax.f32 %v1775_v12, 0.0  ;;  %v1818_v27 = vmax.f32 %v1778_v63, 0.0  ;;  %v21145_v12 = vld [vmem:[#allocation34_spill] sm:$0xff]  ;;  %v21146_v63 = vld [vmem:[#allocation35_spill] sm:$0xff] }
 0x5c4   : > { %vm5621_vm15 = vcmp.lt.s32.totalorder %v20056_v37, 2  ;;  %vm5622_vm6 = vcmp.eq.s32.totalorder %v20056_v37, 0  ;;  %vm5625_vm5 = vcmp.eq.s32.totalorder %v20056_v37, 2  ;;  %vm9572_vm8 = vcmp.lt.s32.totalorder %v20058_v50, 2 }
 0x5c5   : > { %v10186_v34 = vmul.f32 %v19820_v26, %v19875_v57  ;;  %vm5619_vm9 = vweird.f32 %v19973_v17  ;;  %vm9573_vm1 = vcmp.eq.s32.totalorder %v20058_v50, 0  ;;  %v10876_v20 = vpack.c.bf16 %v1818_v27, %v1817_v18  ;;  %v21147_v18 = vld [vmem:[#allocation36_spill] sm:$0xff] }
 0x5c6   : > { %v20097_v59 = vrot.slane %v10317_v10, %v21143_v30  ;;  %v20100_v1 = vrot.slane %v10317_v10, %v19665_v41  ;;  %vm9576_vm10 = vcmp.eq.s32.totalorder %v20058_v50, 2  ;;  %v20103_v56 = vadd.f32 %v10185_v62, %v9907_v2  ;;  %v21149_v30 = vld [vmem:[#allocation6_spill] sm:$0xff] }
 0x5c7   : > { %v10191_v57 = vmul.f32 %v19715_v39, %v19900_v44  ;;  %v10192_v45 = vmul.f32 %v19820_v26, %v19900_v44  ;;  %v20119_v62 = vadd.f32 %v10186_v34, %v9908_v40  ;;  %v9911_v27 = vmul.f32 %v19698_v14, %v21147_v18 }
 0x5c8   : > { %v10329_v49 = vadd.f32 %v20097_v59, %v21144_v16  ;;  %v10330_v13 = vadd.f32 %v20100_v1, %v21145_v12  ;;  %v10331_v10 = vadd.f32 %v20097_v59, %v21146_v63  ;;  %v10332_v2 = vadd.f32 %v20100_v1, %v19912_v21  ;;  %v21148_v12 = vld [vmem:[#allocation5_spill] sm:$0xff]  ;;  %v21151_v21 = vld [vmem:[#allocation8_spill] sm:$0xff] }
 0x5c9   : > { %v9912_v44 = vmul.f32 %v19704_v54, %v21147_v18  ;;  %v20127_v16 = vmul.f32 %v19698_v14, %v19922_v53  ;;  %11186 = vmatmul.mubr.bf16.gmra.mrb[112].mxu0 %v10876_v20  ;;  %v20133_v48 = vadd.f32 %v10191_v57, %v9913_v32  ;;  %v20135_v0 = vadd.f32 %v10192_v45, %v9914_v51 }
 0x5ca   : > { %v13456_v41 = vadd.f32 %v21148_v12, %v10329_v49  ;;  %v13457_v63 = vadd.f32 %v21149_v30, %v10330_v13  ;;  %v13458_v31 = vadd.f32 %v21150_v46, %v10331_v10  ;;  %v13459_v40 = vadd.f32 %v21151_v21, %v10332_v2  ;;  %v20145_v13 = vpop.permute.xlu1 %10061 }
 0x5cb   : > { %v14120_v34 = vpop.eup %14119  ;;  %21152 = vst [vmem:[#allocation17_spill] sm:$0xff] %v20135_v0  ;;  %v9918_v18 = vmul.f32 %v19704_v54, %v19922_v53  ;;  %v10189_v25 = vmul.f32 %v19715_v39, %v19939_v38  ;;  %v21153_v20 = vmov 0.0   ;;  %v10190_v46 = vmul.f32 %v19820_v26, %v19939_v38  ;;  %v20155_v38 = vpop.permute.xlu0 %9778 }
 0x5cc   : > { %13378 = vmatprep.mubr.msk.bf16.mxu0 %vm14269_vm0, %v21153_v20  ;;  %v14122_v49 = vpop.eup %14121  ;;  %v5626_v30 = vxor.u32 2147483648, %v14120_v34  ;;  %v11272_v32 = vmax.f32 %v13456_v41, 0.0  ;;  %v11274_v57 = vmax.f32 %v13458_v31, 0.0  ;;  %v10195_v45 = vmul.f32 %v19715_v39, %v19968_v19 }
 0x5cd   : > { %v5623_v51 = vxor.u32 2147483648, %v14122_v49  ;;  %v11273_v53 = vmax.f32 %v13457_v63, 0.0  ;;  %v11275_v10 = vmax.f32 %v13459_v40, 0.0  ;;  %v10196_v21 = vmul.f32 %v19820_v26, %v19968_v19 }
 0x5ce   : > { %v5627_v2 = vsel %vm5625_vm5, %v5626_v30, %v14122_v49  ;;  %v9578_v12 = vsel %vm9576_vm10, %v5626_v30, %v14122_v49  ;;  %v11348_v20 = vpack.c.bf16 %v11274_v57, %v11272_v32  ;;  %v10333_v40 = vadd.f32 %v20097_v59, %v19924_v36  ;;  %v21154_v57 = vld [vmem:[#allocation9_spill] sm:$0xff]  ;;  %v20182_v50 = vpop.permute.xlu1 %9793 }
 0x5cf   : > { %v5624_v41 = vsel %vm5622_vm6, %v14120_v34, %v5623_v51  ;;  %v9575_v31 = vsel %vm9573_vm1, %v14120_v34, %v5623_v51  ;;  %v11349_v63 = vpack.c.bf16 %v11275_v10, %v11273_v53  ;;  %v10334_v19 = vadd.f32 %v20100_v1, %v19926_v23  ;;  %v21156_v10 = vld [vmem:[#allocation11_spill] sm:$0xff] }
 0x5d0   : > { %v5628_v0 = vsel %vm5621_vm15, %v5624_v41, %v5627_v2  ;;  %v9579_v49 = vsel %vm9572_vm8, %v9575_v31, %v9578_v12  ;;  %v10335_v30 = vadd.f32 %v20097_v59, %v19914_v11  ;;  %v20173_v34 = vadd.f32 %v10189_v25, %v9911_v27  ;;  %v21155_v11 = vld [vmem:[#allocation10_spill] sm:$0xff]  ;;  %v20197_v41 = vpop.permute.xlu0 %10056 }
 0x5d1   : > { %v5629_v32 = vsel %vm5619_vm9, nan, %v5628_v0  ;;  %v13460_v51 = vadd.f32 %v21154_v57, %v10333_v40  ;;  %11622 = vmatprep.mubr.bf16.mxu1 %v11349_v63  ;;  %v10336_v36 = vadd.f32 %v20100_v1, %v19916_v22  ;;  %v20178_v37 = vadd.f32 %v10190_v46, %v9912_v44  ;;  %v21157_v44 = vld [vmem:[#allocation13_spill] sm:$0xff] }
 0x5d2   : > { %9868 = vperm.xlu0 %13866, %v5629_v32   ;;  %v9915_v23 = vmul.f32 %v19698_v14, %v19985_v58  ;;  %v13461_v53 = vadd.f32 %v21155_v11, %v10334_v19  ;;  %v13462_v0 = vadd.f32 %v21156_v10, %v10335_v30  ;;  %v9580_v25 = vsel %vm5619_vm9, nan, %v9579_v49  ;;  %11623 = vmatmul.mubr.bf16.vlgmr.msra.gmra.mrb[112].mxu1 %v11348_v20  ;;  %v20224_v11 = vpop.permute.xlu1 %10071 }
 0x5d3   : > { %v9916_v27 = vmul.f32 %v19704_v54, %v19985_v58  ;;  %v10193_v22 = vmul.f32 %v19715_v39, %v20025_v9  ;;  %v13463_v46 = vadd.f32 %v21157_v44, %v10336_v36  ;;  %v9921_v2 = vmul.f32 %v19698_v14, %v20012_v35 }
 0x5d4   : > { %v9922_v12 = vmul.f32 %v19704_v54, %v20012_v35  ;;  %v11276_v31 = vmax.f32 %v13460_v51, 0.0  ;;  %v11278_v17 = vmax.f32 %v13462_v0, 0.0  ;;  %v10194_v63 = vmul.f32 %v19820_v26, %v20025_v9 }
 0x5d5   : > { %v11277_v58 = vmax.f32 %v13461_v53, 0.0  ;;  %v11279_v40 = vmax.f32 %v13463_v46, 0.0  ;;  %v10337_v49 = vadd.f32 %v20097_v59, %v19983_v28  ;;  %v10199_v20 = vmul.f32 %v19715_v39, %v20052_v43  ;;  %v9789_v46 = vpop.permute.xlu0 %9788 }
 0x5d6   : > { %10146 = vperm.xlu0 %13866, %v9580_v25   ;;  %v10200_v19 = vmul.f32 %v19820_v26, %v20052_v43  ;;  %v11350_v35 = vpack.c.bf16 %v11278_v17, %v11276_v31  ;;  %v10338_v30 = vadd.f32 %v20100_v1, %v19987_v47  ;;  %v20210_v32 = vadd.f32 %v10195_v45, %v20127_v16  ;;  %v20226_v16 = vpop.f32.mrb[64].mxu0  ;;  %v21158_v45 = vld [vmem:[#allocation14_spill] sm:$0xff] }
 0x5d7   : > { %v20212_v9 = vadd.f32 %v10196_v21, %v9918_v18  ;;  %v20214_v57 = vadd.f32 %v10193_v22, %v9915_v23  ;;  %v11351_v51 = vpack.c.bf16 %v11279_v40, %v11277_v58  ;;  %v9919_v28 = vmul.f32 %v19698_v14, %v20066_v6  ;;  %v13947_v18 = vld [vmem:[%s20960_s14] sm:$0xff]   ;;  %v21159_v23 = vld [vmem:[#allocation16_spill] sm:$0xff] }
 0x5d8   : > { %v9920_v36 = vmul.f32 %v19704_v54, %v20066_v6  ;;  %v10197_v43 = vmul.f32 %v19715_v39, %v20109_v60  ;;  %v10198_v47 = vmul.f32 %v19820_v26, %v20109_v60  ;;  %v13464_v21 = vadd.f32 %v21158_v45, %v10337_v49  ;;  %v20237_v60 = vpop.f32.mrb[65].mxu0  ;;  %12063 = vmatpush1.bf16.msra.mxu1 %v13947_v18 }
 0x5d9   : > { %11632 = vmatprep.mubr.bf16.mxu1 %v11351_v51  ;;  %v13465_v53 = vadd.f32 %v21159_v23, %v10338_v30  ;;  %v10339_v6 = vadd.f32 %v20097_v59, %v19935_v42  ;;  %v10340_v10 = vadd.f32 %v20100_v1, %v19962_v4  ;;  %v20239_v0 = vadd.f32 %v10194_v63, %v9916_v27  ;;  %v20247_v31 = vpop.f32.mrb[66].mxu0  ;;  %v21161_v27 = vld [vmem:[#allocation18_spill] sm:$0xff] }
 0x5da   : > { %v20241_v25 = vadd.f32 %v10199_v20, %v9921_v2  ;;  %v20243_v22 = vadd.f32 %v10200_v19, %v9922_v12  ;;  %v9925_v44 = vmul.f32 %v19698_v14, %v20094_v24  ;;  %v9926_v42 = vmul.f32 %v19704_v54, %v20094_v24  ;;  %11633 = vmatmul.mubr.bf16.gmra.mrb[116].mxu1 %v11350_v35  ;;  %v21162_v2 = vld [vmem:[#allocation19_spill] sm:$0xff]  ;;  %v20255_v12 = vpop.f32.mrb[67].mxu0  ;;  %v13948_v19 = vld [vmem:[%s20960_s14 + $0x8] sm:$0xff]  }
 0x5db   : > { %v10203_v4 = vmul.f32 %v19715_v39, %v20145_v13  ;;  %v13466_v17 = vadd.f32 %v21161_v27, %v10339_v6  ;;  %v13467_v63 = vadd.f32 %v21162_v2, %v10340_v10  ;;  %v20257_v58 = vadd.f32 %v10197_v43, %v9919_v28  ;;  %v20265_v20 = vpop.f32.mrb[68].mxu0  ;;  %12064 = vmatprep.subr.bf16.mxu1 %v21115_v8  ;;  %v9804_v43 = vpop.permute.xlu1 %9803  ;;  %v21164_v27 = vld [vmem:[#allocation21_spill] sm:$0xff] }
 0x5dc   : > { %21160 = vst [vmem:[#allocation20_spill] sm:$0xff] %v20243_v22  ;;  %v20259_v40 = vadd.f32 %v10198_v47, %v9920_v36  ;;  %v10204_v49 = vmul.f32 %v19820_v26, %v20145_v13  ;;  %v9923_v24 = vmul.f32 %v19698_v14, %v20155_v38  ;;  %v11280_v35 = vmax.f32 %v13464_v21, 0.0  ;;  %v20271_v36 = vpop.f32.mrb[69].mxu0  ;;  %12065 = vmatpush1.bf16.msra.mxu1 %v13948_v19 }
 0x5dd   : > { %v11281_v30 = vmax.f32 %v13465_v53, 0.0  ;;  %v11282_v51 = vmax.f32 %v13466_v17, 0.0  ;;  %v11283_v28 = vmax.f32 %v13467_v63, 0.0  ;;  %v9924_v13 = vmul.f32 %v19704_v54, %v20155_v38  ;;  %v20281_v23 = vpop.f32.mrb[70].mxu0  ;;  %12066 = vmatprep.subr.bf16.mxu1 %v21115_v8  ;;  %v21165_v17 = vld [vmem:[#allocation22_spill] sm:$0xff]  ;;  %v21166_v63 = vld [vmem:[#allocation23_spill] sm:$0xff] }
 0x5de   : > { %v10341_v47 = vadd.f32 %v20097_v59, %v20019_v15  ;;  %v10342_v18 = vadd.f32 %v20100_v1, %v20039_v52  ;;  %v10343_v45 = vadd.f32 %v20097_v59, %v19989_v7  ;;  %v10201_v21 = vmul.f32 %v19715_v39, %v20197_v41  ;;  %v20287_v10 = vpop.f32.mrb[71].mxu0  ;;  %v10067_v52 = vpop.permute.xlu0 %10066 }
 0x5df   : > { %v11352_v53 = vpack.c.bf16 %v11282_v51, %v11280_v35  ;;  %v11353_v6 = vpack.c.bf16 %v11283_v28, %v11281_v30  ;;  %v10344_v38 = vadd.f32 %v20100_v1, %v19991_v29  ;;  %v20290_v15 = vadd.f32 %v10203_v4, %v9925_v44  ;;  %v20295_v22 = vpop.f32.mrb[72].mxu0  ;;  %v21168_v44 = vld [vmem:[#allocation24_spill] sm:$0xff] }
 0x5e0   : > { %v13468_v7 = vadd.f32 %v21164_v27, %v10341_v47  ;;  %v13469_v2 = vadd.f32 %v21165_v17, %v10342_v18  ;;  %v13470_v19 = vadd.f32 %v21166_v63, %v10343_v45  ;;  %v20297_v35 = vadd.f32 %v10204_v49, %v9926_v42  ;;  %v20304_v51 = vpop.f32.mrb[73].mxu0 }
 0x5e1   : > { %21163 = vst [vmem:[#allocation33_spill] sm:$0xff] %v20290_v15  ;;  %v9929_v29 = vmul.f32 %v19698_v14, %v20182_v50  ;;  %v9930_v30 = vmul.f32 %v19704_v54, %v20182_v50  ;;  %11642 = vmatprep.mubr.bf16.mxu1 %v11353_v6  ;;  %v13471_v4 = vadd.f32 %v21168_v44, %v10344_v38  ;;  %v20310_v49 = vpop.f32.mrb[74].mxu0 }
 0x5e2   : > { %21167 = vst [vmem:[#allocation34_spill] sm:$0xff] %v20297_v35  ;;  %v10202_v28 = vmul.f32 %v19820_v26, %v20197_v41  ;;  %v10207_v47 = vmul.f32 %v19715_v39, %v20224_v11  ;;  %v11284_v18 = vmax.f32 %v13468_v7, 0.0  ;;  %v11286_v42 = vmax.f32 %v13470_v19, 0.0  ;;  %11643 = vmatmul.mubr.bf16.gmra.mrb[120].mxu1 %v11352_v53  ;;  %v20316_v27 = vpop.f32.mrb[75].mxu0  ;;  %v10082_v7 = vpop.permute.xlu1 %10081 }
 0x5e3   : > { %v20312_v45 = vadd.f32 %v10201_v21, %v9923_v24  ;;  %v10208_v50 = vmul.f32 %v19820_v26, %v20224_v11  ;;  %v11285_v6 = vmax.f32 %v13469_v2, 0.0  ;;  %v11287_v38 = vmax.f32 %v13471_v4, 0.0  ;;  %v20321_v44 = vpop.f32.mrb[76].mxu0 }
 0x5e4   : > { %v9927_v17 = vmul.f32 %v19698_v14, %v9789_v46  ;;  %v9928_v41 = vmul.f32 %v19704_v54, %v9789_v46  ;;  %v10205_v63 = vmul.f32 %v19715_v39, %v10067_v52  ;;  %v11354_v19 = vpack.c.bf16 %v11286_v42, %v11284_v18  ;;  %21169 = vst [vmem:[#allocation35_spill] sm:$0xff] %v20321_v44  ;;  %v20326_v2 = vpop.f32.mrb[77].mxu0  ;;  %v9799_v46 = vpop.permute.xlu0 %9798  ;;  %v21172_v44 = vld [vmem:[#allocation26_spill] sm:$0xff] }
 0x5e5   : > { %v9933_v24 = vmul.f32 %v19698_v14, %v9804_v43  ;;  %v10206_v21 = vmul.f32 %v19820_v26, %v10067_v52  ;;  %v10211_v11 = vmul.f32 %v19715_v39, %v10082_v7  ;;  %v11355_v53 = vpack.c.bf16 %v11287_v38, %v11285_v6  ;;  %21170 = vst [vmem:[#allocation36_spill] sm:$0xff] %v20326_v2  ;;  %v20334_v42 = vpop.f32.mrb[78].mxu0 }
 0x5e6   : > { %v9934_v4 = vmul.f32 %v19704_v54, %v9804_v43  ;;  %v10212_v8 = vmul.f32 %v19820_v26, %v10082_v7  ;;  %v10345_v35 = vadd.f32 %v20097_v59, %v20060_v3  ;;  %v10346_v18 = vadd.f32 %v20100_v1, %v20062_v61  ;;  %v20345_v43 = vpop.f32.mrb[79].mxu0  ;;  %v21171_v3 = vld [vmem:[#allocation25_spill] sm:$0xff] }
 0x5e7   : > { %v20336_v15 = vadd.f32 %v10202_v28, %v9924_v13  ;;  %v20338_v52 = vadd.f32 %v10207_v47, %v9929_v29  ;;  %v20340_v6 = vadd.f32 %v10208_v50, %v9930_v30  ;;  %v20343_v38 = vmul.f32 %v19698_v14, %v9799_v46  ;;  %11652 = vmatprep.mubr.bf16.mxu1 %v11355_v53  ;;  %v20353_v28 = vpop.f32.mrb[80].mxu0 }
 0x5e8   : > { %v20347_v7 = vadd.f32 %v10205_v63, %v9927_v17  ;;  %v13472_v2 = vadd.f32 %v21171_v3, %v10345_v35  ;;  %v13473_v61 = vadd.f32 %v21172_v44, %v10346_v18  ;;  %v10347_v13 = vadd.f32 %v20097_v59, %v20048_v5  ;;  %v20363_v17 = vpop.f32.mrb[81].mxu0  ;;  %v21173_v5 = vld [vmem:[#allocation27_spill] sm:$0xff]  ;;  %v21176_v3 = vld [vmem:[#allocation12_spill] sm:$0xff] }
 0x5e9   : > { %v20355_v29 = vadd.f32 %v10206_v21, %v9928_v41  ;;  %v20357_v30 = vadd.f32 %v10211_v11, %v9933_v24  ;;  %v10348_v47 = vadd.f32 %v20100_v1, %v20050_v33  ;;  %v10349_v50 = vadd.f32 %v20097_v59, %v20103_v56  ;;  %v20373_v24 = vpop.f32.mrb[82].mxu0  ;;  %v21174_v11 = vld [vmem:[#allocation28_spill] sm:$0xff] }
 0x5ea   : > { %v20365_v35 = vadd.f32 %v10212_v8, %v9934_v4  ;;  %v20368_v63 = vmul.f32 %v19704_v54, %v9799_v46  ;;  %v13474_v44 = vadd.f32 %v21173_v5, %v10347_v13  ;;  %v10350_v41 = vadd.f32 %v20100_v1, %v20119_v62  ;;  %11653 = vmatmul.mubr.bf16.gmra.mrb[124].mxu1 %v11354_v19  ;;  %v20377_v18 = vpop.f32.mrb[83].mxu0  ;;  %v21175_v4 = vld [vmem:[#allocation37_spill] sm:$0xff]  ;;  %v21177_v5 = vld [vmem:[#allocation15_spill] sm:$0xff] }
 0x5eb   : > { %v11288_v21 = vmax.f32 %v13472_v2, 0.0  ;;  %v11289_v33 = vmax.f32 %v13473_v61, 0.0  ;;  %v13475_v53 = vadd.f32 %v21174_v11, %v10348_v47  ;;  %v13476_v56 = vadd.f32 %v19931_v55, %v10349_v50  ;;  %v20384_v54 = vpop.f32.mrb[84].mxu0 }
 0x5ec   : > { %v11290_v8 = vmax.f32 %v13474_v44, 0.0  ;;  %v13477_v46 = vadd.f32 %v21175_v4, %v10350_v41  ;;  %v10351_v13 = vadd.f32 %v20097_v59, %v21176_v3  ;;  %v10352_v62 = vadd.f32 %v20100_v1, %v21177_v5  ;;  %21178 = vst [vmem:[#allocation5_spill] sm:$0xff] %v20384_v54  ;;  %v20390_v47 = vpop.f32.mrb[85].mxu0  ;;  %v21180_v41 = vld [vmem:[#allocation38_spill] sm:$0xff]  ;;  %v21181_v4 = vld [vmem:[#allocation39_spill] sm:$0xff] }
 0x5ed   : > { %v11291_v19 = vmax.f32 %v13475_v53, 0.0  ;;  %v11292_v2 = vmax.f32 %v13476_v56, 0.0  ;;  %v10353_v61 = vadd.f32 %v20097_v59, %v20173_v34  ;;  %v10354_v55 = vadd.f32 %v20100_v1, %v20178_v37  ;;  %21179 = vst [vmem:[#allocation6_spill] sm:$0xff] %v20390_v47  ;;  %v20394_v14 = vpop.f32.mrb[86].mxu0  ;;  %v10077_v37 = vpop.permute.xlu0 %10076 }
 0x5ee   : > { %v11356_v50 = vpack.c.bf16 %v11290_v8, %v11288_v21  ;;  %v11293_v44 = vmax.f32 %v13477_v46, 0.0  ;;  %v13478_v11 = vadd.f32 %v21180_v41, %v10351_v13  ;;  %v13479_v3 = vadd.f32 %v21181_v4, %v10352_v62  ;;  %v20400_v54 = vpop.f32.mrb[87].mxu0  ;;  %v21182_v8 = vld [vmem:[#allocation17_spill] sm:$0xff] }
 0x5ef   : > { %v11357_v5 = vpack.c.bf16 %v11291_v19, %v11289_v33  ;;  %v13480_v53 = vadd.f32 %v20226_v16, %v10353_v61  ;;  %v13481_v56 = vadd.f32 %v20237_v60, %v10354_v55  ;;  %v10355_v34 = vadd.f32 %v20097_v59, %v20133_v48 }
 0x5f0   : > { %v11294_v47 = vmax.f32 %v13478_v11, 0.0  ;;  %v11295_v21 = vmax.f32 %v13479_v3, 0.0  ;;  %v10356_v46 = vadd.f32 %v20100_v1, %v21182_v8  ;;  %v10357_v13 = vadd.f32 %v20097_v59, %v20214_v57 }
 0x5f1   : > { %v10209_v33 = vmul.f32 %v19715_v39, %v10077_v37  ;;  %11662 = vmatprep.mubr.bf16.mxu1 %v11357_v5  ;;  %v11296_v16 = vmax.f32 %v13480_v53, 0.0  ;;  %v13482_v60 = vadd.f32 %v20247_v31, %v10355_v34  ;;  %v10358_v48 = vadd.f32 %v20100_v1, %v20239_v0 }
 0x5f2   : > { %v11358_v62 = vpack.c.bf16 %v11294_v47, %v11292_v2  ;;  %v11359_v19 = vpack.c.bf16 %v11295_v21, %v11293_v44  ;;  %v13483_v61 = vadd.f32 %v20255_v12, %v10356_v46  ;;  %v13484_v55 = vadd.f32 %v20265_v20, %v10357_v13  ;;  %11663 = vmatmul.mubr.bf16.gmra.mrb[128].mxu1 %v11356_v50 }
 0x5f3   : > { %v11298_v41 = vmax.f32 %v13482_v60, 0.0  ;;  %v13485_v11 = vadd.f32 %v20271_v36, %v10358_v48  ;;  %v10359_v57 = vadd.f32 %v20097_v59, %v20210_v32  ;;  %v10360_v4 = vadd.f32 %v20100_v1, %v20212_v9  ;;  %v21185_v48 = vld [vmem:[#allocation36_spill] sm:$0xff] }
 0x5f4   : > { %11672 = vmatprep.mubr.bf16.mxu1 %v11359_v19  ;;  %v11297_v31 = vmax.f32 %v13481_v56, 0.0  ;;  %v11299_v3 = vmax.f32 %v13483_v61, 0.0  ;;  %v11300_v0 = vmax.f32 %v13484_v55, 0.0  ;;  %v10361_v2 = vadd.f32 %v20097_v59, %v20257_v58  ;;  %v21183_v58 = vld [vmem:[#allocation20_spill] sm:$0xff]  ;;  %v21186_v61 = vld [vmem:[#allocation33_spill] sm:$0xff]  ;;  %v21187_v55 = vld [vmem:[#allocation34_spill] sm:$0xff] }
 0x5f5   : > { %v11360_v12 = vpack.c.bf16 %v11298_v41, %v11296_v16  ;;  %v13486_v20 = vadd.f32 %v20281_v23, %v10359_v57  ;;  %v13487_v47 = vadd.f32 %v20287_v10, %v10360_v4  ;;  %v10362_v36 = vadd.f32 %v20100_v1, %v20259_v40  ;;  %v21184_v16 = vld [vmem:[#allocation35_spill] sm:$0xff] }
 0x5f6   : > { %v11361_v50 = vpack.c.bf16 %v11299_v3, %v11297_v31  ;;  %v11301_v32 = vmax.f32 %v13485_v11, 0.0  ;;  %v13488_v44 = vadd.f32 %v20295_v22, %v10361_v2  ;;  %v10363_v9 = vadd.f32 %v20097_v59, %v20241_v25 }
 0x5f7   : > { %v11302_v5 = vmax.f32 %v13486_v20, 0.0  ;;  %v11303_v53 = vmax.f32 %v13487_v47, 0.0  ;;  %v13489_v56 = vadd.f32 %v20304_v51, %v10362_v36  ;;  %v10364_v34 = vadd.f32 %v20100_v1, %v21183_v58 }
 0x5f8   : > { %v10210_v23 = vmul.f32 %v19820_v26, %v10077_v37  ;;  %v13490_v10 = vadd.f32 %v20310_v49, %v10363_v9  ;;  %v10365_v40 = vadd.f32 %v20097_v59, %v20312_v45  ;;  %v10366_v22 = vadd.f32 %v20100_v1, %v20336_v15 }
 0x5f9   : > { %v10285_v21 = vadd.f32 %v10209_v33, %v20343_v38  ;;  %v11362_v25 = vpack.c.bf16 %v11302_v5, %v11300_v0  ;;  %v11363_v8 = vpack.c.bf16 %v11303_v53, %v11301_v32  ;;  %v13491_v46 = vadd.f32 %v20316_v27, %v10364_v34  ;;  %v21189_v53 = vld [vmem:[#allocation6_spill] sm:$0xff] }
 0x5fa   : > { %v11304_v51 = vmax.f32 %v13488_v44, 0.0  ;;  %v11306_v13 = vmax.f32 %v13490_v10, 0.0  ;;  %v13492_v60 = vadd.f32 %v21184_v16, %v10365_v40  ;;  %v13493_v37 = vadd.f32 %v21185_v48, %v10366_v22  ;;  %11673 = vmatmul.mubr.bf16.gmra.mrb[132].mxu1 %v11358_v62 }
 0x5fb   : > { %v11305_v49 = vmax.f32 %v13489_v56, 0.0  ;;  %v11307_v19 = vmax.f32 %v13491_v46, 0.0  ;;  %v10367_v45 = vadd.f32 %v20097_v59, %v21186_v61  ;;  %v10368_v15 = vadd.f32 %v20100_v1, %v21187_v55  ;;  %11682 = vmatprep.mubr.bf16.mxu1 %v11361_v50  ;;  %v9809_v46 = vpop.permute.xlu0 %9808 }
 0x5fc   : > { %v10286_v38 = vadd.f32 %v10210_v23, %v20368_v63  ;;  %v11364_v33 = vpack.c.bf16 %v11306_v13, %v11304_v51  ;;  %v10369_v27 = vadd.f32 %v20097_v59, %v20347_v7  ;;  %v10370_v41 = vadd.f32 %v20100_v1, %v20355_v29  ;;  %v21191_v13 = vld [vmem:[#allocation31_spill] sm:$0xff] }
 0x5fd   : > { %v11365_v11 = vpack.c.bf16 %v11307_v19, %v11305_v49  ;;  %v13494_v62 = vadd.f32 %v20334_v42, %v10367_v45  ;;  %v13495_v57 = vadd.f32 %v20345_v43, %v10368_v15  ;;  %v10371_v4 = vadd.f32 %v20097_v59, %v20338_v52  ;;  %v13949_v52 = vld [vmem:[%s20960_s14 + $0x10] sm:$0xff]  }
 0x5fe   : > { %v11308_v31 = vmax.f32 %v13492_v60, 0.0  ;;  %v11309_v3 = vmax.f32 %v13493_v37, 0.0  ;;  %v13496_v63 = vadd.f32 %v20353_v28, %v10369_v27  ;;  %v13497_v0 = vadd.f32 %v20363_v17, %v10370_v41  ;;  %12067 = vmatpush1.bf16.msra.mxu1 %v13949_v52  ;;  %v21192_v37 = vld [vmem:[#allocation32_spill] sm:$0xff] }
 0x5ff   : > { %v11310_v2 = vmax.f32 %v13494_v62, 0.0  ;;  %v11311_v20 = vmax.f32 %v13495_v57, 0.0  ;;  %v13498_v7 = vadd.f32 %v20373_v24, %v10371_v4  ;;  %v10372_v29 = vadd.f32 %v20100_v1, %v20340_v6  ;;  %v10087_v51 = vpop.permute.xlu0 %10086 }
 0x600   : > { %v11312_v47 = vmax.f32 %v13496_v63, 0.0  ;;  %v10373_v28 = vadd.f32 %v20097_v59, %v10285_v21  ;;  %v10374_v17 = vadd.f32 %v20100_v1, %v10286_v38  ;;  %v10375_v24 = vadd.f32 %v20097_v59, %v20357_v30  ;;  %v13952_v38 = vld [vmem:[%s20960_s14 + $0x28] sm:$0xff]  }
 0x601   : > { %v11366_v42 = vpack.c.bf16 %v11310_v2, %v11308_v31  ;;  %v11367_v36 = vpack.c.bf16 %v11311_v20, %v11309_v3  ;;  %v11314_v43 = vmax.f32 %v13498_v7, 0.0  ;;  %v13499_v50 = vadd.f32 %v20377_v18, %v10372_v29  ;;  %v21188_v18 = vld [vmem:[#allocation5_spill] sm:$0xff]  ;;  %v13954_v7 = vld [vmem:[%s20960_s14 + $0x38] sm:$0xff]  }
 0x602   : > { %v10376_v6 = vadd.f32 %v20100_v1, %v20365_v35  ;;  %11683 = vmatmul.mubr.bf16.gmra.mrb[136].mxu1 %v11360_v12  ;;  %v11313_v32 = vmax.f32 %v13497_v0, 0.0  ;;  %v13500_v5 = vadd.f32 %v21188_v18, %v10373_v28  ;;  %v13501_v56 = vadd.f32 %v21189_v53, %v10374_v17  ;;  %v13955_v28 = vld [vmem:[%s20960_s14 + $0x40] sm:$0xff]   ;;  %v13960_v18 = vld [vmem:[%s20960_s14 + $0x68] sm:$0xff]   ;;  %v13962_v53 = vld [vmem:[%s20960_s14 + $0x78] sm:$0xff]  }
 0x603   : > { %v20467_v44 = vpack.c.bf16 %v11314_v43, %v11312_v47  ;;  %v11315_v9 = vmax.f32 %v13499_v50, 0.0  ;;  %11692 = vmatprep.mubr.bf16.mxu1 %v11363_v8  ;;  %v13502_v58 = vadd.f32 %v20394_v14, %v10375_v24  ;;  %v21190_v12 = vmov 0   ;;  %v13950_v8 = vld [vmem:[%s20960_s14 + $0x18] sm:$0xff]   ;;  %v9814_v14 = vpop.permute.xlu1 %9813 }
 0x604   : > { %v13503_v34 = vadd.f32 %v20400_v54, %v10376_v6  ;;  %v11316_v30 = vmax.f32 %v13500_v5, 0.0  ;;  %v11317_v10 = vmax.f32 %v13501_v56, 0.0  ;;  %12068 = vmatprep.subr.bf16.mxu1 %v21190_v12  ;;  %v13951_v54 = vld [vmem:[%s20960_s14 + $0x20] sm:$0xff]   ;;  %v9935_v16 = vmul.f32 %v21191_v13, %v9809_v46  ;;  %v13956_v6 = vld [vmem:[%s20960_s14 + $0x48] sm:$0xff]   ;;  %v13961_v5 = vld [vmem:[%s20960_s14 + $0x70] sm:$0xff]   ;;  %v9819_v56 = vpop.permute.xlu0 %9818 }
 0x605   : > { %v11369_v23 = vpack.c.bf16 %v11315_v9, %v11313_v32  ;;  %v11318_v40 = vmax.f32 %v13502_v58, 0.0  ;;  %12069 = vmatpush1.bf16.msra.mxu1 %v13950_v8  ;;  %v10213_v60 = vmul.f32 %v19715_v39, %v10087_v51  ;;  %v10214_v49 = vmul.f32 %v19820_v26, %v10087_v51  ;;  %v13957_v32 = vld [vmem:[%s20960_s14 + $0x50] sm:$0xff]   ;;  %v13959_v9 = vld [vmem:[%s20960_s14 + $0x60] sm:$0xff]  }
 0x606   : > { %v11319_v35 = vmax.f32 %v13503_v34, 0.0  ;;  %12070 = vmatprep.subr.bf16.mxu1 %v21190_v12  ;;  %v9937_v19 = vmul.f32 %v21191_v13, %v9814_v14  ;;  %v9938_v45 = vmul.f32 %v21192_v37, %v9814_v14 }
 0x607   : > { %v20474_v22 = vpack.c.bf16 %v11318_v40, %v11316_v30  ;;  %v10092_v48 = vpop.permute.xlu1 %10091  ;;  %v10289_v15 = vadd.f32 %v10213_v60, %v9935_v16  ;;  %v9940_v40 = vmul.f32 %v21192_v37, %v9819_v56 }
 0x608   : > { %v11371_v21 = vpack.c.bf16 %v11319_v35, %v11317_v10  ;;  %v10215_v61 = vmul.f32 %v19715_v39, %v10092_v48  ;;  %v10216_v55 = vmul.f32 %v19820_v26, %v10092_v48  ;;  %v10097_v34 = vpop.permute.xlu0 %10096 }
 0x609   : > { %12071 = vmatpush1.bf16.msra.mxu1 %v13951_v54  ;;  %v10377_v62 = vadd.f32 %v20097_v59, %v10289_v15  ;;  %v10217_v30 = vmul.f32 %v19715_v39, %v10097_v34  ;;  %v10218_v35 = vmul.f32 %v19820_v26, %v10097_v34 }
 0x60a   : > { %11693 = vmatmul.mubr.bf16.gmra.mrb[140].mxu1 %v11362_v25  ;;  %12072 = vmatprep.subr.bf16.mxu1 %v21190_v12  ;;  %v9936_v25 = vmul.f32 %v21192_v37, %v9809_v46  ;;  %v10291_v41 = vadd.f32 %v10215_v61, %v9937_v19 }
 0x60b   : > { %11702 = vmatprep.mubr.bf16.mxu1 %v11365_v11  ;;  %v10292_v11 = vadd.f32 %v10216_v55, %v9938_v45  ;;  %v9824_v58 = vpop.permute.xlu1 %9823  ;;  %v10294_v14 = vadd.f32 %v10218_v35, %v9940_v40 }
 0x60c   : > { %v10290_v27 = vadd.f32 %v10214_v49, %v9936_v25  ;;  %v10379_v63 = vadd.f32 %v20097_v59, %v10291_v41  ;;  %v9942_v8 = vmul.f32 %v21192_v37, %v9824_v58 }
 0x60d   : > { %12073 = vmatpush1.bf16.msra.mxu1 %v13952_v38  ;;  %v10380_v20 = vadd.f32 %v20100_v1, %v10292_v11  ;;  %v10382_v48 = vadd.f32 %v20100_v1, %v10294_v14 }
 0x60e   : > { %12074 = vmatprep.subr.bf16.mxu1 %v21190_v12  ;;  %v10378_v4 = vadd.f32 %v20100_v1, %v10290_v27 }
 0x60f   : > { %v10102_v10 = vpop.permute.xlu1 %10101 }
 0x612   : > { %11703 = vmatmul.mubr.bf16.gmra.mrb[144].mxu1 %v11364_v33  ;;  %v13953_v33 = vld [vmem:[%s20960_s14 + $0x30] sm:$0xff]  }
 0x613   : > { %11712 = vmatprep.mubr.bf16.mxu1 %v11367_v36  ;;  %12075 = vmatpush1.bf16.msra.mxu1 %v13953_v33 }
 0x614   : > { %12076 = vmatprep.subr.bf16.mxu1 %v21190_v12 }
 0x617   : > { %12077 = vmatpush1.bf16.msra.mxu1 %v13954_v7 }
 0x618   : > { %12078 = vmatprep.subr.bf16.mxu1 %v21190_v12 }
 0x619   : > { %v11127_v57 = vpop.f32.mrb[88].mxu0 }
 0x61a   : > { %11713 = vmatmul.mubr.bf16.gmra.mrb[148].mxu1 %v11366_v42  ;;  %v13504_v31 = vadd.f32 %v11127_v57, %v10377_v62  ;;  %v11129_v3 = vpop.f32.mrb[89].mxu0  ;;  %v9829_v57 = vpop.permute.xlu0 %9828 }
 0x61b   : > { %11722 = vmatprep.mubr.bf16.mxu1 %v11369_v23  ;;  %v13505_v0 = vadd.f32 %v11129_v3, %v10378_v4  ;;  %v11131_v2 = vpop.f32.mrb[90].mxu0  ;;  %12079 = vmatpush1.bf16.msra.mxu1 %v13955_v28  ;;  %v9939_v23 = vmul.f32 %v21191_v13, %v9819_v56  ;;  %v9834_v3 = vpop.permute.xlu1 %9833 }
 0x61c   : > { %v13506_v29 = vadd.f32 %v11131_v2, %v10379_v63  ;;  %v11133_v47 = vpop.f32.mrb[91].mxu0  ;;  %v11320_v42 = vmax.f32 %v13504_v31, 0.0  ;;  %12080 = vmatprep.subr.bf16.mxu1 %v21190_v12  ;;  %v9946_v28 = vmul.f32 %v21192_v37, %v9834_v3 }
 0x61d   : > { %v13507_v36 = vadd.f32 %v11133_v47, %v10380_v20  ;;  %v11321_v50 = vmax.f32 %v13505_v0, 0.0  ;;  %v10293_v46 = vadd.f32 %v10217_v30, %v9939_v23  ;;  %v9943_v47 = vmul.f32 %v21191_v13, %v9829_v57 }
 0x61e   : > { %v11322_v43 = vmax.f32 %v13506_v29, 0.0  ;;  %v10107_v63 = vpop.permute.xlu0 %10106 }
 0x61f   : > { %v11323_v52 = vmax.f32 %v13507_v36, 0.0  ;;  %12081 = vmatpush1.bf16.msra.mxu1 %v13956_v6  ;;  %v10381_v16 = vadd.f32 %v20097_v59, %v10293_v46  ;;  %v10112_v0 = vpop.permute.xlu1 %10111  ;;  %v10221_v36 = vmul.f32 %v19715_v39, %v10107_v63 }
 0x620   : > { %v11372_v17 = vpack.c.bf16 %v11322_v43, %v11320_v42  ;;  %12082 = vmatprep.subr.bf16.mxu1 %v21190_v12  ;;  %v9944_v42 = vmul.f32 %v21192_v37, %v9829_v57  ;;  %v10222_v43 = vmul.f32 %v19820_v26, %v10107_v63 }
 0x621   : > { %v11373_v24 = vpack.c.bf16 %v11323_v52, %v11321_v50  ;;  %v9945_v50 = vmul.f32 %v21191_v13, %v9834_v3  ;;  %v10223_v52 = vmul.f32 %v19715_v39, %v10112_v0  ;;  %v10297_v6 = vadd.f32 %v10221_v36, %v9943_v47 }
 0x622   : > { %11723 = vmatmul.mubr.bf16.gmra.mrb[152].mxu1 %v20467_v44  ;;  %v13958_v44 = vld [vmem:[%s20960_s14 + $0x58] sm:$0xff]   ;;  %v9839_v2 = vpop.permute.xlu0 %9838 }
 0x623   : > { %11732 = vmatprep.mubr.bf16.mxu1 %v11371_v21  ;;  %12083 = vmatpush1.bf16.msra.mxu1 %v13957_v32  ;;  %v10219_v21 = vmul.f32 %v19715_v39, %v10102_v10  ;;  %v9844_v20 = vpop.permute.xlu1 %9843  ;;  %v10298_v32 = vadd.f32 %v10222_v43, %v9944_v42  ;;  %v10385_v56 = vadd.f32 %v20097_v59, %v10297_v6 }
 0x624   : > { %12084 = vmatprep.subr.bf16.mxu1 %v21190_v12  ;;  %v9949_v40 = vmul.f32 %v21191_v13, %v9844_v20 }
 0x626   : > { %v10117_v7 = vpop.permute.xlu0 %10116 }
 0x627   : > { %12085 = vmatpush1.bf16.msra.mxu1 %v13958_v44  ;;  %v10122_v29 = vpop.permute.xlu1 %10121  ;;  %v10226_v34 = vmul.f32 %v19820_v26, %v10117_v7 }
 0x628   : > { %12086 = vmatprep.subr.bf16.mxu1 %v21190_v12  ;;  %v10227_v35 = vmul.f32 %v19715_v39, %v10122_v29  ;;  %v10228_v46 = vmul.f32 %v19820_v26, %v10122_v29 }
 0x62a   : > { %11733 = vmatmul.mubr.bf16.gmra.mrb[156].mxu1 %v20474_v22  ;;  %v9941_v22 = vmul.f32 %v21191_v13, %v9824_v58  ;;  %v9948_v58 = vmul.f32 %v21192_v37, %v9839_v2 }
 0x62b   : > { %11742 = vmatprep.mubr.bf16.mxu1 %v11373_v24  ;;  %12087 = vmatpush1.bf16.msra.mxu1 %v13959_v9  ;;  %v9849_v24 = vpop.permute.xlu0 %9848  ;;  %v9854_v44 = vpop.permute.xlu1 %9853  ;;  %v10299_v9 = vadd.f32 %v10223_v52, %v9945_v50 }
 0x62c   : > { %12088 = vmatprep.subr.bf16.mxu1 %v21190_v12  ;;  %v10295_v54 = vadd.f32 %v10219_v21, %v9941_v22  ;;  %v9951_v29 = vmul.f32 %v21191_v13, %v9849_v24  ;;  %v9952_v43 = vmul.f32 %v21192_v37, %v9849_v24 }
 0x62e   : > { %v10383_v19 = vadd.f32 %v20097_v59, %v10295_v54 }
 0x62f   : > { %12089 = vmatpush1.bf16.msra.mxu1 %v13960_v18  ;;  %v10127_v23 = vpop.permute.xlu0 %10126  ;;  %v10132_v14 = vpop.permute.xlu1 %10131 }
 0x630   : > { %12090 = vmatprep.subr.bf16.mxu1 %v21190_v12  ;;  %v10229_v47 = vmul.f32 %v19715_v39, %v10127_v23  ;;  %v10230_v50 = vmul.f32 %v19820_v26, %v10127_v23  ;;  %v10231_v6 = vmul.f32 %v19715_v39, %v10132_v14 }
 0x632   : > { %11743 = vmatmul.mubr.bf16.gmra.mrb[160].mxu1 %v11372_v17  ;;  %v10224_v17 = vmul.f32 %v19820_v26, %v10112_v0  ;;  %v10306_v24 = vadd.f32 %v10230_v50, %v9952_v43 }
 0x633   : > { %12091 = vmatpush1.bf16.msra.mxu1 %v13961_v5  ;;  %v9947_v5 = vmul.f32 %v21191_v13, %v9839_v2 }
 0x634   : > { %12092 = vmatprep.subr.bf16.mxu1 %v21190_v12  ;;  %v10220_v12 = vmul.f32 %v19820_v26, %v10102_v10  ;;  %v10300_v18 = vadd.f32 %v10224_v17, %v9946_v28  ;;  %v10386_v10 = vadd.f32 %v20100_v1, %v10298_v32  ;;  %v9953_v17 = vmul.f32 %v21191_v13, %v9854_v44 }
 0x636   : > { %v10296_v51 = vadd.f32 %v10220_v12, %v9942_v8  ;;  %v10387_v8 = vadd.f32 %v20097_v59, %v10299_v9  ;;  %v9950_v12 = vmul.f32 %v21192_v37, %v9844_v20  ;;  %v10307_v23 = vadd.f32 %v10231_v6, %v9953_v17 }
 0x637   : > { %12093 = vmatpush1.bf16.msra.mxu1 %v13962_v53  ;;  %v10225_v53 = vmul.f32 %v19715_v39, %v10117_v7 }
 0x638   : > { %v10384_v55 = vadd.f32 %v20100_v1, %v10296_v51 }
 0x654   : > { %v11137_v60 = vpop.f32.mrb[92].mxu0 }
 0x655   : > { %v13508_v25 = vadd.f32 %v11137_v60, %v10381_v16  ;;  %v11139_v49 = vpop.f32.mrb[93].mxu0  ;;  %v10388_v16 = vadd.f32 %v20100_v1, %v10300_v18  ;;  %v10301_v60 = vadd.f32 %v10225_v53, %v9947_v5  ;;  %v9954_v18 = vmul.f32 %v21192_v37, %v9854_v44 }
 0x656   : > { %v13509_v61 = vadd.f32 %v11139_v49, %v10382_v48  ;;  %v11141_v45 = vpop.f32.mrb[94].mxu0  ;;  %v10302_v49 = vadd.f32 %v10226_v34, %v9948_v58  ;;  %v10232_v5 = vmul.f32 %v19820_v26, %v10132_v14  ;;  %v10305_v34 = vadd.f32 %v10229_v47, %v9951_v29 }
 0x657   : > { %v13510_v15 = vadd.f32 %v11141_v45, %v10383_v19  ;;  %v11143_v38 = vpop.f32.mrb[95].mxu0  ;;  %v11324_v41 = vmax.f32 %v13508_v25, 0.0 }
 0x658   : > { %v13511_v27 = vadd.f32 %v11143_v38, %v10384_v55  ;;  %v11325_v33 = vmax.f32 %v13509_v61, 0.0  ;;  %v10303_v61 = vadd.f32 %v10227_v35, %v9949_v40  ;;  %v9859_v38 = vpop.permute.xlu0 %9858  ;;  %v10308_v40 = vadd.f32 %v10232_v5, %v9954_v18 }
 0x659   : > { %v11326_v11 = vmax.f32 %v13510_v15, 0.0  ;;  %v10304_v15 = vadd.f32 %v10228_v46, %v9950_v12  ;;  %v10393_v44 = vadd.f32 %v20097_v59, %v10305_v34 }
 0x65a   : > { %v11327_v62 = vmax.f32 %v13511_v27, 0.0  ;;  %v10391_v0 = vadd.f32 %v20097_v59, %v10303_v61 }
 0x65b   : > { %v11374_v4 = vpack.c.bf16 %v11326_v11, %v11324_v41  ;;  %v10392_v7 = vadd.f32 %v20100_v1, %v10304_v15  ;;  %v10396_v15 = vadd.f32 %v20100_v1, %v10308_v40 }
 0x65c   : > { %v11375_v31 = vpack.c.bf16 %v11327_v62, %v11325_v33  ;;  %v10389_v33 = vadd.f32 %v20097_v59, %v10301_v60  ;;  %v9864_v62 = vpop.permute.xlu1 %9863  ;;  %v10137_v52 = vpop.permute.xlu0 %10136 }
 0x65d   : > { %v10234_v46 = vmul.f32 %v19820_v26, %v10137_v52 }
 0x65e   : > { %11752 = vmatprep.mubr.bf16.mxu1 %v11375_v31  ;;  %v10390_v31 = vadd.f32 %v20100_v1, %v10302_v49  ;;  %v13963_v49 = vld [vmem:[%s20962_s16] sm:$0xff]  }
 0x65f   : > { %11753 = vmatmul.mubr.bf16.gmra.mrb[164].mxu1 %v11374_v4  ;;  %13363 = vmatpush3.bf16.msra.mxu0 %v13963_v49 }
 0x660   : > { %v10142_v53 = vpop.permute.xlu1 %10141  ;;  %v9869_v35 = vpop.permute.xlu0 %9868 }
 0x661   : > { %v10236_v61 = vmul.f32 %v19820_v26, %v10142_v53 }
 0x664   : > { %v9874_v12 = vpop.permute.xlu1 %9873 }
 0x665   : > { %v9961_v17 = vmul.f32 %v21191_v13, %v9874_v12  ;;  %v9962_v5 = vmul.f32 %v21192_v37, %v9874_v12 }
 0x678   : > { %v11147_v30 = vpop.f32.mrb[96].mxu0 }
 0x679   : > { %v13512_v22 = vadd.f32 %v11147_v30, %v10385_v56  ;;  %v11149_v21 = vpop.f32.mrb[97].mxu0 }
 0x67a   : > { %v13513_v54 = vadd.f32 %v11149_v21, %v10386_v10  ;;  %v11151_v51 = vpop.f32.mrb[98].mxu0  ;;  %v10233_v21 = vmul.f32 %v19715_v39, %v10137_v52 }
 0x67b   : > { %v13514_v48 = vadd.f32 %v11151_v51, %v10387_v8  ;;  %v11153_v25 = vpop.f32.mrb[99].mxu0  ;;  %v11328_v45 = vmax.f32 %v13512_v22, 0.0  ;;  %v9955_v22 = vmul.f32 %v21191_v13, %v9859_v38  ;;  %v9956_v8 = vmul.f32 %v21192_v37, %v9859_v38 }
 0x67c   : > { %v13515_v19 = vadd.f32 %v11153_v25, %v10388_v16  ;;  %v11329_v27 = vmax.f32 %v13513_v54, 0.0  ;;  %v10394_v54 = vadd.f32 %v20100_v1, %v10306_v24  ;;  %v9957_v51 = vmul.f32 %v21191_v13, %v9864_v62 }
 0x67d   : > { %v11330_v55 = vmax.f32 %v13514_v48, 0.0  ;;  %v10235_v16 = vmul.f32 %v19715_v39, %v10142_v53  ;;  %v10395_v25 = vadd.f32 %v20097_v59, %v10307_v23  ;;  %v10309_v38 = vadd.f32 %v10233_v21, %v9955_v22 }
 0x67e   : > { %v11331_v41 = vmax.f32 %v13515_v19, 0.0  ;;  %v9958_v19 = vmul.f32 %v21192_v37, %v9864_v62  ;;  %v10152_v62 = vpop.permute.xlu1 %10151 }
 0x67f   : > { %v11376_v11 = vpack.c.bf16 %v11330_v55, %v11328_v45  ;;  %v10239_v6 = vmul.f32 %v19715_v39, %v10152_v62  ;;  %v10240_v53 = vmul.f32 %v19820_v26, %v10152_v62 }
 0x680   : > { %v11377_v57 = vpack.c.bf16 %v11331_v41, %v11329_v27  ;;  %v11157_v4 = vpop.f32.mrb[100].mxu0 }
 0x681   : > { %v13516_v3 = vadd.f32 %v11157_v4, %v10389_v33  ;;  %v11159_v63 = vpop.f32.mrb[101].mxu0  ;;  %v10147_v33 = vpop.permute.xlu0 %10146  ;;  %v21193_v4 = vmov 0.0   ;;  %v10316_v22 = vadd.f32 %v10240_v53, %v9962_v5 }
 0x682   : > { %11762 = vmatprep.mubr.bf16.mxu1 %v11377_v57  ;;  %v13517_v2 = vadd.f32 %v11159_v63, %v10390_v31  ;;  %v11161_v20 = vpop.f32.mrb[102].mxu0  ;;  %13364 = vmatprep.subr.bf16.mxu0 %v21193_v4  ;;  %v10311_v31 = vadd.f32 %v10235_v16, %v9957_v51  ;;  %v10237_v29 = vmul.f32 %v19715_v39, %v10147_v33 }
 0x683   : > { %11763 = vmatmul.mubr.bf16.gmra.mrb[168].mxu1 %v11376_v11  ;;  %v13518_v36 = vadd.f32 %v11161_v20, %v10391_v0  ;;  %v11163_v42 = vpop.f32.mrb[103].mxu0  ;;  %v11332_v32 = vmax.f32 %v13516_v3, 0.0  ;;  %v10310_v11 = vadd.f32 %v10234_v46, %v9956_v8  ;;  %v10312_v0 = vadd.f32 %v10236_v61, %v9958_v19  ;;  %v11418_v19 = vld [vmem:[%s20959_s13] sm:$0x3] }
 0x684   : > { %v13519_v28 = vadd.f32 %v11163_v42, %v10392_v7  ;;  %v11333_v56 = vmax.f32 %v13517_v2, 0.0  ;;  %v9959_v7 = vmul.f32 %v21191_v13, %v9869_v35  ;;  %v9960_v42 = vmul.f32 %v21192_v37, %v9869_v35 }
 0x685   : > { %v11334_v9 = vmax.f32 %v13518_v36, 0.0  ;;  %v10397_v36 = vadd.f32 %v20097_v59, %v10309_v38  ;;  %v10238_v43 = vmul.f32 %v19820_v26, %v10147_v33  ;;  %v10399_v18 = vadd.f32 %v20097_v59, %v10311_v31 }
 0x686   : > { %v11335_v58 = vmax.f32 %v13519_v28, 0.0  ;;  %v10398_v28 = vadd.f32 %v20100_v1, %v10310_v11  ;;  %v10400_v34 = vadd.f32 %v20100_v1, %v10312_v0  ;;  %v10315_v39 = vadd.f32 %v10239_v6, %v9961_v17  ;;  %v21195_v11 = vld [vmem:[#allocation30_spill] sm:$0xff] }
 0x687   : > { %v11378_v30 = vpack.c.bf16 %v11334_v9, %v11332_v32  ;;  %v10314_v13 = vadd.f32 %v10238_v43, %v9960_v42  ;;  %v20624_v33 = vrot.slane %v11418_v19, %v21195_v11 }
 0x688   : > { %v11379_v10 = vpack.c.bf16 %v11335_v58, %v11333_v56  ;;  %v10403_v51 = vadd.f32 %v20097_v59, %v10315_v39 }
 0x689   : > { %v10402_v46 = vadd.f32 %v20100_v1, %v10314_v13 }
 0x68a   : > { %11772 = vmatprep.mubr.bf16.mxu1 %v11379_v10 }
 0x68b   : > { %11773 = vmatmul.mubr.bf16.gmra.mrb[172].mxu1 %v11378_v30  ;;  %v10313_v30 = vadd.f32 %v10237_v29, %v9959_v7 }
 0x68c   : > { %v11167_v14 = vpop.f32.mrb[104].mxu0 }
 0x68d   : > { %v13520_v60 = vadd.f32 %v11167_v14, %v10393_v44  ;;  %v11169_v48 = vpop.f32.mrb[105].mxu0  ;;  %v10401_v26 = vadd.f32 %v20097_v59, %v10313_v30 }
 0x68e   : > { %v13521_v45 = vadd.f32 %v11169_v48, %v10394_v54  ;;  %v11171_v55 = vpop.f32.mrb[106].mxu0  ;;  %v10404_v48 = vadd.f32 %v20100_v1, %v10316_v22 }
 0x68f   : > { %v13522_v27 = vadd.f32 %v11171_v55, %v10395_v25  ;;  %v11173_v41 = vpop.f32.mrb[107].mxu0  ;;  %v11336_v3 = vmax.f32 %v13520_v60, 0.0 }
 0x690   : > { %v13523_v57 = vadd.f32 %v11173_v41, %v10396_v15  ;;  %v11337_v2 = vmax.f32 %v13521_v45, 0.0 }
 0x691   : > { %v11338_v63 = vmax.f32 %v13522_v27, 0.0  ;;  %v21194_v27 = vld [vmem:[#allocation29_spill] sm:$0xff] }
 0x692   : > { %v11339_v20 = vmax.f32 %v13523_v57, 0.0  ;;  %v20621_v41 = vrot.slane %v11418_v19, %v21194_v27 }
 0x693   : > { %v11380_v47 = vpack.c.bf16 %v11338_v63, %v11336_v3 }
 0x694   : > { %v11381_v50 = vpack.c.bf16 %v11339_v20, %v11337_v2  ;;  %v11177_v52 = vpop.f32.mrb[108].mxu0 }
 0x695   : > { %v13524_v32 = vadd.f32 %v11177_v52, %v10397_v36  ;;  %v11179_v9 = vpop.f32.mrb[109].mxu0 }
 0x696   : > { %11782 = vmatprep.mubr.bf16.mxu1 %v11381_v50  ;;  %v13525_v56 = vadd.f32 %v11179_v9, %v10398_v28  ;;  %v11181_v58 = vpop.f32.mrb[110].mxu0 }
 0x697   : > { %11783 = vmatmul.mubr.bf16.gmra.mrb[176].mxu1 %v11380_v47  ;;  %v13526_v24 = vadd.f32 %v11181_v58, %v10399_v18  ;;  %v11183_v10 = vpop.f32.mrb[111].mxu0  ;;  %v11340_v40 = vmax.f32 %v13524_v32, 0.0 }
 0x698   : > { %v13527_v23 = vadd.f32 %v11183_v10, %v10400_v34  ;;  %v11341_v21 = vmax.f32 %v13525_v56, 0.0 }
 0x699   : > { %v11342_v35 = vmax.f32 %v13526_v24, 0.0 }
 0x69a   : > { %v11343_v44 = vmax.f32 %v13527_v23, 0.0 }
 0x69b   : > { %v11382_v37 = vpack.c.bf16 %v11342_v35, %v11340_v40 }
 0x69c   : > { %v11383_v8 = vpack.c.bf16 %v11343_v44, %v11341_v21  ;;  %v11187_v12 = vpop.f32.mrb[112].mxu0 }
 0x69d   : > { %v13528_v14 = vadd.f32 %v11187_v12, %v10401_v26  ;;  %v11189_v54 = vpop.f32.mrb[113].mxu0 }
 0x69e   : > { %11792 = vmatprep.mubr.bf16.mxu1 %v11383_v8  ;;  %v13529_v16 = vadd.f32 %v11189_v54, %v10402_v46  ;;  %v11191_v60 = vpop.f32.mrb[114].mxu0 }
 0x69f   : > { %11793 = vmatmul.mubr.bf16.gmra.mrb[180].mxu1 %v11382_v37  ;;  %v13530_v25 = vadd.f32 %v11191_v60, %v10403_v51  ;;  %v11193_v49 = vpop.f32.mrb[115].mxu0  ;;  %v11344_v45 = vmax.f32 %v13528_v14, 0.0 }
 0x6a0   : > { %v13531_v61 = vadd.f32 %v11193_v49, %v10404_v48  ;;  %v11345_v15 = vmax.f32 %v13529_v16, 0.0 }
 0x6a1   : > { %v11346_v55 = vmax.f32 %v13530_v25, 0.0 }
 0x6a2   : > { %v11347_v38 = vmax.f32 %v13531_v61, 0.0 }
 0x6a3   : > { %v11384_v59 = vpack.c.bf16 %v11346_v55, %v11344_v45 }
 0x6a4   : > { %v11385_v1 = vpack.c.bf16 %v11347_v38, %v11345_v15 }
 0x6a5   : > { %v11624_v57 = vpop.f32.mrb[112].mxu1 }
 0x6a6   : > { %11802 = vmatprep.mubr.bf16.mxu1 %v11385_v1  ;;  %v11625_v31 = vadd.f32 %v11624_v57, %v20621_v41  ;;  %v11626_v3 = vpop.f32.mrb[113].mxu1 }
 0x6a7   : > { %11803 = vmatmul.mubr.bf16.gmra.mrb[184].mxu1 %v11384_v59  ;;  %v11627_v63 = vadd.f32 %v11626_v3, %v20624_v33  ;;  %v11628_v0 = vpop.f32.mrb[114].mxu1 }
 0x6a8   : > { %v11629_v62 = vadd.f32 %v11628_v0, %v20621_v41  ;;  %v11630_v2 = vpop.f32.mrb[115].mxu1  ;;  %v11813_v7 = vmax.f32 %v11625_v31, 0.0 }
 0x6a9   : > { %v11631_v20 = vadd.f32 %v11630_v2, %v20624_v33  ;;  %v11814_v47 = vmax.f32 %v11627_v63, 0.0 }
 0x6aa   : > { %v11815_v29 = vmax.f32 %v11629_v62, 0.0 }
 0x6ab   : > { %v11816_v36 = vmax.f32 %v11631_v20, 0.0 }
 0x6ac   : > { %v11889_v42 = vpack.c.bf16 %v11815_v29, %v11813_v7 }
 0x6ad   : > { %v11890_v43 = vpack.c.bf16 %v11816_v36, %v11814_v47  ;;  %v11634_v50 = vpop.f32.mrb[116].mxu1 }
 0x6ae   : > { %v11635_v52 = vadd.f32 %v11634_v50, %v20621_v41  ;;  %v11636_v28 = vpop.f32.mrb[117].mxu1 }
 0x6af   : > { %v11637_v17 = vadd.f32 %v11636_v28, %v20624_v33  ;;  %v11638_v6 = vpop.f32.mrb[118].mxu1  ;;  %12094 = vmatprep.mubr.bf16.mxu1 %v11890_v43 }
 0x6b0   : > { %v11639_v32 = vadd.f32 %v11638_v6, %v20621_v41  ;;  %v11640_v9 = vpop.f32.mrb[119].mxu1  ;;  %12095 = vmatmul.mubr.bf16.vlgmr.msra.gmra.mrb[188].mxu1 %v11889_v42  ;;  %v11817_v5 = vmax.f32 %v11635_v52, 0.0 }
 0x6b1   : > { %v11641_v18 = vadd.f32 %v11640_v9, %v20624_v33  ;;  %v11818_v56 = vmax.f32 %v11637_v17, 0.0 }
 0x6b2   : > { %v11819_v53 = vmax.f32 %v11639_v32, 0.0 }
 0x6b3   : > { %v11820_v58 = vmax.f32 %v11641_v18, 0.0 }
 0x6b4   : > { %v11891_v34 = vpack.c.bf16 %v11819_v53, %v11817_v5 }
 0x6b5   : > { %v11892_v30 = vpack.c.bf16 %v11820_v58, %v11818_v56  ;;  %v11644_v24 = vpop.f32.mrb[120].mxu1 }
 0x6b6   : > { %v11645_v10 = vadd.f32 %v11644_v24, %v20621_v41  ;;  %v11646_v13 = vpop.f32.mrb[121].mxu1 }
 0x6b7   : > { %12102 = vmatprep.mubr.bf16.mxu1 %v11892_v30  ;;  %v11647_v23 = vadd.f32 %v11646_v13, %v20624_v33  ;;  %v11648_v39 = vpop.f32.mrb[122].mxu1 }
 0x6b8   : > { %12103 = vmatmul.mubr.bf16.gmra.mrb[192].mxu1 %v11891_v34  ;;  %v11649_v40 = vadd.f32 %v11648_v39, %v20621_v41  ;;  %v11650_v35 = vpop.f32.mrb[123].mxu1  ;;  %v11821_v21 = vmax.f32 %v11645_v10, 0.0 }
 0x6b9   : > { %v11651_v22 = vadd.f32 %v11650_v35, %v20624_v33  ;;  %v11822_v37 = vmax.f32 %v11647_v23, 0.0 }
 0x6ba   : > { %v11823_v44 = vmax.f32 %v11649_v40, 0.0 }
 0x6bb   : > { %v11824_v26 = vmax.f32 %v11651_v22, 0.0 }
 0x6bc   : > { %v11893_v8 = vpack.c.bf16 %v11823_v44, %v11821_v21 }
 0x6bd   : > { %v11894_v12 = vpack.c.bf16 %v11824_v26, %v11822_v37  ;;  %v11654_v46 = vpop.f32.mrb[124].mxu1  ;;  %v13964_v37 = vld [vmem:[%s20962_s16 + $0x8] sm:$0xff]  }
 0x6be   : > { %v11655_v14 = vadd.f32 %v11654_v46, %v20621_v41  ;;  %v11656_v54 = vpop.f32.mrb[125].mxu1  ;;  %13365 = vmatpush3.bf16.msra.mxu0 %v13964_v37 }
 0x6bf   : > { %12110 = vmatprep.mubr.bf16.mxu1 %v11894_v12  ;;  %v11657_v51 = vadd.f32 %v11656_v54, %v20624_v33  ;;  %v11658_v16 = vpop.f32.mrb[126].mxu1  ;;  %13366 = vmatprep.subr.bf16.mxu0 %v21193_v4 }
 0x6c0   : > { %12111 = vmatmul.mubr.bf16.gmra.mrb[196].mxu1 %v11893_v8  ;;  %v11659_v60 = vadd.f32 %v11658_v16, %v20621_v41  ;;  %v11660_v48 = vpop.f32.mrb[127].mxu1  ;;  %v11825_v49 = vmax.f32 %v11655_v14, 0.0 }
 0x6c1   : > { %v11661_v25 = vadd.f32 %v11660_v48, %v20624_v33  ;;  %v11826_v61 = vmax.f32 %v11657_v51, 0.0 }
 0x6c2   : > { %v11827_v19 = vmax.f32 %v11659_v60, 0.0 }
 0x6c3   : > { %v11828_v45 = vmax.f32 %v11661_v25, 0.0 }
 0x6c4   : > { %v11895_v55 = vpack.c.bf16 %v11827_v19, %v11825_v49 }
 0x6c5   : > { %v11896_v15 = vpack.c.bf16 %v11828_v45, %v11826_v61  ;;  %v11664_v38 = vpop.f32.mrb[128].mxu1 }
 0x6c6   : > { %v11665_v27 = vadd.f32 %v11664_v38, %v20621_v41  ;;  %v11666_v59 = vpop.f32.mrb[129].mxu1 }
 0x6c7   : > { %12118 = vmatprep.mubr.bf16.mxu1 %v11896_v15  ;;  %v11667_v11 = vadd.f32 %v11666_v59, %v20624_v33  ;;  %v11668_v1 = vpop.f32.mrb[130].mxu1 }
 0x6c8   : > { %12119 = vmatmul.mubr.bf16.gmra.mrb[200].mxu1 %v11895_v55  ;;  %v11669_v57 = vadd.f32 %v11668_v1, %v20621_v41  ;;  %v11670_v31 = vpop.f32.mrb[131].mxu1  ;;  %v11829_v63 = vmax.f32 %v11665_v27, 0.0  ;;  %v13965_v1 = vld [vmem:[%s20962_s16 + $0x10] sm:$0xff]  }
 0x6c9   : > { %v11671_v3 = vadd.f32 %v11670_v31, %v20624_v33  ;;  %v11830_v62 = vmax.f32 %v11667_v11, 0.0  ;;  %13367 = vmatpush3.bf16.msra.mxu0 %v13965_v1 }
 0x6ca   : > { %v11831_v0 = vmax.f32 %v11669_v57, 0.0  ;;  %13368 = vmatprep.subr.bf16.mxu0 %v21193_v4 }
 0x6cb   : > { %v11832_v2 = vmax.f32 %v11671_v3, 0.0 }
 0x6cc   : > { %v11897_v20 = vpack.c.bf16 %v11831_v0, %v11829_v63 }
 0x6cd   : > { %v11898_v7 = vpack.c.bf16 %v11832_v2, %v11830_v62  ;;  %v11674_v29 = vpop.f32.mrb[132].mxu1 }
 0x6ce   : > { %v11675_v47 = vadd.f32 %v11674_v29, %v20621_v41  ;;  %v11676_v36 = vpop.f32.mrb[133].mxu1 }
 0x6cf   : > { %12126 = vmatprep.mubr.bf16.mxu1 %v11898_v7  ;;  %v11677_v42 = vadd.f32 %v11676_v36, %v20624_v33  ;;  %v11678_v43 = vpop.f32.mrb[134].mxu1 }
 0x6d0   : > { %12127 = vmatmul.mubr.bf16.gmra.mrb[204].mxu1 %v11897_v20  ;;  %v11679_v50 = vadd.f32 %v11678_v43, %v20621_v41  ;;  %v11680_v52 = vpop.f32.mrb[135].mxu1  ;;  %v11833_v17 = vmax.f32 %v11675_v47, 0.0 }
 0x6d1   : > { %v11681_v28 = vadd.f32 %v11680_v52, %v20624_v33  ;;  %v11834_v32 = vmax.f32 %v11677_v42, 0.0 }
 0x6d2   : > { %v11835_v6 = vmax.f32 %v11679_v50, 0.0 }
 0x6d3   : > { %v11836_v9 = vmax.f32 %v11681_v28, 0.0 }
 0x6d4   : > { %v11899_v18 = vpack.c.bf16 %v11835_v6, %v11833_v17 }
 0x6d5   : > { %v11900_v5 = vpack.c.bf16 %v11836_v9, %v11834_v32  ;;  %v11684_v53 = vpop.f32.mrb[136].mxu1 }
 0x6d6   : > { %v11685_v56 = vadd.f32 %v11684_v53, %v20621_v41  ;;  %v11686_v58 = vpop.f32.mrb[137].mxu1 }
 0x6d7   : > { %12134 = vmatprep.mubr.bf16.mxu1 %v11900_v5  ;;  %v11687_v34 = vadd.f32 %v11686_v58, %v20624_v33  ;;  %v11688_v30 = vpop.f32.mrb[138].mxu1 }
 0x6d8   : > { %12135 = vmatmul.mubr.bf16.gmra.mrb[208].mxu1 %v11899_v18  ;;  %v11689_v24 = vadd.f32 %v11688_v30, %v20621_v41  ;;  %v11690_v10 = vpop.f32.mrb[139].mxu1  ;;  %v11837_v23 = vmax.f32 %v11685_v56, 0.0 }
 0x6d9   : > { %v11691_v13 = vadd.f32 %v11690_v10, %v20624_v33  ;;  %v11838_v40 = vmax.f32 %v11687_v34, 0.0 }
 0x6da   : > { %v11839_v39 = vmax.f32 %v11689_v24, 0.0 }
 0x6db   : > { %v11840_v35 = vmax.f32 %v11691_v13, 0.0  ;;  %v13966_v13 = vld [vmem:[%s20962_s16 + $0x18] sm:$0xff]  }
 0x6dc   : > { %v11901_v22 = vpack.c.bf16 %v11839_v39, %v11837_v23  ;;  %13369 = vmatpush3.bf16.msra.mxu0 %v13966_v13 }
 0x6dd   : > { %v11902_v21 = vpack.c.bf16 %v11840_v35, %v11838_v40  ;;  %v11694_v44 = vpop.f32.mrb[140].mxu1  ;;  %13370 = vmatprep.subr.bf16.mxu0 %v21193_v4 }
 0x6de   : > { %v11695_v26 = vadd.f32 %v11694_v44, %v20621_v41  ;;  %v11696_v8 = vpop.f32.mrb[141].mxu1 }
 0x6df   : > { %12142 = vmatprep.mubr.bf16.mxu1 %v11902_v21  ;;  %v11697_v12 = vadd.f32 %v11696_v8, %v20624_v33  ;;  %v11698_v46 = vpop.f32.mrb[142].mxu1 }
 0x6e0   : > { %12143 = vmatmul.mubr.bf16.gmra.mrb[212].mxu1 %v11901_v22  ;;  %v11699_v14 = vadd.f32 %v11698_v46, %v20621_v41  ;;  %v11700_v54 = vpop.f32.mrb[143].mxu1  ;;  %v11841_v16 = vmax.f32 %v11695_v26, 0.0 }
 0x6e1   : > { %v11701_v51 = vadd.f32 %v11700_v54, %v20624_v33  ;;  %v11842_v48 = vmax.f32 %v11697_v12, 0.0 }
 0x6e2   : > { %v11843_v60 = vmax.f32 %v11699_v14, 0.0 }
 0x6e3   : > { %v11844_v25 = vmax.f32 %v11701_v51, 0.0  ;;  %v13967_v51 = vld [vmem:[%s20962_s16 + $0x20] sm:$0xff]  }
 0x6e4   : > { %v11903_v49 = vpack.c.bf16 %v11843_v60, %v11841_v16  ;;  %13371 = vmatpush3.bf16.msra.mxu0 %v13967_v51 }
 0x6e5   : > { %v11904_v19 = vpack.c.bf16 %v11844_v25, %v11842_v48  ;;  %v11704_v61 = vpop.f32.mrb[144].mxu1  ;;  %v13968_v25 = vld [vmem:[%s20962_s16 + $0x28] sm:$0xff]   ;;  %13372 = vmatprep.subr.bf16.mxu0 %v21193_v4 }
 0x6e6   : > { %v11705_v45 = vadd.f32 %v11704_v61, %v20621_v41  ;;  %v11706_v55 = vpop.f32.mrb[145].mxu1 }
 0x6e7   : > { %12150 = vmatprep.mubr.bf16.mxu1 %v11904_v19  ;;  %v11707_v15 = vadd.f32 %v11706_v55, %v20624_v33  ;;  %v11708_v38 = vpop.f32.mrb[146].mxu1 }
 0x6e8   : > { %12151 = vmatmul.mubr.bf16.gmra.mrb[216].mxu1 %v11903_v49  ;;  %v11709_v27 = vadd.f32 %v11708_v38, %v20621_v41  ;;  %v11710_v59 = vpop.f32.mrb[147].mxu1  ;;  %v11845_v57 = vmax.f32 %v11705_v45, 0.0  ;;  %13373 = vmatpush3.bf16.msra.mxu0 %v13968_v25 }
 0x6e9   : > { %v11711_v11 = vadd.f32 %v11710_v59, %v20624_v33  ;;  %v11846_v3 = vmax.f32 %v11707_v15, 0.0  ;;  %13374 = vmatprep.subr.bf16.mxu0 %v21193_v4 }
 0x6ea   : > { %v11847_v31 = vmax.f32 %v11709_v27, 0.0 }
 0x6eb   : > { %v11848_v63 = vmax.f32 %v11711_v11, 0.0 }
 0x6ec   : > { %v11905_v0 = vpack.c.bf16 %v11847_v31, %v11845_v57  ;;  %v13969_v57 = vld [vmem:[%s20962_s16 + $0x30] sm:$0xff]  }
 0x6ed   : > { %v11906_v62 = vpack.c.bf16 %v11848_v63, %v11846_v3  ;;  %v11714_v2 = vpop.f32.mrb[148].mxu1  ;;  %13375 = vmatpush3.bf16.msra.mxu0 %v13969_v57 }
 0x6ee   : > { %v11715_v20 = vadd.f32 %v11714_v2, %v20621_v41  ;;  %v11716_v7 = vpop.f32.mrb[149].mxu1  ;;  %13376 = vmatprep.subr.bf16.mxu0 %v21193_v4 }
 0x6ef   : > { %12158 = vmatprep.mubr.bf16.mxu1 %v11906_v62  ;;  %v11717_v29 = vadd.f32 %v11716_v7, %v20624_v33  ;;  %v11718_v47 = vpop.f32.mrb[150].mxu1 }
 0x6f0   : > { %12159 = vmatmul.mubr.bf16.gmra.mrb[220].mxu1 %v11905_v0  ;;  %v11719_v36 = vadd.f32 %v11718_v47, %v20621_v41  ;;  %v11720_v42 = vpop.f32.mrb[151].mxu1  ;;  %v11849_v50 = vmax.f32 %v11715_v20, 0.0  ;;  %v13970_v0 = vld [vmem:[%s20962_s16 + $0x38] sm:$0xff]  }
 0x6f1   : > { %v11721_v43 = vadd.f32 %v11720_v42, %v20624_v33  ;;  %v11850_v28 = vmax.f32 %v11717_v29, 0.0  ;;  %13377 = vmatpush3.bf16.msra.mxu0 %v13970_v0 }
 0x6f2   : > { %v11851_v52 = vmax.f32 %v11719_v36, 0.0 }
 0x6f3   : > { %v11852_v17 = vmax.f32 %v11721_v43, 0.0 }
 0x6f4   : > { %v11907_v6 = vpack.c.bf16 %v11851_v52, %v11849_v50 }
 0x6f5   : > { %v11908_v32 = vpack.c.bf16 %v11852_v17, %v11850_v28  ;;  %v11724_v9 = vpop.f32.mrb[152].mxu1 }
 0x6f6   : > { %v11725_v18 = vadd.f32 %v11724_v9, %v20621_v41  ;;  %v11726_v5 = vpop.f32.mrb[153].mxu1 }
 0x6f7   : > { %12166 = vmatprep.mubr.bf16.mxu1 %v11908_v32  ;;  %v11727_v53 = vadd.f32 %v11726_v5, %v20624_v33  ;;  %v11728_v56 = vpop.f32.mrb[154].mxu1 }
 0x6f8   : > { %12167 = vmatmul.mubr.bf16.gmra.mrb[224].mxu1 %v11907_v6  ;;  %v11729_v58 = vadd.f32 %v11728_v56, %v20621_v41  ;;  %v11730_v34 = vpop.f32.mrb[155].mxu1  ;;  %v11853_v24 = vmax.f32 %v11725_v18, 0.0 }
 0x6f9   : > { %v11731_v30 = vadd.f32 %v11730_v34, %v20624_v33  ;;  %v11854_v23 = vmax.f32 %v11727_v53, 0.0 }
 0x6fa   : > { %v11855_v10 = vmax.f32 %v11729_v58, 0.0 }
 0x6fb   : > { %v11856_v39 = vmax.f32 %v11731_v30, 0.0 }
 0x6fc   : > { %v11909_v40 = vpack.c.bf16 %v11855_v10, %v11853_v24 }
 0x6fd   : > { %v11910_v35 = vpack.c.bf16 %v11856_v39, %v11854_v23  ;;  %v11734_v22 = vpop.f32.mrb[156].mxu1 }
 0x6fe   : > { %v11735_v21 = vadd.f32 %v11734_v22, %v20621_v41  ;;  %v11736_v44 = vpop.f32.mrb[157].mxu1 }
 0x6ff   : > { %12174 = vmatprep.mubr.bf16.mxu1 %v11910_v35  ;;  %v11737_v37 = vadd.f32 %v11736_v44, %v20624_v33  ;;  %v11738_v26 = vpop.f32.mrb[158].mxu1 }
 0x700   : > { %12175 = vmatmul.mubr.bf16.gmra.mrb[228].mxu1 %v11909_v40  ;;  %v11739_v8 = vadd.f32 %v11738_v26, %v20621_v41  ;;  %v11740_v12 = vpop.f32.mrb[159].mxu1  ;;  %v11857_v14 = vmax.f32 %v11735_v21, 0.0 }
 0x701   : > { %v11741_v46 = vadd.f32 %v11740_v12, %v20624_v33  ;;  %v11858_v16 = vmax.f32 %v11737_v37, 0.0 }
 0x702   : > { %v11859_v54 = vmax.f32 %v11739_v8, 0.0 }
 0x703   : > { %v11860_v60 = vmax.f32 %v11741_v46, 0.0 }
 0x704   : > { %v11911_v48 = vpack.c.bf16 %v11859_v54, %v11857_v14 }
 0x705   : > { %v11912_v49 = vpack.c.bf16 %v11860_v60, %v11858_v16  ;;  %v11744_v19 = vpop.f32.mrb[160].mxu1 }
 0x706   : > { %v11745_v61 = vadd.f32 %v11744_v19, %v20621_v41  ;;  %v11746_v45 = vpop.f32.mrb[161].mxu1 }
 0x707   : > { %12182 = vmatprep.mubr.bf16.mxu1 %v11912_v49  ;;  %v11747_v55 = vadd.f32 %v11746_v45, %v20624_v33  ;;  %v11748_v15 = vpop.f32.mrb[162].mxu1 }
 0x708   : > { %12183 = vmatmul.mubr.bf16.gmra.mrb[232].mxu1 %v11911_v48  ;;  %v11749_v38 = vadd.f32 %v11748_v15, %v20621_v41  ;;  %v11750_v27 = vpop.f32.mrb[163].mxu1  ;;  %v11861_v11 = vmax.f32 %v11745_v61, 0.0 }
 0x709   : > { %v11751_v59 = vadd.f32 %v11750_v27, %v20624_v33  ;;  %v11862_v31 = vmax.f32 %v11747_v55, 0.0 }
 0x70a   : > { %v11863_v1 = vmax.f32 %v11749_v38, 0.0 }
 0x70b   : > { %v11864_v3 = vmax.f32 %v11751_v59, 0.0 }
 0x70c   : > { %v11913_v63 = vpack.c.bf16 %v11863_v1, %v11861_v11 }
 0x70d   : > { %v11914_v62 = vpack.c.bf16 %v11864_v3, %v11862_v31 }
 0x70f   : > { %12190 = vmatprep.mubr.bf16.mxu1 %v11914_v62 }
 0x710   : > { %12191 = vmatmul.mubr.bf16.gmra.mrb[236].mxu1 %v11913_v63 }
 0x732   : > { %v11754_v2 = vpop.f32.mrb[164].mxu1 }
 0x733   : > { %v11755_v20 = vadd.f32 %v11754_v2, %v20621_v41  ;;  %v11756_v7 = vpop.f32.mrb[165].mxu1 }
 0x734   : > { %v11757_v29 = vadd.f32 %v11756_v7, %v20624_v33  ;;  %v11758_v47 = vpop.f32.mrb[166].mxu1 }
 0x735   : > { %v11759_v36 = vadd.f32 %v11758_v47, %v20621_v41  ;;  %v11760_v42 = vpop.f32.mrb[167].mxu1  ;;  %v11865_v50 = vmax.f32 %v11755_v20, 0.0 }
 0x736   : > { %v11761_v43 = vadd.f32 %v11760_v42, %v20624_v33  ;;  %v11866_v28 = vmax.f32 %v11757_v29, 0.0 }
 0x737   : > { %v11867_v52 = vmax.f32 %v11759_v36, 0.0 }
 0x738   : > { %v11868_v17 = vmax.f32 %v11761_v43, 0.0 }
 0x739   : > { %v11915_v6 = vpack.c.bf16 %v11867_v52, %v11865_v50 }
 0x73a   : > { %v11916_v32 = vpack.c.bf16 %v11868_v17, %v11866_v28 }
 0x73c   : > { %12198 = vmatprep.mubr.bf16.mxu1 %v11916_v32 }
 0x73d   : > { %12199 = vmatmul.mubr.bf16.gmra.mrb[240].mxu1 %v11915_v6 }
 0x756   : > { %v11764_v9 = vpop.f32.mrb[168].mxu1 }
 0x757   : > { %v11765_v18 = vadd.f32 %v11764_v9, %v20621_v41  ;;  %v11766_v5 = vpop.f32.mrb[169].mxu1 }
 0x758   : > { %v11767_v53 = vadd.f32 %v11766_v5, %v20624_v33  ;;  %v11768_v56 = vpop.f32.mrb[170].mxu1 }
 0x759   : > { %v11769_v58 = vadd.f32 %v11768_v56, %v20621_v41  ;;  %v11770_v34 = vpop.f32.mrb[171].mxu1  ;;  %v11869_v24 = vmax.f32 %v11765_v18, 0.0 }
 0x75a   : > { %v11771_v30 = vadd.f32 %v11770_v34, %v20624_v33  ;;  %v11870_v13 = vmax.f32 %v11767_v53, 0.0 }
 0x75b   : > { %v11871_v10 = vmax.f32 %v11769_v58, 0.0 }
 0x75c   : > { %v11872_v23 = vmax.f32 %v11771_v30, 0.0 }
 0x75d   : > { %v11917_v39 = vpack.c.bf16 %v11871_v10, %v11869_v24  ;;  %v20732_v24 = vld [vmem:[%s20961_s15] ss:$0 sm:$0xff] }
 0x75e   : > { %v11918_v40 = vpack.c.bf16 %v11872_v23, %v11870_v13  ;;  %v11774_v35 = vpop.f32.mrb[172].mxu1 }
 0x75f   : > { %v11775_v22 = vadd.f32 %v11774_v35, %v20621_v41  ;;  %v11776_v21 = vpop.f32.mrb[173].mxu1 }
 0x760   : > { %12206 = vmatprep.mubr.bf16.mxu1 %v11918_v40  ;;  %v11777_v44 = vadd.f32 %v11776_v21, %v20624_v33  ;;  %v11778_v37 = vpop.f32.mrb[174].mxu1 }
 0x761   : > { %12207 = vmatmul.mubr.bf16.gmra.mrb[244].mxu1 %v11917_v39  ;;  %v11779_v26 = vadd.f32 %v11778_v37, %v20621_v41  ;;  %v11780_v8 = vpop.f32.mrb[175].mxu1  ;;  %v11873_v46 = vmax.f32 %v11775_v22, 0.0 }
 0x762   : > { %v11781_v12 = vadd.f32 %v11780_v8, %v20624_v33  ;;  %v11874_v54 = vmax.f32 %v11777_v44, 0.0 }
 0x763   : > { %v11875_v14 = vmax.f32 %v11779_v26, 0.0 }
 0x764   : > { %v11876_v51 = vmax.f32 %v11781_v12, 0.0 }
 0x765   : > { %v11919_v16 = vpack.c.bf16 %v11875_v14, %v11873_v46 }
 0x766   : > { %v11920_v60 = vpack.c.bf16 %v11876_v51, %v11874_v54 }
 0x768   : > { %12214 = vmatprep.mubr.bf16.mxu1 %v11920_v60 }
 0x769   : > { %12215 = vmatmul.mubr.bf16.gmra.mrb[248].mxu1 %v11919_v16 }
 0x76a   : > { %v11784_v48 = vpop.f32.mrb[176].mxu1 }
 0x76b   : > { %v11785_v25 = vadd.f32 %v11784_v48, %v20621_v41  ;;  %v11786_v49 = vpop.f32.mrb[177].mxu1 }
 0x76c   : > { %v11787_v19 = vadd.f32 %v11786_v49, %v20624_v33  ;;  %v11788_v61 = vpop.f32.mrb[178].mxu1 }
 0x76d   : > { %v11789_v45 = vadd.f32 %v11788_v61, %v20621_v41  ;;  %v11790_v55 = vpop.f32.mrb[179].mxu1  ;;  %v11877_v38 = vmax.f32 %v11785_v25, 0.0 }
 0x76e   : > { %v11791_v15 = vadd.f32 %v11790_v55, %v20624_v33  ;;  %v11878_v59 = vmax.f32 %v11787_v19, 0.0 }
 0x76f   : > { %v11879_v27 = vmax.f32 %v11789_v45, 0.0 }
 0x770   : > { %v11880_v11 = vmax.f32 %v11791_v15, 0.0 }
 0x771   : > { %v11921_v1 = vpack.c.bf16 %v11879_v27, %v11877_v38 }
 0x772   : > { %v11922_v57 = vpack.c.bf16 %v11880_v11, %v11878_v59  ;;  %v11794_v31 = vpop.f32.mrb[180].mxu1 }
 0x773   : > { %v11795_v3 = vadd.f32 %v11794_v31, %v20621_v41  ;;  %v11796_v63 = vpop.f32.mrb[181].mxu1 }
 0x774   : > { %12222 = vmatprep.mubr.bf16.mxu1 %v11922_v57  ;;  %v11797_v0 = vadd.f32 %v11796_v63, %v20624_v33  ;;  %v11798_v62 = vpop.f32.mrb[182].mxu1 }
 0x775   : > { %12223 = vmatmul.mubr.bf16.gmra.mrb[252].mxu1 %v11921_v1  ;;  %v11799_v2 = vadd.f32 %v11798_v62, %v20621_v41  ;;  %v11800_v20 = vpop.f32.mrb[183].mxu1  ;;  %v11881_v29 = vmax.f32 %v11795_v3, 0.0 }
 0x776   : > { %v11801_v7 = vadd.f32 %v11800_v20, %v20624_v33  ;;  %v11882_v36 = vmax.f32 %v11797_v0, 0.0 }
 0x777   : > { %v11883_v47 = vmax.f32 %v11799_v2, 0.0 }
 0x778   : > { %v11884_v42 = vmax.f32 %v11801_v7, 0.0 }
 0x779   : > { %v11923_v43 = vpack.c.bf16 %v11883_v47, %v11881_v29 }
 0x77a   : > { %v11924_v50 = vpack.c.bf16 %v11884_v42, %v11882_v36  ;;  %v11804_v52 = vpop.f32.mrb[184].mxu1 }
 0x77b   : > { %v11805_v28 = vadd.f32 %v11804_v52, %v20621_v41  ;;  %v11806_v17 = vpop.f32.mrb[185].mxu1 }
 0x77c   : > { %12230 = vmatprep.mubr.bf16.mxu1 %v11924_v50  ;;  %v11807_v6 = vadd.f32 %v11806_v17, %v20624_v33  ;;  %v11808_v32 = vpop.f32.mrb[186].mxu1 }
 0x77d   : > { %12231 = vmatmul.mubr.bf16.gmra.mrb[0].mxu1 %v11923_v43  ;;  %v11809_v9 = vadd.f32 %v11808_v32, %v20621_v41  ;;  %v11810_v18 = vpop.f32.mrb[187].mxu1  ;;  %v11885_v53 = vmax.f32 %v11805_v28, 0.0 }
 0x77e   : > { %v11811_v5 = vadd.f32 %v11810_v18, %v20624_v33  ;;  %v11886_v58 = vmax.f32 %v11807_v6, 0.0 }
 0x77f   : > { %v11887_v56 = vmax.f32 %v11809_v9, 0.0 }
 0x780   : > { %v11888_v34 = vmax.f32 %v11811_v5, 0.0 }
 0x781   : > { %v11925_v30 = vpack.c.bf16 %v11887_v56, %v11885_v53 }
 0x782   : > { %v11926_v10 = vpack.c.bf16 %v11888_v34, %v11886_v58 }
 0x783   : > { %v12096_v13 = vpop.f32.mrb[188].mxu1 }
 0x784   : > { %12238 = vmatprep.mubr.bf16.mxu1 %v11926_v10  ;;  %v12097_v23 = vadd.f32 %v20732_v24, %v12096_v13  ;;  %v12098_v39 = vpop.f32.mrb[189].mxu1 }
 0x785   : > { %12239 = vmatmul.mubr.bf16.gmra.mrb[4].mxu1 %v11925_v30  ;;  %v12099_v41 = vpop.f32.mrb[190].mxu1 }
 0x786   : > { %v12100_v33 = vadd.f32 %v20732_v24, %v12099_v41  ;;  %v12101_v40 = vpop.f32.mrb[191].mxu1  ;;  %v12247_v35 = vmax.f32 %v12097_v23, 0.0 }
 0x788   : > { %v12248_v22 = vmax.f32 %v12100_v33, 0.0 }
 0x78a   : > { %v12285_v21 = vpack.c.bf16 %v12248_v22, %v12247_v35 }
 0x78b   : > { %v12104_v44 = vpop.f32.mrb[192].mxu1 }
 0x78c   : > { %v12105_v37 = vadd.f32 %v20732_v24, %v12104_v44  ;;  %v12106_v26 = vpop.f32.mrb[193].mxu1  ;;  %13379 = vmatmul.mubr.bf16.vlgmr.msra.gmra.mrb[116].mxu0 %v12285_v21 }
 0x78d   : > { %v12107_v8 = vpop.f32.mrb[194].mxu1  ;;  %13382 = vmatprep.mubr.msk.bf16.mxu0 %vm14269_vm0, %v21193_v4 }
 0x78e   : > { %v12108_v12 = vadd.f32 %v20732_v24, %v12107_v8  ;;  %v12109_v46 = vpop.f32.mrb[195].mxu1  ;;  %v12249_v14 = vmax.f32 %v12105_v37, 0.0 }
 0x790   : > { %v12250_v54 = vmax.f32 %v12108_v12, 0.0 }
 0x792   : > { %v12286_v51 = vpack.c.bf16 %v12250_v54, %v12249_v14 }
 0x793   : > { %v12112_v16 = vpop.f32.mrb[196].mxu1 }
 0x794   : > { %13383 = vmatmul.mubr.bf16.gmra.mrb[120].mxu0 %v12286_v51  ;;  %v12113_v60 = vadd.f32 %v20732_v24, %v12112_v16  ;;  %v12114_v48 = vpop.f32.mrb[197].mxu1 }
 0x795   : > { %v12115_v25 = vpop.f32.mrb[198].mxu1  ;;  %13386 = vmatprep.mubr.msk.bf16.mxu0 %vm14269_vm0, %v21193_v4 }
 0x796   : > { %v12116_v49 = vadd.f32 %v20732_v24, %v12115_v25  ;;  %v12117_v19 = vpop.f32.mrb[199].mxu1  ;;  %v12251_v61 = vmax.f32 %v12113_v60, 0.0 }
 0x798   : > { %v12252_v45 = vmax.f32 %v12116_v49, 0.0 }
 0x79a   : > { %v12287_v55 = vpack.c.bf16 %v12252_v45, %v12251_v61 }
 0x79b   : > { %v12120_v15 = vpop.f32.mrb[200].mxu1 }
 0x79c   : > { %13387 = vmatmul.mubr.bf16.gmra.mrb[124].mxu0 %v12287_v55  ;;  %v12121_v38 = vadd.f32 %v20732_v24, %v12120_v15  ;;  %v12122_v27 = vpop.f32.mrb[201].mxu1 }
 0x79d   : > { %v12123_v59 = vpop.f32.mrb[202].mxu1  ;;  %13390 = vmatprep.mubr.msk.bf16.mxu0 %vm14269_vm0, %v21193_v4 }
 0x79e   : > { %v12124_v11 = vadd.f32 %v20732_v24, %v12123_v59  ;;  %v12125_v1 = vpop.f32.mrb[203].mxu1  ;;  %v12253_v57 = vmax.f32 %v12121_v38, 0.0 }
 0x7a0   : > { %v12254_v31 = vmax.f32 %v12124_v11, 0.0 }
 0x7a2   : > { %v12288_v3 = vpack.c.bf16 %v12254_v31, %v12253_v57 }
 0x7a3   : > { %v12128_v63 = vpop.f32.mrb[204].mxu1 }
 0x7a4   : > { %13391 = vmatmul.mubr.bf16.gmra.mrb[128].mxu0 %v12288_v3  ;;  %v12129_v0 = vadd.f32 %v20732_v24, %v12128_v63  ;;  %v12130_v62 = vpop.f32.mrb[205].mxu1 }
 0x7a5   : > { %v12131_v2 = vpop.f32.mrb[206].mxu1  ;;  %13394 = vmatprep.mubr.msk.bf16.mxu0 %vm14269_vm0, %v21193_v4 }
 0x7a6   : > { %v12132_v20 = vadd.f32 %v20732_v24, %v12131_v2  ;;  %v12133_v7 = vpop.f32.mrb[207].mxu1  ;;  %v12255_v29 = vmax.f32 %v12129_v0, 0.0 }
 0x7a8   : > { %v12256_v47 = vmax.f32 %v12132_v20, 0.0 }
 0x7aa   : > { %v12289_v36 = vpack.c.bf16 %v12256_v47, %v12255_v29 }
 0x7ab   : > { %v12136_v42 = vpop.f32.mrb[208].mxu1 }
 0x7ac   : > { %13395 = vmatmul.mubr.bf16.gmra.mrb[132].mxu0 %v12289_v36  ;;  %v12137_v43 = vadd.f32 %v20732_v24, %v12136_v42  ;;  %v12138_v50 = vpop.f32.mrb[209].mxu1 }
 0x7ad   : > { %v12139_v52 = vpop.f32.mrb[210].mxu1  ;;  %13398 = vmatprep.mubr.msk.bf16.mxu0 %vm14269_vm0, %v21193_v4 }
 0x7ae   : > { %v12140_v28 = vadd.f32 %v20732_v24, %v12139_v52  ;;  %v12141_v17 = vpop.f32.mrb[211].mxu1  ;;  %v12257_v6 = vmax.f32 %v12137_v43, 0.0 }
 0x7b0   : > { %v12258_v32 = vmax.f32 %v12140_v28, 0.0 }
 0x7b2   : > { %v12290_v9 = vpack.c.bf16 %v12258_v32, %v12257_v6 }
 0x7b3   : > { %v12144_v18 = vpop.f32.mrb[212].mxu1 }
 0x7b4   : > { %13399 = vmatmul.mubr.bf16.gmra.mrb[136].mxu0 %v12290_v9  ;;  %v12145_v5 = vadd.f32 %v20732_v24, %v12144_v18  ;;  %v12146_v53 = vpop.f32.mrb[213].mxu1 }
 0x7b5   : > { %v12147_v56 = vpop.f32.mrb[214].mxu1  ;;  %13402 = vmatprep.mubr.msk.bf16.mxu0 %vm14269_vm0, %v21193_v4 }
 0x7b6   : > { %v12148_v58 = vadd.f32 %v20732_v24, %v12147_v56  ;;  %v12149_v34 = vpop.f32.mrb[215].mxu1  ;;  %v12259_v30 = vmax.f32 %v12145_v5, 0.0 }
 0x7b8   : > { %v12260_v10 = vmax.f32 %v12148_v58, 0.0 }
 0x7ba   : > { %v12291_v13 = vpack.c.bf16 %v12260_v10, %v12259_v30 }
 0x7bb   : > { %v12152_v23 = vpop.f32.mrb[216].mxu1 }
 0x7bc   : > { %13403 = vmatmul.mubr.bf16.gmra.mrb[140].mxu0 %v12291_v13  ;;  %v12153_v39 = vadd.f32 %v20732_v24, %v12152_v23  ;;  %v12154_v41 = vpop.f32.mrb[217].mxu1 }
 0x7bd   : > { %v12155_v33 = vpop.f32.mrb[218].mxu1  ;;  %13406 = vmatprep.mubr.msk.bf16.mxu0 %vm14269_vm0, %v21193_v4 }
 0x7be   : > { %v12156_v40 = vadd.f32 %v20732_v24, %v12155_v33  ;;  %v12157_v35 = vpop.f32.mrb[219].mxu1  ;;  %v12261_v22 = vmax.f32 %v12153_v39, 0.0 }
 0x7c0   : > { %v12262_v21 = vmax.f32 %v12156_v40, 0.0 }
 0x7c2   : > { %v12292_v44 = vpack.c.bf16 %v12262_v21, %v12261_v22 }
 0x7c3   : > { %v12160_v37 = vpop.f32.mrb[220].mxu1 }
 0x7c4   : > { %13407 = vmatmul.mubr.bf16.gmra.mrb[144].mxu0 %v12292_v44  ;;  %v12161_v26 = vadd.f32 %v20732_v24, %v12160_v37  ;;  %v12162_v8 = vpop.f32.mrb[221].mxu1 }
 0x7c5   : > { %v12163_v12 = vpop.f32.mrb[222].mxu1  ;;  %13410 = vmatprep.mubr.msk.bf16.mxu0 %vm14269_vm0, %v21193_v4 }
 0x7c6   : > { %v12164_v46 = vadd.f32 %v20732_v24, %v12163_v12  ;;  %v12165_v14 = vpop.f32.mrb[223].mxu1  ;;  %v12263_v54 = vmax.f32 %v12161_v26, 0.0 }
 0x7c8   : > { %v12264_v51 = vmax.f32 %v12164_v46, 0.0 }
 0x7ca   : > { %v12293_v16 = vpack.c.bf16 %v12264_v51, %v12263_v54 }
 0x7cb   : > { %v12168_v60 = vpop.f32.mrb[224].mxu1 }
 0x7cc   : > { %13411 = vmatmul.mubr.bf16.gmra.mrb[148].mxu0 %v12293_v16  ;;  %v12169_v48 = vadd.f32 %v20732_v24, %v12168_v60  ;;  %v12170_v25 = vpop.f32.mrb[225].mxu1 }
 0x7cd   : > { %v12171_v49 = vpop.f32.mrb[226].mxu1  ;;  %13414 = vmatprep.mubr.msk.bf16.mxu0 %vm14269_vm0, %v21193_v4 }
 0x7ce   : > { %v12172_v19 = vadd.f32 %v20732_v24, %v12171_v49  ;;  %v12173_v61 = vpop.f32.mrb[227].mxu1  ;;  %v12265_v45 = vmax.f32 %v12169_v48, 0.0 }
 0x7d0   : > { %v12266_v55 = vmax.f32 %v12172_v19, 0.0 }
 0x7d2   : > { %v12294_v15 = vpack.c.bf16 %v12266_v55, %v12265_v45 }
 0x7d3   : > { %v12176_v38 = vpop.f32.mrb[228].mxu1 }
 0x7d4   : > { %13415 = vmatmul.mubr.bf16.gmra.mrb[152].mxu0 %v12294_v15  ;;  %v12177_v27 = vadd.f32 %v20732_v24, %v12176_v38  ;;  %v12178_v59 = vpop.f32.mrb[229].mxu1 }
 0x7d5   : > { %v12179_v11 = vpop.f32.mrb[230].mxu1  ;;  %13418 = vmatprep.mubr.msk.bf16.mxu0 %vm14269_vm0, %v21193_v4 }
 0x7d6   : > { %v12180_v1 = vadd.f32 %v20732_v24, %v12179_v11  ;;  %v12181_v57 = vpop.f32.mrb[231].mxu1  ;;  %v12267_v31 = vmax.f32 %v12177_v27, 0.0 }
 0x7d8   : > { %v12268_v3 = vmax.f32 %v12180_v1, 0.0 }
 0x7da   : > { %v12295_v63 = vpack.c.bf16 %v12268_v3, %v12267_v31 }
 0x7db   : > { %v12184_v0 = vpop.f32.mrb[232].mxu1 }
 0x7dc   : > { %13419 = vmatmul.mubr.bf16.gmra.mrb[156].mxu0 %v12295_v63  ;;  %v12185_v62 = vadd.f32 %v20732_v24, %v12184_v0  ;;  %v12186_v2 = vpop.f32.mrb[233].mxu1 }
 0x7dd   : > { %v12187_v20 = vpop.f32.mrb[234].mxu1  ;;  %13422 = vmatprep.mubr.msk.bf16.mxu0 %vm14269_vm0, %v21193_v4 }
 0x7de   : > { %v12188_v7 = vadd.f32 %v20732_v24, %v12187_v20  ;;  %v12189_v29 = vpop.f32.mrb[235].mxu1  ;;  %v12269_v47 = vmax.f32 %v12185_v62, 0.0 }
 0x7e0   : > { %v12270_v36 = vmax.f32 %v12188_v7, 0.0 }
 0x7e2   : > { %v12296_v42 = vpack.c.bf16 %v12270_v36, %v12269_v47 }
 0x7e3   : > { %v12192_v43 = vpop.f32.mrb[236].mxu1 }
 0x7e4   : > { %13423 = vmatmul.mubr.bf16.gmra.mrb[160].mxu0 %v12296_v42  ;;  %v12193_v50 = vadd.f32 %v20732_v24, %v12192_v43  ;;  %v12194_v52 = vpop.f32.mrb[237].mxu1  ;;  %v20814_v43 = vld [vmem:[%s20963_s17] ss:$0 sm:$0xff] }
 0x7e5   : > { %v12195_v28 = vpop.f32.mrb[238].mxu1  ;;  %13426 = vmatprep.mubr.msk.bf16.mxu0 %vm14269_vm0, %v21193_v4 }
 0x7e6   : > { %v12196_v17 = vadd.f32 %v20732_v24, %v12195_v28  ;;  %v12197_v6 = vpop.f32.mrb[239].mxu1  ;;  %v12271_v32 = vmax.f32 %v12193_v50, 0.0 }
 0x7e8   : > { %v12272_v9 = vmax.f32 %v12196_v17, 0.0 }
 0x7ea   : > { %v12297_v18 = vpack.c.bf16 %v12272_v9, %v12271_v32 }
 0x7ec   : > { %13427 = vmatmul.mubr.bf16.gmra.mrb[164].mxu0 %v12297_v18 }
 0x7ed   : > { %13430 = vmatprep.mubr.msk.bf16.mxu0 %vm14269_vm0, %v21193_v4 }
 0x810   : > { %v12200_v5 = vpop.f32.mrb[240].mxu1 }
 0x811   : > { %v12201_v53 = vadd.f32 %v20732_v24, %v12200_v5  ;;  %v12202_v56 = vpop.f32.mrb[241].mxu1 }
 0x812   : > { %v12203_v58 = vpop.f32.mrb[242].mxu1 }
 0x813   : > { %v12204_v34 = vadd.f32 %v20732_v24, %v12203_v58  ;;  %v12205_v30 = vpop.f32.mrb[243].mxu1  ;;  %v12273_v10 = vmax.f32 %v12201_v53, 0.0 }
 0x815   : > { %v12274_v13 = vmax.f32 %v12204_v34, 0.0 }
 0x817   : > { %v12298_v23 = vpack.c.bf16 %v12274_v13, %v12273_v10 }
 0x819   : > { %13431 = vmatmul.mubr.bf16.gmra.mrb[168].mxu0 %v12298_v23 }
 0x81a   : > { %13434 = vmatprep.mubr.msk.bf16.mxu0 %vm14269_vm0, %v21193_v4 }
 0x834   : > { %v12208_v39 = vpop.f32.mrb[244].mxu1 }
 0x835   : > { %v12209_v41 = vadd.f32 %v20732_v24, %v12208_v39  ;;  %v12210_v33 = vpop.f32.mrb[245].mxu1 }
 0x836   : > { %v12211_v40 = vpop.f32.mrb[246].mxu1 }
 0x837   : > { %v12212_v35 = vadd.f32 %v20732_v24, %v12211_v40  ;;  %v12213_v22 = vpop.f32.mrb[247].mxu1  ;;  %v12275_v21 = vmax.f32 %v12209_v41, 0.0 }
 0x839   : > { %v12276_v44 = vmax.f32 %v12212_v35, 0.0 }
 0x83b   : > { %v12299_v37 = vpack.c.bf16 %v12276_v44, %v12275_v21 }
 0x83c   : > { %v12216_v26 = vpop.f32.mrb[248].mxu1 }
 0x83d   : > { %13435 = vmatmul.mubr.bf16.gmra.mrb[172].mxu0 %v12299_v37  ;;  %v12217_v8 = vadd.f32 %v20732_v24, %v12216_v26  ;;  %v12218_v12 = vpop.f32.mrb[249].mxu1 }
 0x83e   : > { %v12219_v46 = vpop.f32.mrb[250].mxu1  ;;  %13438 = vmatprep.mubr.msk.bf16.mxu0 %vm14269_vm0, %v21193_v4 }
 0x83f   : > { %v12220_v14 = vadd.f32 %v20732_v24, %v12219_v46  ;;  %v12221_v54 = vpop.f32.mrb[251].mxu1  ;;  %v12277_v51 = vmax.f32 %v12217_v8, 0.0 }
 0x841   : > { %v12278_v16 = vmax.f32 %v12220_v14, 0.0 }
 0x843   : > { %v12300_v60 = vpack.c.bf16 %v12278_v16, %v12277_v51 }
 0x845   : > { %13439 = vmatmul.mubr.bf16.gmra.mrb[176].mxu0 %v12300_v60 }
 0x846   : > { %13442 = vmatprep.mubr.msk.bf16.mxu0 %vm14269_vm0, %v21193_v4 }
 0x848   : > { %v12224_v48 = vpop.f32.mrb[252].mxu1 }
 0x849   : > { %v12225_v25 = vadd.f32 %v20732_v24, %v12224_v48  ;;  %v12226_v49 = vpop.f32.mrb[253].mxu1 }
 0x84a   : > { %v12227_v19 = vpop.f32.mrb[254].mxu1 }
 0x84b   : > { %v12228_v61 = vadd.f32 %v20732_v24, %v12227_v19  ;;  %v12229_v45 = vpop.f32.mrb[255].mxu1  ;;  %v12279_v55 = vmax.f32 %v12225_v25, 0.0 }
 0x84d   : > { %v12280_v15 = vmax.f32 %v12228_v61, 0.0 }
 0x84f   : > { %v12301_v38 = vpack.c.bf16 %v12280_v15, %v12279_v55 }
 0x850   : > { %v12232_v27 = vpop.f32.mrb[0].mxu1 }
 0x851   : > { %13443 = vmatmul.mubr.bf16.gmra.mrb[180].mxu0 %v12301_v38  ;;  %v12233_v59 = vadd.f32 %v20732_v24, %v12232_v27  ;;  %v12234_v11 = vpop.f32.mrb[1].mxu1 }
 0x852   : > { %v12235_v1 = vpop.f32.mrb[2].mxu1  ;;  %13446 = vmatprep.mubr.msk.bf16.mxu0 %vm14269_vm0, %v21193_v4 }
 0x853   : > { %v12236_v57 = vadd.f32 %v20732_v24, %v12235_v1  ;;  %v12237_v31 = vpop.f32.mrb[3].mxu1  ;;  %v12281_v3 = vmax.f32 %v12233_v59, 0.0 }
 0x855   : > { %v12282_v63 = vmax.f32 %v12236_v57, 0.0 }
 0x857   : > { %v12302_v0 = vpack.c.bf16 %v12282_v63, %v12281_v3 }
 0x858   : > { %v12240_v62 = vpop.f32.mrb[4].mxu1 }
 0x859   : > { %13447 = vmatmul.mubr.bf16.gmra.mrb[184].mxu0 %v12302_v0  ;;  %v12241_v2 = vadd.f32 %v20732_v24, %v12240_v62  ;;  %v12242_v20 = vpop.f32.mrb[5].mxu1 }
 0x85a   : > { %v12243_v7 = vpop.f32.mrb[6].mxu1  ;;  %13450 = vmatprep.mubr.msk.bf16.mxu0 %vm14269_vm0, %v21193_v4 }
 0x85b   : > { %v12244_v29 = vadd.f32 %v20732_v24, %v12243_v7  ;;  %v12245_v47 = vpop.f32.mrb[7].mxu1  ;;  %v12283_v36 = vmax.f32 %v12241_v2, 0.0 }
 0x85d   : > { %v12284_v42 = vmax.f32 %v12244_v29, 0.0 }
 0x85f   : > { %v12303_v50 = vpack.c.bf16 %v12284_v42, %v12283_v36  ;;  %v12409_v52 = vpop.f32.mrb[116].mxu0 }
 0x860   : > { %v12410_v28 = vadd.f32 %v20814_v43, %v12409_v52  ;;  %v13380_v17 = vpop.f32.mrb[117].mxu0 }
 0x861   : > { %13451 = vmatmul.mubr.bf16.gmra.mrb[188].mxu0 %v12303_v50  ;;  %v12412_v6 = vpop.f32.mrb[118].mxu0 }
 0x862   : > { %12560 = vst [vmem:[%s20817_s25] sm:$0xff] %v12410_v28  ;;  %v12413_v4 = vadd.f32 %v20814_v43, %v12412_v6  ;;  %v13381_v24 = vpop.f32.mrb[119].mxu0 }
 0x864   : > { %12561 = vst [vmem:[%s20817_s25 + $0x8] sm:$0xff] %v12413_v4 }
 0x867   : > { %v12417_v32 = vpop.f32.mrb[120].mxu0 }
 0x868   : > { %v12418_v9 = vadd.f32 %v20814_v43, %v12417_v32  ;;  %v13384_v18 = vpop.f32.mrb[121].mxu0 }
 0x869   : > { %v12420_v5 = vpop.f32.mrb[122].mxu0 }
 0x86a   : > { %12562 = vst [vmem:[%s20817_s25 + $0x10] sm:$0xff] %v12418_v9  ;;  %v12421_v53 = vadd.f32 %v20814_v43, %v12420_v5  ;;  %v13385_v56 = vpop.f32.mrb[123].mxu0 }
 0x86c   : > { %12563 = vst [vmem:[%s20817_s25 + $0x18] sm:$0xff] %v12421_v53 }
 0x86f   : > { %v12425_v58 = vpop.f32.mrb[124].mxu0 }
 0x870   : > { %v12426_v34 = vadd.f32 %v20814_v43, %v12425_v58  ;;  %v13388_v30 = vpop.f32.mrb[125].mxu0 }
 0x871   : > { %v12428_v10 = vpop.f32.mrb[126].mxu0 }
 0x872   : > { %12564 = vst [vmem:[%s20817_s25 + $0x20] sm:$0xff] %v12426_v34  ;;  %v12429_v13 = vadd.f32 %v20814_v43, %v12428_v10  ;;  %v13389_v23 = vpop.f32.mrb[127].mxu0 }
 0x874   : > { %12565 = vst [vmem:[%s20817_s25 + $0x28] sm:$0xff] %v12429_v13 }
 0x877   : > { %v12433_v39 = vpop.f32.mrb[128].mxu0 }
 0x878   : > { %v12434_v41 = vadd.f32 %v20814_v43, %v12433_v39  ;;  %v13392_v33 = vpop.f32.mrb[129].mxu0 }
 0x879   : > { %v12436_v40 = vpop.f32.mrb[130].mxu0 }
 0x87a   : > { %12566 = vst [vmem:[%s20817_s25 + $0x30] sm:$0xff] %v12434_v41  ;;  %v12437_v35 = vadd.f32 %v20814_v43, %v12436_v40  ;;  %v13393_v22 = vpop.f32.mrb[131].mxu0 }
 0x87c   : > { %12567 = vst [vmem:[%s20817_s25 + $0x38] sm:$0xff] %v12437_v35 }
 0x87f   : > { %v12441_v21 = vpop.f32.mrb[132].mxu0 }
 0x880   : > { %v12442_v44 = vadd.f32 %v20814_v43, %v12441_v21  ;;  %v13396_v37 = vpop.f32.mrb[133].mxu0 }
 0x881   : > { %v12444_v26 = vpop.f32.mrb[134].mxu0 }
 0x882   : > { %12568 = vst [vmem:[%s20817_s25 + $0x40] sm:$0xff] %v12442_v44  ;;  %v12445_v8 = vadd.f32 %v20814_v43, %v12444_v26  ;;  %v13397_v12 = vpop.f32.mrb[135].mxu0 }
 0x884   : > { %12569 = vst [vmem:[%s20817_s25 + $0x48] sm:$0xff] %v12445_v8 }
 0x887   : > { %v12449_v46 = vpop.f32.mrb[136].mxu0 }
 0x888   : > { %v12450_v14 = vadd.f32 %v20814_v43, %v12449_v46  ;;  %v13400_v54 = vpop.f32.mrb[137].mxu0 }
 0x889   : > { %v12452_v51 = vpop.f32.mrb[138].mxu0 }
 0x88a   : > { %12570 = vst [vmem:[%s20817_s25 + $0x50] sm:$0xff] %v12450_v14  ;;  %v12453_v16 = vadd.f32 %v20814_v43, %v12452_v51  ;;  %v13401_v60 = vpop.f32.mrb[139].mxu0 }
 0x88c   : > { %12571 = vst [vmem:[%s20817_s25 + $0x58] sm:$0xff] %v12453_v16 }
 0x88f   : > { %v12457_v48 = vpop.f32.mrb[140].mxu0 }
 0x890   : > { %v12458_v25 = vadd.f32 %v20814_v43, %v12457_v48  ;;  %v13404_v49 = vpop.f32.mrb[141].mxu0 }
 0x891   : > { %v12460_v19 = vpop.f32.mrb[142].mxu0 }
 0x892   : > { %12572 = vst [vmem:[%s20817_s25 + $0x60] sm:$0xff] %v12458_v25  ;;  %v12461_v61 = vadd.f32 %v20814_v43, %v12460_v19  ;;  %v13405_v45 = vpop.f32.mrb[143].mxu0 }
 0x894   : > { %12573 = vst [vmem:[%s20817_s25 + $0x68] sm:$0xff] %v12461_v61 }
 0x897   : > { %v12465_v55 = vpop.f32.mrb[144].mxu0 }
 0x898   : > { %v12466_v15 = vadd.f32 %v20814_v43, %v12465_v55  ;;  %v13408_v38 = vpop.f32.mrb[145].mxu0 }
 0x899   : > { %v12468_v27 = vpop.f32.mrb[146].mxu0 }
 0x89a   : > { %12574 = vst [vmem:[%s20817_s25 + $0x70] sm:$0xff] %v12466_v15  ;;  %v12469_v59 = vadd.f32 %v20814_v43, %v12468_v27  ;;  %v13409_v11 = vpop.f32.mrb[147].mxu0 }
 0x89c   : > { %12575 = vst [vmem:[%s20817_s25 + $0x78] sm:$0xff] %v12469_v59 }
 0x89f   : > { %v12473_v1 = vpop.f32.mrb[148].mxu0 }
 0x8a0   : > { %v12474_v57 = vadd.f32 %v20814_v43, %v12473_v1  ;;  %v13412_v31 = vpop.f32.mrb[149].mxu0 }
 0x8a1   : > { %v12476_v3 = vpop.f32.mrb[150].mxu0 }
 0x8a2   : > { %12576 = vst [vmem:[%s20817_s25 + $0x80] sm:$0xff] %v12474_v57  ;;  %v12477_v63 = vadd.f32 %v20814_v43, %v12476_v3  ;;  %v13413_v0 = vpop.f32.mrb[151].mxu0 }
 0x8a4   : > { %12577 = vst [vmem:[%s20817_s25 + $0x88] sm:$0xff] %v12477_v63 }
 0x8a7   : > { %v12481_v62 = vpop.f32.mrb[152].mxu0 }
 0x8a8   : > { %v12482_v2 = vadd.f32 %v20814_v43, %v12481_v62  ;;  %v13416_v20 = vpop.f32.mrb[153].mxu0 }
 0x8a9   : > { %v12484_v7 = vpop.f32.mrb[154].mxu0 }
 0x8aa   : > { %12578 = vst [vmem:[%s20817_s25 + $0x90] sm:$0xff] %v12482_v2  ;;  %v12485_v29 = vadd.f32 %v20814_v43, %v12484_v7  ;;  %v13417_v47 = vpop.f32.mrb[155].mxu0 }
 0x8ac   : > { %12579 = vst [vmem:[%s20817_s25 + $0x98] sm:$0xff] %v12485_v29 }
 0x8af   : > { %v12489_v36 = vpop.f32.mrb[156].mxu0 }
 0x8b0   : > { %v12490_v42 = vadd.f32 %v20814_v43, %v12489_v36  ;;  %v13420_v50 = vpop.f32.mrb[157].mxu0 }
 0x8b1   : > { %v12492_v52 = vpop.f32.mrb[158].mxu0 }
 0x8b2   : > { %12580 = vst [vmem:[%s20817_s25 + $0xa0] sm:$0xff] %v12490_v42  ;;  %v12493_v28 = vadd.f32 %v20814_v43, %v12492_v52  ;;  %v13421_v17 = vpop.f32.mrb[159].mxu0 }
 0x8b4   : > { %12581 = vst [vmem:[%s20817_s25 + $0xa8] sm:$0xff] %v12493_v28 }
 0x8b7   : > { %v12497_v6 = vpop.f32.mrb[160].mxu0 }
 0x8b8   : > { %v12498_v4 = vadd.f32 %v20814_v43, %v12497_v6  ;;  %v13424_v24 = vpop.f32.mrb[161].mxu0 }
 0x8b9   : > { %v12500_v32 = vpop.f32.mrb[162].mxu0 }
 0x8ba   : > { %12582 = vst [vmem:[%s20817_s25 + $0xb0] sm:$0xff] %v12498_v4  ;;  %v12501_v9 = vadd.f32 %v20814_v43, %v12500_v32  ;;  %v13425_v18 = vpop.f32.mrb[163].mxu0 }
 0x8bc   : > { %12583 = vst [vmem:[%s20817_s25 + $0xb8] sm:$0xff] %v12501_v9 }
 0x8bf   : > { %v12505_v5 = vpop.f32.mrb[164].mxu0 }
 0x8c0   : > { %v12506_v53 = vadd.f32 %v20814_v43, %v12505_v5  ;;  %v13428_v56 = vpop.f32.mrb[165].mxu0 }
 0x8c1   : > { %v12508_v58 = vpop.f32.mrb[166].mxu0 }
 0x8c2   : > { %12584 = vst [vmem:[%s20817_s25 + $0xc0] sm:$0xff] %v12506_v53  ;;  %v12509_v34 = vadd.f32 %v20814_v43, %v12508_v58  ;;  %v13429_v30 = vpop.f32.mrb[167].mxu0 }
 0x8c4   : > { %12585 = vst [vmem:[%s20817_s25 + $0xc8] sm:$0xff] %v12509_v34 }
 0x8ec   : > { %v12513_v10 = vpop.f32.mrb[168].mxu0 }
 0x8ed   : > { %v12514_v13 = vadd.f32 %v20814_v43, %v12513_v10  ;;  %v13432_v23 = vpop.f32.mrb[169].mxu0 }
 0x8ee   : > { %v12516_v39 = vpop.f32.mrb[170].mxu0 }
 0x8ef   : > { %12586 = vst [vmem:[%s20817_s25 + $0xd0] sm:$0xff] %v12514_v13  ;;  %v12517_v41 = vadd.f32 %v20814_v43, %v12516_v39  ;;  %v13433_v33 = vpop.f32.mrb[171].mxu0 }
 0x8f1   : > { %12587 = vst [vmem:[%s20817_s25 + $0xd8] sm:$0xff] %v12517_v41 }
 0x910   : > { %v12521_v40 = vpop.f32.mrb[172].mxu0 }
 0x911   : > { %v12522_v35 = vadd.f32 %v20814_v43, %v12521_v40  ;;  %v13436_v22 = vpop.f32.mrb[173].mxu0 }
 0x912   : > { %v12524_v21 = vpop.f32.mrb[174].mxu0 }
 0x913   : > { %12588 = vst [vmem:[%s20817_s25 + $0xe0] sm:$0xff] %v12522_v35  ;;  %v12525_v44 = vadd.f32 %v20814_v43, %v12524_v21  ;;  %v13437_v37 = vpop.f32.mrb[175].mxu0 }
 0x915   : > { %12589 = vst [vmem:[%s20817_s25 + $0xe8] sm:$0xff] %v12525_v44 }
 0x918   : > { %v12529_v26 = vpop.f32.mrb[176].mxu0 }
 0x919   : > { %v12530_v8 = vadd.f32 %v20814_v43, %v12529_v26  ;;  %v13440_v12 = vpop.f32.mrb[177].mxu0 }
 0x91a   : > { %v12532_v46 = vpop.f32.mrb[178].mxu0 }
 0x91b   : > { %12590 = vst [vmem:[%s20817_s25 + $0xf0] sm:$0xff] %v12530_v8  ;;  %v12533_v14 = vadd.f32 %v20814_v43, %v12532_v46  ;;  %v13441_v54 = vpop.f32.mrb[179].mxu0 }
 0x91d   : > { %12591 = vst [vmem:[%s20817_s25 + $0xf8] sm:$0xff] %v12533_v14 }
 0x924   : > { %v12537_v51 = vpop.f32.mrb[180].mxu0 }
 0x925   : > { %v12538_v16 = vadd.f32 %v20814_v43, %v12537_v51  ;;  %v13444_v60 = vpop.f32.mrb[181].mxu0 }
 0x926   : > { %v12540_v48 = vpop.f32.mrb[182].mxu0 }
 0x927   : > { %12592 = vst [vmem:[%s20817_s25 + $0x100] sm:$0xff] %v12538_v16  ;;  %v12541_v25 = vadd.f32 %v20814_v43, %v12540_v48  ;;  %v13445_v49 = vpop.f32.mrb[183].mxu0 }
 0x929   : > { %12593 = vst [vmem:[%s20817_s25 + $0x108] sm:$0xff] %v12541_v25 }
 0x92c   : > { %v12545_v19 = vpop.f32.mrb[184].mxu0 }
 0x92d   : > { %v12546_v61 = vadd.f32 %v20814_v43, %v12545_v19  ;;  %v13448_v45 = vpop.f32.mrb[185].mxu0 }
 0x92e   : > { %v12548_v55 = vpop.f32.mrb[186].mxu0 }
 0x92f   : > { %12594 = vst [vmem:[%s20817_s25 + $0x110] sm:$0xff] %v12546_v61  ;;  %v12549_v15 = vadd.f32 %v20814_v43, %v12548_v55  ;;  %v13449_v38 = vpop.f32.mrb[187].mxu0 }
 0x931   : > { %12595 = vst [vmem:[%s20817_s25 + $0x118] sm:$0xff] %v12549_v15 }
 0x934   : > { %v12553_v27 = vpop.f32.mrb[188].mxu0 }
 0x935   : > { %v12554_v59 = vadd.f32 %v20814_v43, %v12553_v27  ;;  %v13452_v11 = vpop.f32.mrb[189].mxu0 }
 0x936   : > { %v12556_v1 = vpop.f32.mrb[190].mxu0 }
 0x937   : > { %12596 = vst [vmem:[%s20817_s25 + $0x120] sm:$0xff] %v12554_v59  ;;  %v12557_v57 = vadd.f32 %v20814_v43, %v12556_v1  ;;  %v13453_v31 = vpop.f32.mrb[191].mxu0 }
 0x939   : > { %12597 = vst [vmem:[%s20817_s25 + $0x128] sm:$0xff] %v12557_v57 }
 0x93a   : > { %14215 = shalt.err (!%p14212_p3)
}
 0x93b   : > { %s14216_s3 = scalar_lea.hbm %s20896_s4, 4864  ;;  %s14220_s24 = scalar_lea.hbm %s20964_s18, 19456 }
 0x93c   : > { %p14217_p4 = scmp.ne.s32.totalorder %s20896_s4, %s14216_s3  ;;  %p14221_p9 = scmp.lt.u32.totalorder %s20896_s4, %s20964_s18 }
 0x93d   : > { %p14222_p10 = scmp.lt.u32.totalorder %s14220_s24, %s14216_s3  ;;  %p14224_p12 = scmp.lt.u32.totalorder %s14216_s3, %s20896_s4 }
 0x93e   : > { %p14218_p7 = pnand %p14217_p4, %p14415_p5 }
 0x93f   : > { %p14223_p11 = por %p14222_p10, %p14221_p9 }
 0x940   : > { %p14219_p8 = pneg %p14218_p7 }
 0x941   : > { %p14225_p13 = por %p14224_p12, %p14223_p11 }
 0x943   : > { %p14226_p0 = pnand %p14225_p13, %p14219_p8 }
 0x945   : > { %14229 = shalt.err (!%p14226_p0)
}
 0x946   : > { %s14280_s5 = smov 128   ;;  %s14281_s21 = smov 8  }
 0x947   : > { %13761 = dma.vmem_to_hbm [thread:$0]  (%p14415_p5), %s20900_s26, 4864, %s20896_s4, %s20905_s0, %s14280_s5, %s14280_s5, %s14281_s21  }
 0x948 PF: > { %p13767_p1 = scmp.ge.s32.totalorder %s14264_s30, 2  ;;  %s12627_s6 = sand.u32 1, %s14252_s27  }
 0x949   : > { %s12628_s7 = scalar_lea.sflag [#allocation3], %s12627_s6 }
 0x94a   : > { %p13764_p2 = pnand %p13767_p1, %p14419_p6 }
 0x94c   : > { %14247 = dma.done.wait (!%p13764_p2), %s12628_s7, 4864  }
 0x94d   : > { %14249 = vsyncadd (!%p13764_p2), %s12628_s7, 4294962432  ;;  %p28_p3 = scmp.ge.s32.totalorder %s14402_s1, 6   ;;  %s21196_s27 = smov %s14256_s28 }
 0x94e   : > { %s21197_s28 = smov %s14260_s29  ;;  %s21198_s29 = smov %s14413_s22 }
 0x94f   : > { %s21199_s30 = smov %s14402_s1  ;;  %30 = sbr.rel (!%p28_p3) target bundleno = 12 (0xc), region = 127 }
 0x956   :  { %12633 = vsyncpa [#allocation3], 1 }
 0x957   :  { %12635 = vsyncpa [#allocation3 + $0x1], 1 }

</bundles_post_ra>
